<compile_context>
chip_gen: v6e
topology: v6e:2x2x1
jax: 0.10.0
libtpu: 0.0.40
codegen_flags: <defaults>
</compile_context>

<pallas_src>
import jax
import jax.numpy as jnp
from jax.experimental import pallas as pl
from jax.experimental.pallas import tpu as pltpu

EPS = 1e-5
_MIB = 1024 * 1024


# ----------------------------------------------------------------------------
# In-kernel helpers
# ----------------------------------------------------------------------------
def _conv3x3_taps(src_mm, w_ref, buf_ref):
    """3x3 conv (stride 1, zero pad 1) of a (B,H,W,C) tile.

    src_mm:  (B, H, W, C) value already in the matmul dtype (BN/ReLU already
             applied upstream when applicable).
    w_ref:   (9*C, Cout) weights, row order (dy, dx, cin) -- i.e. the plain
             row-major reshape of an HWIO (3,3,C,Cout) kernel.
    buf_ref: VMEM scratch (B, H+2, W, 3*C): vertically padded; the lane axis
             packs the dx = -1 / 0 / +1 shifted copies of each row so every dy
             tap is a single aligned (M, 3C) matmul operand (no im2col).
    Returns (B*H*W, Cout) f32.
    """
    B, H, W, C = src_mm.shape
    Cout = w_ref.shape[1]
    dt = buf_ref.dtype

    # Interior rows 1..H; lane axis packs [x[., j-1], x[., j], x[., j+1]].
    buf_ref[:, 1:H + 1, :, C:2 * C] = src_mm                               # dx =  0
    buf_ref[:, 1:H + 1, 1:W, 0:C] = src_mm[:, :, :W - 1, :]                # dx = -1
    buf_ref[:, 1:H + 1, 0:W - 1, 2 * C:3 * C] = src_mm[:, :, 1:, :]        # dx = +1

    # Zero ONLY the halo (2 rows + 2 single columns).  Redone every grid step so
    # it stays correct when the "parallel" batch axis is split across TensorCores.
    zrow = jnp.zeros((B, 1, W, 3 * C), dt)
    buf_ref[:, 0:1, :, :] = zrow
    buf_ref[:, H + 1:H + 2, :, :] = zrow
    zcol = jnp.zeros((B, H, 1, C), dt)
    buf_ref[:, 1:H + 1, 0:1, 0:C] = zcol
    buf_ref[:, 1:H + 1, W - 1:W, 2 * C:3 * C] = zcol

    # 3 accumulating K=3C matmuls, one per dy tap.  f32 accumulation: MRB
    # accumulates in place on v7x, plain VPU adds on v5e/v6e.
    M = B * H * W
    acc = None
    for dy in range(3):
        tap = buf_ref[:, dy:dy + H, :, :].reshape(M, 3 * C)
        part = jnp.dot(tap, w_ref[dy * 3 * C:(dy + 1) * 3 * C, :],
                       preferred_element_type=jnp.float32)
        acc = part if acc is None else acc + part
    return acc


def _channel_stats(acc):
    """Per-channel [sum; sum-of-squares] of an (M, C) f32 tile -> (2, C)."""
    s = jnp.sum(acc, axis=0, keepdims=True)
    ss = jnp.sum(acc * acc, axis=0, keepdims=True)
    return jnp.concatenate([s, ss], axis=0)


# ----------------------------------------------------------------------------
# Kernels (grid = (N // B,): B images per grid step)
# ----------------------------------------------------------------------------
def _conv1_kernel(x_ref, w_ref, a1_ref, st_ref, buf_ref):
    """Pass 1: conv1 (bias-free -- it cancels under training-mode BN) + BN1 stats."""
    B, H, W, _ = x_ref.shape
    Cout = w_ref.shape[1]
    acc = _conv3x3_taps(x_ref[...].astype(buf_ref.dtype), w_ref, buf_ref)
    a1_ref[...] = acc.reshape(B, H, W, Cout).astype(a1_ref.dtype)
    st_ref[...] = _channel_stats(acc).reshape(1, 2, Cout)


def _bn1_relu_conv2_kernel(a1_ref, scale_ref, shift_ref, w_ref,
                           a2_ref, st_ref, buf_ref):
    """Pass 2: BN1 scale/shift + ReLU fused into conv2's operand build, conv2,
    BN2 stats."""
    B, H, W, _ = a1_ref.shape
    Cout = w_ref.shape[1]
    h = jnp.maximum(a1_ref[...].astype(jnp.float32) * scale_ref[...] + shift_ref[...],
                    0.0)
    acc = _conv3x3_taps(h.astype(buf_ref.dtype), w_ref, buf_ref)
    a2_ref[...] = acc.reshape(B, H, W, Cout).astype(a2_ref.dtype)
    st_ref[...] = _channel_stats(acc).reshape(1, 2, Cout)


def _finalize_proj_kernel(a2_ref, scale_ref, shift_ref, x_ref, wres_ref, bres_ref,
                          out_ref):
    """Pass 3: BN2 scale/shift + ReLU, fused 1x1-conv residual projection, add."""
    B, H, W, Cin = x_ref.shape
    Cout = out_ref.shape[3]
    y = jnp.maximum(a2_ref[...].astype(jnp.float32) * scale_ref[...] + shift_ref[...],
                    0.0)
    xm = x_ref[...].reshape(B * H * W, Cin).astype(wres_ref.dtype)
    res = jnp.dot(xm, wres_ref[...], preferred_element_type=jnp.float32) + bres_ref[...]
    out_ref[...] = (y + res.reshape(B, H, W, Cout)).astype(out_ref.dtype)


def _finalize_id_kernel(a2_ref, scale_ref, shift_ref, x_ref, out_ref):
    """Pass 3 (identity residual): BN2 scale/shift + ReLU + x."""
    y = jnp.maximum(a2_ref[...].astype(jnp.float32) * scale_ref[...] + shift_ref[...],
                    0.0)
    out_ref[...] = (y + x_ref[...]).astype(out_ref.dtype)


# ----------------------------------------------------------------------------
# Host-side glue
# ----------------------------------------------------------------------------
def _bn_scale_shift(per_tile_stats, gamma, beta, count):
    """Fold training-mode BN batch stats + affine into one per-channel scale/shift.
    per_tile_stats: (G, 2, C) = per-grid-step [sum, sum_of_squares]."""
    s = jnp.sum(per_tile_stats[:, 0, :], axis=0)
    ss = jnp.sum(per_tile_stats[:, 1, :], axis=0)
    mean = s / count
    var = jnp.maximum(ss / count - mean * mean, 0.0)   # clamp: E[x^2]-mean^2 can round < 0
    scale = gamma * jax.lax.rsqrt(var + EPS)
    shift = beta - mean * scale
    return scale.reshape(1, 1, -1), shift.reshape(1, 1, -1)


def _vmem_capacity_bytes():
    """Per-generation VMEM size; conservative 64 MiB (v7x per-TC) fallback."""
    try:
        cap = int(getattr(pltpu.get_tpu_info(), "vmem_capacity_bytes", 0))
        if cap > 0:
            return cap
    except Exception:
        pass
    return 64 * _MIB


def _pass_vmem_bytes(B, H, W, Cin, Cmed, Cout, mm_b, act_b):
    """Upper bound on per-grid-step VMEM: double-buffered in/out blocks + scratch
    + the dominant in-kernel value temps (acc, tap)."""
    f32 = 4
    M = B * H * W
    p1 = (2 * M * Cin * f32 + 2 * 9 * Cin * Cmed * mm_b + 2 * M * Cmed * act_b
          + B * (H + 2) * W * 3 * Cin * mm_b + M * Cmed * f32 + M * 3 * Cin * mm_b)
    p2 = (2 * M * Cmed * act_b + 2 * 9 * Cmed * Cout * mm_b + 2 * M * Cout * act_b
          + B * (H + 2) * W * 3 * Cmed * mm_b + M * Cout * f32 + M * Cmed * f32
          + M * 3 * Cmed * mm_b)
    p3 = (2 * M * Cout * act_b + 2 * M * Cin * f32 + 2 * M * Cout * f32
          + 2 * Cin * Cout * mm_b + M * Cout * f32)
    return max(p1, p2, p3)


def _pick_batch_tile(N, H, W, Cin, Cmed, Cout, mm_b, act_b, budget):
    """Largest / smallest-sufficient divisor of N: enough rows to fill the MXU
    (M >= 512) while fitting the per-generation VMEM budget."""
    fits = [b for b in range(1, N + 1)
            if N % b == 0 and b * H * W <= 16384
            and int(1.3 * _pass_vmem_bytes(b, H, W, Cin, Cmed, Cout, mm_b, act_b)) <= budget]
    if not fits:
        return 1
    for b in fits:                    # smallest tile that already fills the MXU rows
        if b * H * W >= 512:
            return b
    return fits[-1]


def make_params(key, cin, cmed, cout):
    ks = jax.random.split(key, 10)
    p = {
        "w1": 0.1 * jax.random.normal(ks[0], (3, 3, cin, cmed), jnp.float32),
        "b1": 0.1 * jax.random.normal(ks[1], (cmed,), jnp.float32),
        "g1": 1.0 + 0.1 * jax.random.normal(ks[2], (cmed,), jnp.float32),
        "beta1": 0.1 * jax.random.normal(ks[3], (cmed,), jnp.float32),
        "w2": 0.1 * jax.random.normal(ks[4], (3, 3, cmed, cout), jnp.float32),
        "b2": 0.1 * jax.random.normal(ks[5], (cout,), jnp.float32),
        "g2": 1.0 + 0.1 * jax.random.normal(ks[6], (cout,), jnp.float32),
        "beta2": 0.1 * jax.random.normal(ks[7], (cout,), jnp.float32),
    }
    if cin != cout:
        p["wres"] = 0.1 * jax.random.normal(ks[8], (cin, cout), jnp.float32)
        p["bres"] = 0.1 * jax.random.normal(ks[9], (cout,), jnp.float32)
    return p


def res_block_forward(x_nchw, p, downsample=False, mm_dtype=jnp.bfloat16):
    """ResBlock forward.  Default mm_dtype=bfloat16: bf16 MXU operands and bf16
    intermediate activations; accumulation and all BN/element-wise math stay f32."""
    if downsample:
        # TODO(synk): stride-2 path (DownSample=True) not implemented.
        raise NotImplementedError("stride-2 path not implemented")

    x = jnp.transpose(x_nchw, (0, 2, 3, 1)).astype(jnp.float32)          # NCHW -> NHWC
    N, H, W, Cin = x.shape
    Cmed = p["w1"].shape[-1]
    Cout = p["w2"].shape[-1]
    count = N * H * W

    act_dtype = mm_dtype                       # a1/a2 dtype (halves their HBM traffic in bf16)
    mm_b = jnp.dtype(mm_dtype).itemsize
    act_b = jnp.dtype(act_dtype).itemsize

    # (dy, dx, cin)-major weights: matches the dx-packed operand lanes in-kernel.
    w1r = p["w1"].reshape(9 * Cin, Cmed).astype(mm_dtype)
    w2r = p["w2"].reshape(9 * Cmed, Cout).astype(mm_dtype)

    cap = _vmem_capacity_bytes()
    vmem_limit = min(64 * _MIB, int(cap * 0.7))          # per-generation scoped-VMEM budget
    B = _pick_batch_tile(N, H, W, Cin, Cmed, Cout, mm_b, act_b,
                         budget=int(vmem_limit * 0.8))
    G = N // B

    cparams = pltpu.CompilerParams(
        dimension_semantics=("parallel",),               # batch tiles -> split across TCs
        vmem_limit_bytes=vmem_limit,
    )

    def img_spec(c):
        return pl.BlockSpec((B, H, W, c), lambda n: (n, 0, 0, 0))

    def stat_spec(c):
        return pl.BlockSpec((1, 2, c), lambda n: (n, 0, 0))

    def full_spec(a):
        z = (0,) * a.ndim
        return pl.BlockSpec(a.shape, lambda n: z)

    # ---- pass 1: conv1 + per-tile BN1 stats ---------------------------------
    a1, st1 = pl.pallas_call(
        _conv1_kernel,
        grid=(G,),
        in_specs=[img_spec(Cin), full_spec(w1r)],
        out_specs=(img_spec(Cmed), stat_spec(Cmed)),
        out_shape=(jax.ShapeDtypeStruct((N, H, W, Cmed), act_dtype),
                   jax.ShapeDtypeStruct((G, 2, Cmed), jnp.float32)),
        scratch_shapes=[pltpu.VMEM((B, H + 2, W, 3 * Cin), mm_dtype)],
        compiler_params=cparams,
    )(x, w1r)

    scale1, shift1 = _bn_scale_shift(st1, p["g1"], p["beta1"], count)

    # ---- pass 2: BN1 finalize + ReLU (fused) + conv2 + per-tile BN2 stats ----
    a2, st2 = pl.pallas_call(
        _bn1_relu_conv2_kernel,
        grid=(G,),
        in_specs=[img_spec(Cmed), full_spec(scale1), full_spec(shift1), full_spec(w2r)],
        out_specs=(img_spec(Cout), stat_spec(Cout)),
        out_shape=(jax.ShapeDtypeStruct((N, H, W, Cout), act_dtype),
                   jax.ShapeDtypeStruct((G, 2, Cout), jnp.float32)),
        scratch_shapes=[pltpu.VMEM((B, H + 2, W, 3 * Cmed), mm_dtype)],
        compiler_params=cparams,
    )(a1, scale1, shift1, w2r)

    scale2, shift2 = _bn_scale_shift(st2, p["g2"], p["beta2"], count)

    # ---- pass 3: BN2 finalize + ReLU + fused residual ------------------------
    out_shape = jax.ShapeDtypeStruct((N, H, W, Cout), jnp.float32)
    if "wres" in p:
        wres = p["wres"].astype(mm_dtype)
        bres = p["bres"].reshape(1, Cout)
        out = pl.pallas_call(
            _finalize_proj_kernel,
            grid=(G,),
            in_specs=[img_spec(Cout), full_spec(scale2), full_spec(shift2),
                      img_spec(Cin), full_spec(wres), full_spec(bres)],
            out_specs=img_spec(Cout),
            out_shape=out_shape,
            compiler_params=cparams,
        )(a2, scale2, shift2, x, wres, bres)
    else:
        out = pl.pallas_call(
            _finalize_id_kernel,
            grid=(G,),
            in_specs=[img_spec(Cout), full_spec(scale2), full_spec(shift2),
                      img_spec(Cout)],
            out_specs=img_spec(Cout),
            out_shape=out_shape,
            compiler_params=cparams,
        )(a2, scale2, shift2, x)

    return jnp.transpose(out, (0, 3, 1, 2))                              # NHWC -> NCHW


# ---------------- pure-JAX reference (verification only) ----------------
def _bn_train(y_nchw, g, b):
    mean = y_nchw.mean(axis=(0, 2, 3), keepdims=True)
    var = ((y_nchw - mean) ** 2).mean(axis=(0, 2, 3), keepdims=True)
    return (y_nchw - mean) / jnp.sqrt(var + EPS) * g[None, :, None, None] \
        + b[None, :, None, None]


def ref_forward(x_nchw, p):
    dn = ("NCHW", "HWIO", "NCHW")
    y = jax.lax.conv_general_dilated(x_nchw, p["w1"], (1, 1), ((1, 1), (1, 1)),
                                     dimension_numbers=dn)
    y = y + p["b1"][None, :, None, None]      # bias kept here to verify BN cancellation
    y = jnp.maximum(_bn_train(y, p["g1"], p["beta1"]), 0.0)
    y = jax.lax.conv_general_dilated(y, p["w2"], (1, 1), ((1, 1), (1, 1)),
                                     dimension_numbers=dn)
    y = y + p["b2"][None, :, None, None]
    y = jnp.maximum(_bn_train(y, p["g2"], p["beta2"]), 0.0)
    if "wres" in p:
        wres = p["wres"].reshape(1, 1, *p["wres"].shape)
        res = jax.lax.conv_general_dilated(x_nchw, wres, (1, 1), ((0, 0), (0, 0)),
                                           dimension_numbers=dn)
        res = res + p["bres"][None, :, None, None]
    else:
        res = x_nchw
    return y + res


if __name__ == "__main__":
    key = jax.random.PRNGKey(0)
    kx, kp, kp2 = jax.random.split(key, 3)

    fwd_f32 = jax.jit(lambda xx, pp: res_block_forward(xx, pp, mm_dtype=jnp.float32))
    fwd_bf16 = jax.jit(res_block_forward)       # default bf16 MXU-operand/intermediate path

    # --- projection-residual path (In != Out), exact f32 check ---
    N, Cin, H, W = 2, 4, 16, 16
    Cmed, Cout = 8, 16
    x = jax.random.normal(kx, (N, Cin, H, W), jnp.float32)
    params = make_params(kp, Cin, Cmed, Cout)

    out = jax.block_until_ready(fwd_f32(x, params))
    ref = ref_forward(x, params)
    assert out.shape == (N, Cout, H, W), out.shape
    err = float(jnp.max(jnp.abs(out - ref)))
    assert jnp.allclose(out, ref, atol=2e-4, rtol=2e-4), f"proj path max_err={err}"

    # --- identity-residual path (In == Out), exact f32 check ---
    Cin2 = Cout2 = 8
    x2 = jax.random.normal(kx, (N, Cin2, H, W), jnp.float32)
    params2 = make_params(kp2, Cin2, Cmed, Cout2)
    out2 = jax.block_until_ready(fwd_f32(x2, params2))
    ref2 = ref_forward(x2, params2)
    err2 = float(jnp.max(jnp.abs(out2 - ref2)))
    assert jnp.allclose(out2, ref2, atol=2e-4, rtol=2e-4), f"id path max_err={err2}"

    # --- default bf16 throughput path (f32 accumulation / BN math) ---
    out_bf = jax.block_until_ready(fwd_bf16(x, params))
    assert out_bf.shape == (N, Cout, H, W)
    assert bool(jnp.all(jnp.isfinite(out_bf)))
    assert jnp.allclose(out_bf, ref, atol=0.5, rtol=0.5), "bf16 path diverged"

    print("KERNEL_OK")
</pallas_src>

<mosaic_0001>
module attributes {stable_mosaic.version = 11 : i64} {
  func.func @_conv1_kernel(%arg0: i32, %arg1: memref<2x16x16x4xf32, #tpu.memory_space<vmem>>, %arg2: memref<36x8xf32, #tpu.memory_space<vmem>>, %arg3: memref<2x16x16x8xf32, #tpu.memory_space<vmem>>, %arg4: memref<1x2x8xf32, #tpu.memory_space<vmem>>, %arg5: memref<2x18x16x12xf32, #tpu.memory_space<vmem>>) attributes {dimension_semantics = [#tpu.dimension_semantics<parallel>], iteration_bounds = array<i64: 1>, scalar_prefetch = 0 : i64, scratch_operands = 1 : i64, tpu.core_type = #tpu.core_type<tc>, window_params = [{transform_indices = @transform_0, window_bounds = array<i64: 2, 16, 16, 4>}, {pipeline_mode = #tpu.pipeline_mode<synchronous>, transform_indices = @transform_1, window_bounds = array<i64: 36, 8>}, {transform_indices = @transform_2, window_bounds = array<i64: 2, 16, 16, 8>}, {transform_indices = @transform_3, window_bounds = array<i64: 1, 2, 8>}]} {
    %c0 = arith.constant 0 : index
    %c0_0 = arith.constant 0 : index
    %c0_1 = arith.constant 0 : index
    %c0_2 = arith.constant 0 : index
    %0 = vector.load %arg1[%c0, %c0_0, %c0_1, %c0_2] : memref<2x16x16x4xf32, #tpu.memory_space<vmem>>, vector<2x16x16x4xf32>
    %c0_3 = arith.constant 0 : index
    %c1 = arith.constant 1 : index
    %c0_4 = arith.constant 0 : index
    %c4 = arith.constant 4 : index
    %1 = vector.load %arg5[%c0_3, %c1, %c0_4, %c4] : memref<2x18x16x12xf32, #tpu.memory_space<vmem>>, vector<2x16x16x4xf32>
    tpu.vector_store %arg5[%c0_3, %c1, %c0_4, %c4], %0 {strides = array<i32>} : memref<2x18x16x12xf32, #tpu.memory_space<vmem>>, vector<2x16x16x4xf32>,
    %2 = vector.extract_strided_slice %0 {offsets = [0, 0, 0, 0], sizes = [2, 16, 15, 4], strides = [1, 1, 1, 1]} : vector<2x16x16x4xf32> to vector<2x16x15x4xf32>
    %c0_5 = arith.constant 0 : index
    %c1_6 = arith.constant 1 : index
    %c1_7 = arith.constant 1 : index
    %c0_8 = arith.constant 0 : index
    %3 = vector.load %arg5[%c0_5, %c1_6, %c1_7, %c0_8] : memref<2x18x16x12xf32, #tpu.memory_space<vmem>>, vector<2x16x15x4xf32>
    tpu.vector_store %arg5[%c0_5, %c1_6, %c1_7, %c0_8], %2 {strides = array<i32>} : memref<2x18x16x12xf32, #tpu.memory_space<vmem>>, vector<2x16x15x4xf32>,
    %4 = vector.extract_strided_slice %0 {offsets = [0, 0, 1, 0], sizes = [2, 16, 15, 4], strides = [1, 1, 1, 1]} : vector<2x16x16x4xf32> to vector<2x16x15x4xf32>
    %c0_9 = arith.constant 0 : index
    %c1_10 = arith.constant 1 : index
    %c0_11 = arith.constant 0 : index
    %c8 = arith.constant 8 : index
    %5 = vector.load %arg5[%c0_9, %c1_10, %c0_11, %c8] : memref<2x18x16x12xf32, #tpu.memory_space<vmem>>, vector<2x16x15x4xf32>
    tpu.vector_store %arg5[%c0_9, %c1_10, %c0_11, %c8], %4 {strides = array<i32>} : memref<2x18x16x12xf32, #tpu.memory_space<vmem>>, vector<2x16x15x4xf32>,
    %cst = arith.constant 0.000000e+00 : f32
    %6 = vector.broadcast %cst : f32 to vector<2x1x16x12xf32>
    %c0_12 = arith.constant 0 : index
    %c0_13 = arith.constant 0 : index
    %c0_14 = arith.constant 0 : index
    %c0_15 = arith.constant 0 : index
    %7 = vector.load %arg5[%c0_12, %c0_13, %c0_14, %c0_15] : memref<2x18x16x12xf32, #tpu.memory_space<vmem>>, vector<2x1x16x12xf32>
    tpu.vector_store %arg5[%c0_12, %c0_13, %c0_14, %c0_15], %6 {strides = array<i32>} : memref<2x18x16x12xf32, #tpu.memory_space<vmem>>, vector<2x1x16x12xf32>,
    %c0_16 = arith.constant 0 : index
    %c17 = arith.constant 17 : index
    %c0_17 = arith.constant 0 : index
    %c0_18 = arith.constant 0 : index
    %8 = vector.load %arg5[%c0_16, %c17, %c0_17, %c0_18] : memref<2x18x16x12xf32, #tpu.memory_space<vmem>>, vector<2x1x16x12xf32>
    tpu.vector_store %arg5[%c0_16, %c17, %c0_17, %c0_18], %6 {strides = array<i32>} : memref<2x18x16x12xf32, #tpu.memory_space<vmem>>, vector<2x1x16x12xf32>,
    %cst_19 = arith.constant 0.000000e+00 : f32
    %9 = vector.broadcast %cst_19 : f32 to vector<2x16x1x4xf32>
    %c0_20 = arith.constant 0 : index
    %c1_21 = arith.constant 1 : index
    %c0_22 = arith.constant 0 : index
    %c0_23 = arith.constant 0 : index
    %10 = vector.load %arg5[%c0_20, %c1_21, %c0_22, %c0_23] : memref<2x18x16x12xf32, #tpu.memory_space<vmem>>, vector<2x16x1x4xf32>
    tpu.vector_store %arg5[%c0_20, %c1_21, %c0_22, %c0_23], %9 {strides = array<i32>} : memref<2x18x16x12xf32, #tpu.memory_space<vmem>>, vector<2x16x1x4xf32>,
    %c0_24 = arith.constant 0 : index
    %c1_25 = arith.constant 1 : index
    %c15 = arith.constant 15 : index
    %c8_26 = arith.constant 8 : index
    %11 = vector.load %arg5[%c0_24, %c1_25, %c15, %c8_26] : memref<2x18x16x12xf32, #tpu.memory_space<vmem>>, vector<2x16x1x4xf32>
    tpu.vector_store %arg5[%c0_24, %c1_25, %c15, %c8_26], %9 {strides = array<i32>} : memref<2x18x16x12xf32, #tpu.memory_space<vmem>>, vector<2x16x1x4xf32>,
    %c0_27 = arith.constant 0 : index
    %c0_28 = arith.constant 0 : index
    %c0_29 = arith.constant 0 : index
    %c0_30 = arith.constant 0 : index
    %12 = vector.load %arg5[%c0_27, %c0_28, %c0_29, %c0_30] : memref<2x18x16x12xf32, #tpu.memory_space<vmem>>, vector<2x16x16x12xf32>
    %13 = vector.shape_cast %12 : vector<2x16x16x12xf32> to vector<512x12xf32>
    %c0_31 = arith.constant 0 : index
    %c0_32 = arith.constant 0 : index
    %14 = vector.load %arg2[%c0_31, %c0_32] : memref<36x8xf32, #tpu.memory_space<vmem>>, vector<12x8xf32>
    %cst_33 = arith.constant dense<0.000000e+00> : vector<512x8xf32>
    %15 = tpu.matmul %13, %14, %cst_33 {dimension_numbers = #tpu.dot_dimension_numbers<[1], [0], [0], [1], [0, 0, 1, 1], [], []>} : vector<512x12xf32>, vector<12x8xf32>, vector<512x8xf32> -> vector<512x8xf32>
    %c0_34 = arith.constant 0 : index
    %c1_35 = arith.constant 1 : index
    %c0_36 = arith.constant 0 : index
    %c0_37 = arith.constant 0 : index
    %16 = vector.load %arg5[%c0_34, %c1_35, %c0_36, %c0_37] : memref<2x18x16x12xf32, #tpu.memory_space<vmem>>, vector<2x16x16x12xf32>
    %17 = vector.shape_cast %16 : vector<2x16x16x12xf32> to vector<512x12xf32>
    %c12 = arith.constant 12 : index
    %c0_38 = arith.constant 0 : index
    %18 = vector.load %arg2[%c12, %c0_38] : memref<36x8xf32, #tpu.memory_space<vmem>>, vector<12x8xf32>
    %cst_39 = arith.constant dense<0.000000e+00> : vector<512x8xf32>
    %19 = tpu.matmul %17, %18, %cst_39 {dimension_numbers = #tpu.dot_dimension_numbers<[1], [0], [0], [1], [0, 0, 1, 1], [], []>} : vector<512x12xf32>, vector<12x8xf32>, vector<512x8xf32> -> vector<512x8xf32>
    %20 = arith.addf %15, %19 : vector<512x8xf32>
    %c0_40 = arith.constant 0 : index
    %c2 = arith.constant 2 : index
    %c0_41 = arith.constant 0 : index
    %c0_42 = arith.constant 0 : index
    %21 = vector.load %arg5[%c0_40, %c2, %c0_41, %c0_42] : memref<2x18x16x12xf32, #tpu.memory_space<vmem>>, vector<2x16x16x12xf32>
    %22 = vector.shape_cast %21 : vector<2x16x16x12xf32> to vector<512x12xf32>
    %c24 = arith.constant 24 : index
    %c0_43 = arith.constant 0 : index
    %23 = vector.load %arg2[%c24, %c0_43] : memref<36x8xf32, #tpu.memory_space<vmem>>, vector<12x8xf32>
    %cst_44 = arith.constant dense<0.000000e+00> : vector<512x8xf32>
    %24 = tpu.matmul %22, %23, %cst_44 {dimension_numbers = #tpu.dot_dimension_numbers<[1], [0], [0], [1], [0, 0, 1, 1], [], []>} : vector<512x12xf32>, vector<12x8xf32>, vector<512x8xf32> -> vector<512x8xf32>
    %25 = arith.addf %20, %24 : vector<512x8xf32>
    %26 = vector.shape_cast %25 : vector<512x8xf32> to vector<2x16x16x8xf32>
    %c0_45 = arith.constant 0 : index
    %c0_46 = arith.constant 0 : index
    %c0_47 = arith.constant 0 : index
    %c0_48 = arith.constant 0 : index
    %27 = vector.load %arg3[%c0_45, %c0_46, %c0_47, %c0_48] : memref<2x16x16x8xf32, #tpu.memory_space<vmem>>, vector<2x16x16x8xf32>
    tpu.vector_store %arg3[%c0_45, %c0_46, %c0_47, %c0_48], %26 {strides = array<i32>} : memref<2x16x16x8xf32, #tpu.memory_space<vmem>>, vector<2x16x16x8xf32>,
    %cst_49 = arith.constant dense<0.000000e+00> : vector<8xf32>
    %28 = vector.multi_reduction <add>, %25, %cst_49 [0] : vector<512x8xf32> to vector<8xf32>
    %29 = vector.shape_cast %28 : vector<8xf32> to vector<1x8xf32>
    %30 = arith.mulf %25, %25 : vector<512x8xf32>
    %cst_50 = arith.constant dense<0.000000e+00> : vector<8xf32>
    %31 = vector.multi_reduction <add>, %30, %cst_50 [0] : vector<512x8xf32> to vector<8xf32>
    %32 = vector.shape_cast %31 : vector<8xf32> to vector<1x8xf32>
    %33 = tpu.concatenate %29, %32 in 0 : vector<1x8xf32>, vector<1x8xf32> -> vector<2x8xf32>
    %34 = vector.shape_cast %33 : vector<2x8xf32> to vector<1x2x8xf32>
    %c0_51 = arith.constant 0 : index
    %c0_52 = arith.constant 0 : index
    %c0_53 = arith.constant 0 : index
    %35 = vector.load %arg4[%c0_51, %c0_52, %c0_53] : memref<1x2x8xf32, #tpu.memory_space<vmem>>, vector<1x2x8xf32>
    tpu.vector_store %arg4[%c0_51, %c0_52, %c0_53], %34 {strides = array<i32>} : memref<1x2x8xf32, #tpu.memory_space<vmem>>, vector<1x2x8xf32>,
    return
  }
  func.func @transform_0(%arg0: i32) -> (i32, i32, i32, i32) {
    %c0_i32 = arith.constant 0 : i32
    %c0_i32_0 = arith.constant 0 : i32
    %c0_i32_1 = arith.constant 0 : i32
    %c0_i32_2 = arith.constant 0 : i32
    return %arg0, %c0_i32, %c0_i32_0, %c0_i32_1 : i32, i32, i32, i32
  }
  func.func @transform_1(%arg0: i32) -> (i32, i32) {
    %c0_i32 = arith.constant 0 : i32
    %c0_i32_0 = arith.constant 0 : i32
    %c0_i32_1 = arith.constant 0 : i32
    return %c0_i32, %c0_i32_0 : i32, i32
  }
  func.func @transform_2(%arg0: i32) -> (i32, i32, i32, i32) {
    %c0_i32 = arith.constant 0 : i32
    %c0_i32_0 = arith.constant 0 : i32
    %c0_i32_1 = arith.constant 0 : i32
    %c0_i32_2 = arith.constant 0 : i32
    return %arg0, %c0_i32, %c0_i32_0, %c0_i32_1 : i32, i32, i32, i32
  }
  func.func @transform_3(%arg0: i32) -> (i32, i32, i32) {
    %c0_i32 = arith.constant 0 : i32
    %c0_i32_0 = arith.constant 0 : i32
    %c0_i32_1 = arith.constant 0 : i32
    return %arg0, %c0_i32, %c0_i32_0 : i32, i32, i32
  }
}

module attributes {stable_mosaic.version = 11 : i64} {
  func.func @_bn1_relu_conv2_kernel(%arg0: i32, %arg1: memref<2x16x16x8xf32, #tpu.memory_space<vmem>>, %arg2: memref<1x1x8xf32, #tpu.memory_space<vmem>>, %arg3: memref<1x1x8xf32, #tpu.memory_space<vmem>>, %arg4: memref<72x16xf32, #tpu.memory_space<vmem>>, %arg5: memref<2x16x16x16xf32, #tpu.memory_space<vmem>>, %arg6: memref<1x2x16xf32, #tpu.memory_space<vmem>>, %arg7: memref<2x18x16x24xf32, #tpu.memory_space<vmem>>) attributes {dimension_semantics = [#tpu.dimension_semantics<parallel>], iteration_bounds = array<i64: 1>, scalar_prefetch = 0 : i64, scratch_operands = 1 : i64, tpu.core_type = #tpu.core_type<tc>, window_params = [{transform_indices = @transform_0, window_bounds = array<i64: 2, 16, 16, 8>}, {pipeline_mode = #tpu.pipeline_mode<synchronous>, transform_indices = @transform_1, window_bounds = array<i64: 1, 1, 8>}, {pipeline_mode = #tpu.pipeline_mode<synchronous>, transform_indices = @transform_2, window_bounds = array<i64: 1, 1, 8>}, {pipeline_mode = #tpu.pipeline_mode<synchronous>, transform_indices = @transform_3, window_bounds = array<i64: 72, 16>}, {transform_indices = @transform_4, window_bounds = array<i64: 2, 16, 16, 16>}, {transform_indices = @transform_5, window_bounds = array<i64: 1, 2, 16>}]} {
    %c0 = arith.constant 0 : index
    %c0_0 = arith.constant 0 : index
    %c0_1 = arith.constant 0 : index
    %c0_2 = arith.constant 0 : index
    %0 = vector.load %arg1[%c0, %c0_0, %c0_1, %c0_2] : memref<2x16x16x8xf32, #tpu.memory_space<vmem>>, vector<2x16x16x8xf32>
    %c0_3 = arith.constant 0 : index
    %c0_4 = arith.constant 0 : index
    %c0_5 = arith.constant 0 : index
    %1 = vector.load %arg2[%c0_3, %c0_4, %c0_5] : memref<1x1x8xf32, #tpu.memory_space<vmem>>, vector<1x1x8xf32>
    %2 = vector.shape_cast %1 : vector<1x1x8xf32> to vector<1x1x1x8xf32>
    %3 = vector.broadcast %2 : vector<1x1x1x8xf32> to vector<2x16x16x8xf32>
    %4 = arith.mulf %0, %3 : vector<2x16x16x8xf32>
    %c0_6 = arith.constant 0 : index
    %c0_7 = arith.constant 0 : index
    %c0_8 = arith.constant 0 : index
    %5 = vector.load %arg3[%c0_6, %c0_7, %c0_8] : memref<1x1x8xf32, #tpu.memory_space<vmem>>, vector<1x1x8xf32>
    %6 = vector.shape_cast %5 : vector<1x1x8xf32> to vector<1x1x1x8xf32>
    %7 = vector.broadcast %6 : vector<1x1x1x8xf32> to vector<2x16x16x8xf32>
    %8 = arith.addf %4, %7 : vector<2x16x16x8xf32>
    %cst = arith.constant 0.000000e+00 : f32
    %9 = vector.broadcast %cst : f32 to vector<2x16x16x8xf32>
    %10 = arith.maximumf %8, %9 : vector<2x16x16x8xf32>
    %c0_9 = arith.constant 0 : index
    %c1 = arith.constant 1 : index
    %c0_10 = arith.constant 0 : index
    %c8 = arith.constant 8 : index
    %11 = vector.load %arg7[%c0_9, %c1, %c0_10, %c8] : memref<2x18x16x24xf32, #tpu.memory_space<vmem>>, vector<2x16x16x8xf32>
    tpu.vector_store %arg7[%c0_9, %c1, %c0_10, %c8], %10 {strides = array<i32>} : memref<2x18x16x24xf32, #tpu.memory_space<vmem>>, vector<2x16x16x8xf32>,
    %12 = vector.extract_strided_slice %10 {offsets = [0, 0, 0, 0], sizes = [2, 16, 15, 8], strides = [1, 1, 1, 1]} : vector<2x16x16x8xf32> to vector<2x16x15x8xf32>
    %c0_11 = arith.constant 0 : index
    %c1_12 = arith.constant 1 : index
    %c1_13 = arith.constant 1 : index
    %c0_14 = arith.constant 0 : index
    %13 = vector.load %arg7[%c0_11, %c1_12, %c1_13, %c0_14] : memref<2x18x16x24xf32, #tpu.memory_space<vmem>>, vector<2x16x15x8xf32>
    tpu.vector_store %arg7[%c0_11, %c1_12, %c1_13, %c0_14], %12 {strides = array<i32>} : memref<2x18x16x24xf32, #tpu.memory_space<vmem>>, vector<2x16x15x8xf32>,
    %14 = vector.extract_strided_slice %10 {offsets = [0, 0, 1, 0], sizes = [2, 16, 15, 8], strides = [1, 1, 1, 1]} : vector<2x16x16x8xf32> to vector<2x16x15x8xf32>
    %c0_15 = arith.constant 0 : index
    %c1_16 = arith.constant 1 : index
    %c0_17 = arith.constant 0 : index
    %c16 = arith.constant 16 : index
    %15 = vector.load %arg7[%c0_15, %c1_16, %c0_17, %c16] : memref<2x18x16x24xf32, #tpu.memory_space<vmem>>, vector<2x16x15x8xf32>
    tpu.vector_store %arg7[%c0_15, %c1_16, %c0_17, %c16], %14 {strides = array<i32>} : memref<2x18x16x24xf32, #tpu.memory_space<vmem>>, vector<2x16x15x8xf32>,
    %cst_18 = arith.constant 0.000000e+00 : f32
    %16 = vector.broadcast %cst_18 : f32 to vector<2x1x16x24xf32>
    %c0_19 = arith.constant 0 : index
    %c0_20 = arith.constant 0 : index
    %c0_21 = arith.constant 0 : index
    %c0_22 = arith.constant 0 : index
    %17 = vector.load %arg7[%c0_19, %c0_20, %c0_21, %c0_22] : memref<2x18x16x24xf32, #tpu.memory_space<vmem>>, vector<2x1x16x24xf32>
    tpu.vector_store %arg7[%c0_19, %c0_20, %c0_21, %c0_22], %16 {strides = array<i32>} : memref<2x18x16x24xf32, #tpu.memory_space<vmem>>, vector<2x1x16x24xf32>,
    %c0_23 = arith.constant 0 : index
    %c17 = arith.constant 17 : index
    %c0_24 = arith.constant 0 : index
    %c0_25 = arith.constant 0 : index
    %18 = vector.load %arg7[%c0_23, %c17, %c0_24, %c0_25] : memref<2x18x16x24xf32, #tpu.memory_space<vmem>>, vector<2x1x16x24xf32>
    tpu.vector_store %arg7[%c0_23, %c17, %c0_24, %c0_25], %16 {strides = array<i32>} : memref<2x18x16x24xf32, #tpu.memory_space<vmem>>, vector<2x1x16x24xf32>,
    %cst_26 = arith.constant 0.000000e+00 : f32
    %19 = vector.broadcast %cst_26 : f32 to vector<2x16x1x8xf32>
    %c0_27 = arith.constant 0 : index
    %c1_28 = arith.constant 1 : index
    %c0_29 = arith.constant 0 : index
    %c0_30 = arith.constant 0 : index
    %20 = vector.load %arg7[%c0_27, %c1_28, %c0_29, %c0_30] : memref<2x18x16x24xf32, #tpu.memory_space<vmem>>, vector<2x16x1x8xf32>
    tpu.vector_store %arg7[%c0_27, %c1_28, %c0_29, %c0_30], %19 {strides = array<i32>} : memref<2x18x16x24xf32, #tpu.memory_space<vmem>>, vector<2x16x1x8xf32>,
    %c0_31 = arith.constant 0 : index
    %c1_32 = arith.constant 1 : index
    %c15 = arith.constant 15 : index
    %c16_33 = arith.constant 16 : index
    %21 = vector.load %arg7[%c0_31, %c1_32, %c15, %c16_33] : memref<2x18x16x24xf32, #tpu.memory_space<vmem>>, vector<2x16x1x8xf32>
    tpu.vector_store %arg7[%c0_31, %c1_32, %c15, %c16_33], %19 {strides = array<i32>} : memref<2x18x16x24xf32, #tpu.memory_space<vmem>>, vector<2x16x1x8xf32>,
    %c0_34 = arith.constant 0 : index
    %c0_35 = arith.constant 0 : index
    %c0_36 = arith.constant 0 : index
    %c0_37 = arith.constant 0 : index
    %22 = vector.load %arg7[%c0_34, %c0_35, %c0_36, %c0_37] : memref<2x18x16x24xf32, #tpu.memory_space<vmem>>, vector<2x16x16x24xf32>
    %23 = vector.shape_cast %22 : vector<2x16x16x24xf32> to vector<512x24xf32>
    %c0_38 = arith.constant 0 : index
    %c0_39 = arith.constant 0 : index
    %24 = vector.load %arg4[%c0_38, %c0_39] : memref<72x16xf32, #tpu.memory_space<vmem>>, vector<24x16xf32>
    %cst_40 = arith.constant dense<0.000000e+00> : vector<512x16xf32>
    %25 = tpu.matmul %23, %24, %cst_40 {dimension_numbers = #tpu.dot_dimension_numbers<[1], [0], [0], [1], [0, 0, 1, 1], [], []>} : vector<512x24xf32>, vector<24x16xf32>, vector<512x16xf32> -> vector<512x16xf32>
    %c0_41 = arith.constant 0 : index
    %c1_42 = arith.constant 1 : index
    %c0_43 = arith.constant 0 : index
    %c0_44 = arith.constant 0 : index
    %26 = vector.load %arg7[%c0_41, %c1_42, %c0_43, %c0_44] : memref<2x18x16x24xf32, #tpu.memory_space<vmem>>, vector<2x16x16x24xf32>
    %27 = vector.shape_cast %26 : vector<2x16x16x24xf32> to vector<512x24xf32>
    %c24 = arith.constant 24 : index
    %c0_45 = arith.constant 0 : index
    %28 = vector.load %arg4[%c24, %c0_45] : memref<72x16xf32, #tpu.memory_space<vmem>>, vector<24x16xf32>
    %cst_46 = arith.constant dense<0.000000e+00> : vector<512x16xf32>
    %29 = tpu.matmul %27, %28, %cst_46 {dimension_numbers = #tpu.dot_dimension_numbers<[1], [0], [0], [1], [0, 0, 1, 1], [], []>} : vector<512x24xf32>, vector<24x16xf32>, vector<512x16xf32> -> vector<512x16xf32>
    %30 = arith.addf %25, %29 : vector<512x16xf32>
    %c0_47 = arith.constant 0 : index
    %c2 = arith.constant 2 : index
    %c0_48 = arith.constant 0 : index
    %c0_49 = arith.constant 0 : index
    %31 = vector.load %arg7[%c0_47, %c2, %c0_48, %c0_49] : memref<2x18x16x24xf32, #tpu.memory_space<vmem>>, vector<2x16x16x24xf32>
    %32 = vector.shape_cast %31 : vector<2x16x16x24xf32> to vector<512x24xf32>
    %c48 = arith.constant 48 : index
    %c0_50 = arith.constant 0 : index
    %33 = vector.load %arg4[%c48, %c0_50] : memref<72x16xf32, #tpu.memory_space<vmem>>, vector<24x16xf32>
    %cst_51 = arith.constant dense<0.000000e+00> : vector<512x16xf32>
    %34 = tpu.matmul %32, %33, %cst_51 {dimension_numbers = #tpu.dot_dimension_numbers<[1], [0], [0], [1], [0, 0, 1, 1], [], []>} : vector<512x24xf32>, vector<24x16xf32>, vector<512x16xf32> -> vector<512x16xf32>
    %35 = arith.addf %30, %34 : vector<512x16xf32>
    %36 = vector.shape_cast %35 : vector<512x16xf32> to vector<2x16x16x16xf32>
    %c0_52 = arith.constant 0 : index
    %c0_53 = arith.constant 0 : index
    %c0_54 = arith.constant 0 : index
    %c0_55 = arith.constant 0 : index
    %37 = vector.load %arg5[%c0_52, %c0_53, %c0_54, %c0_55] : memref<2x16x16x16xf32, #tpu.memory_space<vmem>>, vector<2x16x16x16xf32>
    tpu.vector_store %arg5[%c0_52, %c0_53, %c0_54, %c0_55], %36 {strides = array<i32>} : memref<2x16x16x16xf32, #tpu.memory_space<vmem>>, vector<2x16x16x16xf32>,
    %cst_56 = arith.constant dense<0.000000e+00> : vector<16xf32>
    %38 = vector.multi_reduction <add>, %35, %cst_56 [0] : vector<512x16xf32> to vector<16xf32>
    %39 = vector.shape_cast %38 : vector<16xf32> to vector<1x16xf32>
    %40 = arith.mulf %35, %35 : vector<512x16xf32>
    %cst_57 = arith.constant dense<0.000000e+00> : vector<16xf32>
    %41 = vector.multi_reduction <add>, %40, %cst_57 [0] : vector<512x16xf32> to vector<16xf32>
    %42 = vector.shape_cast %41 : vector<16xf32> to vector<1x16xf32>
    %43 = tpu.concatenate %39, %42 in 0 : vector<1x16xf32>, vector<1x16xf32> -> vector<2x16xf32>
    %44 = vector.shape_cast %43 : vector<2x16xf32> to vector<1x2x16xf32>
    %c0_58 = arith.constant 0 : index
    %c0_59 = arith.constant 0 : index
    %c0_60 = arith.constant 0 : index
    %45 = vector.load %arg6[%c0_58, %c0_59, %c0_60] : memref<1x2x16xf32, #tpu.memory_space<vmem>>, vector<1x2x16xf32>
    tpu.vector_store %arg6[%c0_58, %c0_59, %c0_60], %44 {strides = array<i32>} : memref<1x2x16xf32, #tpu.memory_space<vmem>>, vector<1x2x16xf32>,
    return
  }
  func.func @transform_0(%arg0: i32) -> (i32, i32, i32, i32) {
    %c0_i32 = arith.constant 0 : i32
    %c0_i32_0 = arith.constant 0 : i32
    %c0_i32_1 = arith.constant 0 : i32
    %c0_i32_2 = arith.constant 0 : i32
    return %arg0, %c0_i32, %c0_i32_0, %c0_i32_1 : i32, i32, i32, i32
  }
  func.func @transform_1(%arg0: i32) -> (i32, i32, i32) {
    %c0_i32 = arith.constant 0 : i32
    %c0_i32_0 = arith.constant 0 : i32
    %c0_i32_1 = arith.constant 0 : i32
    %c0_i32_2 = arith.constant 0 : i32
    return %c0_i32, %c0_i32_0, %c0_i32_1 : i32, i32, i32
  }
  func.func @transform_2(%arg0: i32) -> (i32, i32, i32) {
    %c0_i32 = arith.constant 0 : i32
    %c0_i32_0 = arith.constant 0 : i32
    %c0_i32_1 = arith.constant 0 : i32
    %c0_i32_2 = arith.constant 0 : i32
    return %c0_i32, %c0_i32_0, %c0_i32_1 : i32, i32, i32
  }
  func.func @transform_3(%arg0: i32) -> (i32, i32) {
    %c0_i32 = arith.constant 0 : i32
    %c0_i32_0 = arith.constant 0 : i32
    %c0_i32_1 = arith.constant 0 : i32
    return %c0_i32, %c0_i32_0 : i32, i32
  }
  func.func @transform_4(%arg0: i32) -> (i32, i32, i32, i32) {
    %c0_i32 = arith.constant 0 : i32
    %c0_i32_0 = arith.constant 0 : i32
    %c0_i32_1 = arith.constant 0 : i32
    %c0_i32_2 = arith.constant 0 : i32
    return %arg0, %c0_i32, %c0_i32_0, %c0_i32_1 : i32, i32, i32, i32
  }
  func.func @transform_5(%arg0: i32) -> (i32, i32, i32) {
    %c0_i32 = arith.constant 0 : i32
    %c0_i32_0 = arith.constant 0 : i32
    %c0_i32_1 = arith.constant 0 : i32
    return %arg0, %c0_i32, %c0_i32_0 : i32, i32, i32
  }
}

module attributes {stable_mosaic.version = 11 : i64} {
  func.func @_finalize_proj_kernel(%arg0: i32, %arg1: memref<2x16x16x16xf32, #tpu.memory_space<vmem>>, %arg2: memref<1x1x16xf32, #tpu.memory_space<vmem>>, %arg3: memref<1x1x16xf32, #tpu.memory_space<vmem>>, %arg4: memref<2x16x16x4xf32, #tpu.memory_space<vmem>>, %arg5: memref<4x16xf32, #tpu.memory_space<vmem>>, %arg6: memref<1x16xf32, #tpu.memory_space<vmem>>, %arg7: memref<2x16x16x16xf32, #tpu.memory_space<vmem>>) attributes {dimension_semantics = [#tpu.dimension_semantics<parallel>], iteration_bounds = array<i64: 1>, scalar_prefetch = 0 : i64, scratch_operands = 0 : i64, tpu.core_type = #tpu.core_type<tc>, window_params = [{transform_indices = @transform_0, window_bounds = array<i64: 2, 16, 16, 16>}, {pipeline_mode = #tpu.pipeline_mode<synchronous>, transform_indices = @transform_1, window_bounds = array<i64: 1, 1, 16>}, {pipeline_mode = #tpu.pipeline_mode<synchronous>, transform_indices = @transform_2, window_bounds = array<i64: 1, 1, 16>}, {transform_indices = @transform_3, window_bounds = array<i64: 2, 16, 16, 4>}, {pipeline_mode = #tpu.pipeline_mode<synchronous>, transform_indices = @transform_4, window_bounds = array<i64: 4, 16>}, {pipeline_mode = #tpu.pipeline_mode<synchronous>, transform_indices = @transform_5, window_bounds = array<i64: 1, 16>}, {transform_indices = @transform_6, window_bounds = array<i64: 2, 16, 16, 16>}]} {
    %c0 = arith.constant 0 : index
    %c0_0 = arith.constant 0 : index
    %c0_1 = arith.constant 0 : index
    %c0_2 = arith.constant 0 : index
    %0 = vector.load %arg1[%c0, %c0_0, %c0_1, %c0_2] : memref<2x16x16x16xf32, #tpu.memory_space<vmem>>, vector<2x16x16x16xf32>
    %c0_3 = arith.constant 0 : index
    %c0_4 = arith.constant 0 : index
    %c0_5 = arith.constant 0 : index
    %1 = vector.load %arg2[%c0_3, %c0_4, %c0_5] : memref<1x1x16xf32, #tpu.memory_space<vmem>>, vector<1x1x16xf32>
    %2 = vector.shape_cast %1 : vector<1x1x16xf32> to vector<1x1x1x16xf32>
    %3 = vector.broadcast %2 : vector<1x1x1x16xf32> to vector<2x16x16x16xf32>
    %4 = arith.mulf %0, %3 : vector<2x16x16x16xf32>
    %c0_6 = arith.constant 0 : index
    %c0_7 = arith.constant 0 : index
    %c0_8 = arith.constant 0 : index
    %5 = vector.load %arg3[%c0_6, %c0_7, %c0_8] : memref<1x1x16xf32, #tpu.memory_space<vmem>>, vector<1x1x16xf32>
    %6 = vector.shape_cast %5 : vector<1x1x16xf32> to vector<1x1x1x16xf32>
    %7 = vector.broadcast %6 : vector<1x1x1x16xf32> to vector<2x16x16x16xf32>
    %8 = arith.addf %4, %7 : vector<2x16x16x16xf32>
    %cst = arith.constant 0.000000e+00 : f32
    %9 = vector.broadcast %cst : f32 to vector<2x16x16x16xf32>
    %10 = arith.maximumf %8, %9 : vector<2x16x16x16xf32>
    %c0_9 = arith.constant 0 : index
    %c0_10 = arith.constant 0 : index
    %c0_11 = arith.constant 0 : index
    %c0_12 = arith.constant 0 : index
    %11 = vector.load %arg4[%c0_9, %c0_10, %c0_11, %c0_12] : memref<2x16x16x4xf32, #tpu.memory_space<vmem>>, vector<2x16x16x4xf32>
    %12 = vector.shape_cast %11 : vector<2x16x16x4xf32> to vector<512x4xf32>
    %c0_13 = arith.constant 0 : index
    %c0_14 = arith.constant 0 : index
    %13 = vector.load %arg5[%c0_13, %c0_14] : memref<4x16xf32, #tpu.memory_space<vmem>>, vector<4x16xf32>
    %cst_15 = arith.constant dense<0.000000e+00> : vector<512x16xf32>
    %14 = tpu.matmul %12, %13, %cst_15 {dimension_numbers = #tpu.dot_dimension_numbers<[1], [0], [0], [1], [0, 0, 1, 1], [], []>} : vector<512x4xf32>, vector<4x16xf32>, vector<512x16xf32> -> vector<512x16xf32>
    %c0_16 = arith.constant 0 : index
    %c0_17 = arith.constant 0 : index
    %15 = vector.load %arg6[%c0_16, %c0_17] : memref<1x16xf32, #tpu.memory_space<vmem>>, vector<1x16xf32>
    %16 = vector.broadcast %15 : vector<1x16xf32> to vector<512x16xf32>
    %17 = arith.addf %14, %16 : vector<512x16xf32>
    %18 = vector.shape_cast %17 : vector<512x16xf32> to vector<2x16x16x16xf32>
    %19 = arith.addf %10, %18 : vector<2x16x16x16xf32>
    %c0_18 = arith.constant 0 : index
    %c0_19 = arith.constant 0 : index
    %c0_20 = arith.constant 0 : index
    %c0_21 = arith.constant 0 : index
    %20 = vector.load %arg7[%c0_18, %c0_19, %c0_20, %c0_21] : memref<2x16x16x16xf32, #tpu.memory_space<vmem>>, vector<2x16x16x16xf32>
    tpu.vector_store %arg7[%c0_18, %c0_19, %c0_20, %c0_21], %19 {strides = array<i32>} : memref<2x16x16x16xf32, #tpu.memory_space<vmem>>, vector<2x16x16x16xf32>,
    return
  }
  func.func @transform_0(%arg0: i32) -> (i32, i32, i32, i32) {
    %c0_i32 = arith.constant 0 : i32
    %c0_i32_0 = arith.constant 0 : i32
    %c0_i32_1 = arith.constant 0 : i32
    %c0_i32_2 = arith.constant 0 : i32
    return %arg0, %c0_i32, %c0_i32_0, %c0_i32_1 : i32, i32, i32, i32
  }
  func.func @transform_1(%arg0: i32) -> (i32, i32, i32) {
    %c0_i32 = arith.constant 0 : i32
    %c0_i32_0 = arith.constant 0 : i32
    %c0_i32_1 = arith.constant 0 : i32
    %c0_i32_2 = arith.constant 0 : i32
    return %c0_i32, %c0_i32_0, %c0_i32_1 : i32, i32, i32
  }
  func.func @transform_2(%arg0: i32) -> (i32, i32, i32) {
    %c0_i32 = arith.constant 0 : i32
    %c0_i32_0 = arith.constant 0 : i32
    %c0_i32_1 = arith.constant 0 : i32
    %c0_i32_2 = arith.constant 0 : i32
    return %c0_i32, %c0_i32_0, %c0_i32_1 : i32, i32, i32
  }
  func.func @transform_3(%arg0: i32) -> (i32, i32, i32, i32) {
    %c0_i32 = arith.constant 0 : i32
    %c0_i32_0 = arith.constant 0 : i32
    %c0_i32_1 = arith.constant 0 : i32
    %c0_i32_2 = arith.constant 0 : i32
    return %arg0, %c0_i32, %c0_i32_0, %c0_i32_1 : i32, i32, i32, i32
  }
  func.func @transform_4(%arg0: i32) -> (i32, i32) {
    %c0_i32 = arith.constant 0 : i32
    %c0_i32_0 = arith.constant 0 : i32
    %c0_i32_1 = arith.constant 0 : i32
    return %c0_i32, %c0_i32_0 : i32, i32
  }
  func.func @transform_5(%arg0: i32) -> (i32, i32) {
    %c0_i32 = arith.constant 0 : i32
    %c0_i32_0 = arith.constant 0 : i32
    %c0_i32_1 = arith.constant 0 : i32
    return %c0_i32, %c0_i32_0 : i32, i32
  }
  func.func @transform_6(%arg0: i32) -> (i32, i32, i32, i32) {
    %c0_i32 = arith.constant 0 : i32
    %c0_i32_0 = arith.constant 0 : i32
    %c0_i32_1 = arith.constant 0 : i32
    %c0_i32_2 = arith.constant 0 : i32
    return %arg0, %c0_i32, %c0_i32_0, %c0_i32_1 : i32, i32, i32, i32
  }
}

</mosaic_0001>

<bundles_post_ra>
// kernel: _lambda_.5
= control target key start
LH: loop header
LB: loop body
LE: loop exit
PB: predicated region body
PF: predicated region fallthrough
CT: control target
= control target key end

     0   :  { %vm558_vm0 = vcmask 1043456   ;;  %vm365_vm1 = vcmask 31744   ;;  %vm1011_vm2 = vcmask 130048   ;;  %s2536_s4 = inlined_call_operand.vmem [shape: f32[4,16], index: 4, kind: input, shape index: {}]   ;;  %s2537_s3 = inlined_call_operand.vmem [shape: f32[2,16,16,4], index: 3, kind: input, shape index: {}]   ;;  %s2538_s0 = inlined_call_operand.vmem [shape: f32[2,16,16,16], index: 0, kind: input, shape index: {}]   ;;  %s2539_s1 = inlined_call_operand.vmem [shape: f32[1,1,16], index: 1, kind: input, shape index: {}]   ;;  %s2540_s2 = inlined_call_operand.vmem [shape: f32[1,1,16], index: 2, kind: input, shape index: {}]   ;;  %s2541_s5 = inlined_call_operand.vmem [shape: f32[1,16], index: 5, kind: input, shape index: {}]   ;;  %s2542_s6 = inlined_call_operand.vmem [shape: f32[2,16,16,16], index: 6, kind: output, shape index: {}]  }
   0x1   :  { %v357_v0 = vld [vmem:[%s2536_s4] sm:$0xf]  ;;  %v294_v3 = vld [vmem:[%s2537_s3 + $0x8] sm:$0xff]  ;;  %v295_v5 = vld [vmem:[%s2537_s3 + $0x10] sm:$0xff] }
   0x2   :  { %v293_v1 = vld [vmem:[%s2537_s3] sm:$0xff]  ;;  %1213 = vmatprep.subr.msk.mxu0 %vm558_vm0, %v357_v0  ;;  %1311 = vmatprep.subr.msk.mxu1 %vm558_vm0, %v357_v0  ;;  %v326_v4 = vld [vmem:[%s2537_s3 + $0x108] sm:$0xff]  ;;  %v327_v6 = vld [vmem:[%s2537_s3 + $0x110] sm:$0xff] }
   0x3   :  { %v325_v2 = vld [vmem:[%s2537_s3 + $0x100] sm:$0xff]  ;;  %1214 = vmatpush3.msk.msra.mxu0 %vm558_vm0, %v357_v0  ;;  %1312 = vmatpush3.msk.msra.mxu1 %vm558_vm0, %v357_v0  ;;  %v296_v7 = vld [vmem:[%s2537_s3 + $0x18] sm:$0xff]  ;;  %v298_v11 = vld [vmem:[%s2537_s3 + $0x28] sm:$0xff] }
   0x4   :  { %1215 = vmatprep.mubr.msk.f32.mxu0 %vm365_vm1, %v293_v1  ;;  %1263 = vmatprep.mubr.msk.f32.mxu1 %vm365_vm1, %v325_v2  ;;  %v328_v8 = vld [vmem:[%s2537_s3 + $0x118] sm:$0xff]  ;;  %v297_v9 = vld [vmem:[%s2537_s3 + $0x20] sm:$0xff]  ;;  %v330_v12 = vld [vmem:[%s2537_s3 + $0x128] sm:$0xff] }
   0x5   :  { %1216 = vmatmul.mubr.msk.f32.vlgmr.msra.gmra.mxu0 %vm365_vm1, %v294_v3  ;;  %1264 = vmatmul.mubr.msk.f32.vlgmr.msra.gmra.mxu1 %vm365_vm1, %v326_v4  ;;  %v329_v10 = vld [vmem:[%s2537_s3 + $0x120] sm:$0xff]  ;;  %v299_v13 = vld [vmem:[%s2537_s3 + $0x30] sm:$0xff]  ;;  %v300_v15 = vld [vmem:[%s2537_s3 + $0x38] sm:$0xff] }
   0x6   :  { %1218 = vmatprep.mubr.msk.f32.mxu0 %vm365_vm1, %v295_v5  ;;  %1266 = vmatprep.mubr.msk.f32.mxu1 %vm365_vm1, %v327_v6  ;;  %v331_v14 = vld [vmem:[%s2537_s3 + $0x130] sm:$0xff]  ;;  %v332_v16 = vld [vmem:[%s2537_s3 + $0x138] sm:$0xff]  ;;  %v301_v17 = vld [vmem:[%s2537_s3 + $0x40] sm:$0xff] }
   0x7   :  { %v333_v18 = vld [vmem:[%s2537_s3 + $0x140] sm:$0xff]  ;;  %v302_v19 = vld [vmem:[%s2537_s3 + $0x48] sm:$0xff]  ;;  %v303_v21 = vld [vmem:[%s2537_s3 + $0x50] sm:$0xff] }
   0x8   :  { %v334_v20 = vld [vmem:[%s2537_s3 + $0x148] sm:$0xff]  ;;  %v335_v22 = vld [vmem:[%s2537_s3 + $0x150] sm:$0xff]  ;;  %v304_v23 = vld [vmem:[%s2537_s3 + $0x58] sm:$0xff] }
   0x9   :  { %1219 = vmatmul.mubr.msk.f32.gmra.mxu0 %vm365_vm1, %v296_v7  ;;  %1267 = vmatmul.mubr.msk.f32.gmra.mxu1 %vm365_vm1, %v328_v8  ;;  %v336_v24 = vld [vmem:[%s2537_s3 + $0x158] sm:$0xff]  ;;  %v305_v25 = vld [vmem:[%s2537_s3 + $0x60] sm:$0xff]  ;;  %v306_v27 = vld [vmem:[%s2537_s3 + $0x68] sm:$0xff] }
   0xa   :  { %1221 = vmatprep.mubr.msk.f32.mxu0 %vm365_vm1, %v297_v9  ;;  %1269 = vmatprep.mubr.msk.f32.mxu1 %vm365_vm1, %v329_v10  ;;  %v337_v26 = vld [vmem:[%s2537_s3 + $0x160] sm:$0xff]  ;;  %v338_v28 = vld [vmem:[%s2537_s3 + $0x168] sm:$0xff]  ;;  %v307_v29 = vld [vmem:[%s2537_s3 + $0x70] sm:$0xff] }
   0xb   :  { %v339_v30 = vld [vmem:[%s2537_s3 + $0x170] sm:$0xff]  ;;  %v308_v31 = vld [vmem:[%s2537_s3 + $0x78] sm:$0xff]  ;;  %v309_v33 = vld [vmem:[%s2537_s3 + $0x80] sm:$0xff] }
   0xc   :  { %v340_v32 = vld [vmem:[%s2537_s3 + $0x178] sm:$0xff]  ;;  %v341_v34 = vld [vmem:[%s2537_s3 + $0x180] sm:$0xff]  ;;  %v310_v35 = vld [vmem:[%s2537_s3 + $0x88] sm:$0xff] }
   0xd   :  { %1222 = vmatmul.mubr.msk.f32.gmra.mxu0 %vm365_vm1, %v298_v11  ;;  %1270 = vmatmul.mubr.msk.f32.gmra.mxu1 %vm365_vm1, %v330_v12  ;;  %v342_v36 = vld [vmem:[%s2537_s3 + $0x188] sm:$0xff]  ;;  %v311_v37 = vld [vmem:[%s2537_s3 + $0x90] sm:$0xff]  ;;  %v312_v39 = vld [vmem:[%s2537_s3 + $0x98] sm:$0xff] }
   0xe   :  { %1224 = vmatprep.mubr.msk.f32.mxu0 %vm365_vm1, %v299_v13  ;;  %1272 = vmatprep.mubr.msk.f32.mxu1 %vm365_vm1, %v331_v14  ;;  %v343_v38 = vld [vmem:[%s2537_s3 + $0x190] sm:$0xff]  ;;  %v344_v40 = vld [vmem:[%s2537_s3 + $0x198] sm:$0xff]  ;;  %v313_v41 = vld [vmem:[%s2537_s3 + $0xa0] sm:$0xff] }
   0xf   :  { %v345_v42 = vld [vmem:[%s2537_s3 + $0x1a0] sm:$0xff]  ;;  %v314_v43 = vld [vmem:[%s2537_s3 + $0xa8] sm:$0xff]  ;;  %v315_v45 = vld [vmem:[%s2537_s3 + $0xb0] sm:$0xff] }
  0x10   :  { %v346_v44 = vld [vmem:[%s2537_s3 + $0x1a8] sm:$0xff]  ;;  %v347_v46 = vld [vmem:[%s2537_s3 + $0x1b0] sm:$0xff]  ;;  %v316_v47 = vld [vmem:[%s2537_s3 + $0xb8] sm:$0xff] }
  0x11   :  { %1225 = vmatmul.mubr.msk.f32.gmra.mxu0 %vm365_vm1, %v300_v15  ;;  %1273 = vmatmul.mubr.msk.f32.gmra.mxu1 %vm365_vm1, %v332_v16  ;;  %v348_v48 = vld [vmem:[%s2537_s3 + $0x1b8] sm:$0xff]  ;;  %v317_v49 = vld [vmem:[%s2537_s3 + $0xc0] sm:$0xff]  ;;  %v318_v51 = vld [vmem:[%s2537_s3 + $0xc8] sm:$0xff] }
  0x12   :  { %1227 = vmatprep.mubr.msk.f32.mxu0 %vm365_vm1, %v301_v17  ;;  %1275 = vmatprep.mubr.msk.f32.mxu1 %vm365_vm1, %v333_v18  ;;  %v349_v50 = vld [vmem:[%s2537_s3 + $0x1c0] sm:$0xff]  ;;  %v350_v52 = vld [vmem:[%s2537_s3 + $0x1c8] sm:$0xff]  ;;  %v319_v53 = vld [vmem:[%s2537_s3 + $0xd0] sm:$0xff] }
  0x13   :  { %v351_v54 = vld [vmem:[%s2537_s3 + $0x1d0] sm:$0xff]  ;;  %v320_v55 = vld [vmem:[%s2537_s3 + $0xd8] sm:$0xff]  ;;  %v321_v57 = vld [vmem:[%s2537_s3 + $0xe0] sm:$0xff] }
  0x14   :  { %v352_v56 = vld [vmem:[%s2537_s3 + $0x1d8] sm:$0xff]  ;;  %v353_v58 = vld [vmem:[%s2537_s3 + $0x1e0] sm:$0xff]  ;;  %v322_v59 = vld [vmem:[%s2537_s3 + $0xe8] sm:$0xff] }
  0x15   :  { %1228 = vmatmul.mubr.msk.f32.gmra.mxu0 %vm365_vm1, %v302_v19  ;;  %1276 = vmatmul.mubr.msk.f32.gmra.mxu1 %vm365_vm1, %v334_v20  ;;  %v354_v60 = vld [vmem:[%s2537_s3 + $0x1e8] sm:$0xff]  ;;  %v323_v61 = vld [vmem:[%s2537_s3 + $0xf0] sm:$0xff]  ;;  %v324_v63 = vld [vmem:[%s2537_s3 + $0xf8] sm:$0xff] }
  0x16   :  { %1230 = vmatprep.mubr.msk.f32.mxu0 %vm365_vm1, %v303_v21  ;;  %1278 = vmatprep.mubr.msk.f32.mxu1 %vm365_vm1, %v335_v22  ;;  %v355_v62 = vld [vmem:[%s2537_s3 + $0x1f0] sm:$0xff]  ;;  %v356_v0 = vld [vmem:[%s2537_s3 + $0x1f8] sm:$0xff]  ;;  %v24_v1 = vld [vmem:[%s2538_s0 + $0x8] sm:$0xff] }
  0x17   :  { %v1613_v2 = vld [vmem:[%s2539_s1] ss:$0 sm:$0xff]  ;;  %v56_v3 = vld [vmem:[%s2538_s0 + $0x108] sm:$0xff]  ;;  %v26_v7 = vld [vmem:[%s2538_s0 + $0x18] sm:$0xff] }
  0x18   :  { %v23_v4 = vld [vmem:[%s2538_s0] sm:$0xff]  ;;  %v95_v6 = vmul.f32 %v1613_v2, %v24_v1  ;;  %v58_v8 = vld [vmem:[%s2538_s0 + $0x118] sm:$0xff]  ;;  %v127_v10 = vmul.f32 %v1613_v2, %v56_v3  ;;  %v25_v13 = vld [vmem:[%s2538_s0 + $0x10] sm:$0xff]  ;;  %v97_v15 = vmul.f32 %v1613_v2, %v26_v7 }
  0x19   :  { %1231 = vmatmul.mubr.msk.f32.gmra.mxu0 %vm365_vm1, %v304_v23  ;;  %1279 = vmatmul.mubr.msk.f32.gmra.mxu1 %vm365_vm1, %v336_v24  ;;  %v55_v5 = vld [vmem:[%s2538_s0 + $0x100] sm:$0xff]  ;;  %v94_v11 = vmul.f32 %v1613_v2, %v23_v4  ;;  %v57_v14 = vld [vmem:[%s2538_s0 + $0x110] sm:$0xff]  ;;  %v129_v16 = vmul.f32 %v1613_v2, %v58_v8  ;;  %v28_v17 = vld [vmem:[%s2538_s0 + $0x28] sm:$0xff]  ;;  %v96_v20 = vmul.f32 %v1613_v2, %v25_v13 }
  0x1a   :  { %1233 = vmatprep.mubr.msk.f32.mxu0 %vm365_vm1, %v305_v25  ;;  %1281 = vmatprep.mubr.msk.f32.mxu1 %vm365_vm1, %v337_v26  ;;  %v1634_v9 = vld [vmem:[%s2540_s2] ss:$0 sm:$0xff]  ;;  %v126_v12 = vmul.f32 %v1613_v2, %v55_v5  ;;  %v60_v18 = vld [vmem:[%s2538_s0 + $0x128] sm:$0xff]  ;;  %v128_v21 = vmul.f32 %v1613_v2, %v57_v14  ;;  %v99_v25 = vmul.f32 %v1613_v2, %v28_v17 }
  0x1b   :  { %v1654_v19 = vadd.f32 %v1634_v9, %v95_v6  ;;  %v1659_v22 = vadd.f32 %v1634_v9, %v127_v10  ;;  %v1662_v23 = vadd.f32 %v1634_v9, %v94_v11  ;;  %v131_v26 = vmul.f32 %v1613_v2, %v60_v18  ;;  %v36_v11 = vld [vmem:[%s2538_s0 + $0x68] sm:$0xff] }
  0x1c   :  { %v1665_v24 = vadd.f32 %v1634_v9, %v126_v12  ;;  %v68_v12 = vld [vmem:[%s2538_s0 + $0x168] sm:$0xff] }
  0x1d   :  { %1234 = vmatmul.mubr.msk.f32.gmra.mxu0 %vm365_vm1, %v306_v27  ;;  %1282 = vmatmul.mubr.msk.f32.gmra.mxu1 %vm365_vm1, %v338_v28  ;;  %v1670_v27 = vadd.f32 %v1634_v9, %v97_v15  ;;  %v1673_v28 = vadd.f32 %v1634_v9, %v129_v16 }
  0x1e   :  { %1236 = vmatprep.mubr.msk.f32.mxu0 %vm365_vm1, %v307_v29  ;;  %1284 = vmatprep.mubr.msk.f32.mxu1 %vm365_vm1, %v339_v30  ;;  %v27_v29 = vld [vmem:[%s2538_s0 + $0x20] sm:$0xff] }
  0x1f   :  { %v59_v30 = vld [vmem:[%s2538_s0 + $0x120] sm:$0xff] }
  0x21   :  { %1237 = vmatmul.mubr.msk.f32.gmra.mxu0 %vm365_vm1, %v308_v31  ;;  %1285 = vmatmul.mubr.msk.f32.gmra.mxu1 %vm365_vm1, %v340_v32  ;;  %v230_v31 = vmax.f32 %v1654_v19, 0.0  ;;  %v1683_v32 = vadd.f32 %v1634_v9, %v96_v20 }
  0x22   :  { %1239 = vmatprep.mubr.msk.f32.mxu0 %vm365_vm1, %v309_v33  ;;  %1287 = vmatprep.mubr.msk.f32.mxu1 %vm365_vm1, %v341_v34  ;;  %v1686_v33 = vadd.f32 %v1634_v9, %v128_v21  ;;  %v30_v34 = vld [vmem:[%s2538_s0 + $0x38] sm:$0xff] }
  0x25   :  { %1240 = vmatmul.mubr.msk.f32.gmra.mxu0 %vm365_vm1, %v310_v35  ;;  %1288 = vmatmul.mubr.msk.f32.gmra.mxu1 %vm365_vm1, %v342_v36  ;;  %v62_v35 = vld [vmem:[%s2538_s0 + $0x138] sm:$0xff]  ;;  %v262_v36 = vmax.f32 %v1659_v22, 0.0 }
  0x26   :  { %1242 = vmatprep.mubr.msk.f32.mxu0 %vm365_vm1, %v311_v37  ;;  %1290 = vmatprep.mubr.msk.f32.mxu1 %vm365_vm1, %v343_v38  ;;  %v229_v37 = vmax.f32 %v1662_v23, 0.0  ;;  %v261_v38 = vmax.f32 %v1665_v24, 0.0 }
  0x29   :  { %1243 = vmatmul.mubr.msk.f32.gmra.mxu0 %vm365_vm1, %v312_v39  ;;  %1291 = vmatmul.mubr.msk.f32.gmra.mxu1 %vm365_vm1, %v344_v40  ;;  %v29_v39 = vld [vmem:[%s2538_s0 + $0x30] sm:$0xff] }
  0x2a   :  { %1245 = vmatprep.mubr.msk.f32.mxu0 %vm365_vm1, %v313_v41  ;;  %1293 = vmatprep.mubr.msk.f32.mxu1 %vm365_vm1, %v345_v42  ;;  %v61_v40 = vld [vmem:[%s2538_s0 + $0x130] sm:$0xff]  ;;  %v32_v41 = vld [vmem:[%s2538_s0 + $0x48] sm:$0xff]  ;;  %v1707_v42 = vadd.f32 %v1634_v9, %v99_v25 }
  0x2c   :  { %v234_v1 = vmax.f32 %v1707_v42, 0.0 }
  0x2d   :  { %1246 = vmatmul.mubr.msk.f32.gmra.mxu0 %vm365_vm1, %v314_v43  ;;  %1294 = vmatmul.mubr.msk.f32.gmra.mxu1 %vm365_vm1, %v346_v44  ;;  %v1710_v43 = vadd.f32 %v1634_v9, %v131_v26  ;;  %v98_v44 = vmul.f32 %v1613_v2, %v27_v29  ;;  %v107_v29 = vmul.f32 %v1613_v2, %v36_v11 }
  0x2e   :  { %1248 = vmatprep.mubr.msk.f32.mxu0 %vm365_vm1, %v315_v45  ;;  %1296 = vmatprep.mubr.msk.f32.mxu1 %vm365_vm1, %v347_v46  ;;  %v130_v45 = vmul.f32 %v1613_v2, %v59_v30  ;;  %v64_v46 = vld [vmem:[%s2538_s0 + $0x148] sm:$0xff]  ;;  %v139_v30 = vmul.f32 %v1613_v2, %v68_v12 }
  0x2f   :  { %v266_v3 = vmax.f32 %v1710_v43, 0.0  ;;  %v1750_v4 = vadd.f32 %v1634_v9, %v98_v44  ;;  %v67_v44 = vld [vmem:[%s2538_s0 + $0x160] sm:$0xff] }
  0x30   :  { %v1753_v5 = vadd.f32 %v1634_v9, %v130_v45  ;;  %v1810_v45 = vld [vmem:[%s2541_s5] ss:$0 sm:$0xff] }
  0x31   :  { %1249 = vmatmul.mubr.msk.f32.gmra.mxu0 %vm365_vm1, %v316_v47  ;;  %1297 = vmatmul.mubr.msk.f32.gmra.mxu1 %vm365_vm1, %v348_v48  ;;  %v31_v47 = vld [vmem:[%s2538_s0 + $0x40] sm:$0xff]  ;;  %v233_v25 = vmax.f32 %v1750_v4, 0.0 }
  0x32   :  { %1251 = vmatprep.mubr.msk.f32.mxu0 %vm365_vm1, %v317_v49  ;;  %1299 = vmatprep.mubr.msk.f32.mxu1 %vm365_vm1, %v349_v50  ;;  %v63_v48 = vld [vmem:[%s2538_s0 + $0x140] sm:$0xff]  ;;  %v232_v49 = vmax.f32 %v1670_v27, 0.0  ;;  %v264_v50 = vmax.f32 %v1673_v28, 0.0  ;;  %v265_v26 = vmax.f32 %v1753_v5, 0.0 }
  0x35   :  { %1252 = vmatmul.mubr.msk.f32.gmra.mxu0 %vm365_vm1, %v318_v51  ;;  %1300 = vmatmul.mubr.msk.f32.gmra.mxu1 %vm365_vm1, %v350_v52  ;;  %v101_v51 = vmul.f32 %v1613_v2, %v30_v34  ;;  %v133_v52 = vmul.f32 %v1613_v2, %v62_v35 }
  0x36   :  { %1254 = vmatprep.mubr.msk.f32.mxu0 %vm365_vm1, %v319_v53  ;;  %1302 = vmatprep.mubr.msk.f32.mxu1 %vm365_vm1, %v351_v54  ;;  %v231_v53 = vmax.f32 %v1683_v32, 0.0  ;;  %v263_v54 = vmax.f32 %v1686_v33, 0.0 }
  0x37   :  { %v1756_v6 = vadd.f32 %v1634_v9, %v101_v51  ;;  %v1759_v7 = vadd.f32 %v1634_v9, %v133_v52 }
  0x39   :  { %1255 = vmatmul.mubr.msk.f32.gmra.mxu0 %vm365_vm1, %v320_v55  ;;  %1303 = vmatmul.mubr.msk.f32.gmra.mxu1 %vm365_vm1, %v352_v56  ;;  %v100_v55 = vmul.f32 %v1613_v2, %v29_v39  ;;  %v132_v56 = vmul.f32 %v1613_v2, %v61_v40  ;;  %v236_v34 = vmax.f32 %v1756_v6, 0.0  ;;  %v268_v35 = vmax.f32 %v1759_v7, 0.0 }
  0x3a   :  { %1257 = vmatprep.mubr.msk.f32.mxu0 %vm365_vm1, %v321_v57  ;;  %1305 = vmatprep.mubr.msk.f32.mxu1 %vm365_vm1, %v353_v58  ;;  %v34_v57 = vld [vmem:[%s2538_s0 + $0x58] sm:$0xff] }
  0x3b   :  { %v66_v58 = vld [vmem:[%s2538_s0 + $0x158] sm:$0xff]  ;;  %v105_v8 = vmul.f32 %v1613_v2, %v34_v57  ;;  %v1770_v13 = vadd.f32 %v1634_v9, %v100_v55  ;;  %v1773_v14 = vadd.f32 %v1634_v9, %v132_v56 }
  0x3c   :  { %v137_v10 = vmul.f32 %v1613_v2, %v66_v58  ;;  %v38_v58 = vld [vmem:[%s2538_s0 + $0x78] sm:$0xff] }
  0x3d   :  { %1258 = vmatmul.mubr.msk.f32.gmra.mxu0 %vm365_vm1, %v322_v59  ;;  %1306 = vmatmul.mubr.msk.f32.gmra.mxu1 %vm365_vm1, %v354_v60  ;;  %v103_v59 = vmul.f32 %v1613_v2, %v32_v41  ;;  %v135_v60 = vmul.f32 %v1613_v2, %v64_v46  ;;  %v1796_v39 = vadd.f32 %v1634_v9, %v105_v8  ;;  %v35_v41 = vld [vmem:[%s2538_s0 + $0x60] sm:$0xff]  ;;  %v235_v46 = vmax.f32 %v1770_v13, 0.0 }
  0x3e   :  { %1260 = vmatprep.mubr.msk.f32.mxu0 %vm365_vm1, %v323_v61  ;;  %1308 = vmatprep.mubr.msk.f32.mxu1 %vm365_vm1, %v355_v62  ;;  %v102_v61 = vmul.f32 %v1613_v2, %v31_v47  ;;  %v134_v62 = vmul.f32 %v1613_v2, %v63_v48  ;;  %v1799_v40 = vadd.f32 %v1634_v9, %v137_v10  ;;  %v267_v47 = vmax.f32 %v1773_v14, 0.0 }
  0x3f   :  { %v1778_v17 = vadd.f32 %v1634_v9, %v103_v59  ;;  %v1781_v18 = vadd.f32 %v1634_v9, %v135_v60  ;;  %v70_v59 = vld [vmem:[%s2538_s0 + $0x178] sm:$0xff]  ;;  %v138_v8 = vmul.f32 %v1613_v2, %v67_v44  ;;  %v240_v12 = vmax.f32 %v1796_v39, 0.0 }
  0x40   :  { %v1784_v20 = vadd.f32 %v1634_v9, %v102_v61  ;;  %v1787_v21 = vadd.f32 %v1634_v9, %v134_v62  ;;  %v1831_v62 = vadd.f32 %v1634_v9, %v107_v29  ;;  %v37_v29 = vld [vmem:[%s2538_s0 + $0x70] sm:$0xff] }
  0x41   :  { %1261 = vmatmul.mubr.msk.f32.gmra.mxu0 %vm365_vm1, %v324_v63  ;;  %1309 = vmatmul.mubr.msk.f32.gmra.mxu1 %vm365_vm1, %v356_v0  ;;  %v33_v63 = vld [vmem:[%s2538_s0 + $0x50] sm:$0xff]  ;;  %v238_v52 = vmax.f32 %v1778_v17, 0.0  ;;  %v270_v55 = vmax.f32 %v1781_v18, 0.0 }
  0x42   :  { %v65_v0 = vld [vmem:[%s2538_s0 + $0x150] sm:$0xff]  ;;  %v104_v15 = vmul.f32 %v1613_v2, %v33_v63  ;;  %v1834_v63 = vadd.f32 %v1634_v9, %v139_v30  ;;  %v109_v30 = vmul.f32 %v1613_v2, %v38_v58  ;;  %v242_v19 = vmax.f32 %v1831_v62, 0.0 }
  0x43   :  { %v136_v16 = vmul.f32 %v1613_v2, %v65_v0  ;;  %v106_v0 = vmul.f32 %v1613_v2, %v35_v41  ;;  %v141_v41 = vmul.f32 %v1613_v2, %v70_v59  ;;  %v69_v58 = vld [vmem:[%s2538_s0 + $0x170] sm:$0xff]  ;;  %v2543_v17 = vmax.f32 %v1784_v20, 0.0 }
  0x44   :  { %v1815_v48 = vadd.f32 %v1634_v9, %v104_v15  ;;  %v1887_v23 = vadd.f32 %v1634_v9, %v109_v30 }
  0x45   :  { %v1818_v51 = vadd.f32 %v1634_v9, %v136_v16  ;;  %v1861_v22 = vadd.f32 %v1634_v9, %v106_v0  ;;  %v1890_v24 = vadd.f32 %v1634_v9, %v141_v41 }
  0x46   :  { %v244_v32 = vmax.f32 %v1887_v23, 0.0 }
  0xc5   :  { %v1217_v60 = vpop.f32.mrf.mxu0  ;;  %v1265_v61 = vpop.f32.mrf.mxu1 }
  0xc6   :  { %v634_v10 = vadd.f32 %v1217_v60, %v1810_v45  ;;  %v794_v11 = vadd.f32 %v1265_v61, %v1810_v45 }
  0xc7   :  { %v628_v16 = vpop.f32.mrf.mxu0  ;;  %v788_v57 = vpop.f32.mrf.mxu1 }
  0xc8   :  { %v948_v44 = vadd.f32 %v634_v10, %v230_v31  ;;  %v980_v60 = vadd.f32 %v794_v11, %v262_v36  ;;  %v629_v61 = vadd.f32 %v1810_v45, %v628_v16  ;;  %v789_v15 = vadd.f32 %v1810_v45, %v788_v57  ;;  %v40_v11 = vld [vmem:[%s2538_s0 + $0x88] sm:$0xff] }
  0xc9   :  { %v1220_v56 = vpop.f32.mrf.mxu0  ;;  %v1268_v59 = vpop.f32.mrf.mxu1  ;;  %v274_v31 = vmax.f32 %v1834_v63, 0.0  ;;  %v1864_v36 = vadd.f32 %v1634_v9, %v138_v8  ;;  %v72_v16 = vld [vmem:[%s2538_s0 + $0x188] sm:$0xff] }
  0xca   :  { %1013 = vst.msk [vmem:[%s2542_s6 + $0x8] sm:$0xff] %vm1011_vm2, %v948_v44  ;;  %1045 = vst.msk [vmem:[%s2542_s6 + $0x108] sm:$0xff] %vm1011_vm2, %v980_v60  ;;  %v947_v57 = vadd.f32 %v629_v61, %v229_v37  ;;  %v979_v0 = vadd.f32 %v789_v15, %v261_v38  ;;  %v644_v10 = vadd.f32 %v1220_v56, %v1810_v45 }
  0xcb   :  { %v804_v8 = vadd.f32 %v1268_v59, %v1810_v45  ;;  %v638_v44 = vpop.f32.mrf.mxu0  ;;  %v798_v60 = vpop.f32.mrf.mxu1  ;;  %v108_v37 = vmul.f32 %v1613_v2, %v37_v29  ;;  %v140_v38 = vmul.f32 %v1613_v2, %v69_v58  ;;  %v241_v58 = vmax.f32 %v1861_v22, 0.0 }
  0xcc   :  { %1012 = vst.msk [vmem:[%s2542_s6] sm:$0xff] %vm1011_vm2, %v947_v57  ;;  %1044 = vst.msk [vmem:[%s2542_s6 + $0x100] sm:$0xff] %vm1011_vm2, %v979_v0  ;;  %v950_v56 = vadd.f32 %v644_v10, %v232_v49  ;;  %v639_v29 = vadd.f32 %v1810_v45, %v638_v44  ;;  %v799_v30 = vadd.f32 %v1810_v45, %v798_v60  ;;  %v273_v59 = vmax.f32 %v1864_v36, 0.0  ;;  %v39_v10 = vld [vmem:[%s2538_s0 + $0x80] sm:$0xff] }
  0xcd   :  { %v982_v15 = vadd.f32 %v804_v8, %v264_v50  ;;  %v1223_v41 = vpop.f32.mrf.mxu0  ;;  %v1271_v61 = vpop.f32.mrf.mxu1  ;;  %v111_v57 = vmul.f32 %v1613_v2, %v40_v11  ;;  %v143_v0 = vmul.f32 %v1613_v2, %v72_v16  ;;  %v71_v8 = vld [vmem:[%s2538_s0 + $0x180] sm:$0xff]  ;;  %v1935_v33 = vadd.f32 %v1634_v9, %v108_v37 }
  0xce   :  { %1015 = vst.msk [vmem:[%s2542_s6 + $0x18] sm:$0xff] %vm1011_vm2, %v950_v56  ;;  %v949_v27 = vadd.f32 %v639_v29, %v231_v53  ;;  %v981_v28 = vadd.f32 %v799_v30, %v263_v54  ;;  %v654_v49 = vadd.f32 %v1223_v41, %v1810_v45  ;;  %v814_v50 = vadd.f32 %v1271_v61, %v1810_v45  ;;  %v42_v56 = vld [vmem:[%s2538_s0 + $0x98] sm:$0xff] }
  0xcf   :  { %1047 = vst.msk [vmem:[%s2542_s6 + $0x118] sm:$0xff] %vm1011_vm2, %v982_v15  ;;  %v648_v11 = vpop.f32.mrf.mxu0  ;;  %v808_v16 = vpop.f32.mrf.mxu1  ;;  %v276_v53 = vmax.f32 %v1890_v24, 0.0  ;;  %v1938_v54 = vadd.f32 %v1634_v9, %v140_v38  ;;  %v74_v15 = vld [vmem:[%s2538_s0 + $0x198] sm:$0xff]  ;;  %v1961_v42 = vadd.f32 %v1634_v9, %v111_v57  ;;  %v1964_v43 = vadd.f32 %v1634_v9, %v143_v0 }
  0xd0   :  { %1014 = vst.msk [vmem:[%s2542_s6 + $0x10] sm:$0xff] %vm1011_vm2, %v949_v27  ;;  %1046 = vst.msk [vmem:[%s2542_s6 + $0x110] sm:$0xff] %vm1011_vm2, %v981_v28  ;;  %v952_v44 = vadd.f32 %v654_v49, %v234_v1  ;;  %v984_v60 = vadd.f32 %v814_v50, %v266_v3  ;;  %v649_v37 = vadd.f32 %v1810_v45, %v648_v11  ;;  %v243_v49 = vmax.f32 %v1935_v33, 0.0  ;;  %v41_v11 = vld [vmem:[%s2538_s0 + $0x90] sm:$0xff] }
  0xd1   :  { %v809_v38 = vadd.f32 %v1810_v45, %v808_v16  ;;  %v1226_v29 = vpop.f32.mrf.mxu0  ;;  %v1274_v30 = vpop.f32.mrf.mxu1  ;;  %v110_v1 = vmul.f32 %v1613_v2, %v39_v10  ;;  %v142_v3 = vmul.f32 %v1613_v2, %v71_v8  ;;  %v275_v50 = vmax.f32 %v1938_v54, 0.0  ;;  %v73_v16 = vld [vmem:[%s2538_s0 + $0x190] sm:$0xff] }
  0xd2   :  { %1017 = vst.msk [vmem:[%s2542_s6 + $0x28] sm:$0xff] %vm1011_vm2, %v952_v44  ;;  %1049 = vst.msk [vmem:[%s2542_s6 + $0x128] sm:$0xff] %vm1011_vm2, %v984_v60  ;;  %v951_v41 = vadd.f32 %v649_v37, %v233_v25  ;;  %v664_v57 = vadd.f32 %v1226_v29, %v1810_v45  ;;  %v824_v0 = vadd.f32 %v1274_v30, %v1810_v45  ;;  %v246_v6 = vmax.f32 %v1961_v42, 0.0  ;;  %v44_v29 = vld [vmem:[%s2538_s0 + $0xa8] sm:$0xff] }
  0xd3   :  { %v983_v61 = vadd.f32 %v809_v38, %v265_v26  ;;  %v658_v27 = vpop.f32.mrf.mxu0  ;;  %v818_v28 = vpop.f32.mrf.mxu1  ;;  %v113_v10 = vmul.f32 %v1613_v2, %v42_v56  ;;  %v145_v8 = vmul.f32 %v1613_v2, %v74_v15  ;;  %v2009_v7 = vadd.f32 %v1634_v9, %v110_v1  ;;  %v76_v30 = vld [vmem:[%s2538_s0 + $0x1a8] sm:$0xff] }
  0xd4   :  { %1016 = vst.msk [vmem:[%s2542_s6 + $0x20] sm:$0xff] %vm1011_vm2, %v951_v41  ;;  %v954_v4 = vadd.f32 %v664_v57, %v236_v34  ;;  %v986_v5 = vadd.f32 %v824_v0, %v268_v35  ;;  %v659_v25 = vadd.f32 %v1810_v45, %v658_v27  ;;  %v819_v26 = vadd.f32 %v1810_v45, %v818_v28 }
  0xd5   :  { %1048 = vst.msk [vmem:[%s2542_s6 + $0x120] sm:$0xff] %vm1011_vm2, %v983_v61  ;;  %v1229_v44 = vpop.f32.mrf.mxu0  ;;  %v1277_v60 = vpop.f32.mrf.mxu1  ;;  %v278_v34 = vmax.f32 %v1964_v43, 0.0  ;;  %v2012_v35 = vadd.f32 %v1634_v9, %v142_v3  ;;  %v2035_v13 = vadd.f32 %v1634_v9, %v113_v10  ;;  %v2038_v14 = vadd.f32 %v1634_v9, %v145_v8 }
  0xd6   :  { %1019 = vst.msk [vmem:[%s2542_s6 + $0x38] sm:$0xff] %vm1011_vm2, %v954_v4  ;;  %1051 = vst.msk [vmem:[%s2542_s6 + $0x138] sm:$0xff] %vm1011_vm2, %v986_v5  ;;  %v953_v37 = vadd.f32 %v659_v25, %v235_v46  ;;  %v985_v38 = vadd.f32 %v819_v26, %v267_v47  ;;  %v674_v56 = vadd.f32 %v1229_v44, %v1810_v45  ;;  %v245_v10 = vmax.f32 %v2009_v7, 0.0 }
  0xd7   :  { %v834_v15 = vadd.f32 %v1277_v60, %v1810_v45  ;;  %v668_v1 = vpop.f32.mrf.mxu0  ;;  %v828_v3 = vpop.f32.mrf.mxu1  ;;  %v112_v46 = vmul.f32 %v1613_v2, %v41_v11  ;;  %v144_v47 = vmul.f32 %v1613_v2, %v73_v16  ;;  %v277_v8 = vmax.f32 %v2012_v35, 0.0  ;;  %v43_v11 = vld [vmem:[%s2538_s0 + $0xa0] sm:$0xff] }
  0xd8   :  { %1018 = vst.msk [vmem:[%s2542_s6 + $0x30] sm:$0xff] %vm1011_vm2, %v953_v37  ;;  %1050 = vst.msk [vmem:[%s2542_s6 + $0x130] sm:$0xff] %vm1011_vm2, %v985_v38  ;;  %v956_v41 = vadd.f32 %v674_v56, %v238_v52  ;;  %v669_v57 = vadd.f32 %v1810_v45, %v668_v1  ;;  %v829_v0 = vadd.f32 %v1810_v45, %v828_v3  ;;  %v2544_v52 = vmax.f32 %v1787_v21, 0.0  ;;  %v75_v16 = vld [vmem:[%s2538_s0 + $0x1a0] sm:$0xff]  ;;  %v46_v3 = vld [vmem:[%s2538_s0 + $0xb8] sm:$0xff] }
  0xd9   :  { %v988_v61 = vadd.f32 %v834_v15, %v270_v55  ;;  %v1232_v27 = vpop.f32.mrf.mxu0  ;;  %v1280_v28 = vpop.f32.mrf.mxu1  ;;  %v115_v4 = vmul.f32 %v1613_v2, %v44_v29  ;;  %v147_v5 = vmul.f32 %v1613_v2, %v76_v30  ;;  %v248_v20 = vmax.f32 %v2035_v13, 0.0 }
  0xda   :  { %1021 = vst.msk [vmem:[%s2542_s6 + $0x48] sm:$0xff] %vm1011_vm2, %v956_v41  ;;  %v955_v18 = vadd.f32 %v669_v57, %v2543_v17  ;;  %v987_v55 = vadd.f32 %v829_v0, %v2544_v52  ;;  %v684_v25 = vadd.f32 %v1232_v27, %v1810_v45  ;;  %v844_v26 = vadd.f32 %v1280_v28, %v1810_v45 }
  0xdb   :  { %1053 = vst.msk [vmem:[%s2542_s6 + $0x148] sm:$0xff] %vm1011_vm2, %v988_v61  ;;  %v678_v44 = vpop.f32.mrf.mxu0  ;;  %v838_v60 = vpop.f32.mrf.mxu1  ;;  %v280_v37 = vmax.f32 %v2038_v14, 0.0  ;;  %v2083_v21 = vadd.f32 %v1634_v9, %v112_v46  ;;  %v2086_v38 = vadd.f32 %v1634_v9, %v144_v47  ;;  %v2545_v15 = vmax.f32 %v1799_v40, 0.0  ;;  %v78_v46 = vld [vmem:[%s2538_s0 + $0x1b8] sm:$0xff] }
  0xdc   :  { %1020 = vst.msk [vmem:[%s2542_s6 + $0x40] sm:$0xff] %vm1011_vm2, %v955_v18  ;;  %1052 = vst.msk [vmem:[%s2542_s6 + $0x140] sm:$0xff] %vm1011_vm2, %v987_v55  ;;  %v958_v56 = vadd.f32 %v684_v25, %v240_v12  ;;  %v679_v30 = vadd.f32 %v1810_v45, %v678_v44  ;;  %v839_v1 = vadd.f32 %v1810_v45, %v838_v60  ;;  %v2546_v57 = vmax.f32 %v1815_v48, 0.0  ;;  %v45_v44 = vld [vmem:[%s2538_s0 + $0xb0] sm:$0xff] }
  0xdd   :  { %v990_v29 = vadd.f32 %v844_v26, %v2545_v15  ;;  %v1235_v47 = vpop.f32.mrf.mxu0  ;;  %v1283_v41 = vpop.f32.mrf.mxu1  ;;  %v2109_v39 = vadd.f32 %v1634_v9, %v115_v4  ;;  %v2112_v40 = vadd.f32 %v1634_v9, %v147_v5  ;;  %v114_v12 = vmul.f32 %v1613_v2, %v43_v11  ;;  %v77_v60 = vld [vmem:[%s2538_s0 + $0x1b0] sm:$0xff] }
  0xde   :  { %v146_v61 = vmul.f32 %v1613_v2, %v75_v16  ;;  %1023 = vst.msk [vmem:[%s2542_s6 + $0x58] sm:$0xff] %vm1011_vm2, %v958_v56  ;;  %v957_v0 = vadd.f32 %v679_v30, %v2546_v57  ;;  %v2547_v27 = vmax.f32 %v1818_v51, 0.0  ;;  %v694_v4 = vadd.f32 %v1235_v47, %v1810_v45  ;;  %v80_v47 = vld [vmem:[%s2538_s0 + $0x1c8] sm:$0xff] }
  0xdf   :  { %1055 = vst.msk [vmem:[%s2542_s6 + $0x158] sm:$0xff] %vm1011_vm2, %v990_v29  ;;  %v854_v5 = vadd.f32 %v1283_v41, %v1810_v45  ;;  %v688_v17 = vpop.f32.mrf.mxu0  ;;  %v848_v18 = vpop.f32.mrf.mxu1  ;;  %v247_v52 = vmax.f32 %v2083_v21, 0.0  ;;  %v279_v55 = vmax.f32 %v2086_v38, 0.0  ;;  %v117_v25 = vmul.f32 %v1613_v2, %v46_v3 }
  0xe0   :  { %v989_v28 = vadd.f32 %v839_v1, %v2547_v27  ;;  %v149_v26 = vmul.f32 %v1613_v2, %v78_v46  ;;  %1022 = vst.msk [vmem:[%s2542_s6 + $0x50] sm:$0xff] %vm1011_vm2, %v957_v0  ;;  %v960_v48 = vadd.f32 %v694_v4, %v242_v19  ;;  %v689_v11 = vadd.f32 %v1810_v45, %v688_v17  ;;  %v48_v46 = vld [vmem:[%s2538_s0 + $0xc8] sm:$0xff] }
  0xe1   :  { %v992_v51 = vadd.f32 %v854_v5, %v274_v31  ;;  %v849_v16 = vadd.f32 %v1810_v45, %v848_v18  ;;  %v1238_v56 = vpop.f32.mrf.mxu0  ;;  %v1286_v15 = vpop.f32.mrf.mxu1  ;;  %v250_v62 = vmax.f32 %v2109_v39, 0.0  ;;  %v282_v19 = vmax.f32 %v2112_v40, 0.0 }
  0xe2   :  { %1054 = vst.msk [vmem:[%s2542_s6 + $0x150] sm:$0xff] %vm1011_vm2, %v989_v28  ;;  %v2157_v63 = vadd.f32 %v1634_v9, %v114_v12  ;;  %v2160_v31 = vadd.f32 %v1634_v9, %v146_v61  ;;  %1025 = vst.msk [vmem:[%s2542_s6 + $0x68] sm:$0xff] %vm1011_vm2, %v960_v48  ;;  %v959_v29 = vadd.f32 %v689_v11, %v241_v58  ;;  %v79_v48 = vld [vmem:[%s2538_s0 + $0x1c0] sm:$0xff] }
  0xe3   :  { %1057 = vst.msk [vmem:[%s2542_s6 + $0x168] sm:$0xff] %vm1011_vm2, %v992_v51  ;;  %v991_v30 = vadd.f32 %v849_v16, %v273_v59  ;;  %v704_v1 = vadd.f32 %v1238_v56, %v1810_v45  ;;  %v864_v3 = vadd.f32 %v1286_v15, %v1810_v45  ;;  %v698_v41 = vpop.f32.mrf.mxu0  ;;  %v858_v12 = vpop.f32.mrf.mxu1  ;;  %v2183_v22 = vadd.f32 %v1634_v9, %v117_v25  ;;  %v50_v15 = vld [vmem:[%s2538_s0 + $0xd8] sm:$0xff] }
  0xe4   :  { %v2186_v36 = vadd.f32 %v1634_v9, %v149_v26  ;;  %v116_v58 = vmul.f32 %v1613_v2, %v45_v44  ;;  %v148_v59 = vmul.f32 %v1613_v2, %v77_v60  ;;  %1024 = vst.msk [vmem:[%s2542_s6 + $0x60] sm:$0xff] %vm1011_vm2, %v959_v29  ;;  %v699_v0 = vadd.f32 %v1810_v45, %v698_v41  ;;  %v47_v26 = vld [vmem:[%s2538_s0 + $0xc0] sm:$0xff]  ;;  %v82_v29 = vld [vmem:[%s2538_s0 + $0x1d8] sm:$0xff] }
  0xe5   :  { %1056 = vst.msk [vmem:[%s2542_s6 + $0x160] sm:$0xff] %vm1011_vm2, %v991_v30  ;;  %v962_v61 = vadd.f32 %v704_v1, %v244_v32  ;;  %v994_v57 = vadd.f32 %v864_v3, %v276_v53  ;;  %v859_v27 = vadd.f32 %v1810_v45, %v858_v12  ;;  %v1241_v28 = vpop.f32.mrf.mxu0  ;;  %v1289_v4 = vpop.f32.mrf.mxu1  ;;  %v249_v5 = vmax.f32 %v2157_v63, 0.0 }
  0xe6   :  { %v281_v17 = vmax.f32 %v2160_v31, 0.0  ;;  %v119_v18 = vmul.f32 %v1613_v2, %v48_v46  ;;  %v151_v25 = vmul.f32 %v1613_v2, %v80_v47  ;;  %v961_v23 = vadd.f32 %v699_v0, %v243_v49 }
  0xe7   :  { %1027 = vst.msk [vmem:[%s2542_s6 + $0x78] sm:$0xff] %vm1011_vm2, %v962_v61  ;;  %1059 = vst.msk [vmem:[%s2542_s6 + $0x178] sm:$0xff] %vm1011_vm2, %v994_v57  ;;  %v993_v24 = vadd.f32 %v859_v27, %v275_v50  ;;  %v714_v32 = vadd.f32 %v1241_v28, %v1810_v45  ;;  %v874_v53 = vadd.f32 %v1289_v4, %v1810_v45  ;;  %v708_v51 = vpop.f32.mrf.mxu0  ;;  %v868_v11 = vpop.f32.mrf.mxu1  ;;  %v252_v33 = vmax.f32 %v2183_v22, 0.0  ;;  %v49_v27 = vld [vmem:[%s2538_s0 + $0xd0] sm:$0xff] }
  0xe8   :  { %v284_v49 = vmax.f32 %v2186_v36, 0.0  ;;  %v2231_v54 = vadd.f32 %v1634_v9, %v116_v58  ;;  %v2234_v50 = vadd.f32 %v1634_v9, %v148_v59  ;;  %1026 = vst.msk [vmem:[%s2542_s6 + $0x70] sm:$0xff] %vm1011_vm2, %v961_v23  ;;  %v709_v60 = vadd.f32 %v1810_v45, %v708_v51  ;;  %v81_v28 = vld [vmem:[%s2538_s0 + $0x1d0] sm:$0xff] }
  0xe9   :  { %1058 = vst.msk [vmem:[%s2542_s6 + $0x170] sm:$0xff] %vm1011_vm2, %v993_v24  ;;  %v964_v16 = vadd.f32 %v714_v32, %v246_v6  ;;  %v996_v44 = vadd.f32 %v874_v53, %v278_v34  ;;  %v869_v56 = vadd.f32 %v1810_v45, %v868_v11  ;;  %v1244_v30 = vpop.f32.mrf.mxu0  ;;  %v1292_v1 = vpop.f32.mrf.mxu1  ;;  %v2257_v42 = vadd.f32 %v1634_v9, %v119_v18  ;;  %v52_v53 = vld [vmem:[%s2538_s0 + $0xe8] sm:$0xff] }
  0xea   :  { %v2260_v43 = vadd.f32 %v1634_v9, %v151_v25  ;;  %v118_v6 = vmul.f32 %v1613_v2, %v47_v26  ;;  %v150_v34 = vmul.f32 %v1613_v2, %v79_v48  ;;  %v963_v3 = vadd.f32 %v709_v60, %v245_v10  ;;  %v84_v26 = vld [vmem:[%s2538_s0 + $0x1e8] sm:$0xff] }
  0xeb   :  { %1029 = vst.msk [vmem:[%s2542_s6 + $0x88] sm:$0xff] %vm1011_vm2, %v964_v16  ;;  %1061 = vst.msk [vmem:[%s2542_s6 + $0x188] sm:$0xff] %vm1011_vm2, %v996_v44  ;;  %v995_v46 = vadd.f32 %v869_v56, %v277_v8  ;;  %v724_v47 = vadd.f32 %v1244_v30, %v1810_v45  ;;  %v884_v41 = vadd.f32 %v1292_v1, %v1810_v45  ;;  %v718_v12 = vpop.f32.mrf.mxu0  ;;  %v878_v58 = vpop.f32.mrf.mxu1  ;;  %v251_v59 = vmax.f32 %v2231_v54, 0.0 }
  0xec   :  { %v283_v61 = vmax.f32 %v2234_v50, 0.0  ;;  %v121_v57 = vmul.f32 %v1613_v2, %v50_v15  ;;  %v153_v0 = vmul.f32 %v1613_v2, %v82_v29  ;;  %1028 = vst.msk [vmem:[%s2542_s6 + $0x80] sm:$0xff] %vm1011_vm2, %v963_v3  ;;  %v719_v10 = vadd.f32 %v1810_v45, %v718_v12  ;;  %v83_v3 = vld [vmem:[%s2538_s0 + $0x1e0] sm:$0xff] }
  0xed   :  { %1060 = vst.msk [vmem:[%s2542_s6 + $0x180] sm:$0xff] %vm1011_vm2, %v995_v46  ;;  %v966_v7 = vadd.f32 %v724_v47, %v248_v20  ;;  %v998_v35 = vadd.f32 %v884_v41, %v280_v37  ;;  %v879_v8 = vadd.f32 %v1810_v45, %v878_v58  ;;  %v1247_v4 = vpop.f32.mrf.mxu0  ;;  %v1295_v18 = vpop.f32.mrf.mxu1  ;;  %v254_v13 = vmax.f32 %v2257_v42, 0.0 }
  0xee   :  { %v286_v20 = vmax.f32 %v2260_v43, 0.0  ;;  %v2305_v14 = vadd.f32 %v1634_v9, %v118_v6  ;;  %v2308_v37 = vadd.f32 %v1634_v9, %v150_v34  ;;  %v965_v25 = vadd.f32 %v719_v10, %v247_v52  ;;  %v51_v34 = vld [vmem:[%s2538_s0 + $0xe0] sm:$0xff] }
  0xef   :  { %1031 = vst.msk [vmem:[%s2542_s6 + $0x98] sm:$0xff] %vm1011_vm2, %v966_v7  ;;  %1063 = vst.msk [vmem:[%s2542_s6 + $0x198] sm:$0xff] %vm1011_vm2, %v998_v35  ;;  %v997_v23 = vadd.f32 %v879_v8, %v279_v55  ;;  %v734_v24 = vadd.f32 %v1247_v4, %v1810_v45  ;;  %v894_v32 = vadd.f32 %v1295_v18, %v1810_v45  ;;  %v728_v48 = vpop.f32.mrf.mxu0  ;;  %v888_v51 = vpop.f32.mrf.mxu1  ;;  %v86_v7 = vld [vmem:[%s2538_s0 + $0x1f8] sm:$0xff]  ;;  %v53_v18 = vld [vmem:[%s2538_s0 + $0xf0] sm:$0xff] }
  0xf0   :  { %v2331_v21 = vadd.f32 %v1634_v9, %v121_v57  ;;  %v2334_v38 = vadd.f32 %v1634_v9, %v153_v0  ;;  %v120_v52 = vmul.f32 %v1613_v2, %v49_v27  ;;  %v152_v55 = vmul.f32 %v1613_v2, %v81_v28  ;;  %1030 = vst.msk [vmem:[%s2542_s6 + $0x90] sm:$0xff] %vm1011_vm2, %v965_v25  ;;  %v54_v0 = vld [vmem:[%s2538_s0 + $0xf8] sm:$0xff] }
  0xf1   :  { %1062 = vst.msk [vmem:[%s2542_s6 + $0x190] sm:$0xff] %vm1011_vm2, %v997_v23  ;;  %v968_v11 = vadd.f32 %v734_v24, %v250_v62  ;;  %v1000_v16 = vadd.f32 %v894_v32, %v282_v19  ;;  %v729_v44 = vadd.f32 %v1810_v45, %v728_v48  ;;  %v889_v60 = vadd.f32 %v1810_v45, %v888_v51  ;;  %v1250_v56 = vpop.f32.mrf.mxu0  ;;  %v1298_v15 = vpop.f32.mrf.mxu1 }
  0xf2   :  { %v253_v29 = vmax.f32 %v2305_v14, 0.0  ;;  %v285_v30 = vmax.f32 %v2308_v37, 0.0  ;;  %v123_v1 = vmul.f32 %v1613_v2, %v52_v53  ;;  %v155_v6 = vmul.f32 %v1613_v2, %v84_v26  ;;  %v85_v14 = vld [vmem:[%s2538_s0 + $0x1f0] sm:$0xff] }
  0xf3   :  { %1033 = vst.msk [vmem:[%s2542_s6 + $0xa8] sm:$0xff] %vm1011_vm2, %v968_v11  ;;  %1065 = vst.msk [vmem:[%s2542_s6 + $0x1a8] sm:$0xff] %vm1011_vm2, %v1000_v16  ;;  %v967_v39 = vadd.f32 %v729_v44, %v249_v5  ;;  %v999_v40 = vadd.f32 %v889_v60, %v281_v17  ;;  %v744_v62 = vadd.f32 %v1250_v56, %v1810_v45  ;;  %v738_v46 = vpop.f32.mrf.mxu0  ;;  %v898_v47 = vpop.f32.mrf.mxu1  ;;  %v256_v63 = vmax.f32 %v2331_v21, 0.0 }
  0xf4   :  { %v904_v19 = vadd.f32 %v1298_v15, %v1810_v45  ;;  %v288_v5 = vmax.f32 %v2334_v38, 0.0  ;;  %v2379_v31 = vadd.f32 %v1634_v9, %v120_v52  ;;  %v2382_v17 = vadd.f32 %v1634_v9, %v152_v55 }
  0xf5   :  { %1032 = vst.msk [vmem:[%s2542_s6 + $0xa0] sm:$0xff] %vm1011_vm2, %v967_v39  ;;  %1064 = vst.msk [vmem:[%s2542_s6 + $0x1a0] sm:$0xff] %vm1011_vm2, %v999_v40  ;;  %v970_v41 = vadd.f32 %v744_v62, %v252_v33  ;;  %v739_v58 = vadd.f32 %v1810_v45, %v738_v46  ;;  %v899_v57 = vadd.f32 %v1810_v45, %v898_v47  ;;  %v1253_v35 = vpop.f32.mrf.mxu0  ;;  %v1301_v10 = vpop.f32.mrf.mxu1 }
  0xf6   :  { %v1002_v12 = vadd.f32 %v904_v19, %v284_v49  ;;  %v2405_v22 = vadd.f32 %v1634_v9, %v123_v1  ;;  %v2408_v36 = vadd.f32 %v1634_v9, %v155_v6  ;;  %v122_v33 = vmul.f32 %v1613_v2, %v51_v34 }
  0xf7   :  { %v154_v49 = vmul.f32 %v1613_v2, %v83_v3  ;;  %1035 = vst.msk [vmem:[%s2542_s6 + $0xb8] sm:$0xff] %vm1011_vm2, %v970_v41  ;;  %v969_v8 = vadd.f32 %v739_v58, %v251_v59  ;;  %v1001_v27 = vadd.f32 %v899_v57, %v283_v61  ;;  %v754_v28 = vadd.f32 %v1253_v35, %v1810_v45  ;;  %v748_v37 = vpop.f32.mrf.mxu0  ;;  %v908_v25 = vpop.f32.mrf.mxu1 }
  0xf8   :  { %1067 = vst.msk [vmem:[%s2542_s6 + $0x1b8] sm:$0xff] %vm1011_vm2, %v1002_v12  ;;  %v914_v4 = vadd.f32 %v1301_v10, %v1810_v45  ;;  %v255_v54 = vmax.f32 %v2379_v31, 0.0  ;;  %v287_v59 = vmax.f32 %v2382_v17, 0.0  ;;  %v125_v50 = vmul.f32 %v1613_v2, %v54_v0 }
  0xf9   :  { %v157_v61 = vmul.f32 %v1613_v2, %v86_v7  ;;  %1034 = vst.msk [vmem:[%s2542_s6 + $0xb0] sm:$0xff] %vm1011_vm2, %v969_v8  ;;  %1066 = vst.msk [vmem:[%s2542_s6 + $0x1b0] sm:$0xff] %vm1011_vm2, %v1001_v27  ;;  %v972_v23 = vadd.f32 %v754_v28, %v254_v13  ;;  %v749_v32 = vadd.f32 %v1810_v45, %v748_v37  ;;  %v1256_v26 = vpop.f32.mrf.mxu0  ;;  %v1304_v48 = vpop.f32.mrf.mxu1  ;;  %v290_v16 = vmax.f32 %v2408_v36, 0.0 }
  0xfa   :  { %v1004_v24 = vadd.f32 %v914_v4, %v286_v20  ;;  %v909_v53 = vadd.f32 %v1810_v45, %v908_v25  ;;  %v193_v51 = vadd.f32 %v1634_v9, %v122_v33  ;;  %v225_v21 = vadd.f32 %v1634_v9, %v154_v49 }
  0xfb   :  { %v124_v38 = vmul.f32 %v1613_v2, %v53_v18  ;;  %v156_v52 = vmul.f32 %v1613_v2, %v85_v14  ;;  %1037 = vst.msk [vmem:[%s2542_s6 + $0xc8] sm:$0xff] %vm1011_vm2, %v972_v23  ;;  %v971_v42 = vadd.f32 %v749_v32, %v253_v29  ;;  %v764_v13 = vadd.f32 %v1256_v26, %v1810_v45  ;;  %v758_v55 = vpop.f32.mrf.mxu0  ;;  %v918_v11 = vpop.f32.mrf.mxu1 }
  0xfc   :  { %1069 = vst.msk [vmem:[%s2542_s6 + $0x1c8] sm:$0xff] %vm1011_vm2, %v1004_v24  ;;  %v1003_v43 = vadd.f32 %v909_v53, %v285_v30  ;;  %v924_v20 = vadd.f32 %v1304_v48, %v1810_v45  ;;  %v258_v2 = vmax.f32 %v2405_v22, 0.0  ;;  %v196_v44 = vadd.f32 %v1634_v9, %v125_v50 }
  0xfd   :  { %v228_v60 = vadd.f32 %v1634_v9, %v157_v61  ;;  %1036 = vst.msk [vmem:[%s2542_s6 + $0xc0] sm:$0xff] %vm1011_vm2, %v971_v42  ;;  %v974_v56 = vadd.f32 %v764_v13, %v256_v63  ;;  %v759_v29 = vadd.f32 %v1810_v45, %v758_v55  ;;  %v919_v30 = vadd.f32 %v1810_v45, %v918_v11  ;;  %v1259_v1 = vpop.f32.mrf.mxu0  ;;  %v1307_v6 = vpop.f32.mrf.mxu1 }
  0xfe   :  { %1068 = vst.msk [vmem:[%s2542_s6 + $0x1c0] sm:$0xff] %vm1011_vm2, %v1003_v43  ;;  %v1006_v15 = vadd.f32 %v924_v20, %v288_v5  ;;  %v257_v39 = vmax.f32 %v193_v51, 0.0  ;;  %v289_v40 = vmax.f32 %v225_v21, 0.0  ;;  %v195_v62 = vadd.f32 %v1634_v9, %v124_v38 }
  0xff   :  { %v227_v19 = vadd.f32 %v1634_v9, %v156_v52  ;;  %1039 = vst.msk [vmem:[%s2542_s6 + $0xd8] sm:$0xff] %vm1011_vm2, %v974_v56  ;;  %v973_v34 = vadd.f32 %v759_v29, %v255_v54  ;;  %v1005_v3 = vadd.f32 %v919_v30, %v287_v59  ;;  %v774_v46 = vadd.f32 %v1259_v1, %v1810_v45  ;;  %v768_v63 = vpop.f32.mrf.mxu0  ;;  %v928_v5 = vpop.f32.mrf.mxu1 }
 0x100   :  { %1071 = vst.msk [vmem:[%s2542_s6 + $0x1d8] sm:$0xff] %vm1011_vm2, %v1006_v15  ;;  %v934_v47 = vadd.f32 %v1307_v6, %v1810_v45  ;;  %v260_v31 = vmax.f32 %v196_v44, 0.0  ;;  %v292_v9 = vmax.f32 %v228_v60, 0.0  ;;  %v769_v12 = vadd.f32 %v1810_v45, %v768_v63 }
 0x101   :  { %1038 = vst.msk [vmem:[%s2542_s6 + $0xd0] sm:$0xff] %vm1011_vm2, %v973_v34  ;;  %1070 = vst.msk [vmem:[%s2542_s6 + $0x1d0] sm:$0xff] %vm1011_vm2, %v1005_v3  ;;  %v976_v17 = vadd.f32 %v774_v46, %v258_v2  ;;  %v929_v58 = vadd.f32 %v1810_v45, %v928_v5  ;;  %v1262_v57 = vpop.f32.mrf.mxu0  ;;  %v1310_v0 = vpop.f32.mrf.mxu1  ;;  %v259_v7 = vmax.f32 %v195_v62, 0.0  ;;  %v291_v35 = vmax.f32 %v227_v19, 0.0 }
 0x102   :  { %v1008_v41 = vadd.f32 %v934_v47, %v290_v16  ;;  %v975_v10 = vadd.f32 %v769_v12, %v257_v39  ;;  %v784_v36 = vadd.f32 %v1262_v57, %v1810_v45  ;;  %v944_v33 = vadd.f32 %v1310_v0, %v1810_v45 }
 0x103   :  { %1041 = vst.msk [vmem:[%s2542_s6 + $0xe8] sm:$0xff] %vm1011_vm2, %v976_v17  ;;  %v1007_v22 = vadd.f32 %v929_v58, %v289_v40  ;;  %v778_v49 = vpop.f32.mrf.mxu0  ;;  %v938_v8 = vpop.f32.mrf.mxu1 }
 0x104   :  { %1073 = vst.msk [vmem:[%s2542_s6 + $0x1e8] sm:$0xff] %vm1011_vm2, %v1008_v41  ;;  %1040 = vst.msk [vmem:[%s2542_s6 + $0xe0] sm:$0xff] %vm1011_vm2, %v975_v10  ;;  %v978_v27 = vadd.f32 %v784_v36, %v260_v31  ;;  %v1010_v28 = vadd.f32 %v944_v33, %v292_v9  ;;  %v779_v4 = vadd.f32 %v1810_v45, %v778_v49 }
 0x105   :  { %1072 = vst.msk [vmem:[%s2542_s6 + $0x1e0] sm:$0xff] %vm1011_vm2, %v1007_v22  ;;  %v939_v18 = vadd.f32 %v1810_v45, %v938_v8 }
 0x106   :  { %1043 = vst.msk [vmem:[%s2542_s6 + $0xf8] sm:$0xff] %vm1011_vm2, %v978_v27  ;;  %1075 = vst.msk [vmem:[%s2542_s6 + $0x1f8] sm:$0xff] %vm1011_vm2, %v1010_v28  ;;  %v977_v14 = vadd.f32 %v779_v4, %v259_v7 }
 0x107   :  { %v1009_v37 = vadd.f32 %v939_v18, %v291_v35 }
 0x108   :  { %1042 = vst.msk [vmem:[%s2542_s6 + $0xf0] sm:$0xff] %vm1011_vm2, %v977_v14 }
 0x109   :  { %1074 = vst.msk [vmem:[%s2542_s6 + $0x1f0] sm:$0xff] %vm1011_vm2, %v1009_v37 }

// kernel: _lambda_.3
= control target key start
LH: loop header
LB: loop body
LE: loop exit
PB: predicated region body
PF: predicated region fallthrough
CT: control target
= control target key end

     0   :  { %s3910_s16 = smov 4   ;;  %vm723_vm0 = vcmask 97280   ;;  %v3911_v4 = vmov 0.0   ;;  %s3912_s21 = smov 8   ;;  %vm1123_vm1 = vcmask 1043456   ;;  %vm334_vm2 = vcmask 64544   ;;  %s5932_s0 = inlined_call_operand.vmem [shape: f32[2,16,16,4], index: 0, kind: input, shape index: {}]   ;;  %s5933_s1 = inlined_call_operand.vmem [shape: f32[36,8], index: 1, kind: input, shape index: {}]   ;;  %s5934_s2 = inlined_call_operand.vmem [shape: f32[2,16,16,8], index: 2, kind: output, shape index: {0}]   ;;  %s5935_s3 = inlined_call_operand.vmem [shape: f32[1,2,8], index: 3, kind: output, shape index: {1}]  }
   0x1   :  { %v3936_v0 = vld [vmem:[%s5932_s0 + $0x100] sm:$0xff]  ;;  %v3950_v2 = vld [vmem:[%s5932_s0 + $0x108] sm:$0xff]  ;;  %724 = vst.msk [vmem:[#allocation2] sm:$0xff] %vm723_vm0, %v3911_v4  ;;  %725 = vst.msk [vmem:[#allocation2 + $0x8] sm:$0xff] %vm723_vm0, %v3911_v4  ;;  %vm399_vm3 = vcmask 31744   ;;  %vm401_vm4 = vcmask 30720  }
   0x2   :  { %v3941_v1 = vld [vmem:[%s5932_s0] sm:$0xff]  ;;  %205 = vrot.lane.b32.xlu0 %v3936_v0, %s3910_s16  ;;  %v3955_v3 = vld [vmem:[%s5932_s0 + $0x8] sm:$0xff]  ;;  %726 = vst.msk [vmem:[#allocation2 + $0x120] sm:$0xff] %vm723_vm0, %v3911_v4  ;;  %727 = vst.msk [vmem:[#allocation2 + $0x128] sm:$0xff] %vm723_vm0, %v3911_v4  ;;  %vm766_vm5 = vcmask 90176   ;;  %vm657_vm6 = vcmask 97345  }
   0x3   :  { %141 = vrot.lane.b32.xlu1 %v3941_v1, %s3910_s16  ;;  %729 = vst.msk [vmem:[#allocation2 + $0x110] sm:$0xff] %vm723_vm0, %v3911_v4  ;;  %730 = vst.msk [vmem:[#allocation2 + $0x118] sm:$0xff] %vm723_vm0, %v3911_v4  ;;  %v3984_v5 = vld [vmem:[%s5932_s0 + $0x110] sm:$0xff]  ;;  %v3989_v6 = vld [vmem:[%s5932_s0 + $0x118] sm:$0xff]  ;;  %vm659_vm7 = vcmask 97344   ;;  %vm733_vm8 = vcmask 24576  }
   0x4   :  { %731 = vst.msk [vmem:[#allocation2 + $0x230] sm:$0xff] %vm723_vm0, %v3911_v4  ;;  %732 = vst.msk [vmem:[#allocation2 + $0x238] sm:$0xff] %vm723_vm0, %v3911_v4  ;;  %v930_v7 = vld [vmem:[%s5933_s1 + $0x14] sm:$0xf]  ;;  %v929_v8 = vld [vmem:[%s5933_s1 + $0xc] sm:$0xff]  ;;  %vm2803_vm9 = vcmask 64512  }
   0x5   :  { %3903 = vmatprep.subr.msk.mxu1 %vm1123_vm1, %v930_v7  ;;  %3603 = vmatprep.subr.msk.mxu0 %vm1123_vm1, %v930_v7  ;;  %v4012_v9 = vld [vmem:[%s5932_s0 + $0x10] sm:$0xff]  ;;  %v4017_v10 = vld [vmem:[%s5932_s0 + $0x18] sm:$0xff]  ;;  %v4030_v11 = vld [vmem:[%s5932_s0 + $0x120] sm:$0xff]  ;;  %vm3198_vm10 = vcmask 1040384   ;;  %vm3200_vm11 = vcmask 58368  }
   0x6   :  { %207 = vrot.lane.b32.xlu0 %v3950_v2, %s3910_s16  ;;  %3905 = vmatpush3.msk.msra.mxu1 %vm1123_vm1, %v930_v7  ;;  %v4035_v12 = vld [vmem:[%s5932_s0 + $0x128] sm:$0xff]  ;;  %v4048_v13 = vld [vmem:[%s5932_s0 + $0x20] sm:$0xff]  ;;  %v4066_v15 = vld [vmem:[%s5932_s0 + $0x130] sm:$0xff] }
   0x7   :  { %143 = vrot.lane.b32.xlu1 %v3955_v3, %s3910_s16  ;;  %3604 = vmatpush3.msk.msra.mxu0 %vm1123_vm1, %v930_v7  ;;  %v4053_v14 = vld [vmem:[%s5932_s0 + $0x28] sm:$0xff]  ;;  %v4071_v16 = vld [vmem:[%s5932_s0 + $0x138] sm:$0xff]  ;;  %v4084_v17 = vld [vmem:[%s5932_s0 + $0x30] sm:$0xff] }
   0x8   :  { %3904 = vmatprep.subr.mxu1 %v929_v8  ;;  %3605 = vmatprep.subr.mxu0 %v929_v8  ;;  %v4089_v18 = vld [vmem:[%s5932_s0 + $0x38] sm:$0xff]  ;;  %v4102_v19 = vld [vmem:[%s5932_s0 + $0x140] sm:$0xff]  ;;  %v4107_v20 = vld [vmem:[%s5932_s0 + $0x148] sm:$0xff] }
   0x9   :  { %3906 = vmatpush3.msra.mxu1 %v929_v8  ;;  %3606 = vmatpush3.msra.mxu0 %v929_v8  ;;  %v4120_v21 = vld [vmem:[%s5932_s0 + $0x40] sm:$0xff]  ;;  %v4125_v22 = vld [vmem:[%s5932_s0 + $0x48] sm:$0xff]  ;;  %v4138_v23 = vld [vmem:[%s5932_s0 + $0x150] sm:$0xff] }
   0xa   :  { %529 = vrot.lane.b32.xlu0 %v3936_v0, %s3912_s21  ;;  %v4143_v24 = vld [vmem:[%s5932_s0 + $0x158] sm:$0xff]  ;;  %v4156_v25 = vld [vmem:[%s5932_s0 + $0x50] sm:$0xff]  ;;  %v4174_v27 = vld [vmem:[%s5932_s0 + $0x160] sm:$0xff] }
   0xb   :  { %531 = vrot.lane.b32.xlu1 %v3950_v2, %s3912_s21  ;;  %v4161_v26 = vld [vmem:[%s5932_s0 + $0x58] sm:$0xff]  ;;  %v4179_v28 = vld [vmem:[%s5932_s0 + $0x168] sm:$0xff]  ;;  %v4192_v29 = vld [vmem:[%s5932_s0 + $0x60] sm:$0xff] }
   0xc   :  { %v4197_v30 = vld [vmem:[%s5932_s0 + $0x68] sm:$0xff]  ;;  %v4210_v31 = vld [vmem:[%s5932_s0 + $0x170] sm:$0xff]  ;;  %v4215_v32 = vld [vmem:[%s5932_s0 + $0x178] sm:$0xff] }
   0xd   :  { %v4228_v33 = vld [vmem:[%s5932_s0 + $0x70] sm:$0xff]  ;;  %v4233_v34 = vld [vmem:[%s5932_s0 + $0x78] sm:$0xff]  ;;  %v4262_v39 = vld [vmem:[%s5932_s0 + $0x180] sm:$0xff] }
   0xe   :  { %209 = vrot.lane.b32.xlu0 %v3984_v5, %s3910_s16  ;;  %v4267_v40 = vld [vmem:[%s5932_s0 + $0x188] sm:$0xff]  ;;  %v4292_v45 = vld [vmem:[%s5932_s0 + $0x80] sm:$0xff]  ;;  %v4324_v53 = vld [vmem:[%s5932_s0 + $0x190] sm:$0xff] }
   0xf   :  { %211 = vrot.lane.b32.xlu1 %v3989_v6, %s3910_s16  ;;  %v4297_v48 = vld [vmem:[%s5932_s0 + $0x88] sm:$0xff]  ;;  %v4329_v56 = vld [vmem:[%s5932_s0 + $0x198] sm:$0xff]  ;;  %v4356_v61 = vld [vmem:[%s5932_s0 + $0x90] sm:$0xff] }
  0x12   :  { %465 = vrot.lane.b32.xlu0 %v3941_v1, %s3912_s21 }
  0x13   :  { %467 = vrot.lane.b32.xlu1 %v3955_v3, %s3912_s21 }
  0x16   :  { %145 = vrot.lane.b32.xlu0 %v4012_v9, %s3910_s16 }
  0x17   :  { %147 = vrot.lane.b32.xlu1 %v4017_v10, %s3910_s16 }
  0x1a   :  { %533 = vrot.lane.b32.xlu0 %v3984_v5, %s3912_s21 }
  0x1b   :  { %535 = vrot.lane.b32.xlu1 %v3989_v6, %s3912_s21 }
  0x1e   :  { %213 = vrot.lane.b32.xlu0 %v4030_v11, %s3910_s16 }
  0x1f   :  { %215 = vrot.lane.b32.xlu1 %v4035_v12, %s3910_s16 }
  0x22   :  { %469 = vrot.lane.b32.xlu0 %v4012_v9, %s3912_s21 }
  0x23   :  { %471 = vrot.lane.b32.xlu1 %v4017_v10, %s3912_s21 }
  0x26   :  { %149 = vrot.lane.b32.xlu0 %v4048_v13, %s3910_s16 }
  0x27   :  { %151 = vrot.lane.b32.xlu1 %v4053_v14, %s3910_s16 }
  0x2a   :  { %537 = vrot.lane.b32.xlu0 %v4030_v11, %s3912_s21 }
  0x2b   :  { %539 = vrot.lane.b32.xlu1 %v4035_v12, %s3912_s21 }
  0x2e   :  { %217 = vrot.lane.b32.xlu0 %v4066_v15, %s3910_s16 }
  0x2f   :  { %219 = vrot.lane.b32.xlu1 %v4071_v16, %s3910_s16 }
  0x32   :  { %473 = vrot.lane.b32.xlu0 %v4048_v13, %s3912_s21 }
  0x33   :  { %475 = vrot.lane.b32.xlu1 %v4053_v14, %s3912_s21 }
  0x36   :  { %153 = vrot.lane.b32.xlu0 %v4084_v17, %s3910_s16 }
  0x37   :  { %155 = vrot.lane.b32.xlu1 %v4089_v18, %s3910_s16 }
  0x3a   :  { %541 = vrot.lane.b32.xlu0 %v4066_v15, %s3912_s21 }
  0x3b   :  { %543 = vrot.lane.b32.xlu1 %v4071_v16, %s3912_s21 }
  0x3e   :  { %221 = vrot.lane.b32.xlu0 %v4102_v19, %s3910_s16 }
  0x3f   :  { %223 = vrot.lane.b32.xlu1 %v4107_v20, %s3910_s16 }
  0x42   :  { %477 = vrot.lane.b32.xlu0 %v4084_v17, %s3912_s21 }
  0x43   :  { %479 = vrot.lane.b32.xlu1 %v4089_v18, %s3912_s21 }
  0x46   :  { %157 = vrot.lane.b32.xlu0 %v4120_v21, %s3910_s16 }
  0x47   :  { %159 = vrot.lane.b32.xlu1 %v4125_v22, %s3910_s16 }
  0x4a   :  { %545 = vrot.lane.b32.xlu0 %v4102_v19, %s3912_s21 }
  0x4b   :  { %547 = vrot.lane.b32.xlu1 %v4107_v20, %s3912_s21 }
  0x4e   :  { %225 = vrot.lane.b32.xlu0 %v4138_v23, %s3910_s16 }
  0x4f   :  { %227 = vrot.lane.b32.xlu1 %v4143_v24, %s3910_s16 }
  0x52   :  { %481 = vrot.lane.b32.xlu0 %v4120_v21, %s3912_s21 }
  0x53   :  { %483 = vrot.lane.b32.xlu1 %v4125_v22, %s3912_s21 }
  0x56   :  { %161 = vrot.lane.b32.xlu0 %v4156_v25, %s3910_s16 }
  0x57   :  { %163 = vrot.lane.b32.xlu1 %v4161_v26, %s3910_s16 }
  0x5a   :  { %549 = vrot.lane.b32.xlu0 %v4138_v23, %s3912_s21 }
  0x5b   :  { %551 = vrot.lane.b32.xlu1 %v4143_v24, %s3912_s21 }
  0x5e   :  { %229 = vrot.lane.b32.xlu0 %v4174_v27, %s3910_s16 }
  0x5f   :  { %231 = vrot.lane.b32.xlu1 %v4179_v28, %s3910_s16 }
  0x62   :  { %485 = vrot.lane.b32.xlu0 %v4156_v25, %s3912_s21 }
  0x63   :  { %487 = vrot.lane.b32.xlu1 %v4161_v26, %s3912_s21 }
  0x66   :  { %165 = vrot.lane.b32.xlu0 %v4192_v29, %s3910_s16 }
  0x67   :  { %167 = vrot.lane.b32.xlu1 %v4197_v30, %s3910_s16 }
  0x6a   :  { %553 = vrot.lane.b32.xlu0 %v4174_v27, %s3912_s21 }
  0x6b   :  { %555 = vrot.lane.b32.xlu1 %v4179_v28, %s3912_s21 }
  0x6e   :  { %233 = vrot.lane.b32.xlu0 %v4210_v31, %s3910_s16 }
  0x6f   :  { %235 = vrot.lane.b32.xlu1 %v4215_v32, %s3910_s16 }
  0x72   :  { %489 = vrot.lane.b32.xlu0 %v4192_v29, %s3912_s21 }
  0x73   :  { %491 = vrot.lane.b32.xlu1 %v4197_v30, %s3912_s21 }
  0x74   :  { %v206_v35 = vpop.permute.xlu0 %205 }
  0x75   :  { %v142_v36 = vpop.permute.xlu1 %141  ;;  %367 = vst.msk [vmem:[#allocation2 + $0x130] sm:$0xff] %vm334_vm2, %v206_v35 }
  0x76   :  { %335 = vst.msk [vmem:[#allocation2 + $0x10] sm:$0xff] %vm334_vm2, %v142_v36  ;;  %169 = vrot.lane.b32.xlu0 %v4228_v33, %s3910_s16 }
  0x77   :  { %171 = vrot.lane.b32.xlu1 %v4233_v34, %s3910_s16 }
  0x78   :  { %v208_v37 = vpop.permute.xlu0 %207 }
  0x79   :  { %v144_v38 = vpop.permute.xlu1 %143  ;;  %368 = vst.msk [vmem:[#allocation2 + $0x138] sm:$0xff] %vm334_vm2, %v208_v37 }
  0x7a   :  { %336 = vst.msk [vmem:[#allocation2 + $0x18] sm:$0xff] %vm334_vm2, %v144_v38  ;;  %557 = vrot.lane.b32.xlu0 %v4210_v31, %s3912_s21 }
  0x7b   :  { %433 = vst.msk [vmem:[#allocation2 + $0x131] sm:$0xff] %vm399_vm3, %v3936_v0  ;;  %400 = vst.msk [vmem:[#allocation2 + $0x11] sm:$0xff] %vm399_vm3, %v3941_v1  ;;  %559 = vrot.lane.b32.xlu1 %v4215_v32, %s3912_s21  ;;  %v4361_v0 = vld [vmem:[%s5932_s0 + $0x98] sm:$0xff] }
  0x7c   :  { %434 = vst.msk [vmem:[#allocation2 + $0x139] sm:$0x7f] %vm401_vm4, %v3950_v2  ;;  %402 = vst.msk [vmem:[#allocation2 + $0x19] sm:$0x7f] %vm401_vm4, %v3955_v3  ;;  %v530_v41 = vpop.permute.xlu0 %529 }
  0x7d   :  { %783 = vst.msk [vmem:[#allocation2 + $0x13f] sm:$0x1] %vm766_vm5, %v3911_v4  ;;  %767 = vst.msk [vmem:[#allocation2 + $0x1f] sm:$0x1] %vm766_vm5, %v3911_v4  ;;  %v532_v42 = vpop.permute.xlu1 %531 }
  0x7e   :  { %691 = vst.msk [vmem:[#allocation2 + $0x12f] sm:$0xfe] %vm657_vm6, %v530_v41  ;;  %237 = vrot.lane.b32.xlu0 %v4262_v39, %s3910_s16 }
  0x7f   :  { %692 = vst.msk [vmem:[#allocation2 + $0x137] sm:$0xff] %vm659_vm7, %v532_v42  ;;  %239 = vrot.lane.b32.xlu1 %v4267_v40, %s3910_s16  ;;  %v4452_v42 = vld [vmem:[%s5932_s0 + $0x1b0] sm:$0xff] }
  0x80   :  { %750 = vst.msk [vmem:[#allocation2 + $0x130] sm:$0x1] %vm733_vm8, %v3911_v4  ;;  %v210_v43 = vpop.permute.xlu0 %209 }
  0x81   :  { %v212_v44 = vpop.permute.xlu1 %211  ;;  %369 = vst.msk [vmem:[#allocation2 + $0x140] sm:$0xff] %vm334_vm2, %v210_v43 }
  0x82   :  { %370 = vst.msk [vmem:[#allocation2 + $0x148] sm:$0xff] %vm334_vm2, %v212_v44  ;;  %493 = vrot.lane.b32.xlu0 %v4228_v33, %s3912_s21 }
  0x83   :  { %435 = vst.msk [vmem:[#allocation2 + $0x141] sm:$0xff] %vm399_vm3, %v3984_v5  ;;  %495 = vrot.lane.b32.xlu1 %v4233_v34, %s3912_s21 }
  0x84   :  { %436 = vst.msk [vmem:[#allocation2 + $0x149] sm:$0x7f] %vm401_vm4, %v3989_v6  ;;  %v466_v46 = vpop.permute.xlu0 %465  ;;  %v4388_v6 = vld [vmem:[%s5932_s0 + $0x1a0] sm:$0xff] }
  0x85   :  { %784 = vst.msk [vmem:[#allocation2 + $0x14f] sm:$0x1] %vm766_vm5, %v3911_v4  ;;  %v468_v47 = vpop.permute.xlu1 %467 }
  0x86   :  { %v898_v49 = vld [vmem:[#allocation2 + $0x138] sm:$0xff]  ;;  %658 = vst.msk [vmem:[#allocation2 + $0xf] sm:$0xfe] %vm657_vm6, %v466_v46  ;;  %173 = vrot.lane.b32.xlu0 %v4292_v45, %s3910_s16 }
  0x87   :  { %660 = vst.msk [vmem:[#allocation2 + $0x17] sm:$0xff] %vm659_vm7, %v468_v47  ;;  %v897_v50 = vld [vmem:[#allocation2 + $0x130] sm:$0xff]  ;;  %175 = vrot.lane.b32.xlu1 %v4297_v48, %s3910_s16 }
  0x88   :  { %734 = vst.msk [vmem:[#allocation2 + $0x10] sm:$0x1] %vm733_vm8, %v3911_v4  ;;  %3655 = vmatprep.mubr.msk.f32.mxu1 %vm723_vm0, %v897_v50  ;;  %v146_v51 = vpop.permute.xlu0 %145  ;;  %v4490_v50 = vld [vmem:[%s5932_s0 + $0xb0] sm:$0xff] }
  0x89   :  { %3656 = vmatmul.mubr.msk.f32.vlgmr.msra.gmra.mxu1 %vm723_vm0, %v898_v49  ;;  %v148_v52 = vpop.permute.xlu1 %147  ;;  %337 = vst.msk [vmem:[#allocation2 + $0x20] sm:$0xff] %vm334_vm2, %v146_v51 }
  0x8a   :  { %338 = vst.msk [vmem:[#allocation2 + $0x28] sm:$0xff] %vm334_vm2, %v148_v52  ;;  %561 = vrot.lane.b32.xlu0 %v4262_v39, %s3912_s21 }
  0x8b   :  { %403 = vst.msk [vmem:[#allocation2 + $0x21] sm:$0xff] %vm399_vm3, %v4012_v9  ;;  %563 = vrot.lane.b32.xlu1 %v4267_v40, %s3912_s21  ;;  %v4393_v9 = vld [vmem:[%s5932_s0 + $0x1a8] sm:$0xff] }
  0x8c   :  { %404 = vst.msk [vmem:[#allocation2 + $0x29] sm:$0x7f] %vm401_vm4, %v4017_v10  ;;  %v534_v54 = vpop.permute.xlu0 %533 }
  0x8d   :  { %768 = vst.msk [vmem:[#allocation2 + $0x2f] sm:$0x1] %vm766_vm5, %v3911_v4  ;;  %v536_v55 = vpop.permute.xlu1 %535 }
  0x8e   :  { %v866_v57 = vld [vmem:[#allocation2 + $0x18] sm:$0xff]  ;;  %693 = vst.msk [vmem:[#allocation2 + $0x13f] sm:$0xfe] %vm657_vm6, %v534_v54  ;;  %241 = vrot.lane.b32.xlu0 %v4324_v53, %s3910_s16 }
  0x8f   :  { %694 = vst.msk [vmem:[#allocation2 + $0x147] sm:$0xff] %vm659_vm7, %v536_v55  ;;  %v865_v58 = vld [vmem:[#allocation2 + $0x10] sm:$0xff]  ;;  %243 = vrot.lane.b32.xlu1 %v4329_v56, %s3910_s16 }
  0x90   :  { %751 = vst.msk [vmem:[#allocation2 + $0x140] sm:$0x1] %vm733_vm8, %v3911_v4  ;;  %3607 = vmatprep.mubr.msk.f32.mxu0 %vm723_vm0, %v865_v58  ;;  %v214_v59 = vpop.permute.xlu0 %213  ;;  %v4522_v58 = vld [vmem:[%s5932_s0 + $0x1c0] sm:$0xff] }
  0x91   :  { %3608 = vmatmul.mubr.msk.f32.vlgmr.msra.gmra.mxu0 %vm723_vm0, %v866_v57  ;;  %v216_v60 = vpop.permute.xlu1 %215  ;;  %371 = vst.msk [vmem:[#allocation2 + $0x150] sm:$0xff] %vm334_vm2, %v214_v59 }
  0x92   :  { %372 = vst.msk [vmem:[#allocation2 + $0x158] sm:$0xff] %vm334_vm2, %v216_v60  ;;  %497 = vrot.lane.b32.xlu0 %v4292_v45, %s3912_s21 }
  0x93   :  { %437 = vst.msk [vmem:[#allocation2 + $0x151] sm:$0xff] %vm399_vm3, %v4030_v11  ;;  %499 = vrot.lane.b32.xlu1 %v4297_v48, %s3912_s21 }
  0x94   :  { %438 = vst.msk [vmem:[#allocation2 + $0x159] sm:$0x7f] %vm401_vm4, %v4035_v12  ;;  %v470_v62 = vpop.permute.xlu0 %469 }
  0x95   :  { %785 = vst.msk [vmem:[#allocation2 + $0x15f] sm:$0x1] %vm766_vm5, %v3911_v4  ;;  %v472_v63 = vpop.permute.xlu1 %471 }
  0x96   :  { %v900_v1 = vld [vmem:[#allocation2 + $0x148] sm:$0xff]  ;;  %661 = vst.msk [vmem:[#allocation2 + $0x1f] sm:$0xfe] %vm657_vm6, %v470_v62  ;;  %177 = vrot.lane.b32.xlu0 %v4356_v61, %s3910_s16 }
  0x97   :  { %662 = vst.msk [vmem:[#allocation2 + $0x27] sm:$0xff] %vm659_vm7, %v472_v63  ;;  %v899_v2 = vld [vmem:[#allocation2 + $0x140] sm:$0xff]  ;;  %179 = vrot.lane.b32.xlu1 %v4361_v0, %s3910_s16  ;;  %v864_v62 = vld [vmem:[%s5933_s1 + $0x8] sm:$0xf] }
  0x98   :  { %735 = vst.msk [vmem:[#allocation2 + $0x20] sm:$0x1] %vm733_vm8, %v3911_v4  ;;  %3658 = vmatprep.mubr.msk.f32.mxu1 %vm723_vm0, %v899_v2  ;;  %v150_v3 = vpop.permute.xlu0 %149  ;;  %3703 = vmatprep.subr.msk.mxu1 %vm1123_vm1, %v864_v62 }
  0x99   :  { %3659 = vmatmul.mubr.msk.f32.gmra.mxu1 %vm723_vm0, %v900_v1  ;;  %v152_v5 = vpop.permute.xlu1 %151  ;;  %339 = vst.msk [vmem:[#allocation2 + $0x30] sm:$0xff] %vm334_vm2, %v150_v3  ;;  %v2158_v1 = vld [vmem:[%s5933_s1 + $0x20] sm:$0xf] }
  0x9a   :  { %340 = vst.msk [vmem:[#allocation2 + $0x38] sm:$0xff] %vm334_vm2, %v152_v5  ;;  %565 = vrot.lane.b32.xlu0 %v4324_v53, %s3912_s21  ;;  %3704 = vmatpush3.msk.msra.mxu1 %vm1123_vm1, %v864_v62  ;;  %v4570_v5 = vld [vmem:[%s5932_s0 + $0xc0] sm:$0xff] }
  0x9b   :  { %405 = vst.msk [vmem:[#allocation2 + $0x31] sm:$0xff] %vm399_vm3, %v4048_v13  ;;  %567 = vrot.lane.b32.xlu1 %v4329_v56, %s3912_s21  ;;  %3803 = vmatprep.subr.msk.mxu0 %vm1123_vm1, %v2158_v1 }
  0x9c   :  { %406 = vst.msk [vmem:[#allocation2 + $0x39] sm:$0x7f] %vm401_vm4, %v4053_v14  ;;  %v538_v7 = vpop.permute.xlu0 %537  ;;  %v4420_v14 = vld [vmem:[%s5932_s0 + $0xa0] sm:$0xff]  ;;  %3804 = vmatpush3.msk.msra.mxu0 %vm1123_vm1, %v2158_v1 }
  0x9d   :  { %769 = vst.msk [vmem:[#allocation2 + $0x3f] sm:$0x1] %vm766_vm5, %v3911_v4  ;;  %v540_v8 = vpop.permute.xlu1 %539  ;;  %v4716_v1 = vld [vmem:[%s5932_s0 + $0xe0] sm:$0xff] }
  0x9e   :  { %v868_v10 = vld [vmem:[#allocation2 + $0x28] sm:$0xff]  ;;  %695 = vst.msk [vmem:[#allocation2 + $0x14f] sm:$0xfe] %vm657_vm6, %v538_v7  ;;  %245 = vrot.lane.b32.xlu0 %v4388_v6, %s3910_s16 }
  0x9f   :  { %696 = vst.msk [vmem:[#allocation2 + $0x157] sm:$0xff] %vm659_vm7, %v540_v8  ;;  %v867_v11 = vld [vmem:[#allocation2 + $0x20] sm:$0xff]  ;;  %247 = vrot.lane.b32.xlu1 %v4393_v9, %s3910_s16 }
  0xa0   :  { %752 = vst.msk [vmem:[#allocation2 + $0x150] sm:$0x1] %vm733_vm8, %v3911_v4  ;;  %3610 = vmatprep.mubr.msk.f32.mxu0 %vm723_vm0, %v867_v11  ;;  %v218_v12 = vpop.permute.xlu0 %217 }
  0xa1   :  { %3611 = vmatmul.mubr.msk.f32.gmra.mxu0 %vm723_vm0, %v868_v10  ;;  %v220_v13 = vpop.permute.xlu1 %219  ;;  %373 = vst.msk [vmem:[#allocation2 + $0x160] sm:$0xff] %vm334_vm2, %v218_v12 }
  0xa2   :  { %374 = vst.msk [vmem:[#allocation2 + $0x168] sm:$0xff] %vm334_vm2, %v220_v13  ;;  %501 = vrot.lane.b32.xlu0 %v4356_v61, %s3912_s21  ;;  %v4602_v13 = vld [vmem:[%s5932_s0 + $0x1d0] sm:$0xff] }
  0xa3   :  { %439 = vst.msk [vmem:[#allocation2 + $0x161] sm:$0xff] %vm399_vm3, %v4066_v15  ;;  %503 = vrot.lane.b32.xlu1 %v4361_v0, %s3912_s21  ;;  %v4425_v15 = vld [vmem:[%s5932_s0 + $0xa8] sm:$0xff] }
  0xa4   :  { %440 = vst.msk [vmem:[#allocation2 + $0x169] sm:$0x7f] %vm401_vm4, %v4071_v16  ;;  %v474_v35 = vpop.permute.xlu0 %473 }
  0xa5   :  { %786 = vst.msk [vmem:[#allocation2 + $0x16f] sm:$0x1] %vm766_vm5, %v3911_v4  ;;  %v476_v36 = vpop.permute.xlu1 %475 }
  0xa6   :  { %v902_v16 = vld [vmem:[#allocation2 + $0x158] sm:$0xff]  ;;  %663 = vst.msk [vmem:[#allocation2 + $0x2f] sm:$0xfe] %vm657_vm6, %v474_v35  ;;  %181 = vrot.lane.b32.xlu0 %v4420_v14, %s3910_s16 }
  0xa7   :  { %664 = vst.msk [vmem:[#allocation2 + $0x37] sm:$0xff] %vm659_vm7, %v476_v36  ;;  %v901_v37 = vld [vmem:[#allocation2 + $0x150] sm:$0xff]  ;;  %183 = vrot.lane.b32.xlu1 %v4425_v15, %s3910_s16 }
  0xa8   :  { %736 = vst.msk [vmem:[#allocation2 + $0x30] sm:$0x1] %vm733_vm8, %v3911_v4  ;;  %3661 = vmatprep.mubr.msk.f32.mxu1 %vm723_vm0, %v901_v37  ;;  %v154_v38 = vpop.permute.xlu0 %153 }
  0xa9   :  { %3662 = vmatmul.mubr.msk.f32.gmra.mxu1 %vm723_vm0, %v902_v16  ;;  %v156_v41 = vpop.permute.xlu1 %155  ;;  %341 = vst.msk [vmem:[#allocation2 + $0x40] sm:$0xff] %vm334_vm2, %v154_v38 }
  0xaa   :  { %342 = vst.msk [vmem:[#allocation2 + $0x48] sm:$0xff] %vm334_vm2, %v156_v41  ;;  %569 = vrot.lane.b32.xlu0 %v4388_v6, %s3912_s21  ;;  %v4640_v41 = vld [vmem:[%s5932_s0 + $0xd0] sm:$0xff] }
  0xab   :  { %407 = vst.msk [vmem:[#allocation2 + $0x41] sm:$0xff] %vm399_vm3, %v4084_v17  ;;  %571 = vrot.lane.b32.xlu1 %v4393_v9, %s3912_s21  ;;  %v4457_v17 = vld [vmem:[%s5932_s0 + $0x1b8] sm:$0xff] }
  0xac   :  { %408 = vst.msk [vmem:[#allocation2 + $0x49] sm:$0x7f] %vm401_vm4, %v4089_v18  ;;  %v542_v43 = vpop.permute.xlu0 %541 }
  0xad   :  { %770 = vst.msk [vmem:[#allocation2 + $0x4f] sm:$0x1] %vm766_vm5, %v3911_v4  ;;  %v544_v44 = vpop.permute.xlu1 %543 }
  0xae   :  { %v4459_v18 = vld [vmem:[#allocation2 + $0x38] sm:$0xff]  ;;  %697 = vst.msk [vmem:[#allocation2 + $0x15f] sm:$0xfe] %vm657_vm6, %v542_v43  ;;  %249 = vrot.lane.b32.xlu0 %v4452_v42, %s3910_s16 }
  0xaf   :  { %698 = vst.msk [vmem:[#allocation2 + $0x167] sm:$0xff] %vm659_vm7, %v544_v44  ;;  %v4463_v46 = vld [vmem:[#allocation2 + $0x30] sm:$0xff]  ;;  %251 = vrot.lane.b32.xlu1 %v4457_v17, %s3910_s16 }
  0xb0   :  { %753 = vst.msk [vmem:[#allocation2 + $0x160] sm:$0x1] %vm733_vm8, %v3911_v4  ;;  %3613 = vmatprep.mubr.msk.f32.mxu0 %vm723_vm0, %v4463_v46  ;;  %v222_v47 = vpop.permute.xlu0 %221 }
  0xb1   :  { %3614 = vmatmul.mubr.msk.f32.gmra.mxu0 %vm723_vm0, %v4459_v18  ;;  %v224_v49 = vpop.permute.xlu1 %223  ;;  %375 = vst.msk [vmem:[#allocation2 + $0x170] sm:$0xff] %vm334_vm2, %v222_v47 }
  0xb2   :  { %376 = vst.msk [vmem:[#allocation2 + $0x178] sm:$0xff] %vm334_vm2, %v224_v49  ;;  %505 = vrot.lane.b32.xlu0 %v4420_v14, %s3912_s21 }
  0xb3   :  { %441 = vst.msk [vmem:[#allocation2 + $0x171] sm:$0xff] %vm399_vm3, %v4102_v19  ;;  %507 = vrot.lane.b32.xlu1 %v4425_v15, %s3912_s21  ;;  %v4495_v19 = vld [vmem:[%s5932_s0 + $0xb8] sm:$0xff] }
  0xb4   :  { %442 = vst.msk [vmem:[#allocation2 + $0x179] sm:$0x7f] %vm401_vm4, %v4107_v20  ;;  %v478_v51 = vpop.permute.xlu0 %477 }
  0xb5   :  { %787 = vst.msk [vmem:[#allocation2 + $0x17f] sm:$0x1] %vm766_vm5, %v3911_v4  ;;  %v480_v52 = vpop.permute.xlu1 %479 }
  0xb6   :  { %v904_v20 = vld [vmem:[#allocation2 + $0x168] sm:$0xff]  ;;  %665 = vst.msk [vmem:[#allocation2 + $0x3f] sm:$0xfe] %vm657_vm6, %v478_v51  ;;  %185 = vrot.lane.b32.xlu0 %v4490_v50, %s3910_s16 }
  0xb7   :  { %666 = vst.msk [vmem:[#allocation2 + $0x47] sm:$0xff] %vm659_vm7, %v480_v52  ;;  %v903_v54 = vld [vmem:[#allocation2 + $0x160] sm:$0xff]  ;;  %187 = vrot.lane.b32.xlu1 %v4495_v19, %s3910_s16 }
  0xb8   :  { %737 = vst.msk [vmem:[#allocation2 + $0x40] sm:$0x1] %vm733_vm8, %v3911_v4  ;;  %3664 = vmatprep.mubr.msk.f32.mxu1 %vm723_vm0, %v903_v54  ;;  %v158_v55 = vpop.permute.xlu0 %157  ;;  %v4672_v52 = vld [vmem:[%s5932_s0 + $0x1e0] sm:$0xff] }
  0xb9   :  { %3665 = vmatmul.mubr.msk.f32.gmra.mxu1 %vm723_vm0, %v904_v20  ;;  %v160_v57 = vpop.permute.xlu1 %159  ;;  %343 = vst.msk [vmem:[#allocation2 + $0x50] sm:$0xff] %vm334_vm2, %v158_v55 }
  0xba   :  { %344 = vst.msk [vmem:[#allocation2 + $0x58] sm:$0xff] %vm334_vm2, %v160_v57  ;;  %573 = vrot.lane.b32.xlu0 %v4452_v42, %s3912_s21  ;;  %v863_v57 = vld [vmem:[%s5933_s1] sm:$0xff] }
  0xbb   :  { %409 = vst.msk [vmem:[#allocation2 + $0x51] sm:$0xff] %vm399_vm3, %v4120_v21  ;;  %575 = vrot.lane.b32.xlu1 %v4457_v17, %s3912_s21  ;;  %v4527_v21 = vld [vmem:[%s5932_s0 + $0x1c8] sm:$0xff]  ;;  %3705 = vmatprep.subr.mxu1 %v863_v57 }
  0xbc   :  { %410 = vst.msk [vmem:[#allocation2 + $0x59] sm:$0x7f] %vm401_vm4, %v4125_v22  ;;  %v546_v59 = vpop.permute.xlu0 %545  ;;  %3706 = vmatpush3.msra.mxu1 %v863_v57 }
  0xbd   :  { %771 = vst.msk [vmem:[#allocation2 + $0x5f] sm:$0x1] %vm766_vm5, %v3911_v4  ;;  %v548_v60 = vpop.permute.xlu1 %547 }
  0xbe   :  { %v4529_v22 = vld [vmem:[#allocation2 + $0x48] sm:$0xff]  ;;  %699 = vst.msk [vmem:[#allocation2 + $0x16f] sm:$0xfe] %vm657_vm6, %v546_v59  ;;  %253 = vrot.lane.b32.xlu0 %v4522_v58, %s3910_s16  ;;  %v2157_v59 = vld [vmem:[%s5933_s1 + $0x18] sm:$0xff] }
  0xbf   :  { %700 = vst.msk [vmem:[#allocation2 + $0x177] sm:$0xff] %vm659_vm7, %v548_v60  ;;  %v4536_v63 = vld [vmem:[#allocation2 + $0x40] sm:$0xff]  ;;  %255 = vrot.lane.b32.xlu1 %v4527_v21, %s3910_s16  ;;  %3805 = vmatprep.subr.mxu0 %v2157_v59 }
  0xc0   :  { %754 = vst.msk [vmem:[#allocation2 + $0x170] sm:$0x1] %vm733_vm8, %v3911_v4  ;;  %3616 = vmatprep.mubr.msk.f32.mxu0 %vm723_vm0, %v4536_v63  ;;  %v226_v2 = vpop.permute.xlu0 %225  ;;  %3806 = vmatpush3.msra.mxu0 %v2157_v59 }
  0xc1   :  { %3617 = vmatmul.mubr.msk.f32.gmra.mxu0 %vm723_vm0, %v4529_v22  ;;  %v228_v3 = vpop.permute.xlu1 %227  ;;  %377 = vst.msk [vmem:[#allocation2 + $0x180] sm:$0xff] %vm334_vm2, %v226_v2 }
  0xc2   :  { %378 = vst.msk [vmem:[#allocation2 + $0x188] sm:$0xff] %vm334_vm2, %v228_v3  ;;  %509 = vrot.lane.b32.xlu0 %v4490_v50, %s3912_s21 }
  0xc3   :  { %443 = vst.msk [vmem:[#allocation2 + $0x181] sm:$0xff] %vm399_vm3, %v4138_v23  ;;  %511 = vrot.lane.b32.xlu1 %v4495_v19, %s3912_s21  ;;  %v4575_v23 = vld [vmem:[%s5932_s0 + $0xc8] sm:$0xff] }
  0xc4   :  { %444 = vst.msk [vmem:[#allocation2 + $0x189] sm:$0x7f] %vm401_vm4, %v4143_v24  ;;  %v482_v7 = vpop.permute.xlu0 %481 }
  0xc5   :  { %788 = vst.msk [vmem:[#allocation2 + $0x18f] sm:$0x1] %vm766_vm5, %v3911_v4  ;;  %v484_v8 = vpop.permute.xlu1 %483 }
  0xc6   :  { %v906_v24 = vld [vmem:[#allocation2 + $0x178] sm:$0xff]  ;;  %667 = vst.msk [vmem:[#allocation2 + $0x4f] sm:$0xfe] %vm657_vm6, %v482_v7  ;;  %189 = vrot.lane.b32.xlu0 %v4570_v5, %s3910_s16 }
  0xc7   :  { %668 = vst.msk [vmem:[#allocation2 + $0x57] sm:$0xff] %vm659_vm7, %v484_v8  ;;  %v905_v10 = vld [vmem:[#allocation2 + $0x170] sm:$0xff]  ;;  %191 = vrot.lane.b32.xlu1 %v4575_v23, %s3910_s16 }
  0xc8   :  { %738 = vst.msk [vmem:[#allocation2 + $0x50] sm:$0x1] %vm733_vm8, %v3911_v4  ;;  %3667 = vmatprep.mubr.msk.f32.mxu1 %vm723_vm0, %v905_v10  ;;  %v162_v11 = vpop.permute.xlu0 %161  ;;  %v4748_v10 = vld [vmem:[%s5932_s0 + $0x1f0] sm:$0xff] }
  0xc9   :  { %3668 = vmatmul.mubr.msk.f32.gmra.mxu1 %vm723_vm0, %v906_v24  ;;  %v164_v12 = vpop.permute.xlu1 %163  ;;  %345 = vst.msk [vmem:[#allocation2 + $0x60] sm:$0xff] %vm334_vm2, %v162_v11 }
  0xca   :  { %346 = vst.msk [vmem:[#allocation2 + $0x68] sm:$0xff] %vm334_vm2, %v164_v12  ;;  %577 = vrot.lane.b32.xlu0 %v4522_v58, %s3912_s21 }
  0xcb   :  { %411 = vst.msk [vmem:[#allocation2 + $0x61] sm:$0xff] %vm399_vm3, %v4156_v25  ;;  %579 = vrot.lane.b32.xlu1 %v4527_v21, %s3912_s21  ;;  %v4607_v25 = vld [vmem:[%s5932_s0 + $0x1d8] sm:$0xff] }
  0xcc   :  { %412 = vst.msk [vmem:[#allocation2 + $0x69] sm:$0x7f] %vm401_vm4, %v4161_v26  ;;  %v550_v35 = vpop.permute.xlu0 %549 }
  0xcd   :  { %772 = vst.msk [vmem:[#allocation2 + $0x6f] sm:$0x1] %vm766_vm5, %v3911_v4  ;;  %v552_v36 = vpop.permute.xlu1 %551 }
  0xce   :  { %v4609_v26 = vld [vmem:[#allocation2 + $0x58] sm:$0xff]  ;;  %701 = vst.msk [vmem:[#allocation2 + $0x17f] sm:$0xfe] %vm657_vm6, %v550_v35  ;;  %257 = vrot.lane.b32.xlu0 %v4602_v13, %s3910_s16 }
  0xcf   :  { %702 = vst.msk [vmem:[#allocation2 + $0x187] sm:$0xff] %vm659_vm7, %v552_v36  ;;  %v4613_v16 = vld [vmem:[#allocation2 + $0x50] sm:$0xff]  ;;  %259 = vrot.lane.b32.xlu1 %v4607_v25, %s3910_s16 }
  0xd0   :  { %755 = vst.msk [vmem:[#allocation2 + $0x180] sm:$0x1] %vm733_vm8, %v3911_v4  ;;  %3619 = vmatprep.mubr.msk.f32.mxu0 %vm723_vm0, %v4613_v16  ;;  %v230_v37 = vpop.permute.xlu0 %229 }
  0xd1   :  { %3620 = vmatmul.mubr.msk.f32.gmra.mxu0 %vm723_vm0, %v4609_v26  ;;  %v232_v38 = vpop.permute.xlu1 %231  ;;  %379 = vst.msk [vmem:[#allocation2 + $0x190] sm:$0xff] %vm334_vm2, %v230_v37 }
  0xd2   :  { %380 = vst.msk [vmem:[#allocation2 + $0x198] sm:$0xff] %vm334_vm2, %v232_v38  ;;  %513 = vrot.lane.b32.xlu0 %v4570_v5, %s3912_s21  ;;  %v4786_v38 = vld [vmem:[%s5932_s0 + $0xf0] sm:$0xff] }
  0xd3   :  { %445 = vst.msk [vmem:[#allocation2 + $0x191] sm:$0xff] %vm399_vm3, %v4174_v27  ;;  %515 = vrot.lane.b32.xlu1 %v4575_v23, %s3912_s21  ;;  %v4645_v27 = vld [vmem:[%s5932_s0 + $0xd8] sm:$0xff] }
  0xd4   :  { %446 = vst.msk [vmem:[#allocation2 + $0x199] sm:$0x7f] %vm401_vm4, %v4179_v28  ;;  %v486_v43 = vpop.permute.xlu0 %485 }
  0xd5   :  { %789 = vst.msk [vmem:[#allocation2 + $0x19f] sm:$0x1] %vm766_vm5, %v3911_v4  ;;  %v488_v44 = vpop.permute.xlu1 %487 }
  0xd6   :  { %v908_v28 = vld [vmem:[#allocation2 + $0x188] sm:$0xff]  ;;  %669 = vst.msk [vmem:[#allocation2 + $0x5f] sm:$0xfe] %vm657_vm6, %v486_v43  ;;  %193 = vrot.lane.b32.xlu0 %v4640_v41, %s3910_s16 }
  0xd7   :  { %670 = vst.msk [vmem:[#allocation2 + $0x67] sm:$0xff] %vm659_vm7, %v488_v44  ;;  %v907_v47 = vld [vmem:[#allocation2 + $0x180] sm:$0xff]  ;;  %195 = vrot.lane.b32.xlu1 %v4645_v27, %s3910_s16 }
  0xd8   :  { %739 = vst.msk [vmem:[#allocation2 + $0x60] sm:$0x1] %vm733_vm8, %v3911_v4  ;;  %3670 = vmatprep.mubr.msk.f32.mxu1 %vm723_vm0, %v907_v47  ;;  %v166_v49 = vpop.permute.xlu0 %165 }
  0xd9   :  { %3671 = vmatmul.mubr.msk.f32.gmra.mxu1 %vm723_vm0, %v908_v28  ;;  %v168_v51 = vpop.permute.xlu1 %167  ;;  %347 = vst.msk [vmem:[#allocation2 + $0x70] sm:$0xff] %vm334_vm2, %v166_v49 }
  0xda   :  { %348 = vst.msk [vmem:[#allocation2 + $0x78] sm:$0xff] %vm334_vm2, %v168_v51  ;;  %581 = vrot.lane.b32.xlu0 %v4602_v13, %s3912_s21 }
  0xdb   :  { %413 = vst.msk [vmem:[#allocation2 + $0x71] sm:$0xff] %vm399_vm3, %v4192_v29  ;;  %583 = vrot.lane.b32.xlu1 %v4607_v25, %s3912_s21  ;;  %v4677_v29 = vld [vmem:[%s5932_s0 + $0x1e8] sm:$0xff] }
  0xdc   :  { %414 = vst.msk [vmem:[#allocation2 + $0x79] sm:$0x7f] %vm401_vm4, %v4197_v30  ;;  %v554_v20 = vpop.permute.xlu0 %553 }
  0xdd   :  { %773 = vst.msk [vmem:[#allocation2 + $0x7f] sm:$0x1] %vm766_vm5, %v3911_v4  ;;  %v556_v54 = vpop.permute.xlu1 %555 }
  0xde   :  { %v4679_v30 = vld [vmem:[#allocation2 + $0x68] sm:$0xff]  ;;  %703 = vst.msk [vmem:[#allocation2 + $0x18f] sm:$0xfe] %vm657_vm6, %v554_v20  ;;  %261 = vrot.lane.b32.xlu0 %v4672_v52, %s3910_s16 }
  0xdf   :  { %704 = vst.msk [vmem:[#allocation2 + $0x197] sm:$0xff] %vm659_vm7, %v556_v54  ;;  %v4683_v55 = vld [vmem:[#allocation2 + $0x60] sm:$0xff]  ;;  %263 = vrot.lane.b32.xlu1 %v4677_v29, %s3910_s16 }
  0xe0   :  { %756 = vst.msk [vmem:[#allocation2 + $0x190] sm:$0x1] %vm733_vm8, %v3911_v4  ;;  %3622 = vmatprep.mubr.msk.f32.mxu0 %vm723_vm0, %v4683_v55  ;;  %v234_v60 = vpop.permute.xlu0 %233 }
  0xe1   :  { %3623 = vmatmul.mubr.msk.f32.gmra.mxu0 %vm723_vm0, %v4679_v30  ;;  %v236_v62 = vpop.permute.xlu1 %235  ;;  %381 = vst.msk [vmem:[#allocation2 + $0x1a0] sm:$0xff] %vm334_vm2, %v234_v60 }
  0xe2   :  { %382 = vst.msk [vmem:[#allocation2 + $0x1a8] sm:$0xff] %vm334_vm2, %v236_v62  ;;  %517 = vrot.lane.b32.xlu0 %v4640_v41, %s3912_s21 }
  0xe3   :  { %447 = vst.msk [vmem:[#allocation2 + $0x1a1] sm:$0xff] %vm399_vm3, %v4210_v31  ;;  %519 = vrot.lane.b32.xlu1 %v4645_v27, %s3912_s21  ;;  %v4721_v31 = vld [vmem:[%s5932_s0 + $0xe8] sm:$0xff] }
  0xe4   :  { %448 = vst.msk [vmem:[#allocation2 + $0x1a9] sm:$0x7f] %vm401_vm4, %v4215_v32  ;;  %v490_v2 = vpop.permute.xlu0 %489 }
  0xe5   :  { %790 = vst.msk [vmem:[#allocation2 + $0x1af] sm:$0x1] %vm766_vm5, %v3911_v4  ;;  %v492_v3 = vpop.permute.xlu1 %491 }
  0xe6   :  { %v910_v32 = vld [vmem:[#allocation2 + $0x198] sm:$0xff]  ;;  %671 = vst.msk [vmem:[#allocation2 + $0x6f] sm:$0xfe] %vm657_vm6, %v490_v2  ;;  %197 = vrot.lane.b32.xlu0 %v4716_v1, %s3910_s16 }
  0xe7   :  { %672 = vst.msk [vmem:[#allocation2 + $0x77] sm:$0xff] %vm659_vm7, %v492_v3  ;;  %v909_v7 = vld [vmem:[#allocation2 + $0x190] sm:$0xff]  ;;  %199 = vrot.lane.b32.xlu1 %v4721_v31, %s3910_s16 }
  0xe8   :  { %740 = vst.msk [vmem:[#allocation2 + $0x70] sm:$0x1] %vm733_vm8, %v3911_v4  ;;  %3673 = vmatprep.mubr.msk.f32.mxu1 %vm723_vm0, %v909_v7  ;;  %v170_v8 = vpop.permute.xlu0 %169 }
  0xe9   :  { %3674 = vmatmul.mubr.msk.f32.gmra.mxu1 %vm723_vm0, %v910_v32  ;;  %v172_v24 = vpop.permute.xlu1 %171  ;;  %349 = vst.msk [vmem:[#allocation2 + $0x80] sm:$0xff] %vm334_vm2, %v170_v8 }
  0xea   :  { %350 = vst.msk [vmem:[#allocation2 + $0x88] sm:$0xff] %vm334_vm2, %v172_v24  ;;  %585 = vrot.lane.b32.xlu0 %v4672_v52, %s3912_s21 }
  0xeb   :  { %415 = vst.msk [vmem:[#allocation2 + $0x81] sm:$0xff] %vm399_vm3, %v4228_v33  ;;  %587 = vrot.lane.b32.xlu1 %v4677_v29, %s3912_s21  ;;  %v4753_v33 = vld [vmem:[%s5932_s0 + $0x1f8] sm:$0xff] }
  0xec   :  { %416 = vst.msk [vmem:[#allocation2 + $0x89] sm:$0x7f] %vm401_vm4, %v4233_v34  ;;  %v558_v11 = vpop.permute.xlu0 %557 }
  0xed   :  { %774 = vst.msk [vmem:[#allocation2 + $0x8f] sm:$0x1] %vm766_vm5, %v3911_v4  ;;  %v560_v12 = vpop.permute.xlu1 %559 }
  0xee   :  { %v4755_v34 = vld [vmem:[#allocation2 + $0x78] sm:$0xff]  ;;  %705 = vst.msk [vmem:[#allocation2 + $0x19f] sm:$0xfe] %vm657_vm6, %v558_v11  ;;  %265 = vrot.lane.b32.xlu0 %v4748_v10, %s3910_s16 }
  0xef   :  { %706 = vst.msk [vmem:[#allocation2 + $0x1a7] sm:$0xff] %vm659_vm7, %v560_v12  ;;  %v4759_v35 = vld [vmem:[#allocation2 + $0x70] sm:$0xff]  ;;  %267 = vrot.lane.b32.xlu1 %v4753_v33, %s3910_s16 }
  0xf0   :  { %757 = vst.msk [vmem:[#allocation2 + $0x1a0] sm:$0x1] %vm733_vm8, %v3911_v4  ;;  %3625 = vmatprep.mubr.msk.f32.mxu0 %vm723_vm0, %v4759_v35  ;;  %v238_v36 = vpop.permute.xlu0 %237 }
  0xf1   :  { %3626 = vmatmul.mubr.msk.f32.gmra.mxu0 %vm723_vm0, %v4755_v34  ;;  %v240_v37 = vpop.permute.xlu1 %239  ;;  %383 = vst.msk [vmem:[#allocation2 + $0x1b0] sm:$0xff] %vm334_vm2, %v238_v36 }
  0xf2   :  { %384 = vst.msk [vmem:[#allocation2 + $0x1b8] sm:$0xff] %vm334_vm2, %v240_v37  ;;  %521 = vrot.lane.b32.xlu0 %v4716_v1, %s3912_s21 }
  0xf3   :  { %449 = vst.msk [vmem:[#allocation2 + $0x1b1] sm:$0xff] %vm399_vm3, %v4262_v39  ;;  %523 = vrot.lane.b32.xlu1 %v4721_v31, %s3912_s21  ;;  %v4791_v39 = vld [vmem:[%s5932_s0 + $0xf8] sm:$0xff] }
  0xf4   :  { %450 = vst.msk [vmem:[#allocation2 + $0x1b9] sm:$0x7f] %vm401_vm4, %v4267_v40  ;;  %v494_v43 = vpop.permute.xlu0 %493 }
  0xf5   :  { %791 = vst.msk [vmem:[#allocation2 + $0x1bf] sm:$0x1] %vm766_vm5, %v3911_v4  ;;  %v496_v44 = vpop.permute.xlu1 %495 }
  0xf6   :  { %v4793_v40 = vld [vmem:[#allocation2 + $0x1a8] sm:$0xff]  ;;  %673 = vst.msk [vmem:[#allocation2 + $0x7f] sm:$0xfe] %vm657_vm6, %v494_v43  ;;  %201 = vrot.lane.b32.xlu0 %v4786_v38, %s3910_s16 }
  0xf7   :  { %674 = vst.msk [vmem:[#allocation2 + $0x87] sm:$0xff] %vm659_vm7, %v496_v44  ;;  %v4797_v28 = vld [vmem:[#allocation2 + $0x1a0] sm:$0xff]  ;;  %203 = vrot.lane.b32.xlu1 %v4791_v39, %s3910_s16 }
  0xf8   :  { %741 = vst.msk [vmem:[#allocation2 + $0x80] sm:$0x1] %vm733_vm8, %v3911_v4  ;;  %3676 = vmatprep.mubr.msk.f32.mxu1 %vm723_vm0, %v4797_v28  ;;  %v174_v47 = vpop.permute.xlu0 %173 }
  0xf9   :  { %3677 = vmatmul.mubr.msk.f32.gmra.mxu1 %vm723_vm0, %v4793_v40  ;;  %351 = vst.msk [vmem:[#allocation2 + $0x90] sm:$0xff] %vm334_vm2, %v174_v47  ;;  %v176_v49 = vpop.permute.xlu1 %175 }
  0xfa   :  { %352 = vst.msk [vmem:[#allocation2 + $0x98] sm:$0xff] %vm334_vm2, %v176_v49  ;;  %589 = vrot.lane.b32.xlu0 %v4748_v10, %s3912_s21 }
  0xfb   :  { %417 = vst.msk [vmem:[#allocation2 + $0x91] sm:$0xff] %vm399_vm3, %v4292_v45  ;;  %591 = vrot.lane.b32.xlu1 %v4753_v33, %s3912_s21 }
  0xfc   :  { %418 = vst.msk [vmem:[#allocation2 + $0x99] sm:$0x7f] %vm401_vm4, %v4297_v48  ;;  %v562_v51 = vpop.permute.xlu0 %561 }
  0xfd   :  { %775 = vst.msk [vmem:[#allocation2 + $0x9f] sm:$0x1] %vm766_vm5, %v3911_v4  ;;  %v564_v54 = vpop.permute.xlu1 %563 }
  0xfe   :  { %v4821_v20 = vld [vmem:[#allocation2 + $0x88] sm:$0xff]  ;;  %707 = vst.msk [vmem:[#allocation2 + $0x1af] sm:$0xfe] %vm657_vm6, %v562_v51  ;;  %525 = vrot.lane.b32.xlu0 %v4786_v38, %s3912_s21 }
  0xff   :  { %v4824_v57 = vld [vmem:[#allocation2 + $0x80] sm:$0xff]  ;;  %758 = vst.msk [vmem:[#allocation2 + $0x1b0] sm:$0x1] %vm733_vm8, %v3911_v4  ;;  %527 = vrot.lane.b32.xlu1 %v4791_v39, %s3912_s21 }
 0x100   :  { %708 = vst.msk [vmem:[#allocation2 + $0x1b7] sm:$0xff] %vm659_vm7, %v564_v54  ;;  %3628 = vmatprep.mubr.msk.f32.mxu0 %vm723_vm0, %v4824_v57  ;;  %v242_v45 = vpop.permute.xlu0 %241 }
 0x101   :  { %3629 = vmatmul.mubr.msk.f32.gmra.mxu0 %vm723_vm0, %v4821_v20  ;;  %385 = vst.msk [vmem:[#allocation2 + $0x1c0] sm:$0xff] %vm334_vm2, %v242_v45  ;;  %v244_v48 = vpop.permute.xlu1 %243 }
 0x102   :  { %386 = vst.msk [vmem:[#allocation2 + $0x1c8] sm:$0xff] %vm334_vm2, %v244_v48 }
 0x103   :  { %451 = vst.msk [vmem:[#allocation2 + $0x1c1] sm:$0xff] %vm399_vm3, %v4324_v53 }
 0x104   :  { %452 = vst.msk [vmem:[#allocation2 + $0x1c9] sm:$0x7f] %vm401_vm4, %v4329_v56  ;;  %v498_v59 = vpop.permute.xlu0 %497 }
 0x105   :  { %792 = vst.msk [vmem:[#allocation2 + $0x1cf] sm:$0x1] %vm766_vm5, %v3911_v4  ;;  %v500_v60 = vpop.permute.xlu1 %499 }
 0x106   :  { %675 = vst.msk [vmem:[#allocation2 + $0x8f] sm:$0xfe] %vm657_vm6, %v498_v59 }
 0x107   :  { %v4846_v62 = vld [vmem:[#allocation2 + $0x1b0] sm:$0xff]  ;;  %v4848_v2 = vld [vmem:[#allocation2 + $0x1b8] sm:$0xff]  ;;  %742 = vst.msk [vmem:[#allocation2 + $0x90] sm:$0x1] %vm733_vm8, %v3911_v4 }
 0x108   :  { %676 = vst.msk [vmem:[#allocation2 + $0x97] sm:$0xff] %vm659_vm7, %v500_v60  ;;  %3679 = vmatprep.mubr.msk.f32.mxu1 %vm723_vm0, %v4846_v62  ;;  %v178_v53 = vpop.permute.xlu0 %177 }
 0x109   :  { %3680 = vmatmul.mubr.msk.f32.gmra.mxu1 %vm723_vm0, %v4848_v2  ;;  %353 = vst.msk [vmem:[#allocation2 + $0xa0] sm:$0xff] %vm334_vm2, %v178_v53  ;;  %v180_v56 = vpop.permute.xlu1 %179 }
 0x10a   :  { %354 = vst.msk [vmem:[#allocation2 + $0xa8] sm:$0xff] %vm334_vm2, %v180_v56 }
 0x10b   :  { %419 = vst.msk [vmem:[#allocation2 + $0xa1] sm:$0xff] %vm399_vm3, %v4356_v61 }
 0x10c   :  { %420 = vst.msk [vmem:[#allocation2 + $0xa9] sm:$0x7f] %vm401_vm4, %v4361_v0  ;;  %v566_v3 = vpop.permute.xlu0 %565 }
 0x10d   :  { %776 = vst.msk [vmem:[#allocation2 + $0xaf] sm:$0x1] %vm766_vm5, %v3911_v4  ;;  %v568_v32 = vpop.permute.xlu1 %567 }
 0x10e   :  { %709 = vst.msk [vmem:[#allocation2 + $0x1bf] sm:$0xfe] %vm657_vm6, %v566_v3 }
 0x10f   :  { %v4866_v7 = vld [vmem:[#allocation2 + $0x90] sm:$0xff]  ;;  %v4868_v8 = vld [vmem:[#allocation2 + $0x98] sm:$0xff]  ;;  %759 = vst.msk [vmem:[#allocation2 + $0x1c0] sm:$0x1] %vm733_vm8, %v3911_v4 }
 0x110   :  { %710 = vst.msk [vmem:[#allocation2 + $0x1c7] sm:$0xff] %vm659_vm7, %v568_v32  ;;  %3631 = vmatprep.mubr.msk.f32.mxu0 %vm723_vm0, %v4866_v7  ;;  %v246_v61 = vpop.permute.xlu0 %245 }
 0x111   :  { %3632 = vmatmul.mubr.msk.f32.gmra.mxu0 %vm723_vm0, %v4868_v8  ;;  %387 = vst.msk [vmem:[#allocation2 + $0x1d0] sm:$0xff] %vm334_vm2, %v246_v61  ;;  %v248_v0 = vpop.permute.xlu1 %247 }
 0x112   :  { %388 = vst.msk [vmem:[#allocation2 + $0x1d8] sm:$0xff] %vm334_vm2, %v248_v0 }
 0x113   :  { %453 = vst.msk [vmem:[#allocation2 + $0x1d1] sm:$0xff] %vm399_vm3, %v4388_v6 }
 0x114   :  { %454 = vst.msk [vmem:[#allocation2 + $0x1d9] sm:$0x7f] %vm401_vm4, %v4393_v9  ;;  %v502_v24 = vpop.permute.xlu0 %501 }
 0x115   :  { %793 = vst.msk [vmem:[#allocation2 + $0x1df] sm:$0x1] %vm766_vm5, %v3911_v4  ;;  %v504_v11 = vpop.permute.xlu1 %503 }
 0x116   :  { %677 = vst.msk [vmem:[#allocation2 + $0x9f] sm:$0xfe] %vm657_vm6, %v502_v24 }
 0x117   :  { %v4886_v12 = vld [vmem:[#allocation2 + $0x1c0] sm:$0xff]  ;;  %v4888_v36 = vld [vmem:[#allocation2 + $0x1c8] sm:$0xff]  ;;  %743 = vst.msk [vmem:[#allocation2 + $0xa0] sm:$0x1] %vm733_vm8, %v3911_v4 }
 0x118   :  { %678 = vst.msk [vmem:[#allocation2 + $0xa7] sm:$0xff] %vm659_vm7, %v504_v11  ;;  %3682 = vmatprep.mubr.msk.f32.mxu1 %vm723_vm0, %v4886_v12  ;;  %v182_v6 = vpop.permute.xlu0 %181 }
 0x119   :  { %3683 = vmatmul.mubr.msk.f32.gmra.mxu1 %vm723_vm0, %v4888_v36  ;;  %355 = vst.msk [vmem:[#allocation2 + $0xb0] sm:$0xff] %vm334_vm2, %v182_v6  ;;  %v184_v9 = vpop.permute.xlu1 %183 }
 0x11a   :  { %356 = vst.msk [vmem:[#allocation2 + $0xb8] sm:$0xff] %vm334_vm2, %v184_v9 }
 0x11b   :  { %421 = vst.msk [vmem:[#allocation2 + $0xb1] sm:$0xff] %vm399_vm3, %v4420_v14 }
 0x11c   :  { %422 = vst.msk [vmem:[#allocation2 + $0xb9] sm:$0x7f] %vm401_vm4, %v4425_v15  ;;  %v570_v37 = vpop.permute.xlu0 %569 }
 0x11d   :  { %777 = vst.msk [vmem:[#allocation2 + $0xbf] sm:$0x1] %vm766_vm5, %v3911_v4  ;;  %v572_v43 = vpop.permute.xlu1 %571 }
 0x11e   :  { %711 = vst.msk [vmem:[#allocation2 + $0x1cf] sm:$0xfe] %vm657_vm6, %v570_v37 }
 0x11f   :  { %v4906_v44 = vld [vmem:[#allocation2 + $0xa0] sm:$0xff]  ;;  %v4908_v47 = vld [vmem:[#allocation2 + $0xa8] sm:$0xff]  ;;  %760 = vst.msk [vmem:[#allocation2 + $0x1d0] sm:$0x1] %vm733_vm8, %v3911_v4 }
 0x120   :  { %712 = vst.msk [vmem:[#allocation2 + $0x1d7] sm:$0xff] %vm659_vm7, %v572_v43  ;;  %3634 = vmatprep.mubr.msk.f32.mxu0 %vm723_vm0, %v4906_v44  ;;  %v250_v14 = vpop.permute.xlu0 %249 }
 0x121   :  { %3635 = vmatmul.mubr.msk.f32.gmra.mxu0 %vm723_vm0, %v4908_v47  ;;  %389 = vst.msk [vmem:[#allocation2 + $0x1e0] sm:$0xff] %vm334_vm2, %v250_v14  ;;  %v252_v15 = vpop.permute.xlu1 %251 }
 0x122   :  { %390 = vst.msk [vmem:[#allocation2 + $0x1e8] sm:$0xff] %vm334_vm2, %v252_v15 }
 0x123   :  { %455 = vst.msk [vmem:[#allocation2 + $0x1e1] sm:$0xff] %vm399_vm3, %v4452_v42 }
 0x124   :  { %456 = vst.msk [vmem:[#allocation2 + $0x1e9] sm:$0x7f] %vm401_vm4, %v4457_v17  ;;  %v506_v49 = vpop.permute.xlu0 %505 }
 0x125   :  { %794 = vst.msk [vmem:[#allocation2 + $0x1ef] sm:$0x1] %vm766_vm5, %v3911_v4  ;;  %v508_v51 = vpop.permute.xlu1 %507 }
 0x126   :  { %679 = vst.msk [vmem:[#allocation2 + $0xaf] sm:$0xfe] %vm657_vm6, %v506_v49 }
 0x127   :  { %v4926_v54 = vld [vmem:[#allocation2 + $0x1d0] sm:$0xff]  ;;  %v4928_v45 = vld [vmem:[#allocation2 + $0x1d8] sm:$0xff]  ;;  %744 = vst.msk [vmem:[#allocation2 + $0xb0] sm:$0x1] %vm733_vm8, %v3911_v4 }
 0x128   :  { %680 = vst.msk [vmem:[#allocation2 + $0xb7] sm:$0xff] %vm659_vm7, %v508_v51  ;;  %3685 = vmatprep.mubr.msk.f32.mxu1 %vm723_vm0, %v4926_v54  ;;  %v186_v42 = vpop.permute.xlu0 %185 }
 0x129   :  { %3686 = vmatmul.mubr.msk.f32.gmra.mxu1 %vm723_vm0, %v4928_v45  ;;  %357 = vst.msk [vmem:[#allocation2 + $0xc0] sm:$0xff] %vm334_vm2, %v186_v42  ;;  %v188_v17 = vpop.permute.xlu1 %187 }
 0x12a   :  { %358 = vst.msk [vmem:[#allocation2 + $0xc8] sm:$0xff] %vm334_vm2, %v188_v17 }
 0x12b   :  { %423 = vst.msk [vmem:[#allocation2 + $0xc1] sm:$0xff] %vm399_vm3, %v4490_v50 }
 0x12c   :  { %424 = vst.msk [vmem:[#allocation2 + $0xc9] sm:$0x7f] %vm401_vm4, %v4495_v19  ;;  %v574_v48 = vpop.permute.xlu0 %573 }
 0x12d   :  { %778 = vst.msk [vmem:[#allocation2 + $0xcf] sm:$0x1] %vm766_vm5, %v3911_v4  ;;  %v576_v59 = vpop.permute.xlu1 %575 }
 0x12e   :  { %713 = vst.msk [vmem:[#allocation2 + $0x1df] sm:$0xfe] %vm657_vm6, %v574_v48 }
 0x12f   :  { %v4946_v60 = vld [vmem:[#allocation2 + $0xb0] sm:$0xff]  ;;  %v4948_v53 = vld [vmem:[#allocation2 + $0xb8] sm:$0xff]  ;;  %761 = vst.msk [vmem:[#allocation2 + $0x1e0] sm:$0x1] %vm733_vm8, %v3911_v4 }
 0x130   :  { %714 = vst.msk [vmem:[#allocation2 + $0x1e7] sm:$0xff] %vm659_vm7, %v576_v59  ;;  %3637 = vmatprep.mubr.msk.f32.mxu0 %vm723_vm0, %v4946_v60  ;;  %v254_v50 = vpop.permute.xlu0 %253 }
 0x131   :  { %3638 = vmatmul.mubr.msk.f32.gmra.mxu0 %vm723_vm0, %v4948_v53  ;;  %391 = vst.msk [vmem:[#allocation2 + $0x1f0] sm:$0xff] %vm334_vm2, %v254_v50  ;;  %v256_v19 = vpop.permute.xlu1 %255 }
 0x132   :  { %392 = vst.msk [vmem:[#allocation2 + $0x1f8] sm:$0xff] %vm334_vm2, %v256_v19 }
 0x133   :  { %457 = vst.msk [vmem:[#allocation2 + $0x1f1] sm:$0xff] %vm399_vm3, %v4522_v58 }
 0x134   :  { %458 = vst.msk [vmem:[#allocation2 + $0x1f9] sm:$0x7f] %vm401_vm4, %v4527_v21  ;;  %v510_v56 = vpop.permute.xlu0 %509 }
 0x135   :  { %795 = vst.msk [vmem:[#allocation2 + $0x1ff] sm:$0x1] %vm766_vm5, %v3911_v4  ;;  %v512_v3 = vpop.permute.xlu1 %511 }
 0x136   :  { %681 = vst.msk [vmem:[#allocation2 + $0xbf] sm:$0xfe] %vm657_vm6, %v510_v56 }
 0x137   :  { %v4966_v32 = vld [vmem:[#allocation2 + $0x1e0] sm:$0xff]  ;;  %v4968_v61 = vld [vmem:[#allocation2 + $0x1e8] sm:$0xff]  ;;  %745 = vst.msk [vmem:[#allocation2 + $0xc0] sm:$0x1] %vm733_vm8, %v3911_v4 }
 0x138   :  { %682 = vst.msk [vmem:[#allocation2 + $0xc7] sm:$0xff] %vm659_vm7, %v512_v3  ;;  %3688 = vmatprep.mubr.msk.f32.mxu1 %vm723_vm0, %v4966_v32  ;;  %v190_v58 = vpop.permute.xlu0 %189 }
 0x139   :  { %3689 = vmatmul.mubr.msk.f32.gmra.mxu1 %vm723_vm0, %v4968_v61  ;;  %359 = vst.msk [vmem:[#allocation2 + $0xd0] sm:$0xff] %vm334_vm2, %v190_v58  ;;  %v192_v21 = vpop.permute.xlu1 %191 }
 0x13a   :  { %360 = vst.msk [vmem:[#allocation2 + $0xd8] sm:$0xff] %vm334_vm2, %v192_v21 }
 0x13b   :  { %425 = vst.msk [vmem:[#allocation2 + $0xd1] sm:$0xff] %vm399_vm3, %v4570_v5 }
 0x13c   :  { %426 = vst.msk [vmem:[#allocation2 + $0xd9] sm:$0x7f] %vm401_vm4, %v4575_v23  ;;  %v578_v0 = vpop.permute.xlu0 %577 }
 0x13d   :  { %779 = vst.msk [vmem:[#allocation2 + $0xdf] sm:$0x1] %vm766_vm5, %v3911_v4  ;;  %v580_v24 = vpop.permute.xlu1 %579 }
 0x13e   :  { %715 = vst.msk [vmem:[#allocation2 + $0x1ef] sm:$0xfe] %vm657_vm6, %v578_v0 }
 0x13f   :  { %v4986_v11 = vld [vmem:[#allocation2 + $0xc0] sm:$0xff]  ;;  %v4988_v6 = vld [vmem:[#allocation2 + $0xc8] sm:$0xff]  ;;  %762 = vst.msk [vmem:[#allocation2 + $0x1f0] sm:$0x1] %vm733_vm8, %v3911_v4 }
 0x140   :  { %716 = vst.msk [vmem:[#allocation2 + $0x1f7] sm:$0xff] %vm659_vm7, %v580_v24  ;;  %3640 = vmatprep.mubr.msk.f32.mxu0 %vm723_vm0, %v4986_v11  ;;  %v258_v5 = vpop.permute.xlu0 %257 }
 0x141   :  { %3641 = vmatmul.mubr.msk.f32.gmra.mxu0 %vm723_vm0, %v4988_v6  ;;  %393 = vst.msk [vmem:[#allocation2 + $0x200] sm:$0xff] %vm334_vm2, %v258_v5  ;;  %v260_v23 = vpop.permute.xlu1 %259 }
 0x142   :  { %394 = vst.msk [vmem:[#allocation2 + $0x208] sm:$0xff] %vm334_vm2, %v260_v23 }
 0x143   :  { %459 = vst.msk [vmem:[#allocation2 + $0x201] sm:$0xff] %vm399_vm3, %v4602_v13 }
 0x144   :  { %460 = vst.msk [vmem:[#allocation2 + $0x209] sm:$0x7f] %vm401_vm4, %v4607_v25  ;;  %v514_v9 = vpop.permute.xlu0 %513 }
 0x145   :  { %796 = vst.msk [vmem:[#allocation2 + $0x20f] sm:$0x1] %vm766_vm5, %v3911_v4  ;;  %v516_v37 = vpop.permute.xlu1 %515 }
 0x146   :  { %683 = vst.msk [vmem:[#allocation2 + $0xcf] sm:$0xfe] %vm657_vm6, %v514_v9 }
 0x147   :  { %v5006_v43 = vld [vmem:[#allocation2 + $0x1f0] sm:$0xff]  ;;  %v5008_v14 = vld [vmem:[#allocation2 + $0x1f8] sm:$0xff]  ;;  %746 = vst.msk [vmem:[#allocation2 + $0xd0] sm:$0x1] %vm733_vm8, %v3911_v4 }
 0x148   :  { %684 = vst.msk [vmem:[#allocation2 + $0xd7] sm:$0xff] %vm659_vm7, %v516_v37  ;;  %3691 = vmatprep.mubr.msk.f32.mxu1 %vm723_vm0, %v5006_v43  ;;  %v194_v13 = vpop.permute.xlu0 %193 }
 0x149   :  { %3692 = vmatmul.mubr.msk.f32.gmra.mxu1 %vm723_vm0, %v5008_v14  ;;  %361 = vst.msk [vmem:[#allocation2 + $0xe0] sm:$0xff] %vm334_vm2, %v194_v13  ;;  %v196_v25 = vpop.permute.xlu1 %195 }
 0x14a   :  { %362 = vst.msk [vmem:[#allocation2 + $0xe8] sm:$0xff] %vm334_vm2, %v196_v25 }
 0x14b   :  { %427 = vst.msk [vmem:[#allocation2 + $0xe1] sm:$0xff] %vm399_vm3, %v4640_v41 }
 0x14c   :  { %428 = vst.msk [vmem:[#allocation2 + $0xe9] sm:$0x7f] %vm401_vm4, %v4645_v27  ;;  %v582_v15 = vpop.permute.xlu0 %581 }
 0x14d   :  { %780 = vst.msk [vmem:[#allocation2 + $0xef] sm:$0x1] %vm766_vm5, %v3911_v4  ;;  %v584_v49 = vpop.permute.xlu1 %583 }
 0x14e   :  { %717 = vst.msk [vmem:[#allocation2 + $0x1ff] sm:$0xfe] %vm657_vm6, %v582_v15 }
 0x14f   :  { %v5026_v51 = vld [vmem:[#allocation2 + $0xd0] sm:$0xff]  ;;  %v5028_v42 = vld [vmem:[#allocation2 + $0xd8] sm:$0xff]  ;;  %763 = vst.msk [vmem:[#allocation2 + $0x200] sm:$0x1] %vm733_vm8, %v3911_v4 }
 0x150   :  { %718 = vst.msk [vmem:[#allocation2 + $0x207] sm:$0xff] %vm659_vm7, %v584_v49  ;;  %3643 = vmatprep.mubr.msk.f32.mxu0 %vm723_vm0, %v5026_v51  ;;  %v262_v41 = vpop.permute.xlu0 %261  ;;  %v799_v49 = vld [vmem:[#allocation2] sm:$0xff] }
 0x151   :  { %3644 = vmatmul.mubr.msk.f32.gmra.mxu0 %vm723_vm0, %v5028_v42  ;;  %395 = vst.msk [vmem:[#allocation2 + $0x210] sm:$0xff] %vm334_vm2, %v262_v41  ;;  %v264_v27 = vpop.permute.xlu1 %263  ;;  %v800_v41 = vld [vmem:[#allocation2 + $0x8] sm:$0xff] }
 0x152   :  { %396 = vst.msk [vmem:[#allocation2 + $0x218] sm:$0xff] %vm334_vm2, %v264_v27 }
 0x153   :  { %461 = vst.msk [vmem:[#allocation2 + $0x211] sm:$0xff] %vm399_vm3, %v4672_v52 }
 0x154   :  { %462 = vst.msk [vmem:[#allocation2 + $0x219] sm:$0x7f] %vm401_vm4, %v4677_v29  ;;  %v518_v17 = vpop.permute.xlu0 %517 }
 0x155   :  { %797 = vst.msk [vmem:[#allocation2 + $0x21f] sm:$0x1] %vm766_vm5, %v3911_v4  ;;  %v520_v48 = vpop.permute.xlu1 %519 }
 0x156   :  { %685 = vst.msk [vmem:[#allocation2 + $0xdf] sm:$0xfe] %vm657_vm6, %v518_v17 }
 0x157   :  { %v5046_v59 = vld [vmem:[#allocation2 + $0x200] sm:$0xff]  ;;  %v5048_v50 = vld [vmem:[#allocation2 + $0x208] sm:$0xff]  ;;  %747 = vst.msk [vmem:[#allocation2 + $0xe0] sm:$0x1] %vm733_vm8, %v3911_v4 }
 0x158   :  { %686 = vst.msk [vmem:[#allocation2 + $0xe7] sm:$0xff] %vm659_vm7, %v520_v48  ;;  %3694 = vmatprep.mubr.msk.f32.mxu1 %vm723_vm0, %v5046_v59  ;;  %v198_v52 = vpop.permute.xlu0 %197  ;;  %v2093_v48 = vld [vmem:[#allocation2 + $0x20] sm:$0xff] }
 0x159   :  { %3695 = vmatmul.mubr.msk.f32.gmra.mxu1 %vm723_vm0, %v5048_v50  ;;  %363 = vst.msk [vmem:[#allocation2 + $0xf0] sm:$0xff] %vm334_vm2, %v198_v52  ;;  %v200_v29 = vpop.permute.xlu1 %199  ;;  %v802_v52 = vld [vmem:[#allocation2 + $0x18] sm:$0xff] }
 0x15a   :  { %364 = vst.msk [vmem:[#allocation2 + $0xf8] sm:$0xff] %vm334_vm2, %v200_v29  ;;  %v2094_v29 = vld [vmem:[#allocation2 + $0x28] sm:$0xff] }
 0x15b   :  { %429 = vst.msk [vmem:[#allocation2 + $0xf1] sm:$0xff] %vm399_vm3, %v4716_v1 }
 0x15c   :  { %430 = vst.msk [vmem:[#allocation2 + $0xf9] sm:$0x7f] %vm401_vm4, %v4721_v31  ;;  %v586_v19 = vpop.permute.xlu0 %585 }
 0x15d   :  { %781 = vst.msk [vmem:[#allocation2 + $0xff] sm:$0x1] %vm766_vm5, %v3911_v4  ;;  %v588_v56 = vpop.permute.xlu1 %587 }
 0x15e   :  { %719 = vst.msk [vmem:[#allocation2 + $0x20f] sm:$0xfe] %vm657_vm6, %v586_v19 }
 0x15f   :  { %v5066_v3 = vld [vmem:[#allocation2 + $0xe0] sm:$0xff]  ;;  %v5068_v58 = vld [vmem:[#allocation2 + $0xe8] sm:$0xff]  ;;  %764 = vst.msk [vmem:[#allocation2 + $0x210] sm:$0x1] %vm733_vm8, %v3911_v4 }
 0x160   :  { %720 = vst.msk [vmem:[#allocation2 + $0x217] sm:$0xff] %vm659_vm7, %v588_v56  ;;  %3646 = vmatprep.mubr.msk.f32.mxu0 %vm723_vm0, %v5066_v3  ;;  %v266_v1 = vpop.permute.xlu0 %265 }
 0x161   :  { %3647 = vmatmul.mubr.msk.f32.gmra.mxu0 %vm723_vm0, %v5068_v58  ;;  %397 = vst.msk [vmem:[#allocation2 + $0x220] sm:$0xff] %vm334_vm2, %v266_v1  ;;  %v268_v31 = vpop.permute.xlu1 %267 }
 0x162   :  { %398 = vst.msk [vmem:[#allocation2 + $0x228] sm:$0xff] %vm334_vm2, %v268_v31 }
 0x163   :  { %463 = vst.msk [vmem:[#allocation2 + $0x221] sm:$0xff] %vm399_vm3, %v4748_v10 }
 0x164   :  { %464 = vst.msk [vmem:[#allocation2 + $0x229] sm:$0x7f] %vm401_vm4, %v4753_v33  ;;  %v522_v21 = vpop.permute.xlu0 %521 }
 0x165   :  { %798 = vst.msk [vmem:[#allocation2 + $0x22f] sm:$0x1] %vm766_vm5, %v3911_v4  ;;  %v524_v0 = vpop.permute.xlu1 %523 }
 0x166   :  { %687 = vst.msk [vmem:[#allocation2 + $0xef] sm:$0xfe] %vm657_vm6, %v522_v21 }
 0x167   :  { %v5086_v24 = vld [vmem:[#allocation2 + $0x210] sm:$0xff]  ;;  %v5088_v5 = vld [vmem:[#allocation2 + $0x218] sm:$0xff]  ;;  %748 = vst.msk [vmem:[#allocation2 + $0xf0] sm:$0x1] %vm733_vm8, %v3911_v4 }
 0x168   :  { %688 = vst.msk [vmem:[#allocation2 + $0xf7] sm:$0xff] %vm659_vm7, %v524_v0  ;;  %3697 = vmatprep.mubr.msk.f32.mxu1 %vm723_vm0, %v5086_v24  ;;  %v202_v10 = vpop.permute.xlu0 %201 }
 0x169   :  { %3698 = vmatmul.mubr.msk.f32.gmra.mxu1 %vm723_vm0, %v5088_v5  ;;  %365 = vst.msk [vmem:[#allocation2 + $0x100] sm:$0xff] %vm334_vm2, %v202_v10  ;;  %v204_v33 = vpop.permute.xlu1 %203 }
 0x16a   :  { %366 = vst.msk [vmem:[#allocation2 + $0x108] sm:$0xff] %vm334_vm2, %v204_v33 }
 0x16b   :  { %431 = vst.msk [vmem:[#allocation2 + $0x101] sm:$0xff] %vm399_vm3, %v4786_v38 }
 0x16c   :  { %432 = vst.msk [vmem:[#allocation2 + $0x109] sm:$0x7f] %vm401_vm4, %v4791_v39  ;;  %v590_v23 = vpop.permute.xlu0 %589 }
 0x16d   :  { %782 = vst.msk [vmem:[#allocation2 + $0x10f] sm:$0x1] %vm766_vm5, %v3911_v4  ;;  %v592_v9 = vpop.permute.xlu1 %591 }
 0x16e   :  { %721 = vst.msk [vmem:[#allocation2 + $0x21f] sm:$0xfe] %vm657_vm6, %v590_v23 }
 0x16f   :  { %v5106_v37 = vld [vmem:[#allocation2 + $0xf0] sm:$0xff]  ;;  %v5108_v13 = vld [vmem:[#allocation2 + $0xf8] sm:$0xff]  ;;  %765 = vst.msk [vmem:[#allocation2 + $0x220] sm:$0x1] %vm733_vm8, %v3911_v4 }
 0x170   :  { %722 = vst.msk [vmem:[#allocation2 + $0x227] sm:$0xff] %vm659_vm7, %v592_v9  ;;  %3649 = vmatprep.mubr.msk.f32.mxu0 %vm723_vm0, %v5106_v37  ;;  %v526_v38 = vpop.permute.xlu0 %525 }
 0x171   :  { %3650 = vmatmul.mubr.msk.f32.gmra.mxu0 %vm723_vm0, %v5108_v13  ;;  %689 = vst.msk [vmem:[#allocation2 + $0xff] sm:$0xfe] %vm657_vm6, %v526_v38  ;;  %v528_v39 = vpop.permute.xlu1 %527 }
 0x172   :  { %749 = vst.msk [vmem:[#allocation2 + $0x100] sm:$0x1] %vm733_vm8, %v3911_v4  ;;  %v801_v4 = vld [vmem:[#allocation2 + $0x10] sm:$0xff] }
 0x173   :  { %690 = vst.msk [vmem:[#allocation2 + $0x107] sm:$0xff] %vm659_vm7, %v528_v39 }
 0x177   :  { %v5121_v25 = vld [vmem:[#allocation2 + $0x220] sm:$0xff]  ;;  %v5123_v15 = vld [vmem:[#allocation2 + $0x228] sm:$0xff] }
 0x178   :  { %3700 = vmatprep.mubr.msk.f32.mxu1 %vm723_vm0, %v5121_v25 }
 0x179   :  { %3701 = vmatmul.mubr.msk.f32.gmra.mxu1 %vm723_vm0, %v5123_v15 }
 0x17a   :  { %3707 = vmatprep.mubr.msk.f32.mxu1 %vm723_vm0, %v799_v49  ;;  %v5130_v27 = vld [vmem:[#allocation2 + $0x100] sm:$0xff]  ;;  %v5132_v17 = vld [vmem:[#allocation2 + $0x108] sm:$0xff] }
 0x17b   :  { %3652 = vmatprep.mubr.msk.f32.mxu0 %vm723_vm0, %v5130_v27 }
 0x17c   :  { %3653 = vmatmul.mubr.msk.f32.gmra.mxu0 %vm723_vm0, %v5132_v17 }
 0x17d   :  { %3708 = vmatmul.mubr.msk.f32.vlgmr.msra.gmra.mxu1 %vm723_vm0, %v800_v41  ;;  %3807 = vmatprep.mubr.msk.f32.mxu0 %vm723_vm0, %v2093_v48 }
 0x17e   :  { %3710 = vmatprep.mubr.msk.f32.mxu1 %vm723_vm0, %v801_v4 }
 0x180   :  { %3808 = vmatmul.mubr.msk.f32.vlgmr.msra.gmra.mxu0 %vm723_vm0, %v2094_v29 }
 0x181   :  { %3711 = vmatmul.mubr.msk.f32.gmra.mxu1 %vm723_vm0, %v802_v52  ;;  %3810 = vmatprep.mubr.msk.f32.mxu0 %vm723_vm0, %v4463_v46 }
 0x182   :  { %3713 = vmatprep.mubr.msk.f32.mxu1 %vm723_vm0, %v2093_v48 }
 0x184   :  { %3811 = vmatmul.mubr.msk.f32.gmra.mxu0 %vm723_vm0, %v4459_v18 }
 0x185   :  { %3714 = vmatmul.mubr.msk.f32.gmra.mxu1 %vm723_vm0, %v2094_v29  ;;  %3813 = vmatprep.mubr.msk.f32.mxu0 %vm723_vm0, %v4536_v63 }
 0x186   :  { %3716 = vmatprep.mubr.msk.f32.mxu1 %vm723_vm0, %v4463_v46  ;;  %v2123_v46 = vld [vmem:[#allocation2 + $0x110] sm:$0xff] }
 0x188   :  { %3814 = vmatmul.mubr.msk.f32.gmra.mxu0 %vm723_vm0, %v4529_v22 }
 0x189   :  { %3717 = vmatmul.mubr.msk.f32.gmra.mxu1 %vm723_vm0, %v4459_v18  ;;  %3816 = vmatprep.mubr.msk.f32.mxu0 %vm723_vm0, %v4613_v16  ;;  %v831_v18 = vld [vmem:[#allocation2 + $0x120] sm:$0xff] }
 0x18a   :  { %3719 = vmatprep.mubr.msk.f32.mxu1 %vm723_vm0, %v4536_v63  ;;  %v2124_v63 = vld [vmem:[#allocation2 + $0x118] sm:$0xff] }
 0x18c   :  { %3817 = vmatmul.mubr.msk.f32.gmra.mxu0 %vm723_vm0, %v4609_v26 }
 0x18d   :  { %3720 = vmatmul.mubr.msk.f32.gmra.mxu1 %vm723_vm0, %v4529_v22  ;;  %3819 = vmatprep.mubr.msk.f32.mxu0 %vm723_vm0, %v4683_v55  ;;  %v832_v22 = vld [vmem:[#allocation2 + $0x128] sm:$0xff] }
 0x18e   :  { %3722 = vmatprep.mubr.msk.f32.mxu1 %vm723_vm0, %v4613_v16  ;;  %v2125_v16 = vld [vmem:[#allocation2 + $0x140] sm:$0xff] }
 0x190   :  { %3820 = vmatmul.mubr.msk.f32.gmra.mxu0 %vm723_vm0, %v4679_v30 }
 0x191   :  { %3723 = vmatmul.mubr.msk.f32.gmra.mxu1 %vm723_vm0, %v4609_v26  ;;  %3822 = vmatprep.mubr.msk.f32.mxu0 %vm723_vm0, %v4759_v35  ;;  %v833_v26 = vld [vmem:[#allocation2 + $0x130] sm:$0xff] }
 0x192   :  { %3725 = vmatprep.mubr.msk.f32.mxu1 %vm723_vm0, %v4683_v55  ;;  %v2126_v55 = vld [vmem:[#allocation2 + $0x148] sm:$0xff] }
 0x194   :  { %3823 = vmatmul.mubr.msk.f32.gmra.mxu0 %vm723_vm0, %v4755_v34 }
 0x195   :  { %3726 = vmatmul.mubr.msk.f32.gmra.mxu1 %vm723_vm0, %v4679_v30  ;;  %3825 = vmatprep.mubr.msk.f32.mxu0 %vm723_vm0, %v4824_v57  ;;  %v834_v30 = vld [vmem:[#allocation2 + $0x138] sm:$0xff] }
 0x196   :  { %3728 = vmatprep.mubr.msk.f32.mxu1 %vm723_vm0, %v4759_v35  ;;  %v2128_v35 = vld [vmem:[#allocation2 + $0x158] sm:$0xff] }
 0x198   :  { %3826 = vmatmul.mubr.msk.f32.gmra.mxu0 %vm723_vm0, %v4821_v20 }
 0x199   :  { %3729 = vmatmul.mubr.msk.f32.gmra.mxu1 %vm723_vm0, %v4755_v34  ;;  %3828 = vmatprep.mubr.msk.f32.mxu0 %vm723_vm0, %v4866_v7  ;;  %v2127_v34 = vld [vmem:[#allocation2 + $0x150] sm:$0xff] }
 0x19a   :  { %3731 = vmatprep.mubr.msk.f32.mxu1 %vm723_vm0, %v4824_v57  ;;  %v2130_v57 = vld [vmem:[#allocation2 + $0x168] sm:$0xff] }
 0x19c   :  { %3829 = vmatmul.mubr.msk.f32.gmra.mxu0 %vm723_vm0, %v4868_v8 }
 0x19d   :  { %3732 = vmatmul.mubr.msk.f32.gmra.mxu1 %vm723_vm0, %v4821_v20  ;;  %3831 = vmatprep.mubr.msk.f32.mxu0 %vm723_vm0, %v4906_v44  ;;  %v2129_v20 = vld [vmem:[#allocation2 + $0x160] sm:$0xff] }
 0x19e   :  { %3734 = vmatprep.mubr.msk.f32.mxu1 %vm723_vm0, %v4866_v7  ;;  %v2131_v7 = vld [vmem:[#allocation2 + $0x170] sm:$0xff] }
 0x1a0   :  { %3832 = vmatmul.mubr.msk.f32.gmra.mxu0 %vm723_vm0, %v4908_v47 }
 0x1a1   :  { %3735 = vmatmul.mubr.msk.f32.gmra.mxu1 %vm723_vm0, %v4868_v8  ;;  %3834 = vmatprep.mubr.msk.f32.mxu0 %vm723_vm0, %v4946_v60  ;;  %v2132_v8 = vld [vmem:[#allocation2 + $0x178] sm:$0xff] }
 0x1a2   :  { %3737 = vmatprep.mubr.msk.f32.mxu1 %vm723_vm0, %v4906_v44  ;;  %v2133_v44 = vld [vmem:[#allocation2 + $0x180] sm:$0xff] }
 0x1a4   :  { %3835 = vmatmul.mubr.msk.f32.gmra.mxu0 %vm723_vm0, %v4948_v53 }
 0x1a5   :  { %3738 = vmatmul.mubr.msk.f32.gmra.mxu1 %vm723_vm0, %v4908_v47  ;;  %3837 = vmatprep.mubr.msk.f32.mxu0 %vm723_vm0, %v4986_v11  ;;  %v2134_v47 = vld [vmem:[#allocation2 + $0x188] sm:$0xff] }
 0x1a6   :  { %3740 = vmatprep.mubr.msk.f32.mxu1 %vm723_vm0, %v4946_v60  ;;  %v2135_v60 = vld [vmem:[#allocation2 + $0x190] sm:$0xff] }
 0x1a8   :  { %3838 = vmatmul.mubr.msk.f32.gmra.mxu0 %vm723_vm0, %v4988_v6 }
 0x1a9   :  { %3741 = vmatmul.mubr.msk.f32.gmra.mxu1 %vm723_vm0, %v4948_v53  ;;  %3840 = vmatprep.mubr.msk.f32.mxu0 %vm723_vm0, %v5026_v51  ;;  %v2136_v53 = vld [vmem:[#allocation2 + $0x198] sm:$0xff] }
 0x1aa   :  { %3743 = vmatprep.mubr.msk.f32.mxu1 %vm723_vm0, %v4986_v11  ;;  %v5299_v11 = vpop.f32.mrf.mxu1 }
 0x1ac   :  { %3841 = vmatmul.mubr.msk.f32.gmra.mxu0 %vm723_vm0, %v5028_v42 }
 0x1ad   :  { %3744 = vmatmul.mubr.msk.f32.gmra.mxu1 %vm723_vm0, %v4988_v6  ;;  %3843 = vmatprep.mubr.msk.f32.mxu0 %vm723_vm0, %v5066_v3 }
 0x1ae   :  { %3746 = vmatprep.mubr.msk.f32.mxu1 %vm723_vm0, %v5026_v51 }
 0x1b0   :  { %3844 = vmatmul.mubr.msk.f32.gmra.mxu0 %vm723_vm0, %v5068_v58 }
 0x1b1   :  { %3747 = vmatmul.mubr.msk.f32.gmra.mxu1 %vm723_vm0, %v5028_v42  ;;  %3846 = vmatprep.mubr.msk.f32.mxu0 %vm723_vm0, %v5106_v37 }
 0x1b2   :  { %3749 = vmatprep.mubr.msk.f32.mxu1 %vm723_vm0, %v5066_v3 }
 0x1b4   :  { %3847 = vmatmul.mubr.msk.f32.gmra.mxu0 %vm723_vm0, %v5108_v13 }
 0x1b5   :  { %3750 = vmatmul.mubr.msk.f32.gmra.mxu1 %vm723_vm0, %v5068_v58  ;;  %3849 = vmatprep.mubr.msk.f32.mxu0 %vm723_vm0, %v5130_v27 }
 0x1b6   :  { %3752 = vmatprep.mubr.msk.f32.mxu1 %vm723_vm0, %v5106_v37 }
 0x1b8   :  { %3850 = vmatmul.mubr.msk.f32.gmra.mxu0 %vm723_vm0, %v5132_v17 }
 0x1b9   :  { %3753 = vmatmul.mubr.msk.f32.gmra.mxu1 %vm723_vm0, %v5108_v13  ;;  %3852 = vmatprep.mubr.msk.f32.mxu0 %vm723_vm0, %v2123_v46 }
 0x1ba   :  { %3755 = vmatprep.mubr.msk.f32.mxu1 %vm723_vm0, %v831_v18 }
 0x1bc   :  { %3853 = vmatmul.mubr.msk.f32.gmra.mxu0 %vm723_vm0, %v2124_v63 }
 0x1bd   :  { %3756 = vmatmul.mubr.msk.f32.gmra.mxu1 %vm723_vm0, %v832_v22  ;;  %3855 = vmatprep.mubr.msk.f32.mxu0 %vm723_vm0, %v2125_v16 }
 0x1be   :  { %3758 = vmatprep.mubr.msk.f32.mxu1 %vm723_vm0, %v833_v26 }
 0x1c0   :  { %3856 = vmatmul.mubr.msk.f32.gmra.mxu0 %vm723_vm0, %v2126_v55 }
 0x1c1   :  { %3759 = vmatmul.mubr.msk.f32.gmra.mxu1 %vm723_vm0, %v834_v30  ;;  %3858 = vmatprep.mubr.msk.f32.mxu0 %vm723_vm0, %v2127_v34 }
 0x1c2   :  { %3761 = vmatprep.mubr.msk.f32.mxu1 %vm723_vm0, %v2125_v16 }
 0x1c4   :  { %3859 = vmatmul.mubr.msk.f32.gmra.mxu0 %vm723_vm0, %v2128_v35 }
 0x1c5   :  { %3762 = vmatmul.mubr.msk.f32.gmra.mxu1 %vm723_vm0, %v2126_v55  ;;  %3861 = vmatprep.mubr.msk.f32.mxu0 %vm723_vm0, %v2129_v20 }
 0x1c6   :  { %3764 = vmatprep.mubr.msk.f32.mxu1 %vm723_vm0, %v2127_v34 }
 0x1c8   :  { %3862 = vmatmul.mubr.msk.f32.gmra.mxu0 %vm723_vm0, %v2130_v57 }
 0x1c9   :  { %3765 = vmatmul.mubr.msk.f32.gmra.mxu1 %vm723_vm0, %v2128_v35  ;;  %3864 = vmatprep.mubr.msk.f32.mxu0 %vm723_vm0, %v2131_v7 }
 0x1ca   :  { %3767 = vmatprep.mubr.msk.f32.mxu1 %vm723_vm0, %v2129_v20 }
 0x1cc   :  { %3865 = vmatmul.mubr.msk.f32.gmra.mxu0 %vm723_vm0, %v2132_v8 }
 0x1cd   :  { %3768 = vmatmul.mubr.msk.f32.gmra.mxu1 %vm723_vm0, %v2130_v57  ;;  %3867 = vmatprep.mubr.msk.f32.mxu0 %vm723_vm0, %v2133_v44 }
 0x1ce   :  { %3770 = vmatprep.mubr.msk.f32.mxu1 %vm723_vm0, %v2131_v7 }
 0x1d0   :  { %3868 = vmatmul.mubr.msk.f32.gmra.mxu0 %vm723_vm0, %v2134_v47 }
 0x1d1   :  { %3771 = vmatmul.mubr.msk.f32.gmra.mxu1 %vm723_vm0, %v2132_v8  ;;  %3870 = vmatprep.mubr.msk.f32.mxu0 %vm723_vm0, %v2135_v60 }
 0x1d2   :  { %3773 = vmatprep.mubr.msk.f32.mxu1 %vm723_vm0, %v2133_v44 }
 0x1d4   :  { %3871 = vmatmul.mubr.msk.f32.gmra.mxu0 %vm723_vm0, %v2136_v53 }
 0x1d5   :  { %3774 = vmatmul.mubr.msk.f32.gmra.mxu1 %vm723_vm0, %v2134_v47  ;;  %3873 = vmatprep.mubr.msk.f32.mxu0 %vm723_vm0, %v4797_v28 }
 0x1d6   :  { %3776 = vmatprep.mubr.msk.f32.mxu1 %vm723_vm0, %v2135_v60 }
 0x1d8   :  { %3874 = vmatmul.mubr.msk.f32.gmra.mxu0 %vm723_vm0, %v4793_v40 }
 0x1d9   :  { %3777 = vmatmul.mubr.msk.f32.gmra.mxu1 %vm723_vm0, %v2136_v53  ;;  %3876 = vmatprep.mubr.msk.f32.mxu0 %vm723_vm0, %v4846_v62 }
 0x1da   :  { %3779 = vmatprep.mubr.msk.f32.mxu1 %vm723_vm0, %v4797_v28  ;;  %v5311_v28 = vpop.f32.mrf.mxu0 }
 0x1dc   :  { %3877 = vmatmul.mubr.msk.f32.gmra.mxu0 %vm723_vm0, %v4848_v2 }
 0x1dd   :  { %3780 = vmatmul.mubr.msk.f32.gmra.mxu1 %vm723_vm0, %v4793_v40  ;;  %3879 = vmatprep.mubr.msk.f32.mxu0 %vm723_vm0, %v4886_v12  ;;  %v5309_v40 = vpop.f32.mrf.mxu1 }
 0x1de   :  { %3782 = vmatprep.mubr.msk.f32.mxu1 %vm723_vm0, %v4846_v62 }
 0x1df   :  { %v5313_v62 = vpop.f32.mrf.mxu1 }
 0x1e0   :  { %3880 = vmatmul.mubr.msk.f32.gmra.mxu0 %vm723_vm0, %v4888_v36 }
 0x1e1   :  { %3783 = vmatmul.mubr.msk.f32.gmra.mxu1 %vm723_vm0, %v4848_v2  ;;  %3882 = vmatprep.mubr.msk.f32.mxu0 %vm723_vm0, %v4926_v54  ;;  %v5323_v2 = vpop.f32.mrf.mxu0 }
 0x1e2   :  { %3785 = vmatprep.mubr.msk.f32.mxu1 %vm723_vm0, %v4886_v12  ;;  %v5325_v12 = vpop.f32.mrf.mxu1 }
 0x1e3   :  { %v5327_v6 = vpop.f32.mrf.mxu0 }
 0x1e4   :  { %3883 = vmatmul.mubr.msk.f32.gmra.mxu0 %vm723_vm0, %v4928_v45 }
 0x1e5   :  { %3786 = vmatmul.mubr.msk.f32.gmra.mxu1 %vm723_vm0, %v4888_v36  ;;  %3885 = vmatprep.mubr.msk.f32.mxu0 %vm723_vm0, %v4966_v32  ;;  %v5337_v36 = vpop.f32.mrf.mxu1 }
 0x1e6   :  { %3788 = vmatprep.mubr.msk.f32.mxu1 %vm723_vm0, %v4926_v54  ;;  %v5339_v54 = vpop.f32.mrf.mxu0 }
 0x1e8   :  { %3886 = vmatmul.mubr.msk.f32.gmra.mxu0 %vm723_vm0, %v4968_v61 }
 0x1e9   :  { %3789 = vmatmul.mubr.msk.f32.gmra.mxu1 %vm723_vm0, %v4928_v45  ;;  %3888 = vmatprep.mubr.msk.f32.mxu0 %vm723_vm0, %v5006_v43  ;;  %v5349_v45 = vpop.f32.mrf.mxu1 }
 0x1ea   :  { %3791 = vmatprep.mubr.msk.f32.mxu1 %vm723_vm0, %v4966_v32  ;;  %v5351_v32 = vpop.f32.mrf.mxu0 }
 0x1eb   :  { %v5353_v51 = vpop.f32.mrf.mxu1 }
 0x1ec   :  { %3889 = vmatmul.mubr.msk.f32.gmra.mxu0 %vm723_vm0, %v5008_v14 }
 0x1ed   :  { %3792 = vmatmul.mubr.msk.f32.gmra.mxu1 %vm723_vm0, %v4968_v61  ;;  %3891 = vmatprep.mubr.msk.f32.mxu0 %vm723_vm0, %v5046_v59  ;;  %v5363_v61 = vpop.f32.mrf.mxu0 }
 0x1ee   :  { %3794 = vmatprep.mubr.msk.f32.mxu1 %vm723_vm0, %v5006_v43  ;;  %v5365_v43 = vpop.f32.mrf.mxu1 }
 0x1ef   :  { %v5367_v42 = vpop.f32.mrf.mxu0 }
 0x1f0   :  { %3892 = vmatmul.mubr.msk.f32.gmra.mxu0 %vm723_vm0, %v5048_v50 }
 0x1f1   :  { %3795 = vmatmul.mubr.msk.f32.gmra.mxu1 %vm723_vm0, %v5008_v14  ;;  %3894 = vmatprep.mubr.msk.f32.mxu0 %vm723_vm0, %v5086_v24  ;;  %v5377_v14 = vpop.f32.mrf.mxu1  ;;  %v5379_v19 = vpop.f32.mrf.mxu0 }
 0x1f2   :  { %3797 = vmatprep.mubr.msk.f32.mxu1 %vm723_vm0, %v5046_v59  ;;  %v2155_v59 = vld [vmem:[#allocation2 + $0x230] sm:$0xff] }
 0x1f3   :  { %v5386_v56 = vpop.f32.mrf.mxu1  ;;  %v5388_v3 = vpop.f32.mrf.mxu0 }
 0x1f4   :  { %3895 = vmatmul.mubr.msk.f32.gmra.mxu0 %vm723_vm0, %v5088_v5 }
 0x1f5   :  { %3798 = vmatmul.mubr.msk.f32.gmra.mxu1 %vm723_vm0, %v5048_v50  ;;  %3897 = vmatprep.mubr.msk.f32.mxu0 %vm723_vm0, %v5121_v25  ;;  %v2156_v50 = vld [vmem:[#allocation2 + $0x238] sm:$0xff]  ;;  %v5390_v58 = vpop.f32.mrf.mxu1  ;;  %v5393_v1 = vpop.f32.mrf.mxu0 }
 0x1f6   :  { %3800 = vmatprep.mubr.msk.f32.mxu1 %vm723_vm0, %v5086_v24 }
 0x1f7   :  { %v5395_v31 = vpop.f32.mrf.mxu1  ;;  %v5397_v21 = vpop.f32.mrf.mxu0 }
 0x1f8   :  { %3898 = vmatmul.mubr.msk.f32.gmra.mxu0 %vm723_vm0, %v5123_v15 }
 0x1f9   :  { %3801 = vmatmul.mubr.msk.f32.gmra.mxu1 %vm723_vm0, %v5088_v5  ;;  %3900 = vmatprep.mubr.msk.f32.mxu0 %vm723_vm0, %v2155_v59  ;;  %v5399_v0 = vpop.f32.mrf.mxu1  ;;  %v5401_v24 = vpop.f32.mrf.mxu0 }
 0x1fb   :  { %v5403_v5 = vpop.f32.mrf.mxu1  ;;  %v5405_v10 = vpop.f32.mrf.mxu0 }
 0x1fc   :  { %3901 = vmatmul.mubr.msk.f32.gmra.mxu0 %vm723_vm0, %v2156_v50 }
 0x1fd   :  { %v5407_v33 = vpop.f32.mrf.mxu1  ;;  %v5409_v23 = vpop.f32.mrf.mxu0 }
 0x1ff   :  { %v5411_v9 = vpop.f32.mrf.mxu1  ;;  %v5413_v37 = vpop.f32.mrf.mxu0 }
 0x200   :  { %5936 = vst [vmem:[#allocation3_spill] sm:$0xff] %v5411_v9 }
 0x201   :  { %v5415_v13 = vpop.f32.mrf.mxu1  ;;  %v5417_v38 = vpop.f32.mrf.mxu0 }
 0x202   :  { %5937 = vst [vmem:[#allocation4_spill] sm:$0xff] %v5415_v13 }
 0x203   :  { %v5419_v39 = vpop.f32.mrf.mxu1  ;;  %v5421_v25 = vpop.f32.mrf.mxu0 }
 0x204   :  { %5938 = vst [vmem:[#allocation5_spill] sm:$0xff] %v5419_v39 }
 0x205   :  { %v5423_v15 = vpop.f32.mrf.mxu1  ;;  %v5425_v49 = vpop.f32.mrf.mxu0 }
 0x206   :  { %5939 = vst [vmem:[#allocation6_spill] sm:$0xff] %v5423_v15 }
 0x207   :  { %v5427_v41 = vpop.f32.mrf.mxu1  ;;  %v5429_v27 = vpop.f32.mrf.mxu0 }
 0x208   :  { %5940 = vst [vmem:[#allocation7_spill] sm:$0xff] %v5427_v41 }
 0x209   :  { %v5431_v17 = vpop.f32.mrf.mxu1  ;;  %v5433_v4 = vpop.f32.mrf.mxu0 }
 0x20a   :  { %5941 = vst [vmem:[#allocation8_spill] sm:$0xff] %v5431_v17 }
 0x20b   :  { %v5435_v48 = vpop.f32.mrf.mxu1  ;;  %v5437_v52 = vpop.f32.mrf.mxu0 }
 0x20c   :  { %5942 = vst [vmem:[#allocation9_spill] sm:$0xff] %v5435_v48 }
 0x20d   :  { %v5439_v29 = vpop.f32.mrf.mxu1  ;;  %v5441_v18 = vpop.f32.mrf.mxu0 }
 0x20e   :  { %5943 = vst [vmem:[#allocation10_spill] sm:$0xff] %v5439_v29 }
 0x20f   :  { %v5443_v46 = vpop.f32.mrf.mxu1  ;;  %v5445_v22 = vpop.f32.mrf.mxu0 }
 0x210   :  { %5944 = vst [vmem:[#allocation11_spill] sm:$0xff] %v5443_v46 }
 0x211   :  { %v5447_v63 = vpop.f32.mrf.mxu1  ;;  %v5449_v26 = vpop.f32.mrf.mxu0 }
 0x212   :  { %5945 = vst [vmem:[#allocation12_spill] sm:$0xff] %v5447_v63 }
 0x213   :  { %v5451_v16 = vpop.f32.mrf.mxu1  ;;  %v5453_v30 = vpop.f32.mrf.mxu0 }
 0x214   :  { %5946 = vst [vmem:[#allocation13_spill] sm:$0xff] %v5451_v16 }
 0x215   :  { %v5457_v34 = vpop.f32.mrf.mxu0 }
 0x219   :  { %v5455_v55 = vpop.f32.mrf.mxu1 }
 0x21a   :  { %5947 = vst [vmem:[#allocation14_spill] sm:$0xff] %v5455_v55 }
 0x21b   :  { %v5459_v35 = vpop.f32.mrf.mxu1 }
 0x21c   :  { %5948 = vst [vmem:[#allocation15_spill] sm:$0xff] %v5459_v35 }
 0x221   :  { %v5461_v20 = vpop.f32.mrf.mxu0 }
 0x223   :  { %v5465_v7 = vpop.f32.mrf.mxu0 }
 0x229   :  { %v5463_v57 = vpop.f32.mrf.mxu1 }
 0x22a   :  { %5949 = vst [vmem:[#allocation16_spill] sm:$0xff] %v5463_v57 }
 0x22b   :  { %v5467_v8 = vpop.f32.mrf.mxu1 }
 0x22c   :  { %5950 = vst [vmem:[#allocation17_spill] sm:$0xff] %v5467_v8 }
 0x231   :  { %v5469_v44 = vpop.f32.mrf.mxu0 }
 0x233   :  { %v5473_v60 = vpop.f32.mrf.mxu0 }
 0x239   :  { %v5471_v47 = vpop.f32.mrf.mxu1 }
 0x23a   :  { %5951 = vst [vmem:[#allocation18_spill] sm:$0xff] %v5471_v47 }
 0x23b   :  { %v5475_v53 = vpop.f32.mrf.mxu1 }
 0x23c   :  { %5952 = vst [vmem:[#allocation19_spill] sm:$0xff] %v5475_v53  ;;  %v5477_v59 = vpop.f32.mrf.mxu0 }
 0x23d   :  { %v3709_v50 = vpop.f32.mrf.mxu1 }
 0x23e   :  { %v5479_v35 = vpop.f32.mrf.mxu0  ;;  %v1779_v57 = vadd.f32 %v3709_v50, %v5311_v28 }
 0x23f   :  { %v1773_v55 = vpop.f32.mrf.mxu1 }
 0x240   :  { %v3809_v63 = vpop.f32.mrf.mxu0  ;;  %v1774_v8 = vadd.f32 %v1773_v55, %v5323_v2 }
 0x241   :  { %v3712_v16 = vpop.f32.mrf.mxu1  ;;  %v2740_v46 = vadd.f32 %v3809_v63, %v1779_v57 }
 0x242   :  { %v2420_v47 = vpop.f32.mrf.mxu0  ;;  %v1789_v48 = vadd.f32 %v3712_v16, %v5327_v6 }
 0x243   :  { %v1783_v29 = vpop.f32.mrf.mxu1  ;;  %2805 = vst.msk [vmem:[%s5934_s2 + $0x8] sm:$0xff] %vm2803_vm9, %v2740_v46  ;;  %v2739_v53 = vadd.f32 %v2420_v47, %v1774_v8  ;;  %v3002_v17 = vmul.f32 %v2740_v46, %v2740_v46  ;;  %v2869_v8 = vsel %vm2803_vm9, %v2740_v46, 0.0 }
 0x244   :  { %v3812_v15 = vpop.f32.mrf.mxu0  ;;  %v1784_v28 = vadd.f32 %v1783_v29, %v5339_v54 }
 0x245   :  { %v3715_v41 = vpop.f32.mrf.mxu1  ;;  %2804 = vst.msk [vmem:[%s5934_s2] sm:$0xff] %vm2803_vm9, %v2739_v53  ;;  %v2868_v2 = vsel %vm2803_vm9, %v2739_v53, 0.0  ;;  %v3001_v63 = vmul.f32 %v2739_v53, %v2739_v53  ;;  %v2742_v55 = vadd.f32 %v3812_v15, %v1789_v48  ;;  %v3066_v54 = vsel %vm2803_vm9, %v3002_v17, 0.0 }
 0x246   :  { %v2430_v50 = vpop.f32.mrf.mxu0  ;;  %v1799_v16 = vadd.f32 %v3715_v41, %v5351_v32  ;;  %v2870_v29 = vadd.f32 %v2869_v8, %v2868_v2 }
 0x247   :  { %v1793_v57 = vpop.f32.mrf.mxu1  ;;  %v3065_v6 = vsel %vm2803_vm9, %v3001_v63, 0.0  ;;  %v2741_v47 = vadd.f32 %v2430_v50, %v1784_v28  ;;  %2807 = vst.msk [vmem:[%s5934_s2 + $0x18] sm:$0xff] %vm2803_vm9, %v2742_v55  ;;  %v3004_v15 = vmul.f32 %v2742_v55, %v2742_v55  ;;  %v2873_v50 = vsel %vm2803_vm9, %v2742_v55, 0.0 }
 0x248   :  { %v3815_v53 = vpop.f32.mrf.mxu0  ;;  %v3067_v46 = vadd.f32 %v3066_v54, %v3065_v6  ;;  %v1794_v17 = vadd.f32 %v1793_v57, %v5363_v61 }
 0x249   :  { %v3718_v39 = vpop.f32.mrf.mxu1  ;;  %2806 = vst.msk [vmem:[%s5934_s2 + $0x10] sm:$0xff] %vm2803_vm9, %v2741_v47  ;;  %v2871_v48 = vsel %vm2803_vm9, %v2741_v47, 0.0  ;;  %v3003_v32 = vmul.f32 %v2741_v47, %v2741_v47  ;;  %v2744_v41 = vadd.f32 %v3815_v53, %v1799_v16  ;;  %v3070_v61 = vsel %vm2803_vm9, %v3004_v15, 0.0 }
 0x24a   :  { %v2872_v28 = vadd.f32 %v2871_v48, %v2870_v29  ;;  %v2440_v63 = vpop.f32.mrf.mxu0  ;;  %v1809_v13 = vadd.f32 %v3718_v39, %v5367_v42 }
 0x24b   :  { %v1803_v2 = vpop.f32.mrf.mxu1  ;;  %v3068_v8 = vsel %vm2803_vm9, %v3003_v32, 0.0  ;;  %2809 = vst.msk [vmem:[%s5934_s2 + $0x28] sm:$0xff] %vm2803_vm9, %v2744_v41  ;;  %v2743_v47 = vadd.f32 %v2440_v63, %v1794_v17  ;;  %v3006_v57 = vmul.f32 %v2744_v41, %v2744_v41 }
 0x24c   :  { %v3069_v9 = vadd.f32 %v3068_v8, %v3067_v46  ;;  %v2874_v16 = vadd.f32 %v2873_v50, %v2872_v28  ;;  %v3818_v54 = vpop.f32.mrf.mxu0  ;;  %v1804_v55 = vadd.f32 %v1803_v2, %v5379_v19 }
 0x24d   :  { %v3721_v6 = vpop.f32.mrf.mxu1  ;;  %v2746_v29 = vadd.f32 %v3818_v54, %v1809_v13  ;;  %2808 = vst.msk [vmem:[%s5934_s2 + $0x20] sm:$0xff] %vm2803_vm9, %v2743_v47  ;;  %v2875_v42 = vsel %vm2803_vm9, %v2743_v47, 0.0  ;;  %v3005_v39 = vmul.f32 %v2743_v47, %v2743_v47  ;;  %v2877_v13 = vsel %vm2803_vm9, %v2744_v41, 0.0 }
 0x24e   :  { %v3071_v53 = vadd.f32 %v3070_v61, %v3069_v9  ;;  %v2450_v32 = vpop.f32.mrf.mxu0  ;;  %v2876_v46 = vadd.f32 %v2875_v42, %v2874_v16  ;;  %v1819_v15 = vadd.f32 %v3721_v6, %v5388_v3  ;;  %v3074_v63 = vsel %vm2803_vm9, %v3006_v57, 0.0 }
 0x24f   :  { %v1813_v48 = vpop.f32.mrf.mxu1  ;;  %2811 = vst.msk [vmem:[%s5934_s2 + $0x38] sm:$0xff] %vm2803_vm9, %v2746_v29  ;;  %v3072_v19 = vsel %vm2803_vm9, %v3005_v39, 0.0  ;;  %v2745_v17 = vadd.f32 %v2450_v32, %v1804_v55  ;;  %v3008_v47 = vmul.f32 %v2746_v29, %v2746_v29  ;;  %v2881_v57 = vsel %vm2803_vm9, %v2746_v29, 0.0 }
 0x250   :  { %v3821_v2 = vpop.f32.mrf.mxu0  ;;  %v3073_v9 = vadd.f32 %v3072_v19, %v3071_v53  ;;  %v1814_v50 = vadd.f32 %v1813_v48, %v5393_v1  ;;  %v2878_v8 = vadd.f32 %v2877_v13, %v2876_v46 }
 0x251   :  { %v3724_v28 = vpop.f32.mrf.mxu1  ;;  %2810 = vst.msk [vmem:[%s5934_s2 + $0x30] sm:$0xff] %vm2803_vm9, %v2745_v17  ;;  %v2879_v41 = vsel %vm2803_vm9, %v2745_v17, 0.0  ;;  %v3007_v16 = vmul.f32 %v2745_v17, %v2745_v17  ;;  %v2748_v54 = vadd.f32 %v3821_v2, %v1819_v15  ;;  %v3078_v19 = vsel %vm2803_vm9, %v3008_v47, 0.0 }
 0x252   :  { %v2460_v6 = vpop.f32.mrf.mxu0  ;;  %v2880_v61 = vadd.f32 %v2879_v41, %v2878_v8  ;;  %v3075_v55 = vadd.f32 %v3074_v63, %v3073_v9  ;;  %v1829_v39 = vadd.f32 %v3724_v28, %v5397_v21 }
 0x253   :  { %v1823_v3 = vpop.f32.mrf.mxu1  ;;  %v2747_v42 = vadd.f32 %v2460_v6, %v1814_v50  ;;  %v3076_v1 = vsel %vm2803_vm9, %v3007_v16, 0.0  ;;  %2813 = vst.msk [vmem:[%s5934_s2 + $0x48] sm:$0xff] %vm2803_vm9, %v2748_v54  ;;  %v3010_v21 = vmul.f32 %v2748_v54, %v2748_v54  ;;  %v2885_v41 = vsel %vm2803_vm9, %v2748_v54, 0.0 }
 0x254   :  { %v3824_v48 = vpop.f32.mrf.mxu0  ;;  %v3077_v32 = vadd.f32 %v3076_v1, %v3075_v55  ;;  %v2882_v46 = vadd.f32 %v2881_v57, %v2880_v61  ;;  %v1824_v15 = vadd.f32 %v1823_v3, %v5401_v24 }
 0x255   :  { %v3727_v53 = vpop.f32.mrf.mxu1  ;;  %2812 = vst.msk [vmem:[%s5934_s2 + $0x40] sm:$0xff] %vm2803_vm9, %v2747_v42  ;;  %v2883_v29 = vsel %vm2803_vm9, %v2747_v42, 0.0  ;;  %v3009_v13 = vmul.f32 %v2747_v42, %v2747_v42  ;;  %v2750_v17 = vadd.f32 %v3824_v48, %v1829_v39  ;;  %v3082_v42 = vsel %vm2803_vm9, %v3010_v21, 0.0 }
 0x256   :  { %v2470_v2 = vpop.f32.mrf.mxu0  ;;  %v2884_v63 = vadd.f32 %v2883_v29, %v2882_v46  ;;  %v3079_v9 = vadd.f32 %v3078_v19, %v3077_v32  ;;  %v1839_v8 = vadd.f32 %v3727_v53, %v5405_v10 }
 0x257   :  { %v1833_v28 = vpop.f32.mrf.mxu1  ;;  %v3080_v50 = vsel %vm2803_vm9, %v3009_v13, 0.0  ;;  %2815 = vst.msk [vmem:[%s5934_s2 + $0x58] sm:$0xff] %vm2803_vm9, %v2750_v17  ;;  %v2749_v47 = vadd.f32 %v2470_v2, %v1824_v15  ;;  %v3012_v3 = vmul.f32 %v2750_v17, %v2750_v17  ;;  %v2889_v32 = vsel %vm2803_vm9, %v2750_v17, 0.0 }
 0x258   :  { %v3827_v6 = vpop.f32.mrf.mxu0  ;;  %v3081_v24 = vadd.f32 %v3080_v50, %v3079_v9  ;;  %v2886_v61 = vadd.f32 %v2885_v41, %v2884_v63  ;;  %v1834_v57 = vadd.f32 %v1833_v28, %v5409_v23 }
 0x259   :  { %v3730_v16 = vpop.f32.mrf.mxu1  ;;  %v2752_v55 = vadd.f32 %v3827_v6, %v1839_v8  ;;  %2814 = vst.msk [vmem:[%s5934_s2 + $0x50] sm:$0xff] %vm2803_vm9, %v2749_v47  ;;  %v2887_v10 = vsel %vm2803_vm9, %v2749_v47, 0.0  ;;  %v3011_v54 = vmul.f32 %v2749_v47, %v2749_v47  ;;  %v3086_v21 = vsel %vm2803_vm9, %v3012_v3, 0.0 }
 0x25a   :  { %v2480_v39 = vpop.f32.mrf.mxu0  ;;  %v2888_v53 = vadd.f32 %v2887_v10, %v2886_v61  ;;  %v3083_v48 = vadd.f32 %v3082_v42, %v3081_v24  ;;  %v1849_v46 = vadd.f32 %v3730_v16, %v5413_v37 }
 0x25b   :  { %v1843_v1 = vpop.f32.mrf.mxu1  ;;  %2817 = vst.msk [vmem:[%s5934_s2 + $0x68] sm:$0xff] %vm2803_vm9, %v2752_v55  ;;  %v3084_v23 = vsel %vm2803_vm9, %v3011_v54, 0.0  ;;  %v2751_v29 = vadd.f32 %v2480_v39, %v1834_v57  ;;  %v3014_v63 = vmul.f32 %v2752_v55, %v2752_v55  ;;  %v2893_v6 = vsel %vm2803_vm9, %v2752_v55, 0.0 }
 0x25c   :  { %v3830_v19 = vpop.f32.mrf.mxu0  ;;  %v3085_v15 = vadd.f32 %v3084_v23, %v3083_v48  ;;  %v1844_v28 = vadd.f32 %v1843_v1, %v5417_v38  ;;  %v2890_v2 = vadd.f32 %v2889_v32, %v2888_v53 }
 0x25d   :  { %v3733_v13 = vpop.f32.mrf.mxu1  ;;  %2816 = vst.msk [vmem:[%s5934_s2 + $0x60] sm:$0xff] %vm2803_vm9, %v2751_v29  ;;  %v2891_v17 = vsel %vm2803_vm9, %v2751_v29, 0.0  ;;  %v3013_v9 = vmul.f32 %v2751_v29, %v2751_v29  ;;  %v2754_v50 = vadd.f32 %v3830_v19, %v1849_v46  ;;  %v3090_v54 = vsel %vm2803_vm9, %v3014_v63, 0.0 }
 0x25e   :  { %v2490_v8 = vpop.f32.mrf.mxu0  ;;  %v2892_v41 = vadd.f32 %v2891_v17, %v2890_v2  ;;  %v3087_v47 = vadd.f32 %v3086_v21, %v3085_v15  ;;  %v1859_v24 = vadd.f32 %v3733_v13, %v5421_v25 }
 0x25f   :  { %v1853_v37 = vpop.f32.mrf.mxu1  ;;  %v2753_v16 = vadd.f32 %v2490_v8, %v1844_v28  ;;  %v3088_v38 = vsel %vm2803_vm9, %v3013_v9, 0.0  ;;  %2819 = vst.msk [vmem:[%s5934_s2 + $0x78] sm:$0xff] %vm2803_vm9, %v2754_v50  ;;  %v3016_v25 = vmul.f32 %v2754_v50, %v2754_v50  ;;  %v2897_v13 = vsel %vm2803_vm9, %v2754_v50, 0.0 }
 0x260   :  { %v3833_v61 = vpop.f32.mrf.mxu0  ;;  %v3089_v42 = vadd.f32 %v3088_v38, %v3087_v47  ;;  %v2894_v57 = vadd.f32 %v2893_v6, %v2892_v41  ;;  %v1854_v1 = vadd.f32 %v1853_v37, %v5425_v49 }
 0x261   :  { %v3736_v3 = vpop.f32.mrf.mxu1  ;;  %2818 = vst.msk [vmem:[%s5934_s2 + $0x70] sm:$0xff] %vm2803_vm9, %v2753_v16  ;;  %v2895_v55 = vsel %vm2803_vm9, %v2753_v16, 0.0  ;;  %v3015_v10 = vmul.f32 %v2753_v16, %v2753_v16  ;;  %v2756_v39 = vadd.f32 %v3833_v61, %v1859_v24  ;;  %v3094_v17 = vsel %vm2803_vm9, %v3016_v25, 0.0 }
 0x262   :  { %v2500_v48 = vpop.f32.mrf.mxu0  ;;  %v2896_v32 = vadd.f32 %v2895_v55, %v2894_v57  ;;  %v3091_v23 = vadd.f32 %v3090_v54, %v3089_v42  ;;  %v1869_v29 = vadd.f32 %v3736_v3, %v5429_v27 }
 0x263   :  { %v1863_v53 = vpop.f32.mrf.mxu1  ;;  %v3092_v46 = vsel %vm2803_vm9, %v3015_v10, 0.0  ;;  %2821 = vst.msk [vmem:[%s5934_s2 + $0x88] sm:$0xff] %vm2803_vm9, %v2756_v39  ;;  %v2755_v19 = vadd.f32 %v2500_v48, %v1854_v1  ;;  %v3018_v28 = vmul.f32 %v2756_v39, %v2756_v39  ;;  %v2901_v16 = vsel %vm2803_vm9, %v2756_v39, 0.0 }
 0x264   :  { %v3836_v15 = vpop.f32.mrf.mxu0  ;;  %v3093_v49 = vadd.f32 %v3092_v46, %v3091_v23  ;;  %v2898_v2 = vadd.f32 %v2897_v13, %v2896_v32  ;;  %v1864_v9 = vadd.f32 %v1863_v53, %v5433_v4 }
 0x265   :  { %v3739_v21 = vpop.f32.mrf.mxu1  ;;  %v2758_v63 = vadd.f32 %v3836_v15, %v1869_v29  ;;  %2820 = vst.msk [vmem:[%s5934_s2 + $0x80] sm:$0xff] %vm2803_vm9, %v2755_v19  ;;  %v2899_v27 = vsel %vm2803_vm9, %v2755_v19, 0.0  ;;  %v3017_v50 = vmul.f32 %v2755_v19, %v2755_v19  ;;  %v3098_v61 = vsel %vm2803_vm9, %v3018_v28, 0.0 }
 0x266   :  { %v2510_v8 = vpop.f32.mrf.mxu0  ;;  %v2900_v41 = vadd.f32 %v2899_v27, %v2898_v2  ;;  %v3095_v47 = vadd.f32 %v3094_v17, %v3093_v49  ;;  %v1879_v6 = vadd.f32 %v3739_v21, %v5437_v52 }
 0x267   :  { %v1873_v37 = vpop.f32.mrf.mxu1  ;;  %2823 = vst.msk [vmem:[%s5934_s2 + $0x98] sm:$0xff] %vm2803_vm9, %v2758_v63  ;;  %v3096_v4 = vsel %vm2803_vm9, %v3017_v50, 0.0  ;;  %v2757_v38 = vadd.f32 %v2510_v8, %v1864_v9  ;;  %v3020_v10 = vmul.f32 %v2758_v63, %v2758_v63  ;;  %v2905_v23 = vsel %vm2803_vm9, %v2758_v63, 0.0 }
 0x268   :  { %v3839_v3 = vpop.f32.mrf.mxu0  ;;  %v3097_v42 = vadd.f32 %v3096_v4, %v3095_v47  ;;  %v1874_v57 = vadd.f32 %v1873_v37, %v5441_v18  ;;  %v2902_v55 = vadd.f32 %v2901_v16, %v2900_v41 }
 0x269   :  { %v3742_v24 = vpop.f32.mrf.mxu1  ;;  %2822 = vst.msk [vmem:[%s5934_s2 + $0x90] sm:$0xff] %vm2803_vm9, %v2757_v38  ;;  %v2903_v54 = vsel %vm2803_vm9, %v2757_v38, 0.0  ;;  %v3019_v25 = vmul.f32 %v2757_v38, %v2757_v38  ;;  %v2760_v1 = vadd.f32 %v3839_v3, %v1879_v6  ;;  %v3102_v28 = vsel %vm2803_vm9, %v3020_v10, 0.0 }
 0x26a   :  { %v2520_v39 = vpop.f32.mrf.mxu0  ;;  %v2904_v53 = vadd.f32 %v2903_v54, %v2902_v55  ;;  %v3099_v48 = vadd.f32 %v3098_v61, %v3097_v42  ;;  %v1889_v46 = vadd.f32 %v3742_v24, %v5445_v22 }
 0x26b   :  { %v1883_v52 = vpop.f32.mrf.mxu1  ;;  %v2759_v32 = vadd.f32 %v2520_v39, %v1874_v57  ;;  %v3100_v18 = vsel %vm2803_vm9, %v3019_v25, 0.0  ;;  %2825 = vst.msk [vmem:[%s5934_s2 + $0xa8] sm:$0xff] %vm2803_vm9, %v2760_v1  ;;  %v3022_v22 = vmul.f32 %v2760_v1, %v2760_v1  ;;  %v2909_v41 = vsel %vm2803_vm9, %v2760_v1, 0.0 }
 0x26c   :  { %v3842_v13 = vpop.f32.mrf.mxu0  ;;  %v3101_v19 = vadd.f32 %v3100_v18, %v3099_v48  ;;  %v2906_v21 = vadd.f32 %v2905_v23, %v2904_v53  ;;  %v1884_v2 = vadd.f32 %v1883_v52, %v5449_v26 }
 0x26d   :  { %v3745_v29 = vpop.f32.mrf.mxu1  ;;  %2824 = vst.msk [vmem:[%s5934_s2 + $0xa0] sm:$0xff] %vm2803_vm9, %v2759_v32  ;;  %v2907_v15 = vsel %vm2803_vm9, %v2759_v32, 0.0  ;;  %v3021_v49 = vmul.f32 %v2759_v32, %v2759_v32  ;;  %v2762_v63 = vadd.f32 %v3842_v13, %v1889_v46  ;;  %v3106_v3 = vsel %vm2803_vm9, %v3022_v22, 0.0 }
 0x26e   :  { %v2530_v9 = vpop.f32.mrf.mxu0  ;;  %v2908_v27 = vadd.f32 %v2907_v15, %v2906_v21  ;;  %v3103_v50 = vadd.f32 %v3102_v28, %v3101_v19  ;;  %v1899_v8 = vadd.f32 %v3745_v29, %v5453_v30 }
 0x26f   :  { %v1893_v17 = vpop.f32.mrf.mxu1  ;;  %v3104_v37 = vsel %vm2803_vm9, %v3021_v49, 0.0  ;;  %2827 = vst.msk [vmem:[%s5934_s2 + $0xb8] sm:$0xff] %vm2803_vm9, %v2762_v63  ;;  %v2761_v47 = vadd.f32 %v2530_v9, %v1884_v2  ;;  %v3024_v6 = vmul.f32 %v2762_v63, %v2762_v63  ;;  %v2913_v25 = vsel %vm2803_vm9, %v2762_v63, 0.0 }
 0x270   :  { %v3845_v4 = vpop.f32.mrf.mxu0  ;;  %v3105_v26 = vadd.f32 %v3104_v37, %v3103_v50  ;;  %v2910_v38 = vadd.f32 %v2909_v41, %v2908_v27  ;;  %v1894_v61 = vadd.f32 %v1893_v17, %v5457_v34 }
 0x271   :  { %v3748_v16 = vpop.f32.mrf.mxu1  ;;  %v2764_v24 = vadd.f32 %v3845_v4, %v1899_v8  ;;  %2826 = vst.msk [vmem:[%s5934_s2 + $0xb0] sm:$0xff] %vm2803_vm9, %v2761_v47  ;;  %v2911_v30 = vsel %vm2803_vm9, %v2761_v47, 0.0  ;;  %v3023_v42 = vmul.f32 %v2761_v47, %v2761_v47  ;;  %v3110_v48 = vsel %vm2803_vm9, %v3024_v6, 0.0 }
 0x272   :  { %v2540_v55 = vpop.f32.mrf.mxu0  ;;  %v2912_v10 = vadd.f32 %v2911_v30, %v2910_v38  ;;  %v3107_v54 = vadd.f32 %v3106_v3, %v3105_v26  ;;  %v1909_v1 = vadd.f32 %v3748_v16, %v5461_v20 }
 0x273   :  { %v1903_v57 = vpop.f32.mrf.mxu1  ;;  %2829 = vst.msk [vmem:[%s5934_s2 + $0xc8] sm:$0xff] %vm2803_vm9, %v2764_v24  ;;  %v3108_v34 = vsel %vm2803_vm9, %v3023_v42, 0.0  ;;  %v2763_v52 = vadd.f32 %v2540_v55, %v1894_v61  ;;  %v3026_v46 = vmul.f32 %v2764_v24, %v2764_v24  ;;  %v2917_v22 = vsel %vm2803_vm9, %v2764_v24, 0.0 }
 0x274   :  { %v3848_v53 = vpop.f32.mrf.mxu0  ;;  %v3109_v32 = vadd.f32 %v3108_v34, %v3107_v54  ;;  %v1904_v23 = vadd.f32 %v1903_v57, %v5465_v7  ;;  %v2914_v18 = vadd.f32 %v2913_v25, %v2912_v10 }
 0x275   :  { %v3751_v39 = vpop.f32.mrf.mxu1  ;;  %2828 = vst.msk [vmem:[%s5934_s2 + $0xc0] sm:$0xff] %vm2803_vm9, %v2763_v52  ;;  %v2915_v29 = vsel %vm2803_vm9, %v2763_v52, 0.0  ;;  %v3025_v13 = vmul.f32 %v2763_v52, %v2763_v52  ;;  %v2766_v19 = vadd.f32 %v3848_v53, %v1909_v1  ;;  %v3114_v8 = vsel %vm2803_vm9, %v3026_v46, 0.0 }
 0x276   :  { %v2550_v21 = vpop.f32.mrf.mxu0  ;;  %v2916_v15 = vadd.f32 %v2915_v29, %v2914_v18  ;;  %v3111_v49 = vadd.f32 %v3110_v48, %v3109_v32  ;;  %v1919_v2 = vadd.f32 %v3751_v39, %v5469_v44 }
 0x277   :  { %v1913_v20 = vpop.f32.mrf.mxu1  ;;  %v2765_v28 = vadd.f32 %v2550_v21, %v1904_v23  ;;  %v3112_v7 = vsel %vm2803_vm9, %v3025_v13, 0.0  ;;  %2831 = vst.msk [vmem:[%s5934_s2 + $0xd8] sm:$0xff] %vm2803_vm9, %v2766_v19  ;;  %v3028_v44 = vmul.f32 %v2766_v19, %v2766_v19  ;;  %v2921_v3 = vsel %vm2803_vm9, %v2766_v19, 0.0 }
 0x278   :  { %v3851_v17 = vpop.f32.mrf.mxu0  ;;  %v3113_v9 = vadd.f32 %v3112_v7, %v3111_v49  ;;  %v2918_v27 = vadd.f32 %v2917_v22, %v2916_v15  ;;  %v1914_v41 = vadd.f32 %v1913_v20, %v5473_v60 }
 0x279   :  { %v3754_v63 = vpop.f32.mrf.mxu1  ;;  %2830 = vst.msk [vmem:[%s5934_s2 + $0xd0] sm:$0xff] %vm2803_vm9, %v2765_v28  ;;  %v2919_v50 = vsel %vm2803_vm9, %v2765_v28, 0.0  ;;  %v3027_v37 = vmul.f32 %v2765_v28, %v2765_v28  ;;  %v2768_v47 = vadd.f32 %v3851_v17, %v1919_v2  ;;  %v3118_v54 = vsel %vm2803_vm9, %v3028_v44, 0.0 }
 0x27a   :  { %v2560_v4 = vpop.f32.mrf.mxu0  ;;  %v2920_v26 = vadd.f32 %v2919_v50, %v2918_v27  ;;  %v3115_v6 = vadd.f32 %v3114_v8, %v3113_v9  ;;  %v1929_v24 = vadd.f32 %v3754_v63, %v5477_v59 }
 0x27b   :  { %v1923_v16 = vpop.f32.mrf.mxu1  ;;  %v3116_v38 = vsel %vm2803_vm9, %v3027_v37, 0.0  ;;  %2833 = vst.msk [vmem:[%s5934_s2 + $0xe8] sm:$0xff] %vm2803_vm9, %v2768_v47  ;;  %v2767_v61 = vadd.f32 %v2560_v4, %v1914_v41  ;;  %v3030_v57 = vmul.f32 %v2768_v47, %v2768_v47  ;;  %v2925_v48 = vsel %vm2803_vm9, %v2768_v47, 0.0 }
 0x27c   :  { %v3854_v42 = vpop.f32.mrf.mxu0  ;;  %v3117_v60 = vadd.f32 %v3116_v38, %v3115_v6  ;;  %v2922_v55 = vadd.f32 %v2921_v3, %v2920_v26  ;;  %v1924_v25 = vadd.f32 %v1923_v16, %v5479_v35 }
 0x27d   :  { %v3757_v30 = vpop.f32.mrf.mxu1  ;;  %v2770_v10 = vadd.f32 %v3854_v42, %v1929_v24  ;;  %2832 = vst.msk [vmem:[%s5934_s2 + $0xe0] sm:$0xff] %vm2803_vm9, %v2767_v61  ;;  %v2923_v59 = vsel %vm2803_vm9, %v2767_v61, 0.0  ;;  %v3029_v34 = vmul.f32 %v2767_v61, %v2767_v61  ;;  %v3122_v29 = vsel %vm2803_vm9, %v3030_v57, 0.0 }
 0x27e   :  { %v2570_v52 = vpop.f32.mrf.mxu0  ;;  %v2924_v39 = vadd.f32 %v2923_v59, %v2922_v55  ;;  %v3119_v53 = vadd.f32 %v3118_v54, %v3117_v60  ;;  %v1939_v32 = vadd.f32 %v3757_v30, %v5299_v11 }
 0x27f   :  { %v1933_v1 = vpop.f32.mrf.mxu1  ;;  %2835 = vst.msk [vmem:[%s5934_s2 + $0xf8] sm:$0xff] %vm2803_vm9, %v2770_v10  ;;  %v3120_v35 = vsel %vm2803_vm9, %v3029_v34, 0.0  ;;  %v2769_v23 = vadd.f32 %v2570_v52, %v1924_v25  ;;  %v3032_v21 = vmul.f32 %v2770_v10, %v2770_v10  ;;  %v2929_v17 = vsel %vm2803_vm9, %v2770_v10, 0.0 }
 0x280   :  { %v3857_v46 = vpop.f32.mrf.mxu0  ;;  %v3121_v13 = vadd.f32 %v3120_v35, %v3119_v53  ;;  %v1934_v19 = vadd.f32 %v1933_v1, %v5309_v40  ;;  %v2926_v20 = vadd.f32 %v2925_v48, %v2924_v39 }
 0x281   :  { %v3760_v18 = vpop.f32.mrf.mxu1  ;;  %2834 = vst.msk [vmem:[%s5934_s2 + $0xf0] sm:$0xff] %vm2803_vm9, %v2769_v23  ;;  %v2927_v15 = vsel %vm2803_vm9, %v2769_v23, 0.0  ;;  %v3031_v49 = vmul.f32 %v2769_v23, %v2769_v23  ;;  %v2772_v28 = vadd.f32 %v3857_v46, %v1939_v32  ;;  %v3126_v47 = vsel %vm2803_vm9, %v3032_v21, 0.0 }
 0x282   :  { %v2580_v22 = vpop.f32.mrf.mxu0  ;;  %v2928_v7 = vadd.f32 %v2927_v15, %v2926_v20  ;;  %v3123_v2 = vadd.f32 %v3122_v29, %v3121_v13  ;;  %v1949_v9 = vadd.f32 %v3760_v18, %v5313_v62 }
 0x283   :  { %v1943_v11 = vpop.f32.mrf.mxu1  ;;  %v2771_v63 = vadd.f32 %v2580_v22, %v1934_v19  ;;  %v3124_v40 = vsel %vm2803_vm9, %v3031_v49, 0.0  ;;  %2837 = vst.msk [vmem:[%s5934_s2 + $0x108] sm:$0xff] %vm2803_vm9, %v2772_v28  ;;  %v3034_v62 = vmul.f32 %v2772_v28, %v2772_v28  ;;  %v2933_v30 = vsel %vm2803_vm9, %v2772_v28, 0.0 }
 0x284   :  { %v3860_v50 = vpop.f32.mrf.mxu0  ;;  %v3125_v37 = vadd.f32 %v3124_v40, %v3123_v2  ;;  %v2930_v8 = vadd.f32 %v2929_v17, %v2928_v7  ;;  %v1944_v16 = vadd.f32 %v1943_v11, %v5325_v12 }
 0x285   :  { %v3763_v27 = vpop.f32.mrf.mxu1  ;;  %2836 = vst.msk [vmem:[%s5934_s2 + $0x100] sm:$0xff] %vm2803_vm9, %v2771_v63  ;;  %v2931_v44 = vsel %vm2803_vm9, %v2771_v63, 0.0  ;;  %v3033_v41 = vmul.f32 %v2771_v63, %v2771_v63  ;;  %v2774_v4 = vadd.f32 %v3860_v50, %v1949_v9  ;;  %v3130_v25 = vsel %vm2803_vm9, %v3034_v62, 0.0 }
 0x286   :  { %v2590_v6 = vpop.f32.mrf.mxu0  ;;  %v2932_v38 = vadd.f32 %v2931_v44, %v2930_v8  ;;  %v3127_v24 = vadd.f32 %v3126_v47, %v3125_v37  ;;  %v1959_v61 = vadd.f32 %v3763_v27, %v5337_v36 }
 0x287   :  { %v1953_v26 = vpop.f32.mrf.mxu1  ;;  %v3128_v3 = vsel %vm2803_vm9, %v3033_v41, 0.0  ;;  %2839 = vst.msk [vmem:[%s5934_s2 + $0x118] sm:$0xff] %vm2803_vm9, %v2774_v4  ;;  %v2773_v42 = vadd.f32 %v2590_v6, %v1944_v16  ;;  %v3036_v55 = vmul.f32 %v2774_v4, %v2774_v4  ;;  %v2937_v48 = vsel %vm2803_vm9, %v2774_v4, 0.0 }
 0x288   :  { %v3863_v57 = vpop.f32.mrf.mxu0  ;;  %v3129_v12 = vadd.f32 %v3128_v3, %v3127_v24  ;;  %v2934_v10 = vadd.f32 %v2933_v30, %v2932_v38  ;;  %v1954_v59 = vadd.f32 %v1953_v26, %v5349_v45 }
 0x289   :  { %v3766_v60 = vpop.f32.mrf.mxu1  ;;  %v2776_v54 = vadd.f32 %v3863_v57, %v1959_v61  ;;  %2838 = vst.msk [vmem:[%s5934_s2 + $0x110] sm:$0xff] %vm2803_vm9, %v2773_v42  ;;  %v2935_v36 = vsel %vm2803_vm9, %v2773_v42, 0.0  ;;  %v3035_v34 = vmul.f32 %v2773_v42, %v2773_v42  ;;  %v3134_v46 = vsel %vm2803_vm9, %v3036_v55, 0.0 }
 0x28a   :  { %v2600_v52 = vpop.f32.mrf.mxu0  ;;  %v2936_v39 = vadd.f32 %v2935_v36, %v2934_v10  ;;  %v3131_v53 = vadd.f32 %v3130_v25, %v3129_v12  ;;  %v1969_v35 = vadd.f32 %v3766_v60, %v5353_v51 }
 0x28b   :  { %v1963_v1 = vpop.f32.mrf.mxu1  ;;  %2841 = vst.msk [vmem:[%s5934_s2 + $0x128] sm:$0xff] %vm2803_vm9, %v2776_v54  ;;  %v3132_v45 = vsel %vm2803_vm9, %v3035_v34, 0.0  ;;  %v2775_v32 = vadd.f32 %v2600_v52, %v1954_v59  ;;  %v3038_v20 = vmul.f32 %v2776_v54, %v2776_v54  ;;  %v2941_v2 = vsel %vm2803_vm9, %v2776_v54, 0.0 }
 0x28c   :  { %v3866_v18 = vpop.f32.mrf.mxu0  ;;  %v3133_v29 = vadd.f32 %v3132_v45, %v3131_v53  ;;  %v1964_v13 = vadd.f32 %v1963_v1, %v5365_v43  ;;  %v2938_v19 = vadd.f32 %v2937_v48, %v2936_v39 }
 0x28d   :  { %v3769_v23 = vpop.f32.mrf.mxu1  ;;  %2840 = vst.msk [vmem:[%s5934_s2 + $0x120] sm:$0xff] %vm2803_vm9, %v2775_v32  ;;  %v2939_v21 = vsel %vm2803_vm9, %v2775_v32, 0.0  ;;  %v3037_v15 = vmul.f32 %v2775_v32, %v2775_v32  ;;  %v2778_v49 = vadd.f32 %v3866_v18, %v1969_v35  ;;  %v3138_v8 = vsel %vm2803_vm9, %v3038_v20, 0.0 }
 0x28e   :  { %v2610_v28 = vpop.f32.mrf.mxu0  ;;  %v2940_v11 = vadd.f32 %v2939_v21, %v2938_v19  ;;  %v3135_v22 = vadd.f32 %v3134_v46, %v3133_v29  ;;  %v1979_v63 = vadd.f32 %v3769_v23, %v5377_v14 }
 0x28f   :  { %v1973_v51 = vpop.f32.mrf.mxu1  ;;  %v2777_v7 = vadd.f32 %v2610_v28, %v1964_v13  ;;  %v3136_v43 = vsel %vm2803_vm9, %v3037_v15, 0.0  ;;  %2843 = vst.msk [vmem:[%s5934_s2 + $0x138] sm:$0xff] %vm2803_vm9, %v2778_v49  ;;  %v3040_v14 = vmul.f32 %v2778_v49, %v2778_v49  ;;  %v2945_v38 = vsel %vm2803_vm9, %v2778_v49, 0.0 }
 0x290   :  { %v3869_v40 = vpop.f32.mrf.mxu0  ;;  %v3137_v9 = vadd.f32 %v3136_v43, %v3135_v22  ;;  %v2942_v27 = vadd.f32 %v2941_v2, %v2940_v11  ;;  %v1974_v44 = vadd.f32 %v1973_v51, %v5386_v56  ;;  %v5953_v43 = vld [vmem:[#allocation3_spill] sm:$0xff] }
 0x291   :  { %v3772_v17 = vpop.f32.mrf.mxu1  ;;  %2842 = vst.msk [vmem:[%s5934_s2 + $0x130] sm:$0xff] %vm2803_vm9, %v2777_v7  ;;  %v2943_v50 = vsel %vm2803_vm9, %v2777_v7, 0.0  ;;  %v3039_v37 = vmul.f32 %v2777_v7, %v2777_v7  ;;  %v2780_v41 = vadd.f32 %v3869_v40, %v1979_v63  ;;  %v3142_v57 = vsel %vm2803_vm9, %v3040_v14, 0.0 }
 0x292   :  { %v2620_v62 = vpop.f32.mrf.mxu0  ;;  %v2944_v16 = vadd.f32 %v2943_v50, %v2942_v27  ;;  %v3139_v4 = vadd.f32 %v3138_v8, %v3137_v9  ;;  %v1989_v6 = vadd.f32 %v3772_v17, %v5390_v58  ;;  %v5954_v8 = vld [vmem:[#allocation4_spill] sm:$0xff] }
 0x293   :  { %v1983_v47 = vpop.f32.mrf.mxu1  ;;  %v3140_v26 = vsel %vm2803_vm9, %v3039_v37, 0.0  ;;  %2845 = vst.msk [vmem:[%s5934_s2 + $0x148] sm:$0xff] %vm2803_vm9, %v2780_v41  ;;  %v2779_v24 = vadd.f32 %v2620_v62, %v1974_v44  ;;  %v3042_v30 = vmul.f32 %v2780_v41, %v2780_v41  ;;  %v2949_v36 = vsel %vm2803_vm9, %v2780_v41, 0.0 }
 0x294   :  { %v3872_v61 = vpop.f32.mrf.mxu0  ;;  %v3141_v56 = vadd.f32 %v3140_v26, %v3139_v4  ;;  %v2946_v42 = vadd.f32 %v2945_v38, %v2944_v16  ;;  %v1984_v12 = vadd.f32 %v1983_v47, %v5395_v31 }
 0x295   :  { %v3775_v3 = vpop.f32.mrf.mxu1  ;;  %v2782_v60 = vadd.f32 %v3872_v61, %v1989_v6  ;;  %2844 = vst.msk [vmem:[%s5934_s2 + $0x140] sm:$0xff] %vm2803_vm9, %v2779_v24  ;;  %v2947_v58 = vsel %vm2803_vm9, %v2779_v24, 0.0  ;;  %v3041_v55 = vmul.f32 %v2779_v24, %v2779_v24  ;;  %v3146_v53 = vsel %vm2803_vm9, %v3042_v30, 0.0  ;;  %v5955_v24 = vld [vmem:[#allocation5_spill] sm:$0xff] }
 0x296   :  { %v2630_v54 = vpop.f32.mrf.mxu0  ;;  %v2948_v25 = vadd.f32 %v2947_v58, %v2946_v42  ;;  %v3143_v59 = vadd.f32 %v3142_v57, %v3141_v56  ;;  %v1999_v34 = vadd.f32 %v3775_v3, %v5399_v0 }
 0x297   :  { %v1993_v10 = vpop.f32.mrf.mxu1  ;;  %2847 = vst.msk [vmem:[%s5934_s2 + $0x158] sm:$0xff] %vm2803_vm9, %v2782_v60  ;;  %v3144_v31 = vsel %vm2803_vm9, %v3041_v55, 0.0  ;;  %v2781_v1 = vadd.f32 %v2630_v54, %v1984_v12  ;;  %v3044_v32 = vmul.f32 %v2782_v60, %v2782_v60  ;;  %v2953_v21 = vsel %vm2803_vm9, %v2782_v60, 0.0  ;;  %v5956_v55 = vld [vmem:[#allocation6_spill] sm:$0xff] }
 0x298   :  { %v3875_v39 = vpop.f32.mrf.mxu0  ;;  %v3145_v48 = vadd.f32 %v3144_v31, %v3143_v59  ;;  %v1994_v45 = vadd.f32 %v1993_v10, %v5403_v5  ;;  %v2950_v35 = vadd.f32 %v2949_v36, %v2948_v25 }
 0x299   :  { %v3778_v52 = vpop.f32.mrf.mxu1  ;;  %2846 = vst.msk [vmem:[%s5934_s2 + $0x150] sm:$0xff] %vm2803_vm9, %v2781_v1  ;;  %v2951_v23 = vsel %vm2803_vm9, %v2781_v1, 0.0  ;;  %v3043_v18 = vmul.f32 %v2781_v1, %v2781_v1  ;;  %v2784_v46 = vadd.f32 %v3875_v39, %v1999_v34  ;;  %v3150_v2 = vsel %vm2803_vm9, %v3044_v32, 0.0  ;;  %v5957_v34 = vld [vmem:[#allocation7_spill] sm:$0xff] }
 0x29a   :  { %v2640_v29 = vpop.f32.mrf.mxu0  ;;  %v2952_v13 = vadd.f32 %v2951_v23, %v2950_v35  ;;  %v3147_v19 = vadd.f32 %v3146_v53, %v3145_v48  ;;  %v2009_v15 = vadd.f32 %v3778_v52, %v5407_v33 }
 0x29b   :  { %v2003_v0 = vpop.f32.mrf.mxu1  ;;  %v2783_v20 = vadd.f32 %v2640_v29, %v1994_v45  ;;  %v3148_v5 = vsel %vm2803_vm9, %v3043_v18, 0.0  ;;  %2849 = vst.msk [vmem:[%s5934_s2 + $0x168] sm:$0xff] %vm2803_vm9, %v2784_v46  ;;  %v3046_v33 = vmul.f32 %v2784_v46, %v2784_v46  ;;  %v2957_v44 = vsel %vm2803_vm9, %v2784_v46, 0.0 }
 0x29c   :  { %v3878_v51 = vpop.f32.mrf.mxu0  ;;  %v3149_v28 = vadd.f32 %v3148_v5, %v3147_v19  ;;  %v2954_v11 = vadd.f32 %v2953_v21, %v2952_v13  ;;  %v2004_v63 = vadd.f32 %v2003_v0, %v5953_v43  ;;  %v5958_v13 = vld [vmem:[#allocation8_spill] sm:$0xff] }
 0x29d   :  { %v3781_v49 = vpop.f32.mrf.mxu1  ;;  %2848 = vst.msk [vmem:[%s5934_s2 + $0x160] sm:$0xff] %vm2803_vm9, %v2783_v20  ;;  %v2955_v22 = vsel %vm2803_vm9, %v2783_v20, 0.0  ;;  %v3045_v7 = vmul.f32 %v2783_v20, %v2783_v20  ;;  %v2786_v17 = vadd.f32 %v3878_v51, %v2009_v15  ;;  %v3154_v38 = vsel %vm2803_vm9, %v3046_v33, 0.0 }
 0x29e   :  { %v2650_v9 = vpop.f32.mrf.mxu0  ;;  %v2956_v27 = vadd.f32 %v2955_v22, %v2954_v11  ;;  %v3151_v50 = vadd.f32 %v3150_v2, %v3149_v28  ;;  %v2019_v14 = vadd.f32 %v3781_v49, %v5954_v8  ;;  %v5959_v22 = vld [vmem:[#allocation9_spill] sm:$0xff] }
 0x29f   :  { %v2013_v40 = vpop.f32.mrf.mxu1  ;;  %v3152_v37 = vsel %vm2803_vm9, %v3045_v7, 0.0  ;;  %2851 = vst.msk [vmem:[%s5934_s2 + $0x178] sm:$0xff] %vm2803_vm9, %v2786_v17  ;;  %v2785_v41 = vadd.f32 %v2650_v9, %v2004_v63  ;;  %v3048_v4 = vmul.f32 %v2786_v17, %v2786_v17  ;;  %v2961_v12 = vsel %vm2803_vm9, %v2786_v17, 0.0  ;;  %v5960_v9 = vld [vmem:[#allocation10_spill] sm:$0xff] }
 0x2a0   :  { %v3881_v62 = vpop.f32.mrf.mxu0  ;;  %v3153_v16 = vadd.f32 %v3152_v37, %v3151_v50  ;;  %v2958_v26 = vadd.f32 %v2957_v44, %v2956_v27  ;;  %v2014_v3 = vadd.f32 %v2013_v40, %v5955_v24 }
 0x2a1   :  { %v3784_v47 = vpop.f32.mrf.mxu1  ;;  %v2788_v6 = vadd.f32 %v3881_v62, %v2019_v14  ;;  %2850 = vst.msk [vmem:[%s5934_s2 + $0x170] sm:$0xff] %vm2803_vm9, %v2785_v41  ;;  %v2959_v61 = vsel %vm2803_vm9, %v2785_v41, 0.0  ;;  %v3047_v56 = vmul.f32 %v2785_v41, %v2785_v41  ;;  %v3158_v36 = vsel %vm2803_vm9, %v3048_v4, 0.0  ;;  %v5961_v4 = vld [vmem:[#allocation11_spill] sm:$0xff] }
 0x2a2   :  { %v2660_v42 = vpop.f32.mrf.mxu0  ;;  %v2960_v60 = vadd.f32 %v2959_v61, %v2958_v26  ;;  %v3155_v57 = vadd.f32 %v3154_v38, %v3153_v16  ;;  %v2029_v10 = vadd.f32 %v3784_v47, %v5956_v55 }
 0x2a3   :  { %v2023_v30 = vpop.f32.mrf.mxu1  ;;  %2853 = vst.msk [vmem:[%s5934_s2 + $0x188] sm:$0xff] %vm2803_vm9, %v2788_v6  ;;  %v3156_v58 = vsel %vm2803_vm9, %v3047_v56, 0.0  ;;  %v2787_v54 = vadd.f32 %v2660_v42, %v2014_v3  ;;  %v3050_v39 = vmul.f32 %v2788_v6, %v2788_v6  ;;  %v2965_v0 = vsel %vm2803_vm9, %v2788_v6, 0.0 }
 0x2a4   :  { %v3884_v59 = vpop.f32.mrf.mxu0  ;;  %v3157_v31 = vadd.f32 %v3156_v58, %v3155_v57  ;;  %v2024_v1 = vadd.f32 %v2023_v30, %v5957_v34  ;;  %v2962_v52 = vadd.f32 %v2961_v12, %v2960_v60  ;;  %v5962_v60 = vld [vmem:[#allocation12_spill] sm:$0xff] }
 0x2a5   :  { %v3787_v25 = vpop.f32.mrf.mxu1  ;;  %2852 = vst.msk [vmem:[%s5934_s2 + $0x180] sm:$0xff] %vm2803_vm9, %v2787_v54  ;;  %v2963_v53 = vsel %vm2803_vm9, %v2787_v54, 0.0  ;;  %v3049_v48 = vmul.f32 %v2787_v54, %v2787_v54  ;;  %v2790_v45 = vadd.f32 %v3884_v59, %v2029_v10  ;;  %v3162_v28 = vsel %vm2803_vm9, %v3050_v39, 0.0 }
 0x2a6   :  { %v2670_v32 = vpop.f32.mrf.mxu0  ;;  %v2964_v23 = vadd.f32 %v2963_v53, %v2962_v52  ;;  %v3159_v18 = vadd.f32 %v3158_v36, %v3157_v31  ;;  %v2039_v19 = vadd.f32 %v3787_v25, %v5958_v13  ;;  %v5963_v25 = vld [vmem:[#allocation13_spill] sm:$0xff] }
 0x2a7   :  { %v2033_v35 = vpop.f32.mrf.mxu1  ;;  %v2789_v46 = vadd.f32 %v2670_v32, %v2024_v1  ;;  %v3160_v29 = vsel %vm2803_vm9, %v3049_v48, 0.0  ;;  %2855 = vst.msk [vmem:[%s5934_s2 + $0x198] sm:$0xff] %vm2803_vm9, %v2790_v45  ;;  %v3052_v11 = vmul.f32 %v2790_v45, %v2790_v45  ;;  %v2969_v50 = vsel %vm2803_vm9, %v2790_v45, 0.0 }
 0x2a8   :  { %v3887_v21 = vpop.f32.mrf.mxu0  ;;  %v3161_v5 = vadd.f32 %v3160_v29, %v3159_v18  ;;  %v2966_v15 = vadd.f32 %v2965_v0, %v2964_v23  ;;  %v2034_v7 = vadd.f32 %v2033_v35, %v5959_v22  ;;  %v5964_v18 = vld [vmem:[#allocation14_spill] sm:$0xff] }
 0x2a9   :  { %v3790_v20 = vpop.f32.mrf.mxu1  ;;  %2854 = vst.msk [vmem:[%s5934_s2 + $0x190] sm:$0xff] %vm2803_vm9, %v2789_v46  ;;  %v2967_v49 = vsel %vm2803_vm9, %v2789_v46, 0.0  ;;  %v3051_v51 = vmul.f32 %v2789_v46, %v2789_v46  ;;  %v2792_v2 = vadd.f32 %v3887_v21, %v2039_v19  ;;  %v3166_v16 = vsel %vm2803_vm9, %v3052_v11, 0.0 }
 0x2aa   :  { %v2680_v43 = vpop.f32.mrf.mxu0  ;;  %v2968_v63 = vadd.f32 %v2967_v49, %v2966_v15  ;;  %v3163_v17 = vadd.f32 %v3162_v28, %v3161_v5  ;;  %v2049_v27 = vadd.f32 %v3790_v20, %v5960_v9  ;;  %v5965_v49 = vld [vmem:[#allocation15_spill] sm:$0xff] }
 0x2ab   :  { %v2043_v33 = vpop.f32.mrf.mxu1  ;;  %v3164_v40 = vsel %vm2803_vm9, %v3051_v51, 0.0  ;;  %2857 = vst.msk [vmem:[%s5934_s2 + $0x1a8] sm:$0xff] %vm2803_vm9, %v2792_v2  ;;  %v2791_v37 = vadd.f32 %v2680_v43, %v2034_v7  ;;  %v3054_v41 = vmul.f32 %v2792_v2, %v2792_v2  ;;  %v2973_v30 = vsel %vm2803_vm9, %v2792_v2, 0.0  ;;  %v5966_v43 = vld [vmem:[#allocation16_spill] sm:$0xff] }
 0x2ac   :  { %v3890_v14 = vpop.f32.mrf.mxu0  ;;  %v3165_v44 = vadd.f32 %v3164_v40, %v3163_v17  ;;  %v2970_v47 = vadd.f32 %v2969_v50, %v2968_v63  ;;  %v2044_v26 = vadd.f32 %v2043_v33, %v5961_v4 }
 0x2ad   :  { %v3793_v8 = vpop.f32.mrf.mxu1  ;;  %v2794_v62 = vadd.f32 %v3890_v14, %v2049_v27  ;;  %2856 = vst.msk [vmem:[%s5934_s2 + $0x1a0] sm:$0xff] %vm2803_vm9, %v2791_v37  ;;  %v2971_v6 = vsel %vm2803_vm9, %v2791_v37, 0.0  ;;  %v3053_v38 = vmul.f32 %v2791_v37, %v2791_v37  ;;  %v3170_v10 = vsel %vm2803_vm9, %v3054_v41, 0.0  ;;  %v5967_v41 = vld [vmem:[#allocation17_spill] sm:$0xff] }
 0x2ae   :  { %v2690_v3 = vpop.f32.mrf.mxu0  ;;  %v2972_v61 = vadd.f32 %v2971_v6, %v2970_v47  ;;  %v3167_v56 = vadd.f32 %v3166_v16, %v3165_v44  ;;  %v2059_v57 = vadd.f32 %v3793_v8, %v5962_v60 }
 0x2af   :  { %v2053_v24 = vpop.f32.mrf.mxu1  ;;  %2859 = vst.msk [vmem:[%s5934_s2 + $0x1b8] sm:$0xff] %vm2803_vm9, %v2794_v62  ;;  %v3168_v42 = vsel %vm2803_vm9, %v3053_v38, 0.0  ;;  %v2793_v12 = vadd.f32 %v2690_v3, %v2044_v26  ;;  %v3056_v31 = vmul.f32 %v2794_v62, %v2794_v62  ;;  %v2977_v32 = vsel %vm2803_vm9, %v2794_v62, 0.0  ;;  %v5968_v38 = vld [vmem:[#allocation18_spill] sm:$0xff] }
 0x2b0   :  { %v3893_v55 = vpop.f32.mrf.mxu0  ;;  %v3169_v54 = vadd.f32 %v3168_v42, %v3167_v56  ;;  %v2054_v59 = vadd.f32 %v2053_v24, %v5963_v25  ;;  %v2974_v36 = vadd.f32 %v2973_v30, %v2972_v61 }
 0x2b1   :  { %v3796_v58 = vpop.f32.mrf.mxu1  ;;  %2858 = vst.msk [vmem:[%s5934_s2 + $0x1b0] sm:$0xff] %vm2803_vm9, %v2793_v12  ;;  %v2975_v34 = vsel %vm2803_vm9, %v2793_v12, 0.0  ;;  %v3055_v1 = vmul.f32 %v2793_v12, %v2793_v12  ;;  %v2796_v52 = vadd.f32 %v3893_v55, %v2059_v57  ;;  %v3174_v5 = vsel %vm2803_vm9, %v3056_v31, 0.0 }
 0x2b2   :  { %v2700_v53 = vpop.f32.mrf.mxu0  ;;  %v2976_v48 = vadd.f32 %v2975_v34, %v2974_v36  ;;  %v3171_v45 = vadd.f32 %v3170_v10, %v3169_v54  ;;  %v2069_v46 = vadd.f32 %v3796_v58, %v5964_v18  ;;  %v5969_v10 = vld [vmem:[#allocation19_spill] sm:$0xff] }
 0x2b3   :  { %v2063_v39 = vpop.f32.mrf.mxu1  ;;  %v2795_v35 = vadd.f32 %v2700_v53, %v2054_v59  ;;  %v3172_v23 = vsel %vm2803_vm9, %v3055_v1, 0.0  ;;  %2861 = vst.msk [vmem:[%s5934_s2 + $0x1c8] sm:$0xff] %vm2803_vm9, %v2796_v52  ;;  %v3058_v15 = vmul.f32 %v2796_v52, %v2796_v52  ;;  %v2981_v17 = vsel %vm2803_vm9, %v2796_v52, 0.0 }
 0x2b4   :  { %v3896_v29 = vpop.f32.mrf.mxu0  ;;  %v3173_v13 = vadd.f32 %v3172_v23, %v3171_v45  ;;  %v2978_v19 = vadd.f32 %v2977_v32, %v2976_v48  ;;  %v2064_v51 = vadd.f32 %v2063_v39, %v5965_v49 }
 0x2b5   :  { %v3799_v0 = vpop.f32.mrf.mxu1  ;;  %2860 = vst.msk [vmem:[%s5934_s2 + $0x1c0] sm:$0xff] %vm2803_vm9, %v2795_v35  ;;  %v2979_v20 = vsel %vm2803_vm9, %v2795_v35, 0.0  ;;  %v3057_v21 = vmul.f32 %v2795_v35, %v2795_v35  ;;  %v2798_v28 = vadd.f32 %v3896_v29, %v2069_v46  ;;  %v3178_v44 = vsel %vm2803_vm9, %v3058_v15, 0.0 }
 0x2b6   :  { %v2710_v22 = vpop.f32.mrf.mxu0  ;;  %v2980_v7 = vadd.f32 %v2979_v20, %v2978_v19  ;;  %v3175_v2 = vadd.f32 %v3174_v5, %v3173_v13  ;;  %v2079_v63 = vadd.f32 %v3799_v0, %v5966_v43 }
 0x2b7   :  { %v2073_v11 = vpop.f32.mrf.mxu1  ;;  %v3176_v33 = vsel %vm2803_vm9, %v3057_v21, 0.0  ;;  %2863 = vst.msk [vmem:[%s5934_s2 + $0x1d8] sm:$0xff] %vm2803_vm9, %v2798_v28  ;;  %v2797_v40 = vadd.f32 %v2710_v22, %v2064_v51  ;;  %v3060_v37 = vmul.f32 %v2798_v28, %v2798_v28  ;;  %v2985_v61 = vsel %vm2803_vm9, %v2798_v28, 0.0 }
 0x2b8   :  { %v3899_v27 = vpop.f32.mrf.mxu0  ;;  %v3177_v50 = vadd.f32 %v3176_v33, %v3175_v2  ;;  %v2982_v8 = vadd.f32 %v2981_v17, %v2980_v7  ;;  %v2074_v47 = vadd.f32 %v2073_v11, %v5967_v41 }
 0x2b9   :  { %v3802_v9 = vpop.f32.mrf.mxu1  ;;  %v2800_v14 = vadd.f32 %v3899_v27, %v2079_v63  ;;  %2862 = vst.msk [vmem:[%s5934_s2 + $0x1d0] sm:$0xff] %vm2803_vm9, %v2797_v40  ;;  %v2983_v62 = vsel %vm2803_vm9, %v2797_v40, 0.0  ;;  %v3059_v16 = vmul.f32 %v2797_v40, %v2797_v40  ;;  %v3182_v60 = vsel %vm2803_vm9, %v3060_v37, 0.0 }
 0x2ba   :  { %v2720_v4 = vpop.f32.mrf.mxu0  ;;  %v2984_v26 = vadd.f32 %v2983_v62, %v2982_v8  ;;  %v3179_v6 = vadd.f32 %v3178_v44, %v3177_v50  ;;  %v2089_v24 = vadd.f32 %v3802_v9, %v5968_v38 }
 0x2bb   :  { %2865 = vst.msk [vmem:[%s5934_s2 + $0x1e8] sm:$0xff] %vm2803_vm9, %v2800_v14  ;;  %v2083_v3 = vpop.f32.mrf.mxu1  ;;  %v3180_v56 = vsel %vm2803_vm9, %v3059_v16, 0.0  ;;  %v2799_v30 = vadd.f32 %v2720_v4, %v2074_v47  ;;  %v3062_v55 = vmul.f32 %v2800_v14, %v2800_v14  ;;  %v2989_v1 = vsel %vm2803_vm9, %v2800_v14, 0.0 }
 0x2bc   :  { %v3902_v42 = vpop.f32.mrf.mxu0  ;;  %v3181_v57 = vadd.f32 %v3180_v56, %v3179_v6  ;;  %v2986_v12 = vadd.f32 %v2985_v61, %v2984_v26  ;;  %v2084_v54 = vadd.f32 %v2083_v3, %v5969_v10 }
 0x2bd   :  { %v2802_v58 = vadd.f32 %v3902_v42, %v2089_v24  ;;  %2864 = vst.msk [vmem:[%s5934_s2 + $0x1e0] sm:$0xff] %vm2803_vm9, %v2799_v30  ;;  %v2987_v25 = vsel %vm2803_vm9, %v2799_v30, 0.0  ;;  %v3061_v59 = vmul.f32 %v2799_v30, %v2799_v30  ;;  %v3186_v45 = vsel %vm2803_vm9, %v3062_v55, 0.0 }
 0x2be   :  { %v2730_v36 = vpop.f32.mrf.mxu0  ;;  %v2988_v31 = vadd.f32 %v2987_v25, %v2986_v12  ;;  %v3183_v34 = vadd.f32 %v3182_v60, %v3181_v57 }
 0x2bf   :  { %2867 = vst.msk [vmem:[%s5934_s2 + $0x1f8] sm:$0xff] %vm2803_vm9, %v2802_v58  ;;  %v3184_v52 = vsel %vm2803_vm9, %v3061_v59, 0.0  ;;  %v2801_v39 = vadd.f32 %v2730_v36, %v2084_v54  ;;  %v3064_v35 = vmul.f32 %v2802_v58, %v2802_v58  ;;  %v2993_v0 = vsel %vm2803_vm9, %v2802_v58, 0.0 }
 0x2c0   :  { %v3185_v53 = vadd.f32 %v3184_v52, %v3183_v34  ;;  %v2990_v48 = vadd.f32 %v2989_v1, %v2988_v31 }
 0x2c1   :  { %2866 = vst.msk [vmem:[%s5934_s2 + $0x1f0] sm:$0xff] %vm2803_vm9, %v2801_v39  ;;  %v2991_v32 = vsel %vm2803_vm9, %v2801_v39, 0.0  ;;  %v3063_v23 = vmul.f32 %v2801_v39, %v2801_v39  ;;  %v3190_v20 = vsel %vm2803_vm9, %v3064_v35, 0.0 }
 0x2c2   :  { %v2992_v18 = vadd.f32 %v2991_v32, %v2990_v48  ;;  %v3187_v46 = vadd.f32 %v3186_v45, %v3185_v53 }
 0x2c3   :  { %v3188_v29 = vsel %vm2803_vm9, %v3063_v23, 0.0 }
 0x2c4   :  { %v2994_v13 = vadd.f32 %v2993_v0, %v2992_v18  ;;  %v3189_v19 = vadd.f32 %v3188_v29, %v3187_v46 }
 0x2c6   :  { %v2995_v21 = vrot.slane %v2994_v13, 4  ;;  %v3191_v5 = vadd.f32 %v3190_v20, %v3189_v19 }
 0x2c8   :  { %v2996_v15 = vadd.f32 %v2995_v21, %v2994_v13  ;;  %v3192_v49 = vrot.slane %v3191_v5, 4 }
 0x2ca   :  { %v2997_v51 = vrot.slane %v2996_v15, 2  ;;  %v3193_v28 = vadd.f32 %v3192_v49, %v3191_v5 }
 0x2cc   :  { %v2998_v11 = vadd.f32 %v2997_v51, %v2996_v15  ;;  %v3194_v22 = vrot.slane %v3193_v28, 2 }
 0x2ce   :  { %v2999_v7 = vrot.slane %v2998_v11, 1  ;;  %v3195_v2 = vadd.f32 %v3194_v22, %v3193_v28 }
 0x2d0   :  { %v3196_v33 = vrot.slane %v3195_v2, 1  ;;  %v3000_v43 = vadd.f32 %v2999_v7, %v2998_v11 }
 0x2d2   :  { %v3197_v63 = vadd.f32 %v3196_v33, %v3195_v2 }
 0x2d4   :  { %v3199_v17 = vsel %vm3198_vm10, %v3000_v43, %v3197_v63 }
 0x2d5   :  { %3201 = vst.msk [vmem:[%s5935_s3] sm:$0x3] %vm3200_vm11, %v3199_v17 }

// kernel: _lambda_.4
= control target key start
LH: loop header
LB: loop body
LE: loop exit
PB: predicated region body
PF: predicated region fallthrough
CT: control target
= control target key end

     0   :  { %s4127_s9 = smov 8   ;;  %s4128_s18 = smov 16   ;;  %vm935_vm0 = vcmask 195584   ;;  %v4129_v42 = vmov 0.0   ;;  %vm546_vm1 = vcmask 130112   ;;  %vm611_vm2 = vcmask 64512   ;;  %s6288_s0 = inlined_call_operand.vmem [shape: f32[2,16,16,8], index: 0, kind: input, shape index: {}]   ;;  %s6289_s1 = inlined_call_operand.vmem [shape: f32[1,1,8], index: 1, kind: input, shape index: {}]   ;;  %s6290_s2 = inlined_call_operand.vmem [shape: f32[1,1,8], index: 2, kind: input, shape index: {}]   ;;  %s6291_s3 = inlined_call_operand.vmem [shape: f32[72,16], index: 3, kind: input, shape index: {}]   ;;  %s6292_s4 = inlined_call_operand.vmem [shape: f32[2,16,16,16], index: 4, kind: output, shape index: {0}]   ;;  %s6293_s5 = inlined_call_operand.vmem [shape: f32[1,2,16], index: 5, kind: output, shape index: {1}]  }
   0x1   :  { %v51_v0 = vld [vmem:[%s6288_s0 + $0x100] sm:$0xff]  ;;  %v52_v5 = vld [vmem:[%s6288_s0 + $0x108] sm:$0xff]  ;;  %v53_v14 = vld [vmem:[%s6288_s0 + $0x110] sm:$0xff]  ;;  %936 = vst.msk [vmem:[#allocation2] sm:$0xff] %vm935_vm0, %v4129_v42  ;;  %vm613_vm3 = vcmask 63488   ;;  %vm978_vm4 = vcmask 188544  }
   0x2   :  { %v4166_v1 = vld [vmem:[%s6289_s1] ss:$0 sm:$0xff]  ;;  %v20_v6 = vld [vmem:[%s6288_s0 + $0x8] sm:$0xff]  ;;  %v54_v16 = vld [vmem:[%s6288_s0 + $0x118] sm:$0xff]  ;;  %937 = vst.msk [vmem:[#allocation2 + $0x8] sm:$0xff] %vm935_vm0, %v4129_v42  ;;  %vm869_vm5 = vcmask 195713  }
   0x3   :  { %v4171_v2 = vld [vmem:[%s6290_s2] ss:$0 sm:$0xff]  ;;  %v122_v3 = vmul.f32 %v4166_v1, %v51_v0  ;;  %v123_v8 = vmul.f32 %v4166_v1, %v52_v5  ;;  %v91_v9 = vmul.f32 %v4166_v1, %v20_v6  ;;  %v124_v19 = vmul.f32 %v4166_v1, %v53_v14  ;;  %v21_v24 = vld [vmem:[%s6288_s0 + $0x10] sm:$0xff]  ;;  %v1144_v25 = vld [vmem:[%s6291_s3 + $0x28] sm:$0xff]  ;;  %938 = vst.msk [vmem:[#allocation2 + $0x120] sm:$0xff] %vm935_vm0, %v4129_v42 }
   0x4   :  { %v19_v4 = vld [vmem:[%s6288_s0] sm:$0xff]  ;;  %v125_v21 = vmul.f32 %v4166_v1, %v54_v16  ;;  %v22_v26 = vld [vmem:[%s6288_s0 + $0x18] sm:$0xff]  ;;  %4116 = vmatprep.subr.mxu1 %v1144_v25  ;;  %3810 = vmatprep.subr.mxu0 %v1144_v25  ;;  %v92_v29 = vmul.f32 %v4166_v1, %v21_v24  ;;  %v56_v36 = vld [vmem:[%s6288_s0 + $0x128] sm:$0xff]  ;;  %939 = vst.msk [vmem:[#allocation2 + $0x128] sm:$0xff] %vm935_vm0, %v4129_v42  ;;  %vm945_vm6 = vcmask 57344   ;;  %vm871_vm7 = vcmask 195712  }
   0x5   :  { %v90_v7 = vmul.f32 %v4166_v1, %v19_v4  ;;  %v193_v10 = vadd.f32 %v4171_v2, %v122_v3  ;;  %v194_v12 = vadd.f32 %v4171_v2, %v123_v8  ;;  %v162_v13 = vadd.f32 %v4171_v2, %v91_v9  ;;  %4119 = vmatpush3.msra.mxu1 %v1144_v25  ;;  %v1143_v27 = vld [vmem:[%s6291_s3 + $0x20] sm:$0xff]  ;;  %v1142_v32 = vld [vmem:[%s6291_s3 + $0x18] sm:$0xff]  ;;  %v24_v45 = vld [vmem:[%s6288_s0 + $0x28] sm:$0xff] }
   0x6   :  { %v195_v22 = vadd.f32 %v4171_v2, %v124_v19  ;;  %v196_v23 = vadd.f32 %v4171_v2, %v125_v21  ;;  %3811 = vmatpush3.msra.mxu0 %v1144_v25  ;;  %v93_v31 = vmul.f32 %v4166_v1, %v22_v26  ;;  %4117 = vmatprep.subr.mxu1 %v1143_v27  ;;  %v55_v35 = vld [vmem:[%s6288_s0 + $0x120] sm:$0xff]  ;;  %v57_v52 = vld [vmem:[%s6288_s0 + $0x130] sm:$0xff]  ;;  %v58_v53 = vld [vmem:[%s6288_s0 + $0x138] sm:$0xff]  ;;  %vm3008_vm8 = vcmask 130048  }
   0x7   :  { %v161_v11 = vadd.f32 %v4171_v2, %v90_v7  ;;  %v4193_v15 = vmax.f32 %v193_v10, 0.0  ;;  %v4202_v18 = vmax.f32 %v194_v12, 0.0  ;;  %v4207_v20 = vmax.f32 %v162_v13, 0.0  ;;  %3812 = vmatprep.subr.mxu0 %v1143_v27  ;;  %4120 = vmatpush3.msra.mxu1 %v1143_v27  ;;  %941 = vst.msk [vmem:[#allocation2 + $0x110] sm:$0xff] %vm935_vm0, %v4129_v42  ;;  %942 = vst.msk [vmem:[#allocation2 + $0x118] sm:$0xff] %vm935_vm0, %v4129_v42  ;;  %v23_v44 = vld [vmem:[%s6288_s0 + $0x20] sm:$0xff] }
   0x8   :  { %v4230_v28 = vmax.f32 %v195_v22, 0.0  ;;  %v4235_v30 = vmax.f32 %v196_v23, 0.0  ;;  %3813 = vmatpush3.msra.mxu0 %v1143_v27  ;;  %v163_v33 = vadd.f32 %v4171_v2, %v92_v29  ;;  %4118 = vmatprep.subr.mxu1 %v1142_v32  ;;  %v164_v34 = vadd.f32 %v4171_v2, %v93_v31  ;;  %943 = vst.msk [vmem:[#allocation2 + $0x230] sm:$0xff] %vm935_vm0, %v4129_v42  ;;  %v25_v60 = vld [vmem:[%s6288_s0 + $0x30] sm:$0xff]  ;;  %v26_v61 = vld [vmem:[%s6288_s0 + $0x38] sm:$0xff]  ;;  %v59_v6 = vld [vmem:[%s6288_s0 + $0x140] sm:$0xff] }
   0x9   :  { %v4198_v17 = vmax.f32 %v161_v11, 0.0  ;;  %417 = vrot.lane.b32.xlu0 %v4193_v15, %s4127_s9  ;;  %4121 = vmatpush3.msra.mxu1 %v1142_v32  ;;  %v126_v38 = vmul.f32 %v4166_v1, %v55_v35  ;;  %v127_v40 = vmul.f32 %v4166_v1, %v56_v36  ;;  %944 = vst.msk [vmem:[#allocation2 + $0x238] sm:$0xff] %vm935_vm0, %v4129_v42  ;;  %v60_v7 = vld [vmem:[%s6288_s0 + $0x148] sm:$0xff]  ;;  %v27_v14 = vld [vmem:[%s6288_s0 + $0x40] sm:$0xff]  ;;  %v61_v26 = vld [vmem:[%s6288_s0 + $0x150] sm:$0xff]  ;;  %vm3403_vm9 = vcmask 1040384  }
   0xa   :  { %3814 = vmatprep.subr.mxu0 %v1142_v32  ;;  %v4255_v37 = vmax.f32 %v163_v33, 0.0  ;;  %v4260_v39 = vmax.f32 %v164_v34, 0.0  ;;  %v94_v47 = vmul.f32 %v4166_v1, %v23_v44  ;;  %v95_v49 = vmul.f32 %v4166_v1, %v24_v45  ;;  %v28_v16 = vld [vmem:[%s6288_s0 + $0x48] sm:$0xff]  ;;  %v62_v27 = vld [vmem:[%s6288_s0 + $0x158] sm:$0xff]  ;;  %v29_v36 = vld [vmem:[%s6288_s0 + $0x50] sm:$0xff] }
   0xb   :  { %353 = vrot.lane.b32.xlu1 %v4198_v17, %s4127_s9  ;;  %3815 = vmatpush3.msra.mxu0 %v1142_v32  ;;  %v197_v41 = vadd.f32 %v4171_v2, %v126_v38  ;;  %v198_v43 = vadd.f32 %v4171_v2, %v127_v40  ;;  %v128_v55 = vmul.f32 %v4166_v1, %v57_v52  ;;  %v30_v38 = vld [vmem:[%s6288_s0 + $0x58] sm:$0xff]  ;;  %vm3405_vm10 = vcmask 123904  }
   0xc   :  { %v165_v50 = vadd.f32 %v4171_v2, %v94_v47  ;;  %v166_v51 = vadd.f32 %v4171_v2, %v95_v49  ;;  %v129_v57 = vmul.f32 %v4166_v1, %v58_v53  ;;  %v96_v63 = vmul.f32 %v4166_v1, %v25_v60  ;;  %v63_v49 = vld [vmem:[%s6288_s0 + $0x160] sm:$0xff]  ;;  %v32_v60 = vld [vmem:[%s6288_s0 + $0x68] sm:$0xff] }
   0xd   :  { %419 = vrot.lane.b32.xlu0 %v4202_v18, %s4127_s9  ;;  %v4293_v46 = vmax.f32 %v197_v41, 0.0  ;;  %v4298_v48 = vmax.f32 %v198_v43, 0.0  ;;  %v199_v58 = vadd.f32 %v4171_v2, %v128_v55  ;;  %v97_v3 = vmul.f32 %v4166_v1, %v26_v61 }
   0xe   :  { %v4315_v54 = vmax.f32 %v165_v50, 0.0  ;;  %v4320_v56 = vmax.f32 %v166_v51, 0.0  ;;  %v200_v59 = vadd.f32 %v4171_v2, %v129_v57  ;;  %v167_v4 = vadd.f32 %v4171_v2, %v96_v63  ;;  %v64_v50 = vld [vmem:[%s6288_s0 + $0x168] sm:$0xff] }
   0xf   :  { %355 = vrot.lane.b32.xlu1 %v4207_v20, %s4127_s9  ;;  %v4337_v62 = vmax.f32 %v199_v58, 0.0  ;;  %v168_v5 = vadd.f32 %v4171_v2, %v97_v3  ;;  %v130_v9 = vmul.f32 %v4166_v1, %v59_v6  ;;  %v131_v11 = vmul.f32 %v4166_v1, %v60_v7  ;;  %v65_v7 = vld [vmem:[%s6288_s0 + $0x170] sm:$0xff] }
  0x10   :  { %v4342_v0 = vmax.f32 %v200_v59, 0.0  ;;  %v4359_v8 = vmax.f32 %v167_v4, 0.0  ;;  %v98_v21 = vmul.f32 %v4166_v1, %v27_v14  ;;  %v99_v23 = vmul.f32 %v4166_v1, %v28_v16  ;;  %v31_v59 = vld [vmem:[%s6288_s0 + $0x60] sm:$0xff] }
  0x11   :  { %741 = vrot.lane.b32.xlu0 %v4193_v15, %s4128_s18  ;;  %v4364_v10 = vmax.f32 %v168_v5, 0.0  ;;  %v201_v12 = vadd.f32 %v4171_v2, %v130_v9  ;;  %v202_v13 = vadd.f32 %v4171_v2, %v131_v11  ;;  %v132_v31 = vmul.f32 %v4166_v1, %v61_v26  ;;  %v66_v9 = vld [vmem:[%s6288_s0 + $0x178] sm:$0xff] }
  0x12   :  { %v169_v24 = vadd.f32 %v4171_v2, %v98_v21  ;;  %v170_v25 = vadd.f32 %v4171_v2, %v99_v23  ;;  %v133_v33 = vmul.f32 %v4166_v1, %v62_v27  ;;  %v100_v41 = vmul.f32 %v4166_v1, %v29_v36  ;;  %v33_v23 = vld [vmem:[%s6288_s0 + $0x70] sm:$0xff]  ;;  %v68_v36 = vld [vmem:[%s6288_s0 + $0x188] sm:$0xff] }
  0x13   :  { %743 = vrot.lane.b32.xlu1 %v4202_v18, %s4128_s18  ;;  %v4381_v19 = vmax.f32 %v201_v12, 0.0  ;;  %v4386_v22 = vmax.f32 %v202_v13, 0.0  ;;  %v203_v34 = vadd.f32 %v4171_v2, %v132_v31  ;;  %v101_v44 = vmul.f32 %v4166_v1, %v30_v38 }
  0x14   :  { %v4403_v29 = vmax.f32 %v169_v24, 0.0  ;;  %v4408_v32 = vmax.f32 %v170_v25, 0.0  ;;  %v204_v35 = vadd.f32 %v4171_v2, %v133_v33  ;;  %v171_v45 = vadd.f32 %v4171_v2, %v100_v41  ;;  %v34_v24 = vld [vmem:[%s6288_s0 + $0x78] sm:$0xff] }
  0x15   :  { %421 = vrot.lane.b32.xlu0 %v4230_v28, %s4127_s9  ;;  %v4425_v40 = vmax.f32 %v203_v34, 0.0  ;;  %v172_v47 = vadd.f32 %v4171_v2, %v101_v44  ;;  %v134_v52 = vmul.f32 %v4166_v1, %v63_v49  ;;  %v135_v55 = vmul.f32 %v4166_v1, %v64_v50 }
  0x16   :  { %v4430_v43 = vmax.f32 %v204_v35, 0.0  ;;  %v4447_v51 = vmax.f32 %v171_v45, 0.0  ;;  %v102_v63 = vmul.f32 %v4166_v1, %v31_v59  ;;  %v103_v4 = vmul.f32 %v4166_v1, %v32_v60  ;;  %v67_v35 = vld [vmem:[%s6288_s0 + $0x180] sm:$0xff] }
  0x17   :  { %423 = vrot.lane.b32.xlu1 %v4235_v30, %s4127_s9  ;;  %v4452_v53 = vmax.f32 %v172_v47, 0.0  ;;  %v205_v57 = vadd.f32 %v4171_v2, %v134_v52  ;;  %v206_v58 = vadd.f32 %v4171_v2, %v135_v55  ;;  %v136_v12 = vmul.f32 %v4166_v1, %v65_v7  ;;  %v35_v55 = vld [vmem:[%s6288_s0 + $0x80] sm:$0xff] }
  0x18   :  { %v173_v5 = vadd.f32 %v4171_v2, %v102_v63  ;;  %v174_v6 = vadd.f32 %v4171_v2, %v103_v4  ;;  %v137_v14 = vmul.f32 %v4166_v1, %v66_v9  ;;  %v104_v26 = vmul.f32 %v4166_v1, %v33_v23  ;;  %v70_v9 = vld [vmem:[%s6288_s0 + $0x198] sm:$0xff] }
  0x19   :  { %677 = vrot.lane.b32.xlu0 %v4198_v17, %s4128_s18  ;;  %v4469_v61 = vmax.f32 %v205_v57, 0.0  ;;  %v4474_v3 = vmax.f32 %v206_v58, 0.0  ;;  %v207_v16 = vadd.f32 %v4171_v2, %v136_v12  ;;  %v105_v31 = vmul.f32 %v4166_v1, %v34_v24  ;;  %v36_v58 = vld [vmem:[%s6288_s0 + $0x88] sm:$0xff] }
  0x1a   :  { %v4491_v11 = vmax.f32 %v173_v5, 0.0  ;;  %v4496_v13 = vmax.f32 %v174_v6, 0.0  ;;  %v208_v21 = vadd.f32 %v4171_v2, %v137_v14  ;;  %v175_v33 = vadd.f32 %v4171_v2, %v104_v26  ;;  %v69_v6 = vld [vmem:[%s6288_s0 + $0x190] sm:$0xff] }
  0x1b   :  { %679 = vrot.lane.b32.xlu1 %v4207_v20, %s4128_s18  ;;  %v4513_v25 = vmax.f32 %v207_v16, 0.0  ;;  %v176_v34 = vadd.f32 %v4171_v2, %v105_v31  ;;  %v138_v41 = vmul.f32 %v4166_v1, %v67_v35  ;;  %v139_v45 = vmul.f32 %v4166_v1, %v68_v36  ;;  %v38_v36 = vld [vmem:[%s6288_s0 + $0x98] sm:$0xff] }
  0x1c   :  { %v4518_v27 = vmax.f32 %v208_v21, 0.0  ;;  %v4535_v38 = vmax.f32 %v175_v33, 0.0  ;;  %v106_v63 = vmul.f32 %v4166_v1, %v35_v55  ;;  %v140_v16 = vmul.f32 %v4166_v1, %v69_v6 }
  0x1d   :  { %357 = vrot.lane.b32.xlu0 %v4255_v37, %s4127_s9  ;;  %v4540_v44 = vmax.f32 %v176_v34, 0.0  ;;  %v209_v50 = vadd.f32 %v4171_v2, %v138_v41  ;;  %v210_v52 = vadd.f32 %v4171_v2, %v139_v45  ;;  %v141_v23 = vmul.f32 %v4166_v1, %v70_v9  ;;  %v37_v34 = vld [vmem:[%s6288_s0 + $0x90] sm:$0xff] }
  0x1f   :  { %359 = vrot.lane.b32.xlu1 %v4260_v39, %s4127_s9  ;;  %v4565_v60 = vmax.f32 %v209_v50, 0.0  ;;  %v109_v50 = vmul.f32 %v4166_v1, %v38_v36 }
  0x21   :  { %745 = vrot.lane.b32.xlu0 %v4230_v28, %s4128_s18 }
  0x23   :  { %747 = vrot.lane.b32.xlu1 %v4235_v30, %s4128_s18 }
  0x25   :  { %425 = vrot.lane.b32.xlu0 %v4293_v46, %s4127_s9 }
  0x27   :  { %427 = vrot.lane.b32.xlu1 %v4298_v48, %s4127_s9 }
  0x29   :  { %681 = vrot.lane.b32.xlu0 %v4255_v37, %s4128_s18 }
  0x2b   :  { %683 = vrot.lane.b32.xlu1 %v4260_v39, %s4128_s18 }
  0x2d   :  { %361 = vrot.lane.b32.xlu0 %v4315_v54, %s4127_s9 }
  0x2f   :  { %363 = vrot.lane.b32.xlu1 %v4320_v56, %s4127_s9 }
  0x31   :  { %749 = vrot.lane.b32.xlu0 %v4293_v46, %s4128_s18 }
  0x33   :  { %751 = vrot.lane.b32.xlu1 %v4298_v48, %s4128_s18 }
  0x35   :  { %429 = vrot.lane.b32.xlu0 %v4337_v62, %s4127_s9 }
  0x37   :  { %431 = vrot.lane.b32.xlu1 %v4342_v0, %s4127_s9 }
  0x39   :  { %685 = vrot.lane.b32.xlu0 %v4315_v54, %s4128_s18 }
  0x3b   :  { %687 = vrot.lane.b32.xlu1 %v4320_v56, %s4128_s18 }
  0x3d   :  { %365 = vrot.lane.b32.xlu0 %v4359_v8, %s4127_s9 }
  0x3f   :  { %367 = vrot.lane.b32.xlu1 %v4364_v10, %s4127_s9 }
  0x41   :  { %753 = vrot.lane.b32.xlu0 %v4337_v62, %s4128_s18 }
  0x43   :  { %755 = vrot.lane.b32.xlu1 %v4342_v0, %s4128_s18 }
  0x45   :  { %433 = vrot.lane.b32.xlu0 %v4381_v19, %s4127_s9 }
  0x47   :  { %435 = vrot.lane.b32.xlu1 %v4386_v22, %s4127_s9 }
  0x49   :  { %689 = vrot.lane.b32.xlu0 %v4359_v8, %s4128_s18 }
  0x4b   :  { %691 = vrot.lane.b32.xlu1 %v4364_v10, %s4128_s18 }
  0x4d   :  { %369 = vrot.lane.b32.xlu0 %v4403_v29, %s4127_s9 }
  0x4f   :  { %371 = vrot.lane.b32.xlu1 %v4408_v32, %s4127_s9 }
  0x51   :  { %757 = vrot.lane.b32.xlu0 %v4381_v19, %s4128_s18 }
  0x53   :  { %759 = vrot.lane.b32.xlu1 %v4386_v22, %s4128_s18 }
  0x55   :  { %437 = vrot.lane.b32.xlu0 %v4425_v40, %s4127_s9 }
  0x57   :  { %439 = vrot.lane.b32.xlu1 %v4430_v43, %s4127_s9 }
  0x59   :  { %693 = vrot.lane.b32.xlu0 %v4403_v29, %s4128_s18 }
  0x5b   :  { %695 = vrot.lane.b32.xlu1 %v4408_v32, %s4128_s18 }
  0x5d   :  { %373 = vrot.lane.b32.xlu0 %v4447_v51, %s4127_s9 }
  0x5f   :  { %375 = vrot.lane.b32.xlu1 %v4452_v53, %s4127_s9 }
  0x61   :  { %761 = vrot.lane.b32.xlu0 %v4425_v40, %s4128_s18 }
  0x63   :  { %763 = vrot.lane.b32.xlu1 %v4430_v43, %s4128_s18 }
  0x65   :  { %441 = vrot.lane.b32.xlu0 %v4469_v61, %s4127_s9 }
  0x67   :  { %443 = vrot.lane.b32.xlu1 %v4474_v3, %s4127_s9 }
  0x69   :  { %697 = vrot.lane.b32.xlu0 %v4447_v51, %s4128_s18 }
  0x6b   :  { %699 = vrot.lane.b32.xlu1 %v4452_v53, %s4128_s18 }
  0x6d   :  { %377 = vrot.lane.b32.xlu0 %v4491_v11, %s4127_s9 }
  0x6f   :  { %379 = vrot.lane.b32.xlu1 %v4496_v13, %s4127_s9 }
  0x71   :  { %765 = vrot.lane.b32.xlu0 %v4469_v61, %s4128_s18 }
  0x73   :  { %767 = vrot.lane.b32.xlu1 %v4474_v3, %s4128_s18 }
  0x75   :  { %445 = vrot.lane.b32.xlu0 %v4513_v25, %s4127_s9 }
  0x77   :  { %447 = vrot.lane.b32.xlu1 %v4518_v27, %s4127_s9 }
  0x79   :  { %701 = vrot.lane.b32.xlu0 %v4491_v11, %s4128_s18 }
  0x7b   :  { %703 = vrot.lane.b32.xlu1 %v4496_v13, %s4128_s18  ;;  %v418_v47 = vpop.permute.xlu0 %417 }
  0x7c   :  { %579 = vst.msk [vmem:[#allocation2 + $0x130] sm:$0xff] %vm546_vm1, %v418_v47  ;;  %v108_v47 = vmul.f32 %v4166_v1, %v37_v34 }
  0x7d   :  { %v354_v49 = vpop.permute.xlu1 %353  ;;  %381 = vrot.lane.b32.xlu0 %v4535_v38, %s4127_s9 }
  0x7e   :  { %547 = vst.msk [vmem:[#allocation2 + $0x10] sm:$0xff] %vm546_vm1, %v354_v49 }
  0x7f   :  { %383 = vrot.lane.b32.xlu1 %v4540_v44, %s4127_s9  ;;  %v420_v57 = vpop.permute.xlu0 %419 }
  0x80   :  { %580 = vst.msk [vmem:[#allocation2 + $0x138] sm:$0xff] %vm546_vm1, %v420_v57 }
  0x81   :  { %v356_v59 = vpop.permute.xlu1 %355  ;;  %645 = vst.msk [vmem:[#allocation2 + $0x131] sm:$0xff] %vm611_vm2, %v4193_v15  ;;  %769 = vrot.lane.b32.xlu0 %v4513_v25, %s4128_s18  ;;  %v4576_v15 = vmax.f32 %v210_v52, 0.0 }
  0x82   :  { %646 = vst.msk [vmem:[#allocation2 + $0x139] sm:$0x7f] %vm613_vm3, %v4202_v18  ;;  %v107_v18 = vmul.f32 %v4166_v1, %v36_v58 }
  0x83   :  { %548 = vst.msk [vmem:[#allocation2 + $0x18] sm:$0xff] %vm546_vm1, %v356_v59  ;;  %771 = vrot.lane.b32.xlu1 %v4518_v27, %s4128_s18  ;;  %v742_v4 = vpop.permute.xlu0 %741  ;;  %v71_v59 = vld [vmem:[%s6288_s0 + $0x1a0] sm:$0xff] }
  0x84   :  { %995 = vst.msk [vmem:[#allocation2 + $0x13f] sm:$0x1] %vm978_vm4, %v4129_v42 }
  0x85   :  { %612 = vst.msk [vmem:[#allocation2 + $0x11] sm:$0xff] %vm611_vm2, %v4198_v17  ;;  %v744_v5 = vpop.permute.xlu1 %743  ;;  %449 = vrot.lane.b32.xlu0 %v4565_v60, %s4127_s9  ;;  %v177_v17 = vadd.f32 %v4171_v2, %v106_v63 }
  0x86   :  { %614 = vst.msk [vmem:[#allocation2 + $0x19] sm:$0x7f] %vm613_vm3, %v4207_v20  ;;  %v178_v20 = vadd.f32 %v4171_v2, %v107_v18  ;;  %v72_v18 = vld [vmem:[%s6288_s0 + $0x1a8] sm:$0xff] }
  0x87   :  { %979 = vst.msk [vmem:[#allocation2 + $0x1f] sm:$0x1] %vm978_vm4, %v4129_v42  ;;  %451 = vrot.lane.b32.xlu1 %v4576_v15, %s4127_s9  ;;  %v422_v7 = vpop.permute.xlu0 %421  ;;  %v4601_v14 = vmax.f32 %v177_v17, 0.0  ;;  %v142_v17 = vmul.f32 %v4166_v1, %v71_v59  ;;  %v143_v6 = vmul.f32 %v4166_v1, %v72_v18 }
  0x88   :  { %903 = vst.msk [vmem:[#allocation2 + $0x12f] sm:$0xfe] %vm869_vm5, %v742_v4  ;;  %v4610_v21 = vmax.f32 %v178_v20, 0.0 }
  0x89   :  { %962 = vst.msk [vmem:[#allocation2 + $0x130] sm:$0x1] %vm945_vm6, %v4129_v42  ;;  %v424_v12 = vpop.permute.xlu1 %423  ;;  %705 = vrot.lane.b32.xlu0 %v4535_v38, %s4128_s18 }
  0x8a   :  { %904 = vst.msk [vmem:[#allocation2 + $0x137] sm:$0xff] %vm871_vm7, %v744_v5 }
  0x8b   :  { %581 = vst.msk [vmem:[#allocation2 + $0x140] sm:$0xff] %vm546_vm1, %v422_v7  ;;  %582 = vst.msk [vmem:[#allocation2 + $0x148] sm:$0xff] %vm546_vm1, %v424_v12  ;;  %707 = vrot.lane.b32.xlu1 %v4540_v44, %s4128_s18  ;;  %v678_v24 = vpop.permute.xlu0 %677 }
  0x8c   :  { %647 = vst.msk [vmem:[#allocation2 + $0x141] sm:$0xff] %vm611_vm2, %v4230_v28  ;;  %v211_v28 = vadd.f32 %v4171_v2, %v140_v16 }
  0x8d   :  { %648 = vst.msk [vmem:[#allocation2 + $0x149] sm:$0x7f] %vm613_vm3, %v4235_v30  ;;  %v680_v26 = vpop.permute.xlu1 %679  ;;  %385 = vrot.lane.b32.xlu0 %v4601_v14, %s4127_s9  ;;  %v212_v30 = vadd.f32 %v4171_v2, %v141_v23  ;;  %v39_v23 = vld [vmem:[%s6288_s0 + $0xa0] sm:$0xff] }
  0x8e   :  { %996 = vst.msk [vmem:[#allocation2 + $0x14f] sm:$0x1] %vm978_vm4, %v4129_v42  ;;  %v4637_v45 = vmax.f32 %v211_v28, 0.0  ;;  %v110_v28 = vmul.f32 %v4166_v1, %v39_v23 }
  0x8f   :  { %870 = vst.msk [vmem:[#allocation2 + $0xf] sm:$0xfe] %vm869_vm5, %v678_v24  ;;  %387 = vrot.lane.b32.xlu1 %v4610_v21, %s4127_s9  ;;  %v358_v35 = vpop.permute.xlu0 %357  ;;  %v4646_v49 = vmax.f32 %v212_v30, 0.0 }
  0x90   :  { %946 = vst.msk [vmem:[#allocation2 + $0x10] sm:$0x1] %vm945_vm6, %v4129_v42 }
  0x91   :  { %v1110_v31 = vld [vmem:[#allocation2 + $0x130] sm:$0xff]  ;;  %v1111_v33 = vld [vmem:[#allocation2 + $0x138] sm:$0xff]  ;;  %872 = vst.msk [vmem:[#allocation2 + $0x17] sm:$0xff] %vm871_vm7, %v680_v26  ;;  %v360_v41 = vpop.permute.xlu1 %359  ;;  %773 = vrot.lane.b32.xlu0 %v4565_v60, %s4128_s18  ;;  %v40_v26 = vld [vmem:[%s6288_s0 + $0xa8] sm:$0xff] }
  0x92   :  { %3864 = vmatprep.mubr.msk.f32.mxu1 %vm935_vm0, %v1110_v31  ;;  %549 = vst.msk [vmem:[#allocation2 + $0x20] sm:$0xff] %vm546_vm1, %v358_v35  ;;  %550 = vst.msk [vmem:[#allocation2 + $0x28] sm:$0xff] %vm546_vm1, %v360_v41  ;;  %v111_v34 = vmul.f32 %v4166_v1, %v40_v26 }
  0x93   :  { %3865 = vmatmul.mubr.msk.f32.vlgmr.msra.gmra.mxu1 %vm935_vm0, %v1111_v33  ;;  %615 = vst.msk [vmem:[#allocation2 + $0x21] sm:$0xff] %vm611_vm2, %v4255_v37  ;;  %775 = vrot.lane.b32.xlu1 %v4576_v15, %s4128_s18  ;;  %v746_v52 = vpop.permute.xlu0 %745  ;;  %v179_v37 = vadd.f32 %v4171_v2, %v108_v47 }
  0x94   :  { %616 = vst.msk [vmem:[#allocation2 + $0x29] sm:$0x7f] %vm613_vm3, %v4260_v39  ;;  %v180_v39 = vadd.f32 %v4171_v2, %v109_v50  ;;  %v73_v50 = vld [vmem:[%s6288_s0 + $0x1b0] sm:$0xff] }
  0x95   :  { %980 = vst.msk [vmem:[#allocation2 + $0x2f] sm:$0x1] %vm978_vm4, %v4129_v42  ;;  %v748_v55 = vpop.permute.xlu1 %747  ;;  %453 = vrot.lane.b32.xlu0 %v4637_v45, %s4127_s9  ;;  %v4673_v5 = vmax.f32 %v179_v37, 0.0  ;;  %v144_v37 = vmul.f32 %v4166_v1, %v73_v50 }
  0x96   :  { %905 = vst.msk [vmem:[#allocation2 + $0x13f] sm:$0xfe] %vm869_vm5, %v746_v52  ;;  %v4682_v20 = vmax.f32 %v180_v39, 0.0 }
  0x97   :  { %963 = vst.msk [vmem:[#allocation2 + $0x140] sm:$0x1] %vm945_vm6, %v4129_v42  ;;  %455 = vrot.lane.b32.xlu1 %v4646_v49, %s4127_s9  ;;  %v426_v63 = vpop.permute.xlu0 %425 }
  0x98   :  { %v1078_v57 = vld [vmem:[#allocation2 + $0x10] sm:$0xff]  ;;  %v1079_v58 = vld [vmem:[#allocation2 + $0x18] sm:$0xff]  ;;  %906 = vst.msk [vmem:[#allocation2 + $0x147] sm:$0xff] %vm871_vm7, %v748_v55 }
  0x99   :  { %3816 = vmatprep.mubr.msk.f32.mxu0 %vm935_vm0, %v1078_v57  ;;  %583 = vst.msk [vmem:[#allocation2 + $0x150] sm:$0xff] %vm546_vm1, %v426_v63  ;;  %v428_v4 = vpop.permute.xlu1 %427  ;;  %709 = vrot.lane.b32.xlu0 %v4601_v14, %s4128_s18  ;;  %v74_v55 = vld [vmem:[%s6288_s0 + $0x1b8] sm:$0xff] }
  0x9a   :  { %3817 = vmatmul.mubr.msk.f32.vlgmr.msra.gmra.mxu0 %vm935_vm0, %v1079_v58  ;;  %584 = vst.msk [vmem:[#allocation2 + $0x158] sm:$0xff] %vm546_vm1, %v428_v4  ;;  %v145_v59 = vmul.f32 %v4166_v1, %v74_v55 }
  0x9b   :  { %649 = vst.msk [vmem:[#allocation2 + $0x151] sm:$0xff] %vm611_vm2, %v4293_v46  ;;  %711 = vrot.lane.b32.xlu1 %v4610_v21, %s4128_s18  ;;  %v682_v7 = vpop.permute.xlu0 %681  ;;  %v213_v46 = vadd.f32 %v4171_v2, %v142_v17 }
  0x9c   :  { %650 = vst.msk [vmem:[#allocation2 + $0x159] sm:$0x7f] %vm613_vm3, %v4298_v48  ;;  %v214_v48 = vadd.f32 %v4171_v2, %v143_v6  ;;  %v41_v6 = vld [vmem:[%s6288_s0 + $0xb0] sm:$0xff] }
  0x9d   :  { %997 = vst.msk [vmem:[#allocation2 + $0x15f] sm:$0x1] %vm978_vm4, %v4129_v42  ;;  %v684_v9 = vpop.permute.xlu1 %683  ;;  %389 = vrot.lane.b32.xlu0 %v4673_v5, %s4127_s9  ;;  %v4709_v33 = vmax.f32 %v213_v46, 0.0  ;;  %v112_v46 = vmul.f32 %v4166_v1, %v41_v6 }
  0x9e   :  { %873 = vst.msk [vmem:[#allocation2 + $0x1f] sm:$0xfe] %vm869_vm5, %v682_v7  ;;  %v4718_v30 = vmax.f32 %v214_v48, 0.0 }
  0x9f   :  { %v1112_v12 = vld [vmem:[#allocation2 + $0x140] sm:$0xff]  ;;  %v1113_v16 = vld [vmem:[#allocation2 + $0x148] sm:$0xff]  ;;  %947 = vst.msk [vmem:[#allocation2 + $0x20] sm:$0x1] %vm945_vm6, %v4129_v42  ;;  %391 = vrot.lane.b32.xlu1 %v4682_v20, %s4127_s9  ;;  %v362_v24 = vpop.permute.xlu0 %361 }
  0xa0   :  { %874 = vst.msk [vmem:[#allocation2 + $0x27] sm:$0xff] %vm871_vm7, %v684_v9  ;;  %3867 = vmatprep.mubr.msk.f32.mxu1 %vm935_vm0, %v1112_v12  ;;  %v42_v9 = vld [vmem:[%s6288_s0 + $0xb8] sm:$0xff] }
  0xa1   :  { %3868 = vmatmul.mubr.msk.f32.gmra.mxu1 %vm935_vm0, %v1113_v16  ;;  %551 = vst.msk [vmem:[#allocation2 + $0x30] sm:$0xff] %vm546_vm1, %v362_v24  ;;  %v364_v31 = vpop.permute.xlu1 %363  ;;  %777 = vrot.lane.b32.xlu0 %v4637_v45, %s4128_s18  ;;  %v113_v23 = vmul.f32 %v4166_v1, %v42_v9  ;;  %v1077_v9 = vld [vmem:[%s6291_s3 + $0x10] sm:$0xff] }
  0xa2   :  { %552 = vst.msk [vmem:[#allocation2 + $0x38] sm:$0xff] %vm546_vm1, %v364_v31  ;;  %3912 = vmatprep.subr.mxu1 %v1077_v9 }
  0xa3   :  { %617 = vst.msk [vmem:[#allocation2 + $0x31] sm:$0xff] %vm611_vm2, %v4315_v54  ;;  %779 = vrot.lane.b32.xlu1 %v4646_v49, %s4128_s18  ;;  %v750_v35 = vpop.permute.xlu0 %749  ;;  %v181_v54 = vadd.f32 %v4171_v2, %v110_v28  ;;  %3913 = vmatpush3.msra.mxu1 %v1077_v9  ;;  %v79_v9 = vld [vmem:[%s6288_s0 + $0x1e0] sm:$0xff] }
  0xa4   :  { %618 = vst.msk [vmem:[#allocation2 + $0x39] sm:$0x7f] %vm613_vm3, %v4320_v56  ;;  %v182_v56 = vadd.f32 %v4171_v2, %v111_v34  ;;  %v75_v34 = vld [vmem:[%s6288_s0 + $0x1c0] sm:$0xff] }
  0xa5   :  { %981 = vst.msk [vmem:[#allocation2 + $0x3f] sm:$0x1] %vm978_vm4, %v4129_v42  ;;  %v752_v36 = vpop.permute.xlu1 %751  ;;  %457 = vrot.lane.b32.xlu0 %v4709_v33, %s4127_s9  ;;  %v4745_v58 = vmax.f32 %v181_v54, 0.0  ;;  %v146_v54 = vmul.f32 %v4166_v1, %v75_v34 }
  0xa6   :  { %907 = vst.msk [vmem:[#allocation2 + $0x14f] sm:$0xfe] %vm869_vm5, %v750_v35  ;;  %v4754_v39 = vmax.f32 %v182_v56, 0.0 }
  0xa7   :  { %v1080_v41 = vld [vmem:[#allocation2 + $0x20] sm:$0xff]  ;;  %v1081_v47 = vld [vmem:[#allocation2 + $0x28] sm:$0xff]  ;;  %964 = vst.msk [vmem:[#allocation2 + $0x150] sm:$0x1] %vm945_vm6, %v4129_v42  ;;  %459 = vrot.lane.b32.xlu1 %v4718_v30, %s4127_s9  ;;  %v430_v52 = vpop.permute.xlu0 %429 }
  0xa8   :  { %908 = vst.msk [vmem:[#allocation2 + $0x157] sm:$0xff] %vm871_vm7, %v752_v36  ;;  %3819 = vmatprep.mubr.msk.f32.mxu0 %vm935_vm0, %v1080_v41  ;;  %v76_v36 = vld [vmem:[%s6288_s0 + $0x1c8] sm:$0xff] }
  0xa9   :  { %3820 = vmatmul.mubr.msk.f32.gmra.mxu0 %vm935_vm0, %v1081_v47  ;;  %585 = vst.msk [vmem:[#allocation2 + $0x160] sm:$0xff] %vm546_vm1, %v430_v52  ;;  %v432_v57 = vpop.permute.xlu1 %431  ;;  %713 = vrot.lane.b32.xlu0 %v4673_v5, %s4128_s18  ;;  %v147_v50 = vmul.f32 %v4166_v1, %v76_v36 }
  0xaa   :  { %586 = vst.msk [vmem:[#allocation2 + $0x168] sm:$0xff] %vm546_vm1, %v432_v57 }
  0xab   :  { %651 = vst.msk [vmem:[#allocation2 + $0x161] sm:$0xff] %vm611_vm2, %v4337_v62  ;;  %715 = vrot.lane.b32.xlu1 %v4682_v20, %s4128_s18  ;;  %v686_v63 = vpop.permute.xlu0 %685  ;;  %v215_v62 = vadd.f32 %v4171_v2, %v144_v37 }
  0xac   :  { %652 = vst.msk [vmem:[#allocation2 + $0x169] sm:$0x7f] %vm613_vm3, %v4342_v0  ;;  %v216_v0 = vadd.f32 %v4171_v2, %v145_v59  ;;  %v43_v59 = vld [vmem:[%s6288_s0 + $0xc0] sm:$0xff] }
  0xad   :  { %998 = vst.msk [vmem:[#allocation2 + $0x16f] sm:$0x1] %vm978_vm4, %v4129_v42  ;;  %v688_v18 = vpop.permute.xlu1 %687  ;;  %393 = vrot.lane.b32.xlu0 %v4745_v58, %s4127_s9  ;;  %v4781_v16 = vmax.f32 %v215_v62, 0.0  ;;  %v114_v62 = vmul.f32 %v4166_v1, %v43_v59 }
  0xae   :  { %875 = vst.msk [vmem:[#allocation2 + $0x2f] sm:$0xfe] %vm869_vm5, %v686_v63  ;;  %v4790_v48 = vmax.f32 %v216_v0, 0.0 }
  0xaf   :  { %v1114_v4 = vld [vmem:[#allocation2 + $0x150] sm:$0xff]  ;;  %v1115_v17 = vld [vmem:[#allocation2 + $0x158] sm:$0xff]  ;;  %948 = vst.msk [vmem:[#allocation2 + $0x30] sm:$0x1] %vm945_vm6, %v4129_v42  ;;  %395 = vrot.lane.b32.xlu1 %v4754_v39, %s4127_s9  ;;  %v366_v7 = vpop.permute.xlu0 %365 }
  0xb0   :  { %876 = vst.msk [vmem:[#allocation2 + $0x37] sm:$0xff] %vm871_vm7, %v688_v18  ;;  %3870 = vmatprep.mubr.msk.f32.mxu1 %vm935_vm0, %v1114_v4  ;;  %v44_v18 = vld [vmem:[%s6288_s0 + $0xc8] sm:$0xff] }
  0xb1   :  { %3871 = vmatmul.mubr.msk.f32.gmra.mxu1 %vm935_vm0, %v1115_v17  ;;  %553 = vst.msk [vmem:[#allocation2 + $0x40] sm:$0xff] %vm546_vm1, %v366_v7  ;;  %v368_v12 = vpop.permute.xlu1 %367  ;;  %781 = vrot.lane.b32.xlu0 %v4709_v33, %s4128_s18  ;;  %v115_v6 = vmul.f32 %v4166_v1, %v44_v18 }
  0xb2   :  { %554 = vst.msk [vmem:[#allocation2 + $0x48] sm:$0xff] %vm546_vm1, %v368_v12 }
  0xb3   :  { %619 = vst.msk [vmem:[#allocation2 + $0x41] sm:$0xff] %vm611_vm2, %v4359_v8  ;;  %783 = vrot.lane.b32.xlu1 %v4718_v30, %s4128_s18  ;;  %v754_v24 = vpop.permute.xlu0 %753  ;;  %v183_v8 = vadd.f32 %v4171_v2, %v112_v46  ;;  %v185_v46 = vadd.f32 %v4171_v2, %v114_v62 }
  0xb4   :  { %620 = vst.msk [vmem:[#allocation2 + $0x49] sm:$0x7f] %vm613_vm3, %v4364_v10  ;;  %v184_v10 = vadd.f32 %v4171_v2, %v113_v23  ;;  %v2366_v23 = vld [vmem:[%s6291_s3 + $0x40] sm:$0xff] }
  0xb5   :  { %982 = vst.msk [vmem:[#allocation2 + $0x4f] sm:$0x1] %vm978_vm4, %v4129_v42  ;;  %v756_v26 = vpop.permute.xlu1 %755  ;;  %461 = vrot.lane.b32.xlu0 %v4781_v16, %s4127_s9  ;;  %v4817_v47 = vmax.f32 %v183_v8, 0.0  ;;  %4014 = vmatprep.subr.mxu0 %v2366_v23 }
  0xb6   :  { %909 = vst.msk [vmem:[#allocation2 + $0x15f] sm:$0xfe] %vm869_vm5, %v754_v24  ;;  %v4826_v56 = vmax.f32 %v184_v10, 0.0  ;;  %v186_v24 = vadd.f32 %v4171_v2, %v115_v6  ;;  %4015 = vmatpush3.msra.mxu0 %v2366_v23 }
  0xb7   :  { %v1082_v31 = vld [vmem:[#allocation2 + $0x30] sm:$0xff]  ;;  %v1083_v28 = vld [vmem:[#allocation2 + $0x38] sm:$0xff]  ;;  %965 = vst.msk [vmem:[#allocation2 + $0x160] sm:$0x1] %vm945_vm6, %v4129_v42  ;;  %463 = vrot.lane.b32.xlu1 %v4790_v48, %s4127_s9  ;;  %v434_v35 = vpop.permute.xlu0 %433 }
  0xb8   :  { %910 = vst.msk [vmem:[#allocation2 + $0x167] sm:$0xff] %vm871_vm7, %v756_v26  ;;  %3822 = vmatprep.mubr.msk.f32.mxu0 %vm935_vm0, %v1082_v31  ;;  %v77_v26 = vld [vmem:[%s6288_s0 + $0x1d0] sm:$0xff]  ;;  %v4904_v34 = vmax.f32 %v186_v24, 0.0 }
  0xb9   :  { %3823 = vmatmul.mubr.msk.f32.gmra.mxu0 %vm935_vm0, %v1083_v28  ;;  %587 = vst.msk [vmem:[#allocation2 + $0x170] sm:$0xff] %vm546_vm1, %v434_v35  ;;  %v436_v41 = vpop.permute.xlu1 %435  ;;  %717 = vrot.lane.b32.xlu0 %v4745_v58, %s4128_s18  ;;  %v78_v28 = vld [vmem:[%s6288_s0 + $0x1d8] sm:$0xff]  ;;  %v148_v10 = vmul.f32 %v4166_v1, %v77_v26 }
  0xba   :  { %588 = vst.msk [vmem:[#allocation2 + $0x178] sm:$0xff] %vm546_vm1, %v436_v41  ;;  %v149_v35 = vmul.f32 %v4166_v1, %v78_v28  ;;  %v4919_v1 = vld [vmem:[%s6290_s2] ss:$0 sm:$0xff]  ;;  %v1076_v28 = vld [vmem:[%s6291_s3 + $0x8] sm:$0xff] }
  0xbb   :  { %653 = vst.msk [vmem:[#allocation2 + $0x171] sm:$0xff] %vm611_vm2, %v4381_v19  ;;  %719 = vrot.lane.b32.xlu1 %v4754_v39, %s4128_s18  ;;  %v690_v52 = vpop.permute.xlu0 %689  ;;  %v217_v19 = vadd.f32 %v4171_v2, %v146_v54  ;;  %3914 = vmatprep.subr.mxu1 %v1076_v28 }
  0xbc   :  { %654 = vst.msk [vmem:[#allocation2 + $0x179] sm:$0x7f] %vm613_vm3, %v4386_v22  ;;  %v218_v22 = vadd.f32 %v4171_v2, %v147_v50  ;;  %v4895_v2 = vmax.f32 %v185_v46, 0.0  ;;  %3915 = vmatpush3.msra.mxu1 %v1076_v28 }
  0xbd   :  { %999 = vst.msk [vmem:[#allocation2 + $0x17f] sm:$0x1] %vm978_vm4, %v4129_v42  ;;  %v692_v55 = vpop.permute.xlu1 %691  ;;  %397 = vrot.lane.b32.xlu0 %v4817_v47, %s4127_s9  ;;  %v4853_v17 = vmax.f32 %v217_v19, 0.0 }
  0xbe   :  { %877 = vst.msk [vmem:[#allocation2 + $0x3f] sm:$0xfe] %vm869_vm5, %v690_v52  ;;  %v4862_v0 = vmax.f32 %v218_v22, 0.0  ;;  %v45_v52 = vld [vmem:[%s6288_s0 + $0xd0] sm:$0xff]  ;;  %v4941_v22 = vld [vmem:[%s6289_s1] ss:$0 sm:$0xff] }
  0xbf   :  { %v1116_v57 = vld [vmem:[#allocation2 + $0x160] sm:$0xff]  ;;  %v1117_v37 = vld [vmem:[#allocation2 + $0x168] sm:$0xff]  ;;  %949 = vst.msk [vmem:[#allocation2 + $0x40] sm:$0x1] %vm945_vm6, %v4129_v42  ;;  %399 = vrot.lane.b32.xlu1 %v4826_v56, %s4127_s9  ;;  %v370_v63 = vpop.permute.xlu0 %369  ;;  %v116_v59 = vmul.f32 %v4941_v22, %v45_v52  ;;  %v150_v23 = vmul.f32 %v4941_v22, %v79_v9 }
  0xc0   :  { %878 = vst.msk [vmem:[#allocation2 + $0x47] sm:$0xff] %vm871_vm7, %v692_v55  ;;  %3873 = vmatprep.mubr.msk.f32.mxu1 %vm935_vm0, %v1116_v57  ;;  %v46_v57 = vld [vmem:[%s6288_s0 + $0xd8] sm:$0xff] }
  0xc1   :  { %3874 = vmatmul.mubr.msk.f32.gmra.mxu1 %vm935_vm0, %v1117_v37  ;;  %555 = vst.msk [vmem:[#allocation2 + $0x50] sm:$0xff] %vm546_vm1, %v370_v63  ;;  %v372_v4 = vpop.permute.xlu1 %371  ;;  %785 = vrot.lane.b32.xlu0 %v4781_v16, %s4128_s18  ;;  %v117_v18 = vmul.f32 %v4941_v22, %v46_v57 }
  0xc2   :  { %556 = vst.msk [vmem:[#allocation2 + $0x58] sm:$0xff] %vm546_vm1, %v372_v4 }
  0xc3   :  { %621 = vst.msk [vmem:[#allocation2 + $0x51] sm:$0xff] %vm611_vm2, %v4403_v29  ;;  %787 = vrot.lane.b32.xlu1 %v4790_v48, %s4128_s18  ;;  %v758_v7 = vpop.permute.xlu0 %757 }
  0xc4   :  { %622 = vst.msk [vmem:[#allocation2 + $0x59] sm:$0x7f] %vm613_vm3, %v4408_v32 }
  0xc5   :  { %983 = vst.msk [vmem:[#allocation2 + $0x5f] sm:$0x1] %vm978_vm4, %v4129_v42  ;;  %v760_v29 = vpop.permute.xlu1 %759  ;;  %465 = vrot.lane.b32.xlu0 %v4853_v17, %s4127_s9 }
  0xc6   :  { %911 = vst.msk [vmem:[#allocation2 + $0x16f] sm:$0xfe] %vm869_vm5, %v758_v7  ;;  %v188_v7 = vadd.f32 %v4919_v1, %v117_v18 }
  0xc7   :  { %v1084_v12 = vld [vmem:[#allocation2 + $0x40] sm:$0xff]  ;;  %v1085_v32 = vld [vmem:[#allocation2 + $0x48] sm:$0xff]  ;;  %966 = vst.msk [vmem:[#allocation2 + $0x170] sm:$0x1] %vm945_vm6, %v4129_v42  ;;  %467 = vrot.lane.b32.xlu1 %v4862_v0, %s4127_s9  ;;  %v438_v31 = vpop.permute.xlu0 %437 }
  0xc8   :  { %912 = vst.msk [vmem:[#allocation2 + $0x177] sm:$0xff] %vm871_vm7, %v760_v29  ;;  %3825 = vmatprep.mubr.msk.f32.mxu0 %vm935_vm0, %v1084_v12  ;;  %v80_v12 = vld [vmem:[%s6288_s0 + $0x1e8] sm:$0xff]  ;;  %v4992_v24 = vmax.f32 %v188_v7, 0.0  ;;  %v82_v7 = vld [vmem:[%s6288_s0 + $0x1f8] sm:$0xff] }
  0xc9   :  { %3826 = vmatmul.mubr.msk.f32.gmra.mxu0 %vm935_vm0, %v1085_v32  ;;  %589 = vst.msk [vmem:[#allocation2 + $0x180] sm:$0xff] %vm546_vm1, %v438_v31  ;;  %v440_v8 = vpop.permute.xlu1 %439  ;;  %721 = vrot.lane.b32.xlu0 %v4817_v47, %s4128_s18  ;;  %v151_v26 = vmul.f32 %v4941_v22, %v80_v12 }
  0xca   :  { %590 = vst.msk [vmem:[#allocation2 + $0x188] sm:$0xff] %vm546_vm1, %v440_v8 }
  0xcb   :  { %655 = vst.msk [vmem:[#allocation2 + $0x181] sm:$0xff] %vm611_vm2, %v4425_v40  ;;  %723 = vrot.lane.b32.xlu1 %v4826_v56, %s4128_s18  ;;  %v694_v36 = vpop.permute.xlu0 %693  ;;  %v219_v40 = vadd.f32 %v4919_v1, %v148_v10  ;;  %v221_v10 = vadd.f32 %v4919_v1, %v150_v23  ;;  %v153_v23 = vmul.f32 %v4941_v22, %v82_v7 }
  0xcc   :  { %656 = vst.msk [vmem:[#allocation2 + $0x189] sm:$0x7f] %vm613_vm3, %v4430_v43  ;;  %v220_v43 = vadd.f32 %v4919_v1, %v149_v35  ;;  %v2365_v35 = vld [vmem:[%s6291_s3 + $0x38] sm:$0xff] }
  0xcd   :  { %1000 = vst.msk [vmem:[#allocation2 + $0x18f] sm:$0x1] %vm978_vm4, %v4129_v42  ;;  %v696_v41 = vpop.permute.xlu1 %695  ;;  %401 = vrot.lane.b32.xlu0 %v4895_v2, %s4127_s9  ;;  %v4936_v19 = vmax.f32 %v219_v40, 0.0  ;;  %4016 = vmatprep.subr.mxu0 %v2365_v35 }
  0xce   :  { %879 = vst.msk [vmem:[#allocation2 + $0x4f] sm:$0xfe] %vm869_vm5, %v694_v36  ;;  %v4950_v63 = vmax.f32 %v220_v43, 0.0  ;;  %v222_v36 = vadd.f32 %v4919_v1, %v151_v26  ;;  %4017 = vmatpush3.msra.mxu0 %v2365_v35  ;;  %v5025_v43 = vmax.f32 %v221_v10, 0.0  ;;  %v50_v35 = vld [vmem:[%s6288_s0 + $0xf8] sm:$0xff] }
  0xcf   :  { %v1118_v54 = vld [vmem:[#allocation2 + $0x170] sm:$0xff]  ;;  %v1119_v50 = vld [vmem:[#allocation2 + $0x178] sm:$0xff]  ;;  %950 = vst.msk [vmem:[#allocation2 + $0x50] sm:$0x1] %vm945_vm6, %v4129_v42  ;;  %403 = vrot.lane.b32.xlu1 %v4904_v34, %s4127_s9  ;;  %v374_v55 = vpop.permute.xlu0 %373 }
  0xd0   :  { %880 = vst.msk [vmem:[#allocation2 + $0x57] sm:$0xff] %vm871_vm7, %v696_v41  ;;  %3876 = vmatprep.mubr.msk.f32.mxu1 %vm935_vm0, %v1118_v54  ;;  %v47_v41 = vld [vmem:[%s6288_s0 + $0xe0] sm:$0xff] }
  0xd1   :  { %3877 = vmatmul.mubr.msk.f32.gmra.mxu1 %vm935_vm0, %v1119_v50  ;;  %557 = vst.msk [vmem:[#allocation2 + $0x60] sm:$0xff] %vm546_vm1, %v374_v55  ;;  %v376_v37 = vpop.permute.xlu1 %375  ;;  %789 = vrot.lane.b32.xlu0 %v4853_v17, %s4128_s18  ;;  %v48_v50 = vld [vmem:[%s6288_s0 + $0xe8] sm:$0xff]  ;;  %v118_v52 = vmul.f32 %v4941_v22, %v47_v41  ;;  %v5034_v55 = vmax.f32 %v222_v36, 0.0  ;;  %v2364_v41 = vld [vmem:[%s6291_s3 + $0x30] sm:$0xff] }
  0xd2   :  { %558 = vst.msk [vmem:[#allocation2 + $0x68] sm:$0xff] %vm546_vm1, %v376_v37  ;;  %v119_v57 = vmul.f32 %v4941_v22, %v48_v50  ;;  %4018 = vmatprep.subr.mxu0 %v2364_v41 }
  0xd3   :  { %623 = vst.msk [vmem:[#allocation2 + $0x61] sm:$0xff] %vm611_vm2, %v4447_v51  ;;  %791 = vrot.lane.b32.xlu1 %v4862_v0, %s4128_s18  ;;  %v762_v4 = vpop.permute.xlu0 %761  ;;  %4019 = vmatpush3.msra.mxu0 %v2364_v41 }
  0xd4   :  { %624 = vst.msk [vmem:[#allocation2 + $0x69] sm:$0x7f] %vm613_vm3, %v4452_v53  ;;  %v187_v53 = vadd.f32 %v4919_v1, %v116_v59 }
  0xd5   :  { %984 = vst.msk [vmem:[#allocation2 + $0x6f] sm:$0x1] %vm978_vm4, %v4129_v42  ;;  %v764_v62 = vpop.permute.xlu1 %763  ;;  %469 = vrot.lane.b32.xlu0 %v4936_v19, %s4127_s9 }
  0xd6   :  { %913 = vst.msk [vmem:[#allocation2 + $0x17f] sm:$0xfe] %vm869_vm5, %v762_v4  ;;  %v4983_v46 = vmax.f32 %v187_v53, 0.0  ;;  %v190_v4 = vadd.f32 %v4919_v1, %v119_v57 }
  0xd7   :  { %v4956_v6 = vld [vmem:[#allocation2 + $0x50] sm:$0xff]  ;;  %v4958_v51 = vld [vmem:[#allocation2 + $0x58] sm:$0xff]  ;;  %967 = vst.msk [vmem:[#allocation2 + $0x180] sm:$0x1] %vm945_vm6, %v4129_v42  ;;  %471 = vrot.lane.b32.xlu1 %v4950_v63, %s4127_s9  ;;  %v442_v29 = vpop.permute.xlu0 %441 }
  0xd8   :  { %914 = vst.msk [vmem:[#allocation2 + $0x187] sm:$0xff] %vm871_vm7, %v764_v62  ;;  %3828 = vmatprep.mubr.msk.f32.mxu0 %vm935_vm0, %v4956_v6  ;;  %v81_v62 = vld [vmem:[%s6288_s0 + $0x1f0] sm:$0xff] }
  0xd9   :  { %3829 = vmatmul.mubr.msk.f32.gmra.mxu0 %vm935_vm0, %v4958_v51  ;;  %591 = vst.msk [vmem:[#allocation2 + $0x190] sm:$0xff] %vm546_vm1, %v442_v29  ;;  %v444_v32 = vpop.permute.xlu1 %443  ;;  %725 = vrot.lane.b32.xlu0 %v4895_v2, %s4128_s18  ;;  %v152_v12 = vmul.f32 %v4941_v22, %v81_v62 }
  0xda   :  { %592 = vst.msk [vmem:[#allocation2 + $0x198] sm:$0xff] %vm546_vm1, %v444_v32  ;;  %v5076_v32 = vmax.f32 %v190_v4, 0.0 }
  0xdb   :  { %657 = vst.msk [vmem:[#allocation2 + $0x191] sm:$0xff] %vm611_vm2, %v4469_v61  ;;  %727 = vrot.lane.b32.xlu1 %v4904_v34, %s4128_s18  ;;  %v698_v31 = vpop.permute.xlu0 %697 }
  0xdc   :  { %658 = vst.msk [vmem:[#allocation2 + $0x199] sm:$0x7f] %vm613_vm3, %v4474_v3 }
  0xdd   :  { %1001 = vst.msk [vmem:[#allocation2 + $0x19f] sm:$0x1] %vm978_vm4, %v4129_v42  ;;  %v700_v61 = vpop.permute.xlu1 %699  ;;  %405 = vrot.lane.b32.xlu0 %v4983_v46, %s4127_s9 }
  0xde   :  { %881 = vst.msk [vmem:[#allocation2 + $0x5f] sm:$0xfe] %vm869_vm5, %v698_v31 }
  0xdf   :  { %v1120_v8 = vld [vmem:[#allocation2 + $0x180] sm:$0xff]  ;;  %v1121_v3 = vld [vmem:[#allocation2 + $0x188] sm:$0xff]  ;;  %951 = vst.msk [vmem:[#allocation2 + $0x60] sm:$0x1] %vm945_vm6, %v4129_v42  ;;  %407 = vrot.lane.b32.xlu1 %v4992_v24, %s4127_s9  ;;  %v378_v54 = vpop.permute.xlu0 %377 }
  0xe0   :  { %882 = vst.msk [vmem:[#allocation2 + $0x67] sm:$0xff] %vm871_vm7, %v700_v61  ;;  %3879 = vmatprep.mubr.msk.f32.mxu1 %vm935_vm0, %v1120_v8  ;;  %v49_v8 = vld [vmem:[%s6288_s0 + $0xf0] sm:$0xff] }
  0xe1   :  { %3880 = vmatmul.mubr.msk.f32.gmra.mxu1 %vm935_vm0, %v1121_v3  ;;  %559 = vst.msk [vmem:[#allocation2 + $0x70] sm:$0xff] %vm546_vm1, %v378_v54  ;;  %v380_v40 = vpop.permute.xlu1 %379  ;;  %793 = vrot.lane.b32.xlu0 %v4936_v19, %s4128_s18  ;;  %v1075_v3 = vld [vmem:[%s6291_s3] sm:$0xff]  ;;  %v120_v50 = vmul.f32 %v4941_v22, %v49_v8 }
  0xe2   :  { %560 = vst.msk [vmem:[#allocation2 + $0x78] sm:$0xff] %vm546_vm1, %v380_v40  ;;  %3916 = vmatprep.subr.mxu1 %v1075_v3 }
  0xe3   :  { %625 = vst.msk [vmem:[#allocation2 + $0x71] sm:$0xff] %vm611_vm2, %v4491_v11  ;;  %795 = vrot.lane.b32.xlu1 %v4950_v63, %s4128_s18  ;;  %v766_v37 = vpop.permute.xlu0 %765  ;;  %3917 = vmatpush3.msra.mxu1 %v1075_v3 }
  0xe4   :  { %626 = vst.msk [vmem:[#allocation2 + $0x79] sm:$0x7f] %vm613_vm3, %v4496_v13  ;;  %v189_v13 = vadd.f32 %v4919_v1, %v118_v52  ;;  %v121_v52 = vmul.f32 %v4941_v22, %v50_v35 }
  0xe5   :  { %985 = vst.msk [vmem:[#allocation2 + $0x7f] sm:$0x1] %vm978_vm4, %v4129_v42  ;;  %v768_v59 = vpop.permute.xlu1 %767  ;;  %473 = vrot.lane.b32.xlu0 %v5025_v43, %s4127_s9 }
  0xe6   :  { %915 = vst.msk [vmem:[#allocation2 + $0x18f] sm:$0xfe] %vm869_vm5, %v766_v37  ;;  %v5067_v29 = vmax.f32 %v189_v13, 0.0  ;;  %v192_v22 = vadd.f32 %v4919_v1, %v121_v52 }
  0xe7   :  { %v5040_v18 = vld [vmem:[#allocation2 + $0x60] sm:$0xff]  ;;  %v5042_v11 = vld [vmem:[#allocation2 + $0x68] sm:$0xff]  ;;  %968 = vst.msk [vmem:[#allocation2 + $0x190] sm:$0x1] %vm945_vm6, %v4129_v42  ;;  %475 = vrot.lane.b32.xlu1 %v5034_v55, %s4127_s9  ;;  %v446_v53 = vpop.permute.xlu0 %445 }
  0xe8   :  { %916 = vst.msk [vmem:[#allocation2 + $0x197] sm:$0xff] %vm871_vm7, %v768_v59  ;;  %3831 = vmatprep.mubr.msk.f32.mxu0 %vm935_vm0, %v5040_v18 }
  0xe9   :  { %3832 = vmatmul.mubr.msk.f32.gmra.mxu0 %vm935_vm0, %v5042_v11  ;;  %593 = vst.msk [vmem:[#allocation2 + $0x1a0] sm:$0xff] %vm546_vm1, %v446_v53  ;;  %v448_v9 = vpop.permute.xlu1 %447  ;;  %729 = vrot.lane.b32.xlu0 %v4983_v46, %s4128_s18 }
  0xea   :  { %594 = vst.msk [vmem:[#allocation2 + $0x1a8] sm:$0xff] %vm546_vm1, %v448_v9 }
  0xeb   :  { %659 = vst.msk [vmem:[#allocation2 + $0x1a1] sm:$0xff] %vm611_vm2, %v4513_v25  ;;  %731 = vrot.lane.b32.xlu1 %v4992_v24, %s4128_s18  ;;  %v702_v26 = vpop.permute.xlu0 %701  ;;  %v223_v25 = vadd.f32 %v4919_v1, %v152_v12 }
  0xec   :  { %660 = vst.msk [vmem:[#allocation2 + $0x1a9] sm:$0x7f] %vm613_vm3, %v4518_v27  ;;  %v224_v27 = vadd.f32 %v4919_v1, %v153_v23 }
  0xed   :  { %1002 = vst.msk [vmem:[#allocation2 + $0x1af] sm:$0x1] %vm978_vm4, %v4129_v42  ;;  %v704_v31 = vpop.permute.xlu1 %703  ;;  %409 = vrot.lane.b32.xlu0 %v5067_v29, %s4127_s9  ;;  %v5109_v54 = vmax.f32 %v223_v25, 0.0 }
  0xee   :  { %883 = vst.msk [vmem:[#allocation2 + $0x6f] sm:$0xfe] %vm869_vm5, %v702_v26  ;;  %v5118_v40 = vmax.f32 %v224_v27, 0.0 }
  0xef   :  { %v1122_v28 = vld [vmem:[#allocation2 + $0x190] sm:$0xff]  ;;  %v1123_v61 = vld [vmem:[#allocation2 + $0x198] sm:$0xff]  ;;  %952 = vst.msk [vmem:[#allocation2 + $0x70] sm:$0x1] %vm945_vm6, %v4129_v42  ;;  %411 = vrot.lane.b32.xlu1 %v5076_v32, %s4127_s9  ;;  %v382_v10 = vpop.permute.xlu0 %381 }
  0xf0   :  { %884 = vst.msk [vmem:[#allocation2 + $0x77] sm:$0xff] %vm871_vm7, %v704_v31  ;;  %3882 = vmatprep.mubr.msk.f32.mxu1 %vm935_vm0, %v1122_v28 }
  0xf1   :  { %3883 = vmatmul.mubr.msk.f32.gmra.mxu1 %vm935_vm0, %v1123_v61  ;;  %561 = vst.msk [vmem:[#allocation2 + $0x80] sm:$0xff] %vm546_vm1, %v382_v10  ;;  %v384_v36 = vpop.permute.xlu1 %383  ;;  %797 = vrot.lane.b32.xlu0 %v5025_v43, %s4128_s18 }
  0xf2   :  { %562 = vst.msk [vmem:[#allocation2 + $0x88] sm:$0xff] %vm546_vm1, %v384_v36 }
  0xf3   :  { %627 = vst.msk [vmem:[#allocation2 + $0x81] sm:$0xff] %vm611_vm2, %v4535_v38  ;;  %799 = vrot.lane.b32.xlu1 %v5034_v55, %s4128_s18  ;;  %v770_v57 = vpop.permute.xlu0 %769 }
  0xf4   :  { %628 = vst.msk [vmem:[#allocation2 + $0x89] sm:$0x7f] %vm613_vm3, %v4540_v44  ;;  %v191_v44 = vadd.f32 %v4919_v1, %v120_v50  ;;  %v5153_v1 = vmax.f32 %v192_v22, 0.0 }
  0xf5   :  { %986 = vst.msk [vmem:[#allocation2 + $0x8f] sm:$0x1] %vm978_vm4, %v4129_v42  ;;  %v772_v37 = vpop.permute.xlu1 %771  ;;  %477 = vrot.lane.b32.xlu0 %v5109_v54, %s4127_s9 }
  0xf6   :  { %917 = vst.msk [vmem:[#allocation2 + $0x19f] sm:$0xfe] %vm869_vm5, %v770_v57  ;;  %v5145_v62 = vmax.f32 %v191_v44, 0.0 }
  0xf7   :  { %v5124_v59 = vld [vmem:[#allocation2 + $0x70] sm:$0xff]  ;;  %v5126_v38 = vld [vmem:[#allocation2 + $0x78] sm:$0xff]  ;;  %969 = vst.msk [vmem:[#allocation2 + $0x1a0] sm:$0x1] %vm945_vm6, %v4129_v42  ;;  %479 = vrot.lane.b32.xlu1 %v5118_v40, %s4127_s9  ;;  %v450_v13 = vpop.permute.xlu0 %449 }
  0xf8   :  { %918 = vst.msk [vmem:[#allocation2 + $0x1a7] sm:$0xff] %vm871_vm7, %v772_v37  ;;  %3834 = vmatprep.mubr.msk.f32.mxu0 %vm935_vm0, %v5124_v59 }
  0xf9   :  { %3835 = vmatmul.mubr.msk.f32.gmra.mxu0 %vm935_vm0, %v5126_v38  ;;  %595 = vst.msk [vmem:[#allocation2 + $0x1b0] sm:$0xff] %vm546_vm1, %v450_v13  ;;  %v452_v4 = vpop.permute.xlu1 %451  ;;  %733 = vrot.lane.b32.xlu0 %v5067_v29, %s4128_s18 }
  0xfa   :  { %596 = vst.msk [vmem:[#allocation2 + $0x1b8] sm:$0xff] %vm546_vm1, %v452_v4 }
  0xfb   :  { %661 = vst.msk [vmem:[#allocation2 + $0x1b1] sm:$0xff] %vm611_vm2, %v4565_v60  ;;  %735 = vrot.lane.b32.xlu1 %v5076_v32, %s4128_s18  ;;  %v706_v53 = vpop.permute.xlu0 %705 }
  0xfc   :  { %662 = vst.msk [vmem:[#allocation2 + $0x1b9] sm:$0x7f] %vm613_vm3, %v4576_v15 }
  0xfd   :  { %1003 = vst.msk [vmem:[#allocation2 + $0x1bf] sm:$0x1] %vm978_vm4, %v4129_v42  ;;  %v708_v7 = vpop.permute.xlu1 %707  ;;  %413 = vrot.lane.b32.xlu0 %v5145_v62, %s4127_s9 }
  0xfe   :  { %885 = vst.msk [vmem:[#allocation2 + $0x7f] sm:$0xfe] %vm869_vm5, %v706_v53 }
  0xff   :  { %v5158_v9 = vld [vmem:[#allocation2 + $0x1a0] sm:$0xff]  ;;  %v5160_v12 = vld [vmem:[#allocation2 + $0x1a8] sm:$0xff]  ;;  %953 = vst.msk [vmem:[#allocation2 + $0x80] sm:$0x1] %vm945_vm6, %v4129_v42  ;;  %415 = vrot.lane.b32.xlu1 %v5153_v1, %s4127_s9  ;;  %v386_v60 = vpop.permute.xlu0 %385 }
 0x100   :  { %886 = vst.msk [vmem:[#allocation2 + $0x87] sm:$0xff] %vm871_vm7, %v708_v7  ;;  %3885 = vmatprep.mubr.msk.f32.mxu1 %vm935_vm0, %v5158_v9 }
 0x101   :  { %3886 = vmatmul.mubr.msk.f32.gmra.mxu1 %vm935_vm0, %v5160_v12  ;;  %563 = vst.msk [vmem:[#allocation2 + $0x90] sm:$0xff] %vm546_vm1, %v386_v60  ;;  %v388_v15 = vpop.permute.xlu1 %387  ;;  %801 = vrot.lane.b32.xlu0 %v5109_v54, %s4128_s18 }
 0x102   :  { %564 = vst.msk [vmem:[#allocation2 + $0x98] sm:$0xff] %vm546_vm1, %v388_v15 }
 0x103   :  { %629 = vst.msk [vmem:[#allocation2 + $0x91] sm:$0xff] %vm611_vm2, %v4601_v14  ;;  %803 = vrot.lane.b32.xlu1 %v5118_v40, %s4128_s18  ;;  %v774_v23 = vpop.permute.xlu0 %773 }
 0x104   :  { %630 = vst.msk [vmem:[#allocation2 + $0x99] sm:$0x7f] %vm613_vm3, %v4610_v21 }
 0x105   :  { %987 = vst.msk [vmem:[#allocation2 + $0x9f] sm:$0x1] %vm978_vm4, %v4129_v42  ;;  %v776_v26 = vpop.permute.xlu1 %775  ;;  %737 = vrot.lane.b32.xlu0 %v5145_v62, %s4128_s18 }
 0x106   :  { %919 = vst.msk [vmem:[#allocation2 + $0x1af] sm:$0xfe] %vm869_vm5, %v774_v23 }
 0x107   :  { %v5186_v31 = vld [vmem:[#allocation2 + $0x80] sm:$0xff]  ;;  %v5188_v28 = vld [vmem:[#allocation2 + $0x88] sm:$0xff]  ;;  %970 = vst.msk [vmem:[#allocation2 + $0x1b0] sm:$0x1] %vm945_vm6, %v4129_v42  ;;  %739 = vrot.lane.b32.xlu1 %v5153_v1, %s4128_s18  ;;  %v454_v14 = vpop.permute.xlu0 %453 }
 0x108   :  { %920 = vst.msk [vmem:[#allocation2 + $0x1b7] sm:$0xff] %vm871_vm7, %v776_v26  ;;  %3837 = vmatprep.mubr.msk.f32.mxu0 %vm935_vm0, %v5186_v31 }
 0x109   :  { %3838 = vmatmul.mubr.msk.f32.gmra.mxu0 %vm935_vm0, %v5188_v28  ;;  %597 = vst.msk [vmem:[#allocation2 + $0x1c0] sm:$0xff] %vm546_vm1, %v454_v14  ;;  %v456_v21 = vpop.permute.xlu1 %455 }
 0x10a   :  { %598 = vst.msk [vmem:[#allocation2 + $0x1c8] sm:$0xff] %vm546_vm1, %v456_v21 }
 0x10b   :  { %663 = vst.msk [vmem:[#allocation2 + $0x1c1] sm:$0xff] %vm611_vm2, %v4637_v45  ;;  %v710_v61 = vpop.permute.xlu0 %709 }
 0x10c   :  { %664 = vst.msk [vmem:[#allocation2 + $0x1c9] sm:$0x7f] %vm613_vm3, %v4646_v49 }
 0x10d   :  { %1004 = vst.msk [vmem:[#allocation2 + $0x1cf] sm:$0x1] %vm978_vm4, %v4129_v42  ;;  %v712_v25 = vpop.permute.xlu1 %711 }
 0x10e   :  { %887 = vst.msk [vmem:[#allocation2 + $0x8f] sm:$0xfe] %vm869_vm5, %v710_v61 }
 0x10f   :  { %v5210_v27 = vld [vmem:[#allocation2 + $0x1b0] sm:$0xff]  ;;  %v5212_v8 = vld [vmem:[#allocation2 + $0x1b8] sm:$0xff]  ;;  %954 = vst.msk [vmem:[#allocation2 + $0x90] sm:$0x1] %vm945_vm6, %v4129_v42  ;;  %v390_v45 = vpop.permute.xlu0 %389 }
 0x110   :  { %888 = vst.msk [vmem:[#allocation2 + $0x97] sm:$0xff] %vm871_vm7, %v712_v25  ;;  %3888 = vmatprep.mubr.msk.f32.mxu1 %vm935_vm0, %v5210_v27 }
 0x111   :  { %3889 = vmatmul.mubr.msk.f32.gmra.mxu1 %vm935_vm0, %v5212_v8  ;;  %565 = vst.msk [vmem:[#allocation2 + $0xa0] sm:$0xff] %vm546_vm1, %v390_v45  ;;  %v392_v49 = vpop.permute.xlu1 %391 }
 0x112   :  { %566 = vst.msk [vmem:[#allocation2 + $0xa8] sm:$0xff] %vm546_vm1, %v392_v49 }
 0x113   :  { %631 = vst.msk [vmem:[#allocation2 + $0xa1] sm:$0xff] %vm611_vm2, %v4673_v5  ;;  %v778_v3 = vpop.permute.xlu0 %777 }
 0x114   :  { %632 = vst.msk [vmem:[#allocation2 + $0xa9] sm:$0x7f] %vm613_vm3, %v4682_v20 }
 0x115   :  { %988 = vst.msk [vmem:[#allocation2 + $0xaf] sm:$0x1] %vm978_vm4, %v4129_v42  ;;  %v780_v10 = vpop.permute.xlu1 %779 }
 0x116   :  { %921 = vst.msk [vmem:[#allocation2 + $0x1bf] sm:$0xfe] %vm869_vm5, %v778_v3 }
 0x117   :  { %v5230_v35 = vld [vmem:[#allocation2 + $0x90] sm:$0xff]  ;;  %v5232_v36 = vld [vmem:[#allocation2 + $0x98] sm:$0xff]  ;;  %971 = vst.msk [vmem:[#allocation2 + $0x1c0] sm:$0x1] %vm945_vm6, %v4129_v42  ;;  %v458_v5 = vpop.permute.xlu0 %457 }
 0x118   :  { %922 = vst.msk [vmem:[#allocation2 + $0x1c7] sm:$0xff] %vm871_vm7, %v780_v10  ;;  %3840 = vmatprep.mubr.msk.f32.mxu0 %vm935_vm0, %v5230_v35 }
 0x119   :  { %3841 = vmatmul.mubr.msk.f32.gmra.mxu0 %vm935_vm0, %v5232_v36  ;;  %599 = vst.msk [vmem:[#allocation2 + $0x1d0] sm:$0xff] %vm546_vm1, %v458_v5  ;;  %v460_v20 = vpop.permute.xlu1 %459 }
 0x11a   :  { %600 = vst.msk [vmem:[#allocation2 + $0x1d8] sm:$0xff] %vm546_vm1, %v460_v20 }
 0x11b   :  { %665 = vst.msk [vmem:[#allocation2 + $0x1d1] sm:$0xff] %vm611_vm2, %v4709_v33  ;;  %v714_v41 = vpop.permute.xlu0 %713 }
 0x11c   :  { %666 = vst.msk [vmem:[#allocation2 + $0x1d9] sm:$0x7f] %vm613_vm3, %v4718_v30 }
 0x11d   :  { %1005 = vst.msk [vmem:[#allocation2 + $0x1df] sm:$0x1] %vm978_vm4, %v4129_v42  ;;  %v716_v50 = vpop.permute.xlu1 %715 }
 0x11e   :  { %889 = vst.msk [vmem:[#allocation2 + $0x9f] sm:$0xfe] %vm869_vm5, %v714_v41 }
 0x11f   :  { %v5250_v52 = vld [vmem:[#allocation2 + $0x1c0] sm:$0xff]  ;;  %v5252_v57 = vld [vmem:[#allocation2 + $0x1c8] sm:$0xff]  ;;  %955 = vst.msk [vmem:[#allocation2 + $0xa0] sm:$0x1] %vm945_vm6, %v4129_v42  ;;  %v394_v33 = vpop.permute.xlu0 %393 }
 0x120   :  { %890 = vst.msk [vmem:[#allocation2 + $0xa7] sm:$0xff] %vm871_vm7, %v716_v50  ;;  %3891 = vmatprep.mubr.msk.f32.mxu1 %vm935_vm0, %v5250_v52 }
 0x121   :  { %3892 = vmatmul.mubr.msk.f32.gmra.mxu1 %vm935_vm0, %v5252_v57  ;;  %567 = vst.msk [vmem:[#allocation2 + $0xb0] sm:$0xff] %vm546_vm1, %v394_v33  ;;  %v396_v30 = vpop.permute.xlu1 %395 }
 0x122   :  { %568 = vst.msk [vmem:[#allocation2 + $0xb8] sm:$0xff] %vm546_vm1, %v396_v30 }
 0x123   :  { %633 = vst.msk [vmem:[#allocation2 + $0xb1] sm:$0xff] %vm611_vm2, %v4745_v58  ;;  %v782_v37 = vpop.permute.xlu0 %781 }
 0x124   :  { %634 = vst.msk [vmem:[#allocation2 + $0xb9] sm:$0x7f] %vm613_vm3, %v4754_v39 }
 0x125   :  { %989 = vst.msk [vmem:[#allocation2 + $0xbf] sm:$0x1] %vm978_vm4, %v4129_v42  ;;  %v784_v44 = vpop.permute.xlu1 %783 }
 0x126   :  { %923 = vst.msk [vmem:[#allocation2 + $0x1cf] sm:$0xfe] %vm869_vm5, %v782_v37 }
 0x127   :  { %v5270_v22 = vld [vmem:[#allocation2 + $0xa0] sm:$0xff]  ;;  %v5272_v13 = vld [vmem:[#allocation2 + $0xa8] sm:$0xff]  ;;  %972 = vst.msk [vmem:[#allocation2 + $0x1d0] sm:$0x1] %vm945_vm6, %v4129_v42  ;;  %v462_v58 = vpop.permute.xlu0 %461 }
 0x128   :  { %924 = vst.msk [vmem:[#allocation2 + $0x1d7] sm:$0xff] %vm871_vm7, %v784_v44  ;;  %3843 = vmatprep.mubr.msk.f32.mxu0 %vm935_vm0, %v5270_v22 }
 0x129   :  { %3844 = vmatmul.mubr.msk.f32.gmra.mxu0 %vm935_vm0, %v5272_v13  ;;  %601 = vst.msk [vmem:[#allocation2 + $0x1e0] sm:$0xff] %vm546_vm1, %v462_v58  ;;  %v464_v39 = vpop.permute.xlu1 %463 }
 0x12a   :  { %602 = vst.msk [vmem:[#allocation2 + $0x1e8] sm:$0xff] %vm546_vm1, %v464_v39 }
 0x12b   :  { %667 = vst.msk [vmem:[#allocation2 + $0x1e1] sm:$0xff] %vm611_vm2, %v4781_v16  ;;  %v718_v4 = vpop.permute.xlu0 %717 }
 0x12c   :  { %668 = vst.msk [vmem:[#allocation2 + $0x1e9] sm:$0x7f] %vm613_vm3, %v4790_v48 }
 0x12d   :  { %1006 = vst.msk [vmem:[#allocation2 + $0x1ef] sm:$0x1] %vm978_vm4, %v4129_v42  ;;  %v720_v53 = vpop.permute.xlu1 %719 }
 0x12e   :  { %891 = vst.msk [vmem:[#allocation2 + $0xaf] sm:$0xfe] %vm869_vm5, %v718_v4 }
 0x12f   :  { %v5290_v7 = vld [vmem:[#allocation2 + $0x1d0] sm:$0xff]  ;;  %v5292_v60 = vld [vmem:[#allocation2 + $0x1d8] sm:$0xff]  ;;  %956 = vst.msk [vmem:[#allocation2 + $0xb0] sm:$0x1] %vm945_vm6, %v4129_v42  ;;  %v398_v16 = vpop.permute.xlu0 %397 }
 0x130   :  { %892 = vst.msk [vmem:[#allocation2 + $0xb7] sm:$0xff] %vm871_vm7, %v720_v53  ;;  %3894 = vmatprep.mubr.msk.f32.mxu1 %vm935_vm0, %v5290_v7 }
 0x131   :  { %3895 = vmatmul.mubr.msk.f32.gmra.mxu1 %vm935_vm0, %v5292_v60  ;;  %569 = vst.msk [vmem:[#allocation2 + $0xc0] sm:$0xff] %vm546_vm1, %v398_v16  ;;  %v400_v48 = vpop.permute.xlu1 %399 }
 0x132   :  { %570 = vst.msk [vmem:[#allocation2 + $0xc8] sm:$0xff] %vm546_vm1, %v400_v48 }
 0x133   :  { %635 = vst.msk [vmem:[#allocation2 + $0xc1] sm:$0xff] %vm611_vm2, %v4817_v47  ;;  %v786_v15 = vpop.permute.xlu0 %785 }
 0x134   :  { %636 = vst.msk [vmem:[#allocation2 + $0xc9] sm:$0x7f] %vm613_vm3, %v4826_v56 }
 0x135   :  { %990 = vst.msk [vmem:[#allocation2 + $0xcf] sm:$0x1] %vm978_vm4, %v4129_v42  ;;  %v788_v23 = vpop.permute.xlu1 %787 }
 0x136   :  { %925 = vst.msk [vmem:[#allocation2 + $0x1df] sm:$0xfe] %vm869_vm5, %v786_v15 }
 0x137   :  { %v5310_v26 = vld [vmem:[#allocation2 + $0xb0] sm:$0xff]  ;;  %v5312_v14 = vld [vmem:[#allocation2 + $0xb8] sm:$0xff]  ;;  %973 = vst.msk [vmem:[#allocation2 + $0x1e0] sm:$0x1] %vm945_vm6, %v4129_v42  ;;  %v466_v47 = vpop.permute.xlu0 %465 }
 0x138   :  { %926 = vst.msk [vmem:[#allocation2 + $0x1e7] sm:$0xff] %vm871_vm7, %v788_v23  ;;  %3846 = vmatprep.mubr.msk.f32.mxu0 %vm935_vm0, %v5310_v26 }
 0x139   :  { %3847 = vmatmul.mubr.msk.f32.gmra.mxu0 %vm935_vm0, %v5312_v14  ;;  %603 = vst.msk [vmem:[#allocation2 + $0x1f0] sm:$0xff] %vm546_vm1, %v466_v47  ;;  %v468_v56 = vpop.permute.xlu1 %467 }
 0x13a   :  { %604 = vst.msk [vmem:[#allocation2 + $0x1f8] sm:$0xff] %vm546_vm1, %v468_v56 }
 0x13b   :  { %669 = vst.msk [vmem:[#allocation2 + $0x1f1] sm:$0xff] %vm611_vm2, %v4853_v17  ;;  %v722_v21 = vpop.permute.xlu0 %721 }
 0x13c   :  { %670 = vst.msk [vmem:[#allocation2 + $0x1f9] sm:$0x7f] %vm613_vm3, %v4862_v0 }
 0x13d   :  { %1007 = vst.msk [vmem:[#allocation2 + $0x1ff] sm:$0x1] %vm978_vm4, %v4129_v42  ;;  %v724_v61 = vpop.permute.xlu1 %723 }
 0x13e   :  { %893 = vst.msk [vmem:[#allocation2 + $0xbf] sm:$0xfe] %vm869_vm5, %v722_v21 }
 0x13f   :  { %v5330_v25 = vld [vmem:[#allocation2 + $0x1e0] sm:$0xff]  ;;  %v5332_v45 = vld [vmem:[#allocation2 + $0x1e8] sm:$0xff]  ;;  %957 = vst.msk [vmem:[#allocation2 + $0xc0] sm:$0x1] %vm945_vm6, %v4129_v42  ;;  %v402_v17 = vpop.permute.xlu0 %401 }
 0x140   :  { %894 = vst.msk [vmem:[#allocation2 + $0xc7] sm:$0xff] %vm871_vm7, %v724_v61  ;;  %3897 = vmatprep.mubr.msk.f32.mxu1 %vm935_vm0, %v5330_v25 }
 0x141   :  { %3898 = vmatmul.mubr.msk.f32.gmra.mxu1 %vm935_vm0, %v5332_v45  ;;  %571 = vst.msk [vmem:[#allocation2 + $0xd0] sm:$0xff] %vm546_vm1, %v402_v17  ;;  %v404_v0 = vpop.permute.xlu1 %403 }
 0x142   :  { %572 = vst.msk [vmem:[#allocation2 + $0xd8] sm:$0xff] %vm546_vm1, %v404_v0 }
 0x143   :  { %637 = vst.msk [vmem:[#allocation2 + $0xd1] sm:$0xff] %vm611_vm2, %v4895_v2  ;;  %v790_v49 = vpop.permute.xlu0 %789 }
 0x144   :  { %638 = vst.msk [vmem:[#allocation2 + $0xd9] sm:$0x7f] %vm613_vm3, %v4904_v34 }
 0x145   :  { %991 = vst.msk [vmem:[#allocation2 + $0xdf] sm:$0x1] %vm978_vm4, %v4129_v42  ;;  %v792_v3 = vpop.permute.xlu1 %791 }
 0x146   :  { %927 = vst.msk [vmem:[#allocation2 + $0x1ef] sm:$0xfe] %vm869_vm5, %v790_v49 }
 0x147   :  { %v5350_v10 = vld [vmem:[#allocation2 + $0xc0] sm:$0xff]  ;;  %v5352_v5 = vld [vmem:[#allocation2 + $0xc8] sm:$0xff]  ;;  %974 = vst.msk [vmem:[#allocation2 + $0x1f0] sm:$0x1] %vm945_vm6, %v4129_v42  ;;  %v470_v2 = vpop.permute.xlu0 %469 }
 0x148   :  { %928 = vst.msk [vmem:[#allocation2 + $0x1f7] sm:$0xff] %vm871_vm7, %v792_v3  ;;  %3849 = vmatprep.mubr.msk.f32.mxu0 %vm935_vm0, %v5350_v10 }
 0x149   :  { %3850 = vmatmul.mubr.msk.f32.gmra.mxu0 %vm935_vm0, %v5352_v5  ;;  %605 = vst.msk [vmem:[#allocation2 + $0x200] sm:$0xff] %vm546_vm1, %v470_v2  ;;  %v472_v34 = vpop.permute.xlu1 %471 }
 0x14a   :  { %606 = vst.msk [vmem:[#allocation2 + $0x208] sm:$0xff] %vm546_vm1, %v472_v34 }
 0x14b   :  { %671 = vst.msk [vmem:[#allocation2 + $0x201] sm:$0xff] %vm611_vm2, %v4936_v19  ;;  %v726_v20 = vpop.permute.xlu0 %725 }
 0x14c   :  { %672 = vst.msk [vmem:[#allocation2 + $0x209] sm:$0x7f] %vm613_vm3, %v4950_v63 }
 0x14d   :  { %1008 = vst.msk [vmem:[#allocation2 + $0x20f] sm:$0x1] %vm978_vm4, %v4129_v42  ;;  %v728_v41 = vpop.permute.xlu1 %727 }
 0x14e   :  { %895 = vst.msk [vmem:[#allocation2 + $0xcf] sm:$0xfe] %vm869_vm5, %v726_v20 }
 0x14f   :  { %v5370_v50 = vld [vmem:[#allocation2 + $0x1f0] sm:$0xff]  ;;  %v5372_v33 = vld [vmem:[#allocation2 + $0x1f8] sm:$0xff]  ;;  %958 = vst.msk [vmem:[#allocation2 + $0xd0] sm:$0x1] %vm945_vm6, %v4129_v42  ;;  %v406_v19 = vpop.permute.xlu0 %405 }
 0x150   :  { %896 = vst.msk [vmem:[#allocation2 + $0xd7] sm:$0xff] %vm871_vm7, %v728_v41  ;;  %3900 = vmatprep.mubr.msk.f32.mxu1 %vm935_vm0, %v5370_v50  ;;  %v1011_v41 = vld [vmem:[#allocation2] sm:$0xff] }
 0x151   :  { %3901 = vmatmul.mubr.msk.f32.gmra.mxu1 %vm935_vm0, %v5372_v33  ;;  %573 = vst.msk [vmem:[#allocation2 + $0xe0] sm:$0xff] %vm546_vm1, %v406_v19  ;;  %v408_v63 = vpop.permute.xlu1 %407  ;;  %v1012_v19 = vld [vmem:[#allocation2 + $0x8] sm:$0xff] }
 0x152   :  { %574 = vst.msk [vmem:[#allocation2 + $0xe8] sm:$0xff] %vm546_vm1, %v408_v63 }
 0x153   :  { %639 = vst.msk [vmem:[#allocation2 + $0xe1] sm:$0xff] %vm611_vm2, %v4983_v46  ;;  %v794_v30 = vpop.permute.xlu0 %793 }
 0x154   :  { %640 = vst.msk [vmem:[#allocation2 + $0xe9] sm:$0x7f] %vm613_vm3, %v4992_v24 }
 0x155   :  { %992 = vst.msk [vmem:[#allocation2 + $0xef] sm:$0x1] %vm978_vm4, %v4129_v42  ;;  %v796_v37 = vpop.permute.xlu1 %795 }
 0x156   :  { %929 = vst.msk [vmem:[#allocation2 + $0x1ff] sm:$0xfe] %vm869_vm5, %v794_v30 }
 0x157   :  { %v5390_v44 = vld [vmem:[#allocation2 + $0xd0] sm:$0xff]  ;;  %v5392_v58 = vld [vmem:[#allocation2 + $0xd8] sm:$0xff]  ;;  %975 = vst.msk [vmem:[#allocation2 + $0x200] sm:$0x1] %vm945_vm6, %v4129_v42  ;;  %v474_v46 = vpop.permute.xlu0 %473 }
 0x158   :  { %930 = vst.msk [vmem:[#allocation2 + $0x207] sm:$0xff] %vm871_vm7, %v796_v37  ;;  %3852 = vmatprep.mubr.msk.f32.mxu0 %vm935_vm0, %v5390_v44  ;;  %v2300_v37 = vld [vmem:[#allocation2 + $0x20] sm:$0xff] }
 0x159   :  { %3853 = vmatmul.mubr.msk.f32.gmra.mxu0 %vm935_vm0, %v5392_v58  ;;  %607 = vst.msk [vmem:[#allocation2 + $0x210] sm:$0xff] %vm546_vm1, %v474_v46  ;;  %v476_v24 = vpop.permute.xlu1 %475  ;;  %v1014_v46 = vld [vmem:[#allocation2 + $0x18] sm:$0xff] }
 0x15a   :  { %608 = vst.msk [vmem:[#allocation2 + $0x218] sm:$0xff] %vm546_vm1, %v476_v24  ;;  %v2301_v24 = vld [vmem:[#allocation2 + $0x28] sm:$0xff] }
 0x15b   :  { %673 = vst.msk [vmem:[#allocation2 + $0x211] sm:$0xff] %vm611_vm2, %v5025_v43  ;;  %v730_v39 = vpop.permute.xlu0 %729 }
 0x15c   :  { %674 = vst.msk [vmem:[#allocation2 + $0x219] sm:$0x7f] %vm613_vm3, %v5034_v55 }
 0x15d   :  { %1009 = vst.msk [vmem:[#allocation2 + $0x21f] sm:$0x1] %vm978_vm4, %v4129_v42  ;;  %v732_v4 = vpop.permute.xlu1 %731 }
 0x15e   :  { %897 = vst.msk [vmem:[#allocation2 + $0xdf] sm:$0xfe] %vm869_vm5, %v730_v39  ;;  %v2302_v39 = vld [vmem:[#allocation2 + $0x30] sm:$0xff] }
 0x15f   :  { %v5410_v53 = vld [vmem:[#allocation2 + $0x200] sm:$0xff]  ;;  %v5412_v16 = vld [vmem:[#allocation2 + $0x208] sm:$0xff]  ;;  %959 = vst.msk [vmem:[#allocation2 + $0xe0] sm:$0x1] %vm945_vm6, %v4129_v42  ;;  %v410_v43 = vpop.permute.xlu0 %409 }
 0x160   :  { %898 = vst.msk [vmem:[#allocation2 + $0xe7] sm:$0xff] %vm871_vm7, %v732_v4  ;;  %3903 = vmatprep.mubr.msk.f32.mxu1 %vm935_vm0, %v5410_v53  ;;  %v2303_v4 = vld [vmem:[#allocation2 + $0x38] sm:$0xff] }
 0x161   :  { %3904 = vmatmul.mubr.msk.f32.gmra.mxu1 %vm935_vm0, %v5412_v16  ;;  %575 = vst.msk [vmem:[#allocation2 + $0xf0] sm:$0xff] %vm546_vm1, %v410_v43  ;;  %v412_v55 = vpop.permute.xlu1 %411  ;;  %v2304_v43 = vld [vmem:[#allocation2 + $0x40] sm:$0xff] }
 0x162   :  { %576 = vst.msk [vmem:[#allocation2 + $0xf8] sm:$0xff] %vm546_vm1, %v412_v55  ;;  %v2305_v55 = vld [vmem:[#allocation2 + $0x48] sm:$0xff] }
 0x163   :  { %641 = vst.msk [vmem:[#allocation2 + $0xf1] sm:$0xff] %vm611_vm2, %v5067_v29  ;;  %v798_v48 = vpop.permute.xlu0 %797 }
 0x164   :  { %642 = vst.msk [vmem:[#allocation2 + $0xf9] sm:$0x7f] %vm613_vm3, %v5076_v32 }
 0x165   :  { %993 = vst.msk [vmem:[#allocation2 + $0xff] sm:$0x1] %vm978_vm4, %v4129_v42  ;;  %v800_v15 = vpop.permute.xlu1 %799 }
 0x166   :  { %931 = vst.msk [vmem:[#allocation2 + $0x20f] sm:$0xfe] %vm869_vm5, %v798_v48  ;;  %v5655_v48 = vpop.f32.mrf.mxu1 }
 0x167   :  { %v5430_v23 = vld [vmem:[#allocation2 + $0xe0] sm:$0xff]  ;;  %v5432_v47 = vld [vmem:[#allocation2 + $0xe8] sm:$0xff]  ;;  %976 = vst.msk [vmem:[#allocation2 + $0x210] sm:$0x1] %vm945_vm6, %v4129_v42  ;;  %v478_v29 = vpop.permute.xlu0 %477 }
 0x168   :  { %932 = vst.msk [vmem:[#allocation2 + $0x217] sm:$0xff] %vm871_vm7, %v800_v15  ;;  %3855 = vmatprep.mubr.msk.f32.mxu0 %vm935_vm0, %v5430_v23 }
 0x169   :  { %3856 = vmatmul.mubr.msk.f32.gmra.mxu0 %vm935_vm0, %v5432_v47  ;;  %609 = vst.msk [vmem:[#allocation2 + $0x220] sm:$0xff] %vm546_vm1, %v478_v29  ;;  %v480_v32 = vpop.permute.xlu1 %479 }
 0x16a   :  { %610 = vst.msk [vmem:[#allocation2 + $0x228] sm:$0xff] %vm546_vm1, %v480_v32 }
 0x16b   :  { %675 = vst.msk [vmem:[#allocation2 + $0x221] sm:$0xff] %vm611_vm2, %v5109_v54  ;;  %v734_v56 = vpop.permute.xlu0 %733 }
 0x16c   :  { %676 = vst.msk [vmem:[#allocation2 + $0x229] sm:$0x7f] %vm613_vm3, %v5118_v40 }
 0x16d   :  { %1010 = vst.msk [vmem:[#allocation2 + $0x22f] sm:$0x1] %vm978_vm4, %v4129_v42  ;;  %v736_v21 = vpop.permute.xlu1 %735 }
 0x16e   :  { %899 = vst.msk [vmem:[#allocation2 + $0xef] sm:$0xfe] %vm869_vm5, %v734_v56 }
 0x16f   :  { %v5450_v61 = vld [vmem:[#allocation2 + $0x210] sm:$0xff]  ;;  %v5452_v17 = vld [vmem:[#allocation2 + $0x218] sm:$0xff]  ;;  %960 = vst.msk [vmem:[#allocation2 + $0xf0] sm:$0x1] %vm945_vm6, %v4129_v42  ;;  %v414_v54 = vpop.permute.xlu0 %413 }
 0x170   :  { %900 = vst.msk [vmem:[#allocation2 + $0xf7] sm:$0xff] %vm871_vm7, %v736_v21  ;;  %3906 = vmatprep.mubr.msk.f32.mxu1 %vm935_vm0, %v5450_v61 }
 0x171   :  { %3907 = vmatmul.mubr.msk.f32.gmra.mxu1 %vm935_vm0, %v5452_v17  ;;  %577 = vst.msk [vmem:[#allocation2 + $0x100] sm:$0xff] %vm546_vm1, %v414_v54  ;;  %v416_v40 = vpop.permute.xlu1 %415 }
 0x172   :  { %578 = vst.msk [vmem:[#allocation2 + $0x108] sm:$0xff] %vm546_vm1, %v416_v40 }
 0x173   :  { %643 = vst.msk [vmem:[#allocation2 + $0x101] sm:$0xff] %vm611_vm2, %v5145_v62  ;;  %v802_v0 = vpop.permute.xlu0 %801 }
 0x174   :  { %644 = vst.msk [vmem:[#allocation2 + $0x109] sm:$0x7f] %vm613_vm3, %v5153_v1 }
 0x175   :  { %994 = vst.msk [vmem:[#allocation2 + $0x10f] sm:$0x1] %vm978_vm4, %v4129_v42  ;;  %v804_v49 = vpop.permute.xlu1 %803 }
 0x176   :  { %933 = vst.msk [vmem:[#allocation2 + $0x21f] sm:$0xfe] %vm869_vm5, %v802_v0 }
 0x177   :  { %v5470_v3 = vld [vmem:[#allocation2 + $0xf0] sm:$0xff]  ;;  %v5472_v2 = vld [vmem:[#allocation2 + $0xf8] sm:$0xff]  ;;  %977 = vst.msk [vmem:[#allocation2 + $0x220] sm:$0x1] %vm945_vm6, %v4129_v42  ;;  %v738_v62 = vpop.permute.xlu0 %737 }
 0x178   :  { %934 = vst.msk [vmem:[#allocation2 + $0x227] sm:$0xff] %vm871_vm7, %v804_v49  ;;  %3858 = vmatprep.mubr.msk.f32.mxu0 %vm935_vm0, %v5470_v3 }
 0x179   :  { %3859 = vmatmul.mubr.msk.f32.gmra.mxu0 %vm935_vm0, %v5472_v2  ;;  %901 = vst.msk [vmem:[#allocation2 + $0xff] sm:$0xfe] %vm869_vm5, %v738_v62  ;;  %v740_v1 = vpop.permute.xlu1 %739 }
 0x17a   :  { %961 = vst.msk [vmem:[#allocation2 + $0x100] sm:$0x1] %vm945_vm6, %v4129_v42  ;;  %v1013_v42 = vld [vmem:[#allocation2 + $0x10] sm:$0xff] }
 0x17b   :  { %902 = vst.msk [vmem:[#allocation2 + $0x107] sm:$0xff] %vm871_vm7, %v740_v1 }
 0x17f   :  { %v5485_v34 = vld [vmem:[#allocation2 + $0x220] sm:$0xff]  ;;  %v5487_v20 = vld [vmem:[#allocation2 + $0x228] sm:$0xff] }
 0x180   :  { %3909 = vmatprep.mubr.msk.f32.mxu1 %vm935_vm0, %v5485_v34 }
 0x181   :  { %3910 = vmatmul.mubr.msk.f32.gmra.mxu1 %vm935_vm0, %v5487_v20 }
 0x182   :  { %3918 = vmatprep.mubr.msk.f32.mxu1 %vm935_vm0, %v1011_v41  ;;  %v5494_v63 = vld [vmem:[#allocation2 + $0x100] sm:$0xff]  ;;  %v5496_v30 = vld [vmem:[#allocation2 + $0x108] sm:$0xff] }
 0x183   :  { %3861 = vmatprep.mubr.msk.f32.mxu0 %vm935_vm0, %v5494_v63 }
 0x184   :  { %3862 = vmatmul.mubr.msk.f32.gmra.mxu0 %vm935_vm0, %v5496_v30 }
 0x185   :  { %3919 = vmatmul.mubr.msk.f32.vlgmr.msra.gmra.mxu1 %vm935_vm0, %v1012_v19  ;;  %4020 = vmatprep.mubr.msk.f32.mxu0 %vm935_vm0, %v2300_v37 }
 0x186   :  { %3921 = vmatprep.mubr.msk.f32.mxu1 %vm935_vm0, %v1013_v42 }
 0x188   :  { %4021 = vmatmul.mubr.msk.f32.vlgmr.msra.gmra.mxu0 %vm935_vm0, %v2301_v24 }
 0x189   :  { %3922 = vmatmul.mubr.msk.f32.gmra.mxu1 %vm935_vm0, %v1014_v46  ;;  %4023 = vmatprep.mubr.msk.f32.mxu0 %vm935_vm0, %v2302_v39 }
 0x18a   :  { %3924 = vmatprep.mubr.msk.f32.mxu1 %vm935_vm0, %v2300_v37 }
 0x18c   :  { %4024 = vmatmul.mubr.msk.f32.gmra.mxu0 %vm935_vm0, %v2303_v4 }
 0x18d   :  { %3925 = vmatmul.mubr.msk.f32.gmra.mxu1 %vm935_vm0, %v2301_v24  ;;  %4026 = vmatprep.mubr.msk.f32.mxu0 %vm935_vm0, %v2304_v43 }
 0x18e   :  { %3927 = vmatprep.mubr.msk.f32.mxu1 %vm935_vm0, %v2302_v39 }
 0x190   :  { %4027 = vmatmul.mubr.msk.f32.gmra.mxu0 %vm935_vm0, %v2305_v55 }
 0x191   :  { %3928 = vmatmul.mubr.msk.f32.gmra.mxu1 %vm935_vm0, %v2303_v4  ;;  %4029 = vmatprep.mubr.msk.f32.mxu0 %vm935_vm0, %v4956_v6 }
 0x192   :  { %3930 = vmatprep.mubr.msk.f32.mxu1 %vm935_vm0, %v2304_v43 }
 0x194   :  { %4030 = vmatmul.mubr.msk.f32.gmra.mxu0 %vm935_vm0, %v4958_v51 }
 0x195   :  { %3931 = vmatmul.mubr.msk.f32.gmra.mxu1 %vm935_vm0, %v2305_v55  ;;  %4032 = vmatprep.mubr.msk.f32.mxu0 %vm935_vm0, %v5040_v18 }
 0x196   :  { %3933 = vmatprep.mubr.msk.f32.mxu1 %vm935_vm0, %v4956_v6  ;;  %v1043_v6 = vld [vmem:[#allocation2 + $0x120] sm:$0xff] }
 0x198   :  { %4033 = vmatmul.mubr.msk.f32.gmra.mxu0 %vm935_vm0, %v5042_v11 }
 0x199   :  { %3934 = vmatmul.mubr.msk.f32.gmra.mxu1 %vm935_vm0, %v4958_v51  ;;  %4035 = vmatprep.mubr.msk.f32.mxu0 %vm935_vm0, %v5124_v59  ;;  %v2330_v51 = vld [vmem:[#allocation2 + $0x110] sm:$0xff] }
 0x19a   :  { %3936 = vmatprep.mubr.msk.f32.mxu1 %vm935_vm0, %v5040_v18  ;;  %v1044_v18 = vld [vmem:[#allocation2 + $0x128] sm:$0xff] }
 0x19c   :  { %4036 = vmatmul.mubr.msk.f32.gmra.mxu0 %vm935_vm0, %v5126_v38 }
 0x19d   :  { %3937 = vmatmul.mubr.msk.f32.gmra.mxu1 %vm935_vm0, %v5042_v11  ;;  %4038 = vmatprep.mubr.msk.f32.mxu0 %vm935_vm0, %v5186_v31  ;;  %v2331_v11 = vld [vmem:[#allocation2 + $0x118] sm:$0xff] }
 0x19e   :  { %3939 = vmatprep.mubr.msk.f32.mxu1 %vm935_vm0, %v5124_v59  ;;  %v1045_v59 = vld [vmem:[#allocation2 + $0x130] sm:$0xff] }
 0x1a0   :  { %4039 = vmatmul.mubr.msk.f32.gmra.mxu0 %vm935_vm0, %v5188_v28 }
 0x1a1   :  { %3940 = vmatmul.mubr.msk.f32.gmra.mxu1 %vm935_vm0, %v5126_v38  ;;  %4041 = vmatprep.mubr.msk.f32.mxu0 %vm935_vm0, %v5230_v35  ;;  %v2332_v38 = vld [vmem:[#allocation2 + $0x140] sm:$0xff] }
 0x1a2   :  { %3942 = vmatprep.mubr.msk.f32.mxu1 %vm935_vm0, %v5186_v31  ;;  %v1046_v31 = vld [vmem:[#allocation2 + $0x138] sm:$0xff] }
 0x1a4   :  { %4042 = vmatmul.mubr.msk.f32.gmra.mxu0 %vm935_vm0, %v5232_v36 }
 0x1a5   :  { %3943 = vmatmul.mubr.msk.f32.gmra.mxu1 %vm935_vm0, %v5188_v28  ;;  %4044 = vmatprep.mubr.msk.f32.mxu0 %vm935_vm0, %v5270_v22  ;;  %v2333_v28 = vld [vmem:[#allocation2 + $0x148] sm:$0xff] }
 0x1a6   :  { %3945 = vmatprep.mubr.msk.f32.mxu1 %vm935_vm0, %v5230_v35  ;;  %v2334_v35 = vld [vmem:[#allocation2 + $0x150] sm:$0xff] }
 0x1a8   :  { %4045 = vmatmul.mubr.msk.f32.gmra.mxu0 %vm935_vm0, %v5272_v13 }
 0x1a9   :  { %3946 = vmatmul.mubr.msk.f32.gmra.mxu1 %vm935_vm0, %v5232_v36  ;;  %4047 = vmatprep.mubr.msk.f32.mxu0 %vm935_vm0, %v5310_v26  ;;  %v2335_v36 = vld [vmem:[#allocation2 + $0x158] sm:$0xff] }
 0x1aa   :  { %3948 = vmatprep.mubr.msk.f32.mxu1 %vm935_vm0, %v5270_v22  ;;  %v2336_v22 = vld [vmem:[#allocation2 + $0x160] sm:$0xff] }
 0x1ac   :  { %4048 = vmatmul.mubr.msk.f32.gmra.mxu0 %vm935_vm0, %v5312_v14 }
 0x1ad   :  { %3949 = vmatmul.mubr.msk.f32.gmra.mxu1 %vm935_vm0, %v5272_v13  ;;  %4050 = vmatprep.mubr.msk.f32.mxu0 %vm935_vm0, %v5350_v10  ;;  %v2337_v13 = vld [vmem:[#allocation2 + $0x168] sm:$0xff] }
 0x1ae   :  { %3951 = vmatprep.mubr.msk.f32.mxu1 %vm935_vm0, %v5310_v26  ;;  %v2338_v26 = vld [vmem:[#allocation2 + $0x170] sm:$0xff] }
 0x1b0   :  { %4051 = vmatmul.mubr.msk.f32.gmra.mxu0 %vm935_vm0, %v5352_v5 }
 0x1b1   :  { %3952 = vmatmul.mubr.msk.f32.gmra.mxu1 %vm935_vm0, %v5312_v14  ;;  %4053 = vmatprep.mubr.msk.f32.mxu0 %vm935_vm0, %v5390_v44  ;;  %v2339_v14 = vld [vmem:[#allocation2 + $0x178] sm:$0xff] }
 0x1b2   :  { %3954 = vmatprep.mubr.msk.f32.mxu1 %vm935_vm0, %v5350_v10  ;;  %v2340_v10 = vld [vmem:[#allocation2 + $0x180] sm:$0xff] }
 0x1b4   :  { %4054 = vmatmul.mubr.msk.f32.gmra.mxu0 %vm935_vm0, %v5392_v58 }
 0x1b5   :  { %3955 = vmatmul.mubr.msk.f32.gmra.mxu1 %vm935_vm0, %v5352_v5  ;;  %4056 = vmatprep.mubr.msk.f32.mxu0 %vm935_vm0, %v5430_v23  ;;  %v2341_v5 = vld [vmem:[#allocation2 + $0x188] sm:$0xff] }
 0x1b6   :  { %3957 = vmatprep.mubr.msk.f32.mxu1 %vm935_vm0, %v5390_v44  ;;  %v2342_v44 = vld [vmem:[#allocation2 + $0x190] sm:$0xff] }
 0x1b8   :  { %4057 = vmatmul.mubr.msk.f32.gmra.mxu0 %vm935_vm0, %v5432_v47 }
 0x1b9   :  { %3958 = vmatmul.mubr.msk.f32.gmra.mxu1 %vm935_vm0, %v5392_v58  ;;  %4059 = vmatprep.mubr.msk.f32.mxu0 %vm935_vm0, %v5470_v3  ;;  %v2343_v58 = vld [vmem:[#allocation2 + $0x198] sm:$0xff] }
 0x1ba   :  { %3960 = vmatprep.mubr.msk.f32.mxu1 %vm935_vm0, %v5430_v23 }
 0x1bc   :  { %4060 = vmatmul.mubr.msk.f32.gmra.mxu0 %vm935_vm0, %v5472_v2 }
 0x1bd   :  { %3961 = vmatmul.mubr.msk.f32.gmra.mxu1 %vm935_vm0, %v5432_v47  ;;  %4062 = vmatprep.mubr.msk.f32.mxu0 %vm935_vm0, %v5494_v63 }
 0x1be   :  { %3963 = vmatprep.mubr.msk.f32.mxu1 %vm935_vm0, %v5470_v3 }
 0x1c0   :  { %4063 = vmatmul.mubr.msk.f32.gmra.mxu0 %vm935_vm0, %v5496_v30 }
 0x1c1   :  { %3964 = vmatmul.mubr.msk.f32.gmra.mxu1 %vm935_vm0, %v5472_v2  ;;  %4065 = vmatprep.mubr.msk.f32.mxu0 %vm935_vm0, %v2330_v51 }
 0x1c2   :  { %3966 = vmatprep.mubr.msk.f32.mxu1 %vm935_vm0, %v1043_v6 }
 0x1c4   :  { %4066 = vmatmul.mubr.msk.f32.gmra.mxu0 %vm935_vm0, %v2331_v11 }
 0x1c5   :  { %3967 = vmatmul.mubr.msk.f32.gmra.mxu1 %vm935_vm0, %v1044_v18  ;;  %4068 = vmatprep.mubr.msk.f32.mxu0 %vm935_vm0, %v2332_v38 }
 0x1c6   :  { %3969 = vmatprep.mubr.msk.f32.mxu1 %vm935_vm0, %v1045_v59 }
 0x1c8   :  { %4069 = vmatmul.mubr.msk.f32.gmra.mxu0 %vm935_vm0, %v2333_v28 }
 0x1c9   :  { %3970 = vmatmul.mubr.msk.f32.gmra.mxu1 %vm935_vm0, %v1046_v31  ;;  %4071 = vmatprep.mubr.msk.f32.mxu0 %vm935_vm0, %v2334_v35 }
 0x1ca   :  { %3972 = vmatprep.mubr.msk.f32.mxu1 %vm935_vm0, %v2332_v38 }
 0x1cc   :  { %4072 = vmatmul.mubr.msk.f32.gmra.mxu0 %vm935_vm0, %v2335_v36 }
 0x1cd   :  { %3973 = vmatmul.mubr.msk.f32.gmra.mxu1 %vm935_vm0, %v2333_v28  ;;  %4074 = vmatprep.mubr.msk.f32.mxu0 %vm935_vm0, %v2336_v22 }
 0x1ce   :  { %3975 = vmatprep.mubr.msk.f32.mxu1 %vm935_vm0, %v2334_v35 }
 0x1d0   :  { %4075 = vmatmul.mubr.msk.f32.gmra.mxu0 %vm935_vm0, %v2337_v13 }
 0x1d1   :  { %3976 = vmatmul.mubr.msk.f32.gmra.mxu1 %vm935_vm0, %v2335_v36  ;;  %4077 = vmatprep.mubr.msk.f32.mxu0 %vm935_vm0, %v2338_v26 }
 0x1d2   :  { %3978 = vmatprep.mubr.msk.f32.mxu1 %vm935_vm0, %v2336_v22 }
 0x1d4   :  { %4078 = vmatmul.mubr.msk.f32.gmra.mxu0 %vm935_vm0, %v2339_v14 }
 0x1d5   :  { %3979 = vmatmul.mubr.msk.f32.gmra.mxu1 %vm935_vm0, %v2337_v13  ;;  %4080 = vmatprep.mubr.msk.f32.mxu0 %vm935_vm0, %v2340_v10 }
 0x1d6   :  { %3981 = vmatprep.mubr.msk.f32.mxu1 %vm935_vm0, %v2338_v26 }
 0x1d8   :  { %4081 = vmatmul.mubr.msk.f32.gmra.mxu0 %vm935_vm0, %v2341_v5 }
 0x1d9   :  { %3982 = vmatmul.mubr.msk.f32.gmra.mxu1 %vm935_vm0, %v2339_v14  ;;  %4083 = vmatprep.mubr.msk.f32.mxu0 %vm935_vm0, %v2342_v44 }
 0x1da   :  { %3984 = vmatprep.mubr.msk.f32.mxu1 %vm935_vm0, %v2340_v10 }
 0x1dc   :  { %4084 = vmatmul.mubr.msk.f32.gmra.mxu0 %vm935_vm0, %v2343_v58 }
 0x1dd   :  { %3985 = vmatmul.mubr.msk.f32.gmra.mxu1 %vm935_vm0, %v2341_v5  ;;  %4086 = vmatprep.mubr.msk.f32.mxu0 %vm935_vm0, %v5158_v9 }
 0x1de   :  { %3987 = vmatprep.mubr.msk.f32.mxu1 %vm935_vm0, %v2342_v44 }
 0x1e0   :  { %4087 = vmatmul.mubr.msk.f32.gmra.mxu0 %vm935_vm0, %v5160_v12 }
 0x1e1   :  { %3988 = vmatmul.mubr.msk.f32.gmra.mxu1 %vm935_vm0, %v2343_v58  ;;  %4089 = vmatprep.mubr.msk.f32.mxu0 %vm935_vm0, %v5210_v27 }
 0x1e2   :  { %3990 = vmatprep.mubr.msk.f32.mxu1 %vm935_vm0, %v5158_v9  ;;  %v5665_v9 = vpop.f32.mrf.mxu1 }
 0x1e4   :  { %4090 = vmatmul.mubr.msk.f32.gmra.mxu0 %vm935_vm0, %v5212_v8 }
 0x1e5   :  { %3991 = vmatmul.mubr.msk.f32.gmra.mxu1 %vm935_vm0, %v5160_v12  ;;  %4092 = vmatprep.mubr.msk.f32.mxu0 %vm935_vm0, %v5250_v52  ;;  %v5667_v12 = vpop.f32.mrf.mxu0 }
 0x1e6   :  { %3993 = vmatprep.mubr.msk.f32.mxu1 %vm935_vm0, %v5210_v27  ;;  %v5669_v27 = vpop.f32.mrf.mxu1 }
 0x1e8   :  { %4093 = vmatmul.mubr.msk.f32.gmra.mxu0 %vm935_vm0, %v5252_v57 }
 0x1e9   :  { %3994 = vmatmul.mubr.msk.f32.gmra.mxu1 %vm935_vm0, %v5212_v8  ;;  %4095 = vmatprep.mubr.msk.f32.mxu0 %vm935_vm0, %v5290_v7  ;;  %v5679_v8 = vpop.f32.mrf.mxu0 }
 0x1ea   :  { %3996 = vmatprep.mubr.msk.f32.mxu1 %vm935_vm0, %v5250_v52  ;;  %v5681_v52 = vpop.f32.mrf.mxu1 }
 0x1eb   :  { %v5683_v15 = vpop.f32.mrf.mxu0 }
 0x1ec   :  { %4096 = vmatmul.mubr.msk.f32.gmra.mxu0 %vm935_vm0, %v5292_v60 }
 0x1ed   :  { %3997 = vmatmul.mubr.msk.f32.gmra.mxu1 %vm935_vm0, %v5252_v57  ;;  %4098 = vmatprep.mubr.msk.f32.mxu0 %vm935_vm0, %v5330_v25  ;;  %v5693_v57 = vpop.f32.mrf.mxu1 }
 0x1ee   :  { %3999 = vmatprep.mubr.msk.f32.mxu1 %vm935_vm0, %v5290_v7  ;;  %v5695_v7 = vpop.f32.mrf.mxu0 }
 0x1f0   :  { %4099 = vmatmul.mubr.msk.f32.gmra.mxu0 %vm935_vm0, %v5332_v45 }
 0x1f1   :  { %4000 = vmatmul.mubr.msk.f32.gmra.mxu1 %vm935_vm0, %v5292_v60  ;;  %4101 = vmatprep.mubr.msk.f32.mxu0 %vm935_vm0, %v5370_v50  ;;  %v5705_v60 = vpop.f32.mrf.mxu1 }
 0x1f2   :  { %4002 = vmatprep.mubr.msk.f32.mxu1 %vm935_vm0, %v5330_v25  ;;  %v5707_v25 = vpop.f32.mrf.mxu0 }
 0x1f3   :  { %v5709_v23 = vpop.f32.mrf.mxu1 }
 0x1f4   :  { %4102 = vmatmul.mubr.msk.f32.gmra.mxu0 %vm935_vm0, %v5372_v33 }
 0x1f5   :  { %4003 = vmatmul.mubr.msk.f32.gmra.mxu1 %vm935_vm0, %v5332_v45  ;;  %4104 = vmatprep.mubr.msk.f32.mxu0 %vm935_vm0, %v5410_v53  ;;  %v5719_v45 = vpop.f32.mrf.mxu0 }
 0x1f6   :  { %4005 = vmatprep.mubr.msk.f32.mxu1 %vm935_vm0, %v5370_v50  ;;  %v5721_v50 = vpop.f32.mrf.mxu1 }
 0x1f7   :  { %v5723_v47 = vpop.f32.mrf.mxu0 }
 0x1f8   :  { %4105 = vmatmul.mubr.msk.f32.gmra.mxu0 %vm935_vm0, %v5412_v16 }
 0x1f9   :  { %4006 = vmatmul.mubr.msk.f32.gmra.mxu1 %vm935_vm0, %v5372_v33  ;;  %4107 = vmatprep.mubr.msk.f32.mxu0 %vm935_vm0, %v5450_v61  ;;  %v5733_v33 = vpop.f32.mrf.mxu1  ;;  %v5735_v29 = vpop.f32.mrf.mxu0 }
 0x1fa   :  { %4008 = vmatprep.mubr.msk.f32.mxu1 %vm935_vm0, %v5410_v53  ;;  %v2362_v53 = vld [vmem:[#allocation2 + $0x230] sm:$0xff] }
 0x1fb   :  { %v5742_v32 = vpop.f32.mrf.mxu1  ;;  %v5744_v56 = vpop.f32.mrf.mxu0 }
 0x1fc   :  { %4108 = vmatmul.mubr.msk.f32.gmra.mxu0 %vm935_vm0, %v5452_v17 }
 0x1fd   :  { %4009 = vmatmul.mubr.msk.f32.gmra.mxu1 %vm935_vm0, %v5412_v16  ;;  %4110 = vmatprep.mubr.msk.f32.mxu0 %vm935_vm0, %v5485_v34  ;;  %v2363_v16 = vld [vmem:[#allocation2 + $0x238] sm:$0xff]  ;;  %v5746_v21 = vpop.f32.mrf.mxu1 }
 0x1fe   :  { %4011 = vmatprep.mubr.msk.f32.mxu1 %vm935_vm0, %v5450_v61  ;;  %v5749_v61 = vpop.f32.mrf.mxu0 }
 0x1ff   :  { %v5751_v54 = vpop.f32.mrf.mxu1 }
 0x200   :  { %4111 = vmatmul.mubr.msk.f32.gmra.mxu0 %vm935_vm0, %v5487_v20  ;;  %v5753_v40 = vpop.f32.mrf.mxu0 }
 0x201   :  { %4012 = vmatmul.mubr.msk.f32.gmra.mxu1 %vm935_vm0, %v5452_v17  ;;  %4113 = vmatprep.mubr.msk.f32.mxu0 %vm935_vm0, %v2362_v53  ;;  %v5755_v17 = vpop.f32.mrf.mxu1 }
 0x202   :  { %v5757_v0 = vpop.f32.mrf.mxu0 }
 0x203   :  { %v5759_v49 = vpop.f32.mrf.mxu1 }
 0x204   :  { %4114 = vmatmul.mubr.msk.f32.gmra.mxu0 %vm935_vm0, %v2363_v16  ;;  %v5761_v3 = vpop.f32.mrf.mxu0 }
 0x205   :  { %v5763_v2 = vpop.f32.mrf.mxu1 }
 0x206   :  { %v5765_v62 = vpop.f32.mrf.mxu0 }
 0x207   :  { %v5767_v1 = vpop.f32.mrf.mxu1 }
 0x208   :  { %6294 = vst [vmem:[#allocation3_spill] sm:$0xff] %v5767_v1  ;;  %v5769_v34 = vpop.f32.mrf.mxu0 }
 0x209   :  { %v5771_v20 = vpop.f32.mrf.mxu1 }
 0x20a   :  { %6295 = vst [vmem:[#allocation4_spill] sm:$0xff] %v5771_v20  ;;  %v5773_v41 = vpop.f32.mrf.mxu0 }
 0x20b   :  { %v5775_v19 = vpop.f32.mrf.mxu1 }
 0x20c   :  { %6296 = vst [vmem:[#allocation5_spill] sm:$0xff] %v5775_v19  ;;  %v5777_v63 = vpop.f32.mrf.mxu0 }
 0x20d   :  { %v5779_v30 = vpop.f32.mrf.mxu1 }
 0x20e   :  { %6297 = vst [vmem:[#allocation6_spill] sm:$0xff] %v5779_v30  ;;  %v5781_v42 = vpop.f32.mrf.mxu0 }
 0x20f   :  { %v5783_v37 = vpop.f32.mrf.mxu1 }
 0x210   :  { %6298 = vst [vmem:[#allocation7_spill] sm:$0xff] %v5783_v37  ;;  %v5785_v46 = vpop.f32.mrf.mxu0 }
 0x211   :  { %v5787_v24 = vpop.f32.mrf.mxu1 }
 0x212   :  { %6299 = vst [vmem:[#allocation8_spill] sm:$0xff] %v5787_v24  ;;  %v5789_v39 = vpop.f32.mrf.mxu0 }
 0x213   :  { %v5791_v4 = vpop.f32.mrf.mxu1 }
 0x214   :  { %6300 = vst [vmem:[#allocation9_spill] sm:$0xff] %v5791_v4  ;;  %v5793_v43 = vpop.f32.mrf.mxu0 }
 0x215   :  { %v5795_v55 = vpop.f32.mrf.mxu1 }
 0x216   :  { %6301 = vst [vmem:[#allocation10_spill] sm:$0xff] %v5795_v55  ;;  %v5797_v6 = vpop.f32.mrf.mxu0 }
 0x217   :  { %v5799_v51 = vpop.f32.mrf.mxu1 }
 0x218   :  { %6302 = vst [vmem:[#allocation11_spill] sm:$0xff] %v5799_v51  ;;  %v5801_v18 = vpop.f32.mrf.mxu0 }
 0x219   :  { %v5803_v11 = vpop.f32.mrf.mxu1 }
 0x21a   :  { %6303 = vst [vmem:[#allocation12_spill] sm:$0xff] %v5803_v11  ;;  %v5805_v59 = vpop.f32.mrf.mxu0 }
 0x21b   :  { %v5807_v38 = vpop.f32.mrf.mxu1 }
 0x21c   :  { %6304 = vst [vmem:[#allocation13_spill] sm:$0xff] %v5807_v38  ;;  %v5809_v31 = vpop.f32.mrf.mxu0 }
 0x21e   :  { %v5813_v35 = vpop.f32.mrf.mxu0 }
 0x221   :  { %v5811_v28 = vpop.f32.mrf.mxu1 }
 0x222   :  { %6305 = vst [vmem:[#allocation14_spill] sm:$0xff] %v5811_v28 }
 0x223   :  { %v5815_v36 = vpop.f32.mrf.mxu1 }
 0x224   :  { %6306 = vst [vmem:[#allocation15_spill] sm:$0xff] %v5815_v36 }
 0x229   :  { %v5817_v22 = vpop.f32.mrf.mxu0 }
 0x22b   :  { %v5821_v26 = vpop.f32.mrf.mxu0 }
 0x231   :  { %v5819_v13 = vpop.f32.mrf.mxu1 }
 0x232   :  { %6307 = vst [vmem:[#allocation16_spill] sm:$0xff] %v5819_v13 }
 0x233   :  { %v5823_v14 = vpop.f32.mrf.mxu1 }
 0x234   :  { %6308 = vst [vmem:[#allocation17_spill] sm:$0xff] %v5823_v14 }
 0x239   :  { %v5825_v10 = vpop.f32.mrf.mxu0 }
 0x23b   :  { %v5829_v44 = vpop.f32.mrf.mxu0 }
 0x241   :  { %v5827_v5 = vpop.f32.mrf.mxu1 }
 0x242   :  { %6309 = vst [vmem:[#allocation18_spill] sm:$0xff] %v5827_v5 }
 0x243   :  { %v5831_v58 = vpop.f32.mrf.mxu1 }
 0x244   :  { %6310 = vst [vmem:[#allocation19_spill] sm:$0xff] %v5831_v58  ;;  %v5833_v53 = vpop.f32.mrf.mxu0 }
 0x245   :  { %v3920_v16 = vpop.f32.mrf.mxu1 }
 0x246   :  { %v5835_v36 = vpop.f32.mrf.mxu0  ;;  %v1986_v13 = vadd.f32 %v3920_v16, %v5667_v12 }
 0x247   :  { %v1980_v28 = vpop.f32.mrf.mxu1 }
 0x248   :  { %v4022_v11 = vpop.f32.mrf.mxu0  ;;  %v1981_v14 = vadd.f32 %v1980_v28, %v5679_v8 }
 0x249   :  { %v3923_v38 = vpop.f32.mrf.mxu1  ;;  %v2945_v51 = vadd.f32 %v4022_v11, %v1986_v13 }
 0x24a   :  { %v2625_v5 = vpop.f32.mrf.mxu0  ;;  %v1996_v4 = vadd.f32 %v3923_v38, %v5683_v15 }
 0x24b   :  { %v1990_v55 = vpop.f32.mrf.mxu1  ;;  %3010 = vst.msk [vmem:[%s6292_s4 + $0x8] sm:$0xff] %vm3008_vm8, %v2945_v51  ;;  %v2944_v58 = vadd.f32 %v2625_v5, %v1981_v14  ;;  %v3207_v24 = vmul.f32 %v2945_v51, %v2945_v51  ;;  %v3074_v14 = vsel %vm3008_vm8, %v2945_v51, 0.0 }
 0x24c   :  { %v4025_v30 = vpop.f32.mrf.mxu0  ;;  %v1991_v12 = vadd.f32 %v1990_v55, %v5695_v7 }
 0x24d   :  { %v3926_v37 = vpop.f32.mrf.mxu1  ;;  %3009 = vst.msk [vmem:[%s6292_s4] sm:$0xff] %vm3008_vm8, %v2944_v58  ;;  %v3073_v8 = vsel %vm3008_vm8, %v2944_v58, 0.0  ;;  %v3206_v11 = vmul.f32 %v2944_v58, %v2944_v58  ;;  %v2947_v28 = vadd.f32 %v4025_v30, %v1996_v4  ;;  %v3271_v7 = vsel %vm3008_vm8, %v3207_v24, 0.0 }
 0x24e   :  { %v2635_v16 = vpop.f32.mrf.mxu0  ;;  %v2006_v38 = vadd.f32 %v3926_v37, %v5707_v25  ;;  %v3075_v55 = vadd.f32 %v3074_v14, %v3073_v8 }
 0x24f   :  { %v2000_v13 = vpop.f32.mrf.mxu1  ;;  %v3270_v15 = vsel %vm3008_vm8, %v3206_v11, 0.0  ;;  %v2946_v5 = vadd.f32 %v2635_v16, %v1991_v12  ;;  %3012 = vst.msk [vmem:[%s6292_s4 + $0x18] sm:$0xff] %vm3008_vm8, %v2947_v28  ;;  %v3209_v30 = vmul.f32 %v2947_v28, %v2947_v28  ;;  %v3078_v16 = vsel %vm3008_vm8, %v2947_v28, 0.0 }
 0x250   :  { %v4028_v58 = vpop.f32.mrf.mxu0  ;;  %v3272_v51 = vadd.f32 %v3271_v7, %v3270_v15  ;;  %v2001_v24 = vadd.f32 %v2000_v13, %v5719_v45 }
 0x251   :  { %v3929_v19 = vpop.f32.mrf.mxu1  ;;  %3011 = vst.msk [vmem:[%s6292_s4 + $0x10] sm:$0xff] %vm3008_vm8, %v2946_v5  ;;  %v3076_v4 = vsel %vm3008_vm8, %v2946_v5, 0.0  ;;  %v3208_v25 = vmul.f32 %v2946_v5, %v2946_v5  ;;  %v2949_v37 = vadd.f32 %v4028_v58, %v2006_v38  ;;  %v3275_v45 = vsel %vm3008_vm8, %v3209_v30, 0.0 }
 0x252   :  { %v3077_v12 = vadd.f32 %v3076_v4, %v3075_v55  ;;  %v2645_v11 = vpop.f32.mrf.mxu0  ;;  %v2016_v20 = vadd.f32 %v3929_v19, %v5723_v47 }
 0x253   :  { %v2010_v8 = vpop.f32.mrf.mxu1  ;;  %v3273_v14 = vsel %vm3008_vm8, %v3208_v25, 0.0  ;;  %3014 = vst.msk [vmem:[%s6292_s4 + $0x28] sm:$0xff] %vm3008_vm8, %v2949_v37  ;;  %v2948_v5 = vadd.f32 %v2645_v11, %v2001_v24  ;;  %v3211_v13 = vmul.f32 %v2949_v37, %v2949_v37 }
 0x254   :  { %v3274_v1 = vadd.f32 %v3273_v14, %v3272_v51  ;;  %v3079_v38 = vadd.f32 %v3078_v16, %v3077_v12  ;;  %v4031_v7 = vpop.f32.mrf.mxu0  ;;  %v2011_v28 = vadd.f32 %v2010_v8, %v5735_v29 }
 0x255   :  { %v3932_v15 = vpop.f32.mrf.mxu1  ;;  %v2951_v55 = vadd.f32 %v4031_v7, %v2016_v20  ;;  %3013 = vst.msk [vmem:[%s6292_s4 + $0x20] sm:$0xff] %vm3008_vm8, %v2948_v5  ;;  %v3080_v47 = vsel %vm3008_vm8, %v2948_v5, 0.0  ;;  %v3210_v19 = vmul.f32 %v2948_v5, %v2948_v5  ;;  %v3082_v20 = vsel %vm3008_vm8, %v2949_v37, 0.0 }
 0x256   :  { %v3276_v58 = vadd.f32 %v3275_v45, %v3274_v1  ;;  %v2655_v25 = vpop.f32.mrf.mxu0  ;;  %v3081_v51 = vadd.f32 %v3080_v47, %v3079_v38  ;;  %v2026_v30 = vadd.f32 %v3932_v15, %v5744_v56  ;;  %v3279_v11 = vsel %vm3008_vm8, %v3211_v13, 0.0 }
 0x257   :  { %v2020_v4 = vpop.f32.mrf.mxu1  ;;  %3016 = vst.msk [vmem:[%s6292_s4 + $0x38] sm:$0xff] %vm3008_vm8, %v2951_v55  ;;  %v3277_v29 = vsel %vm3008_vm8, %v3210_v19, 0.0  ;;  %v2950_v24 = vadd.f32 %v2655_v25, %v2011_v28  ;;  %v3213_v5 = vmul.f32 %v2951_v55, %v2951_v55  ;;  %v3086_v13 = vsel %vm3008_vm8, %v2951_v55, 0.0 }
 0x258   :  { %v4034_v8 = vpop.f32.mrf.mxu0  ;;  %v3278_v1 = vadd.f32 %v3277_v29, %v3276_v58  ;;  %v2021_v16 = vadd.f32 %v2020_v4, %v5749_v61  ;;  %v3083_v14 = vadd.f32 %v3082_v20, %v3081_v51 }
 0x259   :  { %v3935_v12 = vpop.f32.mrf.mxu1  ;;  %3015 = vst.msk [vmem:[%s6292_s4 + $0x30] sm:$0xff] %vm3008_vm8, %v2950_v24  ;;  %v3084_v37 = vsel %vm3008_vm8, %v2950_v24, 0.0  ;;  %v3212_v38 = vmul.f32 %v2950_v24, %v2950_v24  ;;  %v2953_v7 = vadd.f32 %v4034_v8, %v2026_v30  ;;  %v3283_v29 = vsel %vm3008_vm8, %v3213_v5, 0.0 }
 0x25a   :  { %v2665_v15 = vpop.f32.mrf.mxu0  ;;  %v3085_v45 = vadd.f32 %v3084_v37, %v3083_v14  ;;  %v3280_v28 = vadd.f32 %v3279_v11, %v3278_v1  ;;  %v2036_v19 = vadd.f32 %v3935_v12, %v5753_v40 }
 0x25b   :  { %v2030_v56 = vpop.f32.mrf.mxu1  ;;  %v2952_v47 = vadd.f32 %v2665_v15, %v2021_v16  ;;  %v3281_v61 = vsel %vm3008_vm8, %v3212_v38, 0.0  ;;  %3018 = vst.msk [vmem:[%s6292_s4 + $0x48] sm:$0xff] %vm3008_vm8, %v2953_v7  ;;  %v3215_v40 = vmul.f32 %v2953_v7, %v2953_v7  ;;  %v3090_v37 = vsel %vm3008_vm8, %v2953_v7, 0.0 }
 0x25c   :  { %v4037_v4 = vpop.f32.mrf.mxu0  ;;  %v3282_v25 = vadd.f32 %v3281_v61, %v3280_v28  ;;  %v3087_v51 = vadd.f32 %v3086_v13, %v3085_v45  ;;  %v2031_v30 = vadd.f32 %v2030_v56, %v5757_v0 }
 0x25d   :  { %v3938_v58 = vpop.f32.mrf.mxu1  ;;  %3017 = vst.msk [vmem:[%s6292_s4 + $0x40] sm:$0xff] %vm3008_vm8, %v2952_v47  ;;  %v3088_v55 = vsel %vm3008_vm8, %v2952_v47, 0.0  ;;  %v3214_v20 = vmul.f32 %v2952_v47, %v2952_v47  ;;  %v2955_v24 = vadd.f32 %v4037_v4, %v2036_v19  ;;  %v3287_v47 = vsel %vm3008_vm8, %v3215_v40, 0.0 }
 0x25e   :  { %v2675_v8 = vpop.f32.mrf.mxu0  ;;  %v3089_v11 = vadd.f32 %v3088_v55, %v3087_v51  ;;  %v3284_v1 = vadd.f32 %v3283_v29, %v3282_v25  ;;  %v2046_v14 = vadd.f32 %v3938_v58, %v5761_v3 }
 0x25f   :  { %v2040_v12 = vpop.f32.mrf.mxu1  ;;  %v3285_v16 = vsel %vm3008_vm8, %v3214_v20, 0.0  ;;  %3020 = vst.msk [vmem:[%s6292_s4 + $0x58] sm:$0xff] %vm3008_vm8, %v2955_v24  ;;  %v2954_v5 = vadd.f32 %v2675_v8, %v2031_v30  ;;  %v3217_v56 = vmul.f32 %v2955_v24, %v2955_v24  ;;  %v3094_v25 = vsel %vm3008_vm8, %v2955_v24, 0.0 }
 0x260   :  { %v4040_v15 = vpop.f32.mrf.mxu0  ;;  %v3286_v0 = vadd.f32 %v3285_v16, %v3284_v1  ;;  %v3091_v45 = vadd.f32 %v3090_v37, %v3089_v11  ;;  %v2041_v13 = vadd.f32 %v2040_v12, %v5765_v62 }
 0x261   :  { %v3941_v38 = vpop.f32.mrf.mxu1  ;;  %v2957_v28 = vadd.f32 %v4040_v15, %v2046_v14  ;;  %3019 = vst.msk [vmem:[%s6292_s4 + $0x50] sm:$0xff] %vm3008_vm8, %v2954_v5  ;;  %v3092_v3 = vsel %vm3008_vm8, %v2954_v5, 0.0  ;;  %v3216_v7 = vmul.f32 %v2954_v5, %v2954_v5  ;;  %v3291_v40 = vsel %vm3008_vm8, %v3217_v56, 0.0 }
 0x262   :  { %v2685_v19 = vpop.f32.mrf.mxu0  ;;  %v3093_v58 = vadd.f32 %v3092_v3, %v3091_v45  ;;  %v3288_v4 = vadd.f32 %v3287_v47, %v3286_v0  ;;  %v2056_v51 = vadd.f32 %v3941_v38, %v5769_v34 }
 0x263   :  { %v2050_v61 = vpop.f32.mrf.mxu1  ;;  %3022 = vst.msk [vmem:[%s6292_s4 + $0x68] sm:$0xff] %vm3008_vm8, %v2957_v28  ;;  %v3289_v62 = vsel %vm3008_vm8, %v3216_v7, 0.0  ;;  %v2956_v55 = vadd.f32 %v2685_v19, %v2041_v13  ;;  %v3219_v11 = vmul.f32 %v2957_v28, %v2957_v28  ;;  %v3098_v15 = vsel %vm3008_vm8, %v2957_v28, 0.0 }
 0x264   :  { %v4043_v29 = vpop.f32.mrf.mxu0  ;;  %v3290_v30 = vadd.f32 %v3289_v62, %v3288_v4  ;;  %v2051_v12 = vadd.f32 %v2050_v61, %v5773_v41  ;;  %v3095_v8 = vadd.f32 %v3094_v25, %v3093_v58 }
 0x265   :  { %v3944_v20 = vpop.f32.mrf.mxu1  ;;  %3021 = vst.msk [vmem:[%s6292_s4 + $0x60] sm:$0xff] %vm3008_vm8, %v2956_v55  ;;  %v3096_v24 = vsel %vm3008_vm8, %v2956_v55, 0.0  ;;  %v3218_v1 = vmul.f32 %v2956_v55, %v2956_v55  ;;  %v2959_v16 = vadd.f32 %v4043_v29, %v2056_v51  ;;  %v3295_v7 = vsel %vm3008_vm8, %v3219_v11, 0.0 }
 0x266   :  { %v2695_v14 = vpop.f32.mrf.mxu0  ;;  %v3097_v37 = vadd.f32 %v3096_v24, %v3095_v8  ;;  %v3292_v5 = vadd.f32 %v3291_v40, %v3290_v30  ;;  %v2066_v0 = vadd.f32 %v3944_v20, %v5777_v63 }
 0x267   :  { %v2060_v34 = vpop.f32.mrf.mxu1  ;;  %v2958_v38 = vadd.f32 %v2695_v14, %v2051_v12  ;;  %v3293_v41 = vsel %vm3008_vm8, %v3218_v1, 0.0  ;;  %3024 = vst.msk [vmem:[%s6292_s4 + $0x78] sm:$0xff] %vm3008_vm8, %v2959_v16  ;;  %v3221_v63 = vmul.f32 %v2959_v16, %v2959_v16  ;;  %v3102_v20 = vsel %vm3008_vm8, %v2959_v16, 0.0 }
 0x268   :  { %v4046_v45 = vpop.f32.mrf.mxu0  ;;  %v3294_v47 = vadd.f32 %v3293_v41, %v3292_v5  ;;  %v3099_v13 = vadd.f32 %v3098_v15, %v3097_v37  ;;  %v2061_v61 = vadd.f32 %v2060_v34, %v5781_v42 }
 0x269   :  { %v3947_v56 = vpop.f32.mrf.mxu1  ;;  %3023 = vst.msk [vmem:[%s6292_s4 + $0x70] sm:$0xff] %vm3008_vm8, %v2958_v38  ;;  %v3100_v28 = vsel %vm3008_vm8, %v2958_v38, 0.0  ;;  %v3220_v3 = vmul.f32 %v2958_v38, %v2958_v38  ;;  %v2961_v19 = vadd.f32 %v4046_v45, %v2066_v0  ;;  %v3299_v24 = vsel %vm3008_vm8, %v3221_v63, 0.0 }
 0x26a   :  { %v2705_v4 = vpop.f32.mrf.mxu0  ;;  %v3101_v25 = vadd.f32 %v3100_v28, %v3099_v13  ;;  %v3296_v62 = vadd.f32 %v3295_v7, %v3294_v47  ;;  %v2076_v55 = vadd.f32 %v3947_v56, %v5785_v46 }
 0x26b   :  { %v2070_v58 = vpop.f32.mrf.mxu1  ;;  %v3297_v51 = vsel %vm3008_vm8, %v3220_v3, 0.0  ;;  %3026 = vst.msk [vmem:[%s6292_s4 + $0x88] sm:$0xff] %vm3008_vm8, %v2961_v19  ;;  %v2960_v29 = vadd.f32 %v2705_v4, %v2061_v61  ;;  %v3223_v12 = vmul.f32 %v2961_v19, %v2961_v19  ;;  %v3106_v38 = vsel %vm3008_vm8, %v2961_v19, 0.0 }
 0x26c   :  { %v4049_v30 = vpop.f32.mrf.mxu0  ;;  %v3298_v42 = vadd.f32 %v3297_v51, %v3296_v62  ;;  %v3103_v8 = vadd.f32 %v3102_v20, %v3101_v25  ;;  %v2071_v1 = vadd.f32 %v2070_v58, %v5789_v39 }
 0x26d   :  { %v3950_v40 = vpop.f32.mrf.mxu1  ;;  %v2963_v11 = vadd.f32 %v4049_v30, %v2076_v55  ;;  %3025 = vst.msk [vmem:[%s6292_s4 + $0x80] sm:$0xff] %vm3008_vm8, %v2960_v29  ;;  %v3104_v46 = vsel %vm3008_vm8, %v2960_v29, 0.0  ;;  %v3222_v16 = vmul.f32 %v2960_v29, %v2960_v29  ;;  %v3303_v45 = vsel %vm3008_vm8, %v3223_v12, 0.0 }
 0x26e   :  { %v2715_v14 = vpop.f32.mrf.mxu0  ;;  %v3105_v37 = vadd.f32 %v3104_v46, %v3103_v8  ;;  %v3300_v5 = vadd.f32 %v3299_v24, %v3298_v42  ;;  %v2086_v15 = vadd.f32 %v3950_v40, %v5793_v43 }
 0x26f   :  { %v2080_v34 = vpop.f32.mrf.mxu1  ;;  %3028 = vst.msk [vmem:[%s6292_s4 + $0x98] sm:$0xff] %vm3008_vm8, %v2963_v11  ;;  %v3301_v39 = vsel %vm3008_vm8, %v3222_v16, 0.0  ;;  %v2962_v41 = vadd.f32 %v2715_v14, %v2071_v1  ;;  %v3225_v3 = vmul.f32 %v2963_v11, %v2963_v11  ;;  %v3110_v62 = vsel %vm3008_vm8, %v2963_v11, 0.0 }
 0x270   :  { %v4052_v56 = vpop.f32.mrf.mxu0  ;;  %v3302_v47 = vadd.f32 %v3301_v39, %v3300_v5  ;;  %v2081_v13 = vadd.f32 %v2080_v34, %v5797_v6  ;;  %v3107_v28 = vadd.f32 %v3106_v38, %v3105_v37 }
 0x271   :  { %v3953_v0 = vpop.f32.mrf.mxu1  ;;  %3027 = vst.msk [vmem:[%s6292_s4 + $0x90] sm:$0xff] %vm3008_vm8, %v2962_v41  ;;  %v3108_v7 = vsel %vm3008_vm8, %v2962_v41, 0.0  ;;  %v3224_v63 = vmul.f32 %v2962_v41, %v2962_v41  ;;  %v2965_v61 = vadd.f32 %v4052_v56, %v2086_v15  ;;  %v3307_v12 = vsel %vm3008_vm8, %v3225_v3, 0.0 }
 0x272   :  { %v2725_v19 = vpop.f32.mrf.mxu0  ;;  %v3109_v58 = vadd.f32 %v3108_v7, %v3107_v28  ;;  %v3304_v4 = vadd.f32 %v3303_v45, %v3302_v47  ;;  %v2096_v51 = vadd.f32 %v3953_v0, %v5801_v18 }
 0x273   :  { %v2090_v43 = vpop.f32.mrf.mxu1  ;;  %v2964_v25 = vadd.f32 %v2725_v19, %v2081_v13  ;;  %v3305_v6 = vsel %vm3008_vm8, %v3224_v63, 0.0  ;;  %3030 = vst.msk [vmem:[%s6292_s4 + $0xa8] sm:$0xff] %vm3008_vm8, %v2965_v61  ;;  %v3227_v18 = vmul.f32 %v2965_v61, %v2965_v61  ;;  %v3114_v37 = vsel %vm3008_vm8, %v2965_v61, 0.0 }
 0x274   :  { %v4055_v20 = vpop.f32.mrf.mxu0  ;;  %v3306_v29 = vadd.f32 %v3305_v6, %v3304_v4  ;;  %v3111_v40 = vadd.f32 %v3110_v62, %v3109_v58  ;;  %v2091_v8 = vadd.f32 %v2090_v43, %v5805_v59 }
 0x275   :  { %v3956_v55 = vpop.f32.mrf.mxu1  ;;  %3029 = vst.msk [vmem:[%s6292_s4 + $0xa0] sm:$0xff] %vm3008_vm8, %v2964_v25  ;;  %v3112_v30 = vsel %vm3008_vm8, %v2964_v25, 0.0  ;;  %v3226_v42 = vmul.f32 %v2964_v25, %v2964_v25  ;;  %v2967_v11 = vadd.f32 %v4055_v20, %v2096_v51  ;;  %v3311_v56 = vsel %vm3008_vm8, %v3227_v18, 0.0 }
 0x276   :  { %v2735_v1 = vpop.f32.mrf.mxu0  ;;  %v3113_v46 = vadd.f32 %v3112_v30, %v3111_v40  ;;  %v3308_v16 = vadd.f32 %v3307_v12, %v3306_v29  ;;  %v2106_v14 = vadd.f32 %v3956_v55, %v5809_v31 }
 0x277   :  { %v2100_v24 = vpop.f32.mrf.mxu1  ;;  %v3309_v34 = vsel %vm3008_vm8, %v3226_v42, 0.0  ;;  %3032 = vst.msk [vmem:[%s6292_s4 + $0xb8] sm:$0xff] %vm3008_vm8, %v2967_v11  ;;  %v2966_v5 = vadd.f32 %v2735_v1, %v2091_v8  ;;  %v3229_v15 = vmul.f32 %v2967_v11, %v2967_v11  ;;  %v3118_v63 = vsel %vm3008_vm8, %v2967_v11, 0.0 }
 0x278   :  { %v4058_v39 = vpop.f32.mrf.mxu0  ;;  %v3310_v59 = vadd.f32 %v3309_v34, %v3308_v16  ;;  %v3115_v41 = vadd.f32 %v3114_v37, %v3113_v46  ;;  %v2101_v45 = vadd.f32 %v2100_v24, %v5813_v35 }
 0x279   :  { %v3959_v38 = vpop.f32.mrf.mxu1  ;;  %v2969_v0 = vadd.f32 %v4058_v39, %v2106_v14  ;;  %3031 = vst.msk [vmem:[%s6292_s4 + $0xb0] sm:$0xff] %vm3008_vm8, %v2966_v5  ;;  %v3116_v31 = vsel %vm3008_vm8, %v2966_v5, 0.0  ;;  %v3228_v47 = vmul.f32 %v2966_v5, %v2966_v5  ;;  %v3315_v4 = vsel %vm3008_vm8, %v3229_v15, 0.0 }
 0x27a   :  { %v2745_v28 = vpop.f32.mrf.mxu0  ;;  %v3117_v3 = vadd.f32 %v3116_v31, %v3115_v41  ;;  %v3312_v7 = vadd.f32 %v3311_v56, %v3310_v59  ;;  %v2116_v61 = vadd.f32 %v3959_v38, %v5817_v22 }
 0x27b   :  { %v2110_v13 = vpop.f32.mrf.mxu1  ;;  %3034 = vst.msk [vmem:[%s6292_s4 + $0xc8] sm:$0xff] %vm3008_vm8, %v2969_v0  ;;  %v3313_v35 = vsel %vm3008_vm8, %v3228_v47, 0.0  ;;  %v2968_v43 = vadd.f32 %v2745_v28, %v2101_v45  ;;  %v3231_v51 = vmul.f32 %v2969_v0, %v2969_v0  ;;  %v3122_v18 = vsel %vm3008_vm8, %v2969_v0, 0.0 }
 0x27c   :  { %v4061_v58 = vpop.f32.mrf.mxu0  ;;  %v3314_v25 = vadd.f32 %v3313_v35, %v3312_v7  ;;  %v2111_v62 = vadd.f32 %v2110_v13, %v5821_v26  ;;  %v3119_v6 = vadd.f32 %v3118_v63, %v3117_v3 }
 0x27d   :  { %v3962_v19 = vpop.f32.mrf.mxu1  ;;  %3033 = vst.msk [vmem:[%s6292_s4 + $0xc0] sm:$0xff] %vm3008_vm8, %v2968_v43  ;;  %v3120_v55 = vsel %vm3008_vm8, %v2968_v43, 0.0  ;;  %v3230_v20 = vmul.f32 %v2968_v43, %v2968_v43  ;;  %v2971_v29 = vadd.f32 %v4061_v58, %v2116_v61  ;;  %v3319_v14 = vsel %vm3008_vm8, %v3231_v51, 0.0 }
 0x27e   :  { %v2755_v40 = vpop.f32.mrf.mxu0  ;;  %v3121_v30 = vadd.f32 %v3120_v55, %v3119_v6  ;;  %v3316_v42 = vadd.f32 %v3315_v4, %v3314_v25  ;;  %v2126_v8 = vadd.f32 %v3962_v19, %v5825_v10 }
 0x27f   :  { %v2120_v22 = vpop.f32.mrf.mxu1  ;;  %v2970_v12 = vadd.f32 %v2755_v40, %v2111_v62  ;;  %v3317_v26 = vsel %vm3008_vm8, %v3230_v20, 0.0  ;;  %3036 = vst.msk [vmem:[%s6292_s4 + $0xd8] sm:$0xff] %vm3008_vm8, %v2971_v29  ;;  %v3233_v10 = vmul.f32 %v2971_v29, %v2971_v29  ;;  %v3126_v56 = vsel %vm3008_vm8, %v2971_v29, 0.0 }
 0x280   :  { %v4064_v24 = vpop.f32.mrf.mxu0  ;;  %v3318_v1 = vadd.f32 %v3317_v26, %v3316_v42  ;;  %v3123_v46 = vadd.f32 %v3122_v18, %v3121_v30  ;;  %v2121_v37 = vadd.f32 %v2120_v22, %v5829_v44 }
 0x281   :  { %v3965_v11 = vpop.f32.mrf.mxu1  ;;  %3035 = vst.msk [vmem:[%s6292_s4 + $0xd0] sm:$0xff] %vm3008_vm8, %v2970_v12  ;;  %v3124_v16 = vsel %vm3008_vm8, %v2970_v12, 0.0  ;;  %v3232_v34 = vmul.f32 %v2970_v12, %v2970_v12  ;;  %v2973_v5 = vadd.f32 %v4064_v24, %v2126_v8  ;;  %v3323_v7 = vsel %vm3008_vm8, %v3233_v10, 0.0 }
 0x282   :  { %v2765_v39 = vpop.f32.mrf.mxu0  ;;  %v3125_v59 = vadd.f32 %v3124_v16, %v3123_v46  ;;  %v3320_v15 = vadd.f32 %v3319_v14, %v3318_v1  ;;  %v2136_v0 = vadd.f32 %v3965_v11, %v5833_v53 }
 0x283   :  { %v2130_v38 = vpop.f32.mrf.mxu1  ;;  %v3321_v41 = vsel %vm3008_vm8, %v3232_v34, 0.0  ;;  %3038 = vst.msk [vmem:[%s6292_s4 + $0xe8] sm:$0xff] %vm3008_vm8, %v2973_v5  ;;  %v2972_v45 = vadd.f32 %v2765_v39, %v2121_v37  ;;  %v3235_v13 = vmul.f32 %v2973_v5, %v2973_v5  ;;  %v3130_v4 = vsel %vm3008_vm8, %v2973_v5, 0.0 }
 0x284   :  { %v4067_v47 = vpop.f32.mrf.mxu0  ;;  %v3322_v44 = vadd.f32 %v3321_v41, %v3320_v15  ;;  %v3127_v28 = vadd.f32 %v3126_v56, %v3125_v59  ;;  %v2131_v63 = vadd.f32 %v2130_v38, %v5835_v36 }
 0x285   :  { %v3968_v31 = vpop.f32.mrf.mxu1  ;;  %v2975_v3 = vadd.f32 %v4067_v47, %v2136_v0  ;;  %3037 = vst.msk [vmem:[%s6292_s4 + $0xe0] sm:$0xff] %vm3008_vm8, %v2972_v45  ;;  %v3128_v53 = vsel %vm3008_vm8, %v2972_v45, 0.0  ;;  %v3234_v35 = vmul.f32 %v2972_v45, %v2972_v45  ;;  %v3327_v55 = vsel %vm3008_vm8, %v3235_v13, 0.0 }
 0x286   :  { %v2775_v43 = vpop.f32.mrf.mxu0  ;;  %v3129_v19 = vadd.f32 %v3128_v53, %v3127_v28  ;;  %v3324_v58 = vadd.f32 %v3323_v7, %v3322_v44  ;;  %v2146_v25 = vadd.f32 %v3968_v31, %v5655_v48 }
 0x287   :  { %v2140_v61 = vpop.f32.mrf.mxu1  ;;  %3040 = vst.msk [vmem:[%s6292_s4 + $0xf8] sm:$0xff] %vm3008_vm8, %v2975_v3  ;;  %v3325_v36 = vsel %vm3008_vm8, %v3234_v35, 0.0  ;;  %v2974_v62 = vadd.f32 %v2775_v43, %v2131_v63  ;;  %v3237_v40 = vmul.f32 %v2975_v3, %v2975_v3  ;;  %v3134_v24 = vsel %vm3008_vm8, %v2975_v3, 0.0 }
 0x288   :  { %v4070_v51 = vpop.f32.mrf.mxu0  ;;  %v3326_v20 = vadd.f32 %v3325_v36, %v3324_v58  ;;  %v2141_v29 = vadd.f32 %v2140_v61, %v5665_v9  ;;  %v3131_v22 = vadd.f32 %v3130_v4, %v3129_v19 }
 0x289   :  { %v3971_v6 = vpop.f32.mrf.mxu1  ;;  %3039 = vst.msk [vmem:[%s6292_s4 + $0xf0] sm:$0xff] %vm3008_vm8, %v2974_v62  ;;  %v3132_v30 = vsel %vm3008_vm8, %v2974_v62, 0.0  ;;  %v3236_v42 = vmul.f32 %v2974_v62, %v2974_v62  ;;  %v2977_v12 = vadd.f32 %v4070_v51, %v2146_v25  ;;  %v3331_v5 = vsel %vm3008_vm8, %v3237_v40, 0.0 }
 0x28a   :  { %v2785_v18 = vpop.f32.mrf.mxu0  ;;  %v3133_v26 = vadd.f32 %v3132_v30, %v3131_v22  ;;  %v3328_v8 = vadd.f32 %v3327_v55, %v3326_v20  ;;  %v2156_v1 = vadd.f32 %v3971_v6, %v5669_v27 }
 0x28b   :  { %v2150_v48 = vpop.f32.mrf.mxu1  ;;  %v2976_v11 = vadd.f32 %v2785_v18, %v2141_v29  ;;  %v3329_v9 = vsel %vm3008_vm8, %v3236_v42, 0.0  ;;  %3042 = vst.msk [vmem:[%s6292_s4 + $0x108] sm:$0xff] %vm3008_vm8, %v2977_v12  ;;  %v3239_v27 = vmul.f32 %v2977_v12, %v2977_v12  ;;  %v3138_v31 = vsel %vm3008_vm8, %v2977_v12, 0.0 }
 0x28c   :  { %v4073_v16 = vpop.f32.mrf.mxu0  ;;  %v3330_v34 = vadd.f32 %v3329_v9, %v3328_v8  ;;  %v3135_v14 = vadd.f32 %v3134_v24, %v3133_v26  ;;  %v2151_v38 = vadd.f32 %v2150_v48, %v5681_v52 }
 0x28d   :  { %v3974_v46 = vpop.f32.mrf.mxu1  ;;  %3041 = vst.msk [vmem:[%s6292_s4 + $0x100] sm:$0xff] %vm3008_vm8, %v2976_v11  ;;  %v3136_v10 = vsel %vm3008_vm8, %v2976_v11, 0.0  ;;  %v3238_v37 = vmul.f32 %v2976_v11, %v2976_v11  ;;  %v2979_v39 = vadd.f32 %v4073_v16, %v2156_v1  ;;  %v3335_v63 = vsel %vm3008_vm8, %v3239_v27, 0.0 }
 0x28e   :  { %v2795_v15 = vpop.f32.mrf.mxu0  ;;  %v3137_v41 = vadd.f32 %v3136_v10, %v3135_v14  ;;  %v3332_v0 = vadd.f32 %v3331_v5, %v3330_v34  ;;  %v2166_v45 = vadd.f32 %v3974_v46, %v5693_v57 }
 0x28f   :  { %v2160_v59 = vpop.f32.mrf.mxu1  ;;  %v3333_v56 = vsel %vm3008_vm8, %v3238_v37, 0.0  ;;  %3044 = vst.msk [vmem:[%s6292_s4 + $0x118] sm:$0xff] %vm3008_vm8, %v2979_v39  ;;  %v2978_v47 = vadd.f32 %v2795_v15, %v2151_v38  ;;  %v3241_v28 = vmul.f32 %v2979_v39, %v2979_v39  ;;  %v3142_v4 = vsel %vm3008_vm8, %v2979_v39, 0.0 }
 0x290   :  { %v4076_v13 = vpop.f32.mrf.mxu0  ;;  %v3334_v52 = vadd.f32 %v3333_v56, %v3332_v0  ;;  %v3139_v3 = vadd.f32 %v3138_v31, %v3137_v41  ;;  %v2161_v53 = vadd.f32 %v2160_v59, %v5705_v60 }
 0x291   :  { %v3977_v44 = vpop.f32.mrf.mxu1  ;;  %v2981_v7 = vadd.f32 %v4076_v13, %v2166_v45  ;;  %3043 = vst.msk [vmem:[%s6292_s4 + $0x110] sm:$0xff] %vm3008_vm8, %v2978_v47  ;;  %v3140_v57 = vsel %vm3008_vm8, %v2978_v47, 0.0  ;;  %v3240_v35 = vmul.f32 %v2978_v47, %v2978_v47  ;;  %v3339_v51 = vsel %vm3008_vm8, %v3241_v28, 0.0 }
 0x292   :  { %v2805_v43 = vpop.f32.mrf.mxu0  ;;  %v3141_v19 = vadd.f32 %v3140_v57, %v3139_v3  ;;  %v3336_v58 = vadd.f32 %v3335_v63, %v3334_v52  ;;  %v2176_v36 = vadd.f32 %v3977_v44, %v5709_v23 }
 0x293   :  { %v2170_v61 = vpop.f32.mrf.mxu1  ;;  %3046 = vst.msk [vmem:[%s6292_s4 + $0x128] sm:$0xff] %vm3008_vm8, %v2981_v7  ;;  %v3337_v60 = vsel %vm3008_vm8, %v3240_v35, 0.0  ;;  %v2980_v25 = vadd.f32 %v2805_v43, %v2161_v53  ;;  %v3243_v22 = vmul.f32 %v2981_v7, %v2981_v7  ;;  %v3146_v8 = vsel %vm3008_vm8, %v2981_v7, 0.0 }
 0x294   :  { %v4079_v6 = vpop.f32.mrf.mxu0  ;;  %v3338_v55 = vadd.f32 %v3337_v60, %v3336_v58  ;;  %v2171_v20 = vadd.f32 %v2170_v61, %v5721_v50  ;;  %v3143_v29 = vadd.f32 %v3142_v4, %v3141_v19 }
 0x295   :  { %v3980_v62 = vpop.f32.mrf.mxu1  ;;  %3045 = vst.msk [vmem:[%s6292_s4 + $0x120] sm:$0xff] %vm3008_vm8, %v2980_v25  ;;  %v3144_v40 = vsel %vm3008_vm8, %v2980_v25, 0.0  ;;  %v3242_v30 = vmul.f32 %v2980_v25, %v2980_v25  ;;  %v2983_v42 = vadd.f32 %v4079_v6, %v2176_v36  ;;  %v3343_v14 = vsel %vm3008_vm8, %v3243_v22, 0.0 }
 0x296   :  { %v2815_v12 = vpop.f32.mrf.mxu0  ;;  %v3145_v48 = vadd.f32 %v3144_v40, %v3143_v29  ;;  %v3340_v18 = vadd.f32 %v3339_v51, %v3338_v55  ;;  %v2186_v11 = vadd.f32 %v3980_v62, %v5733_v33 }
 0x297   :  { %v2180_v23 = vpop.f32.mrf.mxu1  ;;  %v2982_v26 = vadd.f32 %v2815_v12, %v2171_v20  ;;  %v3341_v50 = vsel %vm3008_vm8, %v3242_v30, 0.0  ;;  %3048 = vst.msk [vmem:[%s6292_s4 + $0x138] sm:$0xff] %vm3008_vm8, %v2983_v42  ;;  %v3245_v33 = vmul.f32 %v2983_v42, %v2983_v42  ;;  %v3150_v41 = vsel %vm3008_vm8, %v2983_v42, 0.0 }
 0x298   :  { %v4082_v9 = vpop.f32.mrf.mxu0  ;;  %v3342_v1 = vadd.f32 %v3341_v50, %v3340_v18  ;;  %v3147_v46 = vadd.f32 %v3146_v8, %v3145_v48  ;;  %v2181_v10 = vadd.f32 %v2180_v23, %v5742_v32  ;;  %v6311_v50 = vld [vmem:[#allocation3_spill] sm:$0xff] }
 0x299   :  { %v3983_v24 = vpop.f32.mrf.mxu1  ;;  %3047 = vst.msk [vmem:[%s6292_s4 + $0x130] sm:$0xff] %vm3008_vm8, %v2982_v26  ;;  %v3148_v16 = vsel %vm3008_vm8, %v2982_v26, 0.0  ;;  %v3244_v34 = vmul.f32 %v2982_v26, %v2982_v26  ;;  %v2985_v37 = vadd.f32 %v4082_v9, %v2186_v11  ;;  %v3347_v13 = vsel %vm3008_vm8, %v3245_v33, 0.0 }
 0x29a   :  { %v2825_v27 = vpop.f32.mrf.mxu0  ;;  %v3149_v38 = vadd.f32 %v3148_v16, %v3147_v46  ;;  %v3344_v39 = vadd.f32 %v3343_v14, %v3342_v1  ;;  %v2196_v15 = vadd.f32 %v3983_v24, %v5746_v21  ;;  %v6312_v14 = vld [vmem:[#allocation4_spill] sm:$0xff] }
 0x29b   :  { %v2190_v5 = vpop.f32.mrf.mxu1  ;;  %v3345_v59 = vsel %vm3008_vm8, %v3244_v34, 0.0  ;;  %3050 = vst.msk [vmem:[%s6292_s4 + $0x148] sm:$0xff] %vm3008_vm8, %v2985_v37  ;;  %v2984_v0 = vadd.f32 %v2825_v27, %v2181_v10  ;;  %v3247_v31 = vmul.f32 %v2985_v37, %v2985_v37  ;;  %v3154_v57 = vsel %vm3008_vm8, %v2985_v37, 0.0 }
 0x29c   :  { %v4085_v45 = vpop.f32.mrf.mxu0  ;;  %v3346_v32 = vadd.f32 %v3345_v59, %v3344_v39  ;;  %v3151_v47 = vadd.f32 %v3150_v41, %v3149_v38  ;;  %v2191_v52 = vadd.f32 %v2190_v5, %v5751_v54 }
 0x29d   :  { %v3986_v56 = vpop.f32.mrf.mxu1  ;;  %v2987_v44 = vadd.f32 %v4085_v45, %v2196_v15  ;;  %3049 = vst.msk [vmem:[%s6292_s4 + $0x140] sm:$0xff] %vm3008_vm8, %v2984_v0  ;;  %v3152_v21 = vsel %vm3008_vm8, %v2984_v0, 0.0  ;;  %v3246_v28 = vmul.f32 %v2984_v0, %v2984_v0  ;;  %v3351_v58 = vsel %vm3008_vm8, %v3247_v31, 0.0  ;;  %v6313_v0 = vld [vmem:[#allocation5_spill] sm:$0xff] }
 0x29e   :  { %v2835_v7 = vpop.f32.mrf.mxu0  ;;  %v3153_v63 = vadd.f32 %v3152_v21, %v3151_v47  ;;  %v3348_v53 = vadd.f32 %v3347_v13, %v3346_v32  ;;  %v2206_v35 = vadd.f32 %v3986_v56, %v5755_v17 }
 0x29f   :  { %v2200_v3 = vpop.f32.mrf.mxu1  ;;  %3052 = vst.msk [vmem:[%s6292_s4 + $0x158] sm:$0xff] %vm3008_vm8, %v2987_v44  ;;  %v3349_v54 = vsel %vm3008_vm8, %v3246_v28, 0.0  ;;  %v2986_v61 = vadd.f32 %v2835_v7, %v2191_v52  ;;  %v3249_v25 = vmul.f32 %v2987_v44, %v2987_v44  ;;  %v3158_v40 = vsel %vm3008_vm8, %v2987_v44, 0.0  ;;  %v6314_v28 = vld [vmem:[#allocation6_spill] sm:$0xff] }
 0x2a0   :  { %v4088_v19 = vpop.f32.mrf.mxu0  ;;  %v3350_v4 = vadd.f32 %v3349_v54, %v3348_v53  ;;  %v2201_v60 = vadd.f32 %v2200_v3, %v5759_v49  ;;  %v3155_v36 = vadd.f32 %v3154_v57, %v3153_v63 }
 0x2a1   :  { %v3989_v43 = vpop.f32.mrf.mxu1  ;;  %3051 = vst.msk [vmem:[%s6292_s4 + $0x150] sm:$0xff] %vm3008_vm8, %v2986_v61  ;;  %v3156_v62 = vsel %vm3008_vm8, %v2986_v61, 0.0  ;;  %v3248_v6 = vmul.f32 %v2986_v61, %v2986_v61  ;;  %v2989_v51 = vadd.f32 %v4088_v19, %v2206_v35  ;;  %v3355_v8 = vsel %vm3008_vm8, %v3249_v25, 0.0  ;;  %v6315_v35 = vld [vmem:[#allocation7_spill] sm:$0xff] }
 0x2a2   :  { %v2845_v55 = vpop.f32.mrf.mxu0  ;;  %v3157_v20 = vadd.f32 %v3156_v62, %v3155_v36  ;;  %v3352_v29 = vadd.f32 %v3351_v58, %v3350_v4  ;;  %v2216_v30 = vadd.f32 %v3989_v43, %v5763_v2 }
 0x2a3   :  { %v2210_v17 = vpop.f32.mrf.mxu1  ;;  %v2988_v22 = vadd.f32 %v2845_v55, %v2201_v60  ;;  %v3353_v49 = vsel %vm3008_vm8, %v3248_v6, 0.0  ;;  %3054 = vst.msk [vmem:[%s6292_s4 + $0x168] sm:$0xff] %vm3008_vm8, %v2989_v51  ;;  %v3251_v2 = vmul.f32 %v2989_v51, %v2989_v51  ;;  %v3162_v10 = vsel %vm3008_vm8, %v2989_v51, 0.0 }
 0x2a4   :  { %v4091_v23 = vpop.f32.mrf.mxu0  ;;  %v3354_v12 = vadd.f32 %v3353_v49, %v3352_v29  ;;  %v3159_v48 = vadd.f32 %v3158_v40, %v3157_v20  ;;  %v2211_v11 = vadd.f32 %v2210_v17, %v6311_v50  ;;  %v6316_v20 = vld [vmem:[#allocation8_spill] sm:$0xff] }
 0x2a5   :  { %v3992_v42 = vpop.f32.mrf.mxu1  ;;  %3053 = vst.msk [vmem:[%s6292_s4 + $0x160] sm:$0xff] %vm3008_vm8, %v2988_v22  ;;  %v3160_v18 = vsel %vm3008_vm8, %v2988_v22, 0.0  ;;  %v3250_v26 = vmul.f32 %v2988_v22, %v2988_v22  ;;  %v2991_v24 = vadd.f32 %v4091_v23, %v2216_v30  ;;  %v3359_v41 = vsel %vm3008_vm8, %v3251_v2, 0.0 }
 0x2a6   :  { %v2855_v1 = vpop.f32.mrf.mxu0  ;;  %v3161_v46 = vadd.f32 %v3160_v18, %v3159_v48  ;;  %v3356_v16 = vadd.f32 %v3355_v8, %v3354_v12  ;;  %v2226_v33 = vadd.f32 %v3992_v42, %v6312_v14  ;;  %v6317_v18 = vld [vmem:[#allocation9_spill] sm:$0xff] }
 0x2a7   :  { %v2220_v9 = vpop.f32.mrf.mxu1  ;;  %v3357_v34 = vsel %vm3008_vm8, %v3250_v26, 0.0  ;;  %3056 = vst.msk [vmem:[%s6292_s4 + $0x178] sm:$0xff] %vm3008_vm8, %v2991_v24  ;;  %v2990_v37 = vadd.f32 %v2855_v1, %v2211_v11  ;;  %v3253_v39 = vmul.f32 %v2991_v24, %v2991_v24  ;;  %v3166_v52 = vsel %vm3008_vm8, %v2991_v24, 0.0  ;;  %v6318_v1 = vld [vmem:[#allocation10_spill] sm:$0xff] }
 0x2a8   :  { %v4094_v27 = vpop.f32.mrf.mxu0  ;;  %v3358_v38 = vadd.f32 %v3357_v34, %v3356_v16  ;;  %v3163_v59 = vadd.f32 %v3162_v10, %v3161_v46  ;;  %v2221_v56 = vadd.f32 %v2220_v9, %v6313_v0 }
 0x2a9   :  { %v3995_v5 = vpop.f32.mrf.mxu1  ;;  %v2993_v15 = vadd.f32 %v4094_v27, %v2226_v33  ;;  %3055 = vst.msk [vmem:[%s6292_s4 + $0x170] sm:$0xff] %vm3008_vm8, %v2990_v37  ;;  %v3164_v45 = vsel %vm3008_vm8, %v2990_v37, 0.0  ;;  %v3252_v32 = vmul.f32 %v2990_v37, %v2990_v37  ;;  %v3363_v57 = vsel %vm3008_vm8, %v3253_v39, 0.0  ;;  %v6319_v39 = vld [vmem:[#allocation11_spill] sm:$0xff] }
 0x2aa   :  { %v2865_v47 = vpop.f32.mrf.mxu0  ;;  %v3165_v44 = vadd.f32 %v3164_v45, %v3163_v59  ;;  %v3360_v13 = vadd.f32 %v3359_v41, %v3358_v38  ;;  %v2236_v3 = vadd.f32 %v3995_v5, %v6314_v28 }
 0x2ab   :  { %v2230_v31 = vpop.f32.mrf.mxu1  ;;  %3058 = vst.msk [vmem:[%s6292_s4 + $0x188] sm:$0xff] %vm3008_vm8, %v2993_v15  ;;  %v3361_v21 = vsel %vm3008_vm8, %v3252_v32, 0.0  ;;  %v2992_v7 = vadd.f32 %v2865_v47, %v2221_v56  ;;  %v3255_v19 = vmul.f32 %v2993_v15, %v2993_v15  ;;  %v3170_v17 = vsel %vm3008_vm8, %v2993_v15, 0.0 }
 0x2ac   :  { %v4097_v53 = vpop.f32.mrf.mxu0  ;;  %v3362_v54 = vadd.f32 %v3361_v21, %v3360_v13  ;;  %v2231_v61 = vadd.f32 %v2230_v31, %v6315_v35  ;;  %v3167_v43 = vadd.f32 %v3166_v52, %v3165_v44  ;;  %v6320_v44 = vld [vmem:[#allocation12_spill] sm:$0xff] }
 0x2ad   :  { %v3998_v63 = vpop.f32.mrf.mxu1  ;;  %3057 = vst.msk [vmem:[%s6292_s4 + $0x180] sm:$0xff] %vm3008_vm8, %v2992_v7  ;;  %v3168_v58 = vsel %vm3008_vm8, %v2992_v7, 0.0  ;;  %v3254_v4 = vmul.f32 %v2992_v7, %v2992_v7  ;;  %v2995_v60 = vadd.f32 %v4097_v53, %v2236_v3  ;;  %v3367_v12 = vsel %vm3008_vm8, %v3255_v19, 0.0 }
 0x2ae   :  { %v2875_v25 = vpop.f32.mrf.mxu0  ;;  %v3169_v62 = vadd.f32 %v3168_v58, %v3167_v43  ;;  %v3364_v6 = vadd.f32 %v3363_v57, %v3362_v54  ;;  %v2246_v29 = vadd.f32 %v3998_v63, %v6316_v20  ;;  %v6321_v63 = vld [vmem:[#allocation13_spill] sm:$0xff] }
 0x2af   :  { %v2240_v36 = vpop.f32.mrf.mxu1  ;;  %v2994_v51 = vadd.f32 %v2875_v25, %v2231_v61  ;;  %v3365_v55 = vsel %vm3008_vm8, %v3254_v4, 0.0  ;;  %3060 = vst.msk [vmem:[%s6292_s4 + $0x198] sm:$0xff] %vm3008_vm8, %v2995_v60  ;;  %v3257_v48 = vmul.f32 %v2995_v60, %v2995_v60  ;;  %v3174_v16 = vsel %vm3008_vm8, %v2995_v60, 0.0 }
 0x2b0   :  { %v4100_v40 = vpop.f32.mrf.mxu0  ;;  %v3366_v49 = vadd.f32 %v3365_v55, %v3364_v6  ;;  %v3171_v30 = vadd.f32 %v3170_v17, %v3169_v62  ;;  %v2241_v26 = vadd.f32 %v2240_v36, %v6317_v18  ;;  %v6322_v6 = vld [vmem:[#allocation14_spill] sm:$0xff] }
 0x2b1   :  { %v4001_v22 = vpop.f32.mrf.mxu1  ;;  %3059 = vst.msk [vmem:[%s6292_s4 + $0x190] sm:$0xff] %vm3008_vm8, %v2994_v51  ;;  %v3172_v42 = vsel %vm3008_vm8, %v2994_v51, 0.0  ;;  %v3256_v23 = vmul.f32 %v2994_v51, %v2994_v51  ;;  %v2997_v8 = vadd.f32 %v4100_v40, %v2246_v29  ;;  %v3371_v38 = vsel %vm3008_vm8, %v3257_v48, 0.0 }
 0x2b2   :  { %v2885_v50 = vpop.f32.mrf.mxu0  ;;  %v3173_v11 = vadd.f32 %v3172_v42, %v3171_v30  ;;  %v3368_v24 = vadd.f32 %v3367_v12, %v3366_v49  ;;  %v2256_v46 = vadd.f32 %v4001_v22, %v6318_v1  ;;  %v6323_v42 = vld [vmem:[#allocation15_spill] sm:$0xff] }
 0x2b3   :  { %v2250_v2 = vpop.f32.mrf.mxu1  ;;  %v3369_v9 = vsel %vm3008_vm8, %v3256_v23, 0.0  ;;  %3062 = vst.msk [vmem:[%s6292_s4 + $0x1a8] sm:$0xff] %vm3008_vm8, %v2997_v8  ;;  %v2996_v34 = vadd.f32 %v2885_v50, %v2241_v26  ;;  %v3259_v37 = vmul.f32 %v2997_v8, %v2997_v8  ;;  %v3178_v31 = vsel %vm3008_vm8, %v2997_v8, 0.0  ;;  %v6324_v50 = vld [vmem:[#allocation16_spill] sm:$0xff] }
 0x2b4   :  { %v4103_v33 = vpop.f32.mrf.mxu0  ;;  %v3370_v10 = vadd.f32 %v3369_v9, %v3368_v24  ;;  %v3175_v5 = vadd.f32 %v3174_v16, %v3173_v11  ;;  %v2251_v59 = vadd.f32 %v2250_v2, %v6319_v39 }
 0x2b5   :  { %v4004_v14 = vpop.f32.mrf.mxu1  ;;  %v2999_v27 = vadd.f32 %v4103_v33, %v2256_v46  ;;  %3061 = vst.msk [vmem:[%s6292_s4 + $0x1a0] sm:$0xff] %vm3008_vm8, %v2996_v34  ;;  %v3176_v15 = vsel %vm3008_vm8, %v2996_v34, 0.0  ;;  %v3258_v41 = vmul.f32 %v2996_v34, %v2996_v34  ;;  %v3375_v3 = vsel %vm3008_vm8, %v3259_v37, 0.0  ;;  %v6325_v37 = vld [vmem:[#allocation17_spill] sm:$0xff] }
 0x2b6   :  { %v2895_v56 = vpop.f32.mrf.mxu0  ;;  %v3177_v45 = vadd.f32 %v3176_v15, %v3175_v5  ;;  %v3372_v32 = vadd.f32 %v3371_v38, %v3370_v10  ;;  %v2266_v13 = vadd.f32 %v4004_v14, %v6320_v44 }
 0x2b7   :  { %v2260_v0 = vpop.f32.mrf.mxu1  ;;  %3064 = vst.msk [vmem:[%s6292_s4 + $0x1b8] sm:$0xff] %vm3008_vm8, %v2999_v27  ;;  %v3373_v47 = vsel %vm3008_vm8, %v3258_v41, 0.0  ;;  %v2998_v52 = vadd.f32 %v2895_v56, %v2251_v59  ;;  %v3261_v54 = vmul.f32 %v2999_v27, %v2999_v27  ;;  %v3182_v25 = vsel %vm3008_vm8, %v2999_v27, 0.0  ;;  %v6326_v41 = vld [vmem:[#allocation18_spill] sm:$0xff] }
 0x2b8   :  { %v4106_v28 = vpop.f32.mrf.mxu0  ;;  %v3374_v7 = vadd.f32 %v3373_v47, %v3372_v32  ;;  %v2261_v53 = vadd.f32 %v2260_v0, %v6321_v63  ;;  %v3179_v57 = vadd.f32 %v3178_v31, %v3177_v45 }
 0x2b9   :  { %v4007_v21 = vpop.f32.mrf.mxu1  ;;  %3063 = vst.msk [vmem:[%s6292_s4 + $0x1b0] sm:$0xff] %vm3008_vm8, %v2998_v52  ;;  %v3180_v35 = vsel %vm3008_vm8, %v2998_v52, 0.0  ;;  %v3260_v61 = vmul.f32 %v2998_v52, %v2998_v52  ;;  %v3001_v43 = vadd.f32 %v4106_v28, %v2266_v13  ;;  %v3379_v49 = vsel %vm3008_vm8, %v3261_v54, 0.0 }
 0x2ba   :  { %v2905_v58 = vpop.f32.mrf.mxu0  ;;  %v3181_v4 = vadd.f32 %v3180_v35, %v3179_v57  ;;  %v3376_v60 = vadd.f32 %v3375_v3, %v3374_v7  ;;  %v2276_v51 = vadd.f32 %v4007_v21, %v6322_v6  ;;  %v6327_v3 = vld [vmem:[#allocation19_spill] sm:$0xff] }
 0x2bb   :  { %v2270_v19 = vpop.f32.mrf.mxu1  ;;  %v3000_v36 = vadd.f32 %v2905_v58, %v2261_v53  ;;  %v3377_v62 = vsel %vm3008_vm8, %v3260_v61, 0.0  ;;  %3066 = vst.msk [vmem:[%s6292_s4 + $0x1c8] sm:$0xff] %vm3008_vm8, %v3001_v43  ;;  %v3263_v30 = vmul.f32 %v3001_v43, %v3001_v43  ;;  %v3186_v24 = vsel %vm3008_vm8, %v3001_v43, 0.0 }
 0x2bc   :  { %v4109_v55 = vpop.f32.mrf.mxu0  ;;  %v3378_v20 = vadd.f32 %v3377_v62, %v3376_v60  ;;  %v3183_v29 = vadd.f32 %v3182_v25, %v3181_v4  ;;  %v2271_v23 = vadd.f32 %v2270_v19, %v6323_v42 }
 0x2bd   :  { %v4010_v17 = vpop.f32.mrf.mxu1  ;;  %3065 = vst.msk [vmem:[%s6292_s4 + $0x1c0] sm:$0xff] %vm3008_vm8, %v3000_v36  ;;  %v3184_v22 = vsel %vm3008_vm8, %v3000_v36, 0.0  ;;  %v3262_v40 = vmul.f32 %v3000_v36, %v3000_v36  ;;  %v3003_v12 = vadd.f32 %v4109_v55, %v2276_v51  ;;  %v3383_v10 = vsel %vm3008_vm8, %v3263_v30, 0.0 }
 0x2be   :  { %v2915_v18 = vpop.f32.mrf.mxu0  ;;  %v3185_v26 = vadd.f32 %v3184_v22, %v3183_v29  ;;  %v3380_v8 = vadd.f32 %v3379_v49, %v3378_v20  ;;  %v2286_v11 = vadd.f32 %v4010_v17, %v6324_v50 }
 0x2bf   :  { %v2280_v48 = vpop.f32.mrf.mxu1  ;;  %v3381_v2 = vsel %vm3008_vm8, %v3262_v40, 0.0  ;;  %3068 = vst.msk [vmem:[%s6292_s4 + $0x1d8] sm:$0xff] %vm3008_vm8, %v3003_v12  ;;  %v3002_v9 = vadd.f32 %v2915_v18, %v2271_v23  ;;  %v3265_v34 = vmul.f32 %v3003_v12, %v3003_v12  ;;  %v3190_v45 = vsel %vm3008_vm8, %v3003_v12, 0.0 }
 0x2c0   :  { %v4112_v46 = vpop.f32.mrf.mxu0  ;;  %v3382_v16 = vadd.f32 %v3381_v2, %v3380_v8  ;;  %v3187_v14 = vadd.f32 %v3186_v24, %v3185_v26  ;;  %v2281_v5 = vadd.f32 %v2280_v48, %v6325_v37 }
 0x2c1   :  { %v4013_v1 = vpop.f32.mrf.mxu1  ;;  %v3005_v33 = vadd.f32 %v4112_v46, %v2286_v11  ;;  %3067 = vst.msk [vmem:[%s6292_s4 + $0x1d0] sm:$0xff] %vm3008_vm8, %v3002_v9  ;;  %v3188_v27 = vsel %vm3008_vm8, %v3002_v9, 0.0  ;;  %v3264_v38 = vmul.f32 %v3002_v9, %v3002_v9  ;;  %v3387_v44 = vsel %vm3008_vm8, %v3265_v34, 0.0 }
 0x2c2   :  { %v2925_v39 = vpop.f32.mrf.mxu0  ;;  %v3189_v59 = vadd.f32 %v3188_v27, %v3187_v14  ;;  %v3384_v15 = vadd.f32 %v3383_v10, %v3382_v16  ;;  %v2296_v0 = vadd.f32 %v4013_v1, %v6326_v41 }
 0x2c3   :  { %3070 = vst.msk [vmem:[%s6292_s4 + $0x1e8] sm:$0xff] %vm3008_vm8, %v3005_v33  ;;  %v2290_v56 = vpop.f32.mrf.mxu1  ;;  %v3385_v32 = vsel %vm3008_vm8, %v3264_v38, 0.0  ;;  %v3004_v31 = vadd.f32 %v2925_v39, %v2281_v5  ;;  %v3267_v28 = vmul.f32 %v3005_v33, %v3005_v33  ;;  %v3194_v61 = vsel %vm3008_vm8, %v3005_v33, 0.0 }
 0x2c4   :  { %v4115_v47 = vpop.f32.mrf.mxu0  ;;  %v3386_v13 = vadd.f32 %v3385_v32, %v3384_v15  ;;  %v3191_v52 = vadd.f32 %v3190_v45, %v3189_v59  ;;  %v2291_v7 = vadd.f32 %v2290_v56, %v6327_v3 }
 0x2c5   :  { %v3007_v21 = vadd.f32 %v4115_v47, %v2296_v0  ;;  %3069 = vst.msk [vmem:[%s6292_s4 + $0x1e0] sm:$0xff] %vm3008_vm8, %v3004_v31  ;;  %v3192_v63 = vsel %vm3008_vm8, %v3004_v31, 0.0  ;;  %v3266_v53 = vmul.f32 %v3004_v31, %v3004_v31  ;;  %v3391_v60 = vsel %vm3008_vm8, %v3267_v28, 0.0 }
 0x2c6   :  { %v2935_v57 = vpop.f32.mrf.mxu0  ;;  %v3193_v54 = vadd.f32 %v3192_v63, %v3191_v52  ;;  %v3388_v35 = vadd.f32 %v3387_v44, %v3386_v13 }
 0x2c7   :  { %3072 = vst.msk [vmem:[%s6292_s4 + $0x1f8] sm:$0xff] %vm3008_vm8, %v3007_v21  ;;  %v3389_v43 = vsel %vm3008_vm8, %v3266_v53, 0.0  ;;  %v3006_v19 = vadd.f32 %v2935_v57, %v2291_v7  ;;  %v3269_v36 = vmul.f32 %v3007_v21, %v3007_v21  ;;  %v3198_v17 = vsel %vm3008_vm8, %v3007_v21, 0.0 }
 0x2c8   :  { %v3390_v58 = vadd.f32 %v3389_v43, %v3388_v35  ;;  %v3195_v4 = vadd.f32 %v3194_v61, %v3193_v54 }
 0x2c9   :  { %3071 = vst.msk [vmem:[%s6292_s4 + $0x1f0] sm:$0xff] %vm3008_vm8, %v3006_v19  ;;  %v3196_v25 = vsel %vm3008_vm8, %v3006_v19, 0.0  ;;  %v3268_v62 = vmul.f32 %v3006_v19, %v3006_v19  ;;  %v3395_v22 = vsel %vm3008_vm8, %v3269_v36, 0.0 }
 0x2ca   :  { %v3197_v6 = vadd.f32 %v3196_v25, %v3195_v4  ;;  %v3392_v51 = vadd.f32 %v3391_v60, %v3390_v58 }
 0x2cb   :  { %v3393_v55 = vsel %vm3008_vm8, %v3268_v62, 0.0 }
 0x2cc   :  { %v3199_v20 = vadd.f32 %v3198_v17, %v3197_v6  ;;  %v3394_v29 = vadd.f32 %v3393_v55, %v3392_v51 }
 0x2ce   :  { %v3200_v40 = vrot.slane %v3199_v20, 4  ;;  %v3396_v49 = vadd.f32 %v3395_v22, %v3394_v29 }
 0x2d0   :  { %v3201_v30 = vadd.f32 %v3200_v40, %v3199_v20  ;;  %v3397_v42 = vrot.slane %v3396_v49, 4 }
 0x2d2   :  { %v3202_v23 = vrot.slane %v3201_v30, 2  ;;  %v3398_v12 = vadd.f32 %v3397_v42, %v3396_v49 }
 0x2d4   :  { %v3203_v48 = vadd.f32 %v3202_v23, %v3201_v30  ;;  %v3399_v18 = vrot.slane %v3398_v12, 2 }
 0x2d6   :  { %v3204_v26 = vrot.slane %v3203_v48, 1  ;;  %v3400_v8 = vadd.f32 %v3399_v18, %v3398_v12 }
 0x2d8   :  { %v3401_v2 = vrot.slane %v3400_v8, 1  ;;  %v3205_v50 = vadd.f32 %v3204_v26, %v3203_v48 }
 0x2da   :  { %v3402_v11 = vadd.f32 %v3401_v2, %v3400_v8 }
 0x2dc   :  { %v3404_v24 = vsel %vm3403_vm9, %v3205_v50, %v3402_v11 }
 0x2dd   :  { %3406 = vst.msk [vmem:[%s6293_s5] sm:$0x3] %vm3405_vm10, %v3404_v24 }

</bundles_post_ra>
